<compile_context>
chip_gen: v7x
topology: tpu7x:2x2x1
jax: 0.10.0
libtpu: 0.0.40
codegen_flags: <defaults>
</compile_context>

<pallas_src>
import functools

import jax
import jax.numpy as jnp
from jax.experimental import pallas as pl
from jax.experimental.pallas import tpu as pltpu


def _round_up(x, m):
    return ((x + m - 1) // m) * m


# ----------------------------------------------------------------------------
# Fused kernel: stem -> conv_head -> pooled-sum accumulate -> head MLP.
# ----------------------------------------------------------------------------
def _fused_forward_kernel(p_ref, ws_ref, bs_ref, wh_ref, bh_ref,
                          w1_ref, b1_ref, w2_ref, b2_ref,
                          o_ref, acc_ref, *, hw, tm, inv_hw):
    t = pl.program_id(1)

    @pl.when(t == 0)
    def _():
        acc_ref[...] = jnp.zeros_like(acc_ref)

    patches = p_ref[0]                                       # (tm, Kpad) bf16

    # --- stem: conv3x3/s2 (im2col matmul) + folded BN + SiLU (f32 epilogue) --
    s = jnp.dot(patches, ws_ref[...], preferred_element_type=jnp.float32)
    s = s + bs_ref[...]
    s = s * jax.nn.sigmoid(s)                                # (tm, 128) f32

    # --- conv_head: 1x1 conv -> 1280 + folded BN + SiLU -----------------------
    f = jnp.dot(s.astype(jnp.bfloat16), wh_ref[...],
                preferred_element_type=jnp.float32)
    f = f + bh_ref[...]
    f = f * jax.nn.sigmoid(f)                                # (tm, 1280) f32

    # --- global-average-pool partial sum: masked ones-vector matmul on MXU ---
    # (avoids an XLU sublane reduction; mask drops zero-padded HW rows)
    row = t * tm + jax.lax.broadcasted_iota(jnp.int32, (1, tm), 1)
    mask = (row < hw).astype(jnp.bfloat16)                   # (1, tm)
    acc_ref[...] += jnp.dot(mask, f.astype(jnp.bfloat16),
                            preferred_element_type=jnp.float32)

    # --- head MLP, only on the last HW tile of this batch element ------------
    @pl.when(t == pl.num_programs(1) - 1)
    def _():
        feat = acc_ref[...] * inv_hw                         # (1, 1280) mean
        h = jnp.dot(feat.astype(jnp.bfloat16), w1_ref[...],
                    preferred_element_type=jnp.float32) + b1_ref[...]
        h = h * jax.nn.sigmoid(h)                            # SiLU
        # Dropout(p=0.2): identity at inference time.
        o = jnp.dot(h.astype(jnp.bfloat16), w2_ref[...],
                    preferred_element_type=jnp.float32) + b2_ref[...]
        o_ref[...] = o.reshape(o_ref.shape).astype(o_ref.dtype)


def fused_forward(patches, w_s, b_s, w_h, b_h, w1, b1, w2, b2, *, hw, tm):
    """patches: (B, HWpad, Kpad) bf16 with HWpad % tm == 0."""
    B, hw_pad, kp = patches.shape
    c1 = w_s.shape[1]
    feat = w_h.shape[1]
    hid = w1.shape[1]
    ncp = w2.shape[1]
    n_tiles = hw_pad // tm

    out = pl.pallas_call(
        functools.partial(_fused_forward_kernel, hw=hw, tm=tm, inv_hw=1.0 / hw),
        out_shape=jax.ShapeDtypeStruct((B, 1, ncp), jnp.float32),
        grid_spec=pltpu.PrefetchScalarGridSpec(
            num_scalar_prefetch=0,
            grid=(B, n_tiles),
            in_specs=[
                pl.BlockSpec((1, tm, kp), lambda b, t: (b, t, 0)),   # patches
                pl.BlockSpec((kp, c1), lambda b, t: (0, 0)),         # w_stem
                pl.BlockSpec((1, c1), lambda b, t: (0, 0)),          # b_stem
                pl.BlockSpec((c1, feat), lambda b, t: (0, 0)),       # w_head
                pl.BlockSpec((1, feat), lambda b, t: (0, 0)),        # b_head
                pl.BlockSpec((feat, hid), lambda b, t: (0, 0)),      # w1
                pl.BlockSpec((1, hid), lambda b, t: (0, 0)),         # b1
                pl.BlockSpec((hid, ncp), lambda b, t: (0, 0)),       # w2
                pl.BlockSpec((1, ncp), lambda b, t: (0, 0)),         # b2
            ],
            out_specs=pl.BlockSpec((1, 1, ncp), lambda b, t: (b, 0, 0)),
            scratch_shapes=[pltpu.VMEM((1, feat), jnp.float32)],     # pooled sum
        ),
        compiler_params=pltpu.CompilerParams(
            dimension_semantics=("parallel", "arbitrary"),
            vmem_limit_bytes=32 * 1024 * 1024,
        ),
    )(patches, w_s, b_s, w_h, b_h, w1, b1, w2, b2)
    return out[:, 0, :]                                      # (B, ncp)


# ----------------------------------------------------------------------------
# Glue: im2col (TF-"SAME", stride 2), BN folding, parameter setup.
# ----------------------------------------------------------------------------
def im2col_same_s2(x_nhwc, kh=3, kw=3, stride=2):
    B, H, W, C = x_nhwc.shape
    Ho = -(-H // stride)
    Wo = -(-W // stride)
    pad_h = max((Ho - 1) * stride + kh - H, 0)
    pad_w = max((Wo - 1) * stride + kw - W, 0)
    xp = jnp.pad(
        x_nhwc,
        ((0, 0), (pad_h // 2, pad_h - pad_h // 2),
         (pad_w // 2, pad_w - pad_w // 2), (0, 0)),
    )
    cols = []
    for i in range(kh):
        for j in range(kw):
            cols.append(
                xp[:, i: i + stride * Ho: stride, j: j + stride * Wo: stride, :]
            )
    patches = jnp.concatenate(cols, axis=-1)   # [B, Ho, Wo, kh*kw*C]
    return patches, Ho, Wo


def fold_bn(w, gamma, beta, mean, var, eps=1e-3):
    # conv has no bias in EfficientNetV2; fold eval-mode BN into w / b.
    scale = gamma / jnp.sqrt(var + eps)
    return w * scale[None, :], beta - mean * scale


class WeaponDetectorPallas:
    STEM_CH = 24
    FEAT_CH = 1280   # tf_efficientnetv2_m classifier.in_features
    HID = 512
    NUM_CLASSES = 1
    K_PAD = 32       # 3*3*3 = 27 -> 32 (MXU K dim)
    C1_PAD = 128     # 24 stem channels -> 128 (lane-dense)
    NC_PAD = 128     # 1 logit -> 128 lanes inside the kernel

    def __init__(self, key):
        k = jax.random.split(key, 8)
        # Stem conv: flattened [kh*kw*in, out] = [27, 24] to match im2col order.
        self.w_stem = 0.1 * jax.random.normal(k[0], (3 * 3 * 3, self.STEM_CH), jnp.float32)
        self.bn1_g = 1.0 + 0.05 * jax.random.normal(k[1], (self.STEM_CH,), jnp.float32)
        self.bn1_b = 0.05 * jax.random.normal(k[2], (self.STEM_CH,), jnp.float32)
        self.bn1_m = jnp.zeros((self.STEM_CH,), jnp.float32)
        self.bn1_v = jnp.ones((self.STEM_CH,), jnp.float32)
        # conv_head 1x1 -> 1280 (TODO(synk): real model feeds this from the
        # final MBConv stage, omitted here).
        self.w_head_conv = 0.05 * jax.random.normal(
            k[3], (self.STEM_CH, self.FEAT_CH), jnp.float32)
        self.bn2_g = 1.0 + 0.05 * jax.random.normal(k[4], (self.FEAT_CH,), jnp.float32)
        self.bn2_b = 0.05 * jax.random.normal(k[5], (self.FEAT_CH,), jnp.float32)
        self.bn2_m = jnp.zeros((self.FEAT_CH,), jnp.float32)
        self.bn2_v = jnp.ones((self.FEAT_CH,), jnp.float32)
        # Classification head (nn.Linear weights stored transposed: x @ W).
        self.w1 = 0.02 * jax.random.normal(k[6], (self.FEAT_CH, self.HID), jnp.float32)
        self.b1 = jnp.zeros((self.HID,), jnp.float32)
        self.w2 = 0.02 * jax.random.normal(k[7], (self.HID, self.NUM_CLASSES), jnp.float32)
        self.b2 = jnp.zeros((self.NUM_CLASSES,), jnp.float32)
        self._prepare()

    def _prepare(self):
        """Fold eval-mode BN, zero-pad to TPU-friendly shapes, cast to bf16."""
        w_s, b_s = fold_bn(self.w_stem, self.bn1_g, self.bn1_b, self.bn1_m, self.bn1_v)
        w_h, b_h = fold_bn(self.w_head_conv, self.bn2_g, self.bn2_b, self.bn2_m, self.bn2_v)

        kp, c1p, ncp = self.K_PAD, self.C1_PAD, self.NC_PAD
        # Padded channels: weight columns/rows and biases are zero, so
        # SiLU(0) = 0 and they contribute nothing downstream.
        self.w_s_p = (jnp.zeros((kp, c1p), jnp.float32)
                      .at[: w_s.shape[0], : w_s.shape[1]].set(w_s)
                      .astype(jnp.bfloat16))
        self.b_s_p = jnp.zeros((1, c1p), jnp.float32).at[0, : b_s.shape[0]].set(b_s)
        self.w_h_p = (jnp.zeros((c1p, self.FEAT_CH), jnp.float32)
                      .at[: w_h.shape[0], :].set(w_h)
                      .astype(jnp.bfloat16))
        self.b_h_p = b_h.reshape(1, self.FEAT_CH).astype(jnp.float32)
        self.w1_p = self.w1.astype(jnp.bfloat16)
        self.b1_p = self.b1.reshape(1, self.HID).astype(jnp.float32)
        self.w2_p = (jnp.zeros((self.HID, ncp), jnp.float32)
                     .at[:, : self.NUM_CLASSES].set(self.w2)
                     .astype(jnp.bfloat16))
        self.b2_p = jnp.zeros((1, ncp), jnp.float32).at[0, : self.NUM_CLASSES].set(self.b2)

    def __call__(self, x_nchw):
        x = jnp.transpose(x_nchw, (0, 2, 3, 1))              # NCHW -> NHWC
        B = x.shape[0]

        # im2col for the stem conv (TODO(synk): move into the kernel).
        patches, Ho, Wo = im2col_same_s2(x)
        HW = Ho * Wo
        p = patches.reshape(B, HW, -1)

        # Row-tile size: large enough to amortize per-step overhead, bounded
        # so tiles fit every generation's VMEM (re-derived for v7x's 64 MiB).
        tm = min(512, _round_up(HW, 8))
        hw_pad = _round_up(HW, tm)
        p = jnp.pad(p, ((0, 0), (0, hw_pad - HW), (0, self.K_PAD - p.shape[-1])))
        p = p.astype(jnp.bfloat16)

        # TODO(synk): EfficientNetV2-M MBConv/FusedMBConv block stack omitted.

        out = fused_forward(
            p, self.w_s_p, self.b_s_p, self.w_h_p, self.b_h_p,
            self.w1_p, self.b1_p, self.w2_p, self.b2_p, hw=HW, tm=tm)
        return out[:, : self.NUM_CLASSES]                    # (B, 1)


if __name__ == "__main__":
    key = jax.random.PRNGKey(0)
    k_param, k_x = jax.random.split(key)
    model = WeaponDetectorPallas(k_param)

    # Small image consistent with the module's NCHW image input.
    x = jax.random.normal(k_x, (2, 3, 32, 32), jnp.float32)

    out = model(x)
    out = jax.block_until_ready(out)
    assert out.shape == (2, 1), out.shape
    print("KERNEL_OK")
</pallas_src>

<mosaic_0001>
module attributes {stable_mosaic.version = 11 : i64} {
  func.func @_fused_forward_kernel(%arg0: i32, %arg1: i32, %arg2: memref<1x256x32xbf16, #tpu.memory_space<vmem>>, %arg3: memref<32x128xbf16, #tpu.memory_space<vmem>>, %arg4: memref<1x128xf32, #tpu.memory_space<vmem>>, %arg5: memref<128x1280xbf16, #tpu.memory_space<vmem>>, %arg6: memref<1x1280xf32, #tpu.memory_space<vmem>>, %arg7: memref<1280x512xbf16, #tpu.memory_space<vmem>>, %arg8: memref<1x512xf32, #tpu.memory_space<vmem>>, %arg9: memref<512x128xbf16, #tpu.memory_space<vmem>>, %arg10: memref<1x128xf32, #tpu.memory_space<vmem>>, %arg11: memref<1x1x128xf32, #tpu.memory_space<vmem>>, %arg12: memref<1x1280xf32, #tpu.memory_space<vmem>>) attributes {dimension_semantics = [#tpu.dimension_semantics<parallel>, #tpu.dimension_semantics<arbitrary>], iteration_bounds = array<i64: 2, 1>, scalar_prefetch = 0 : i64, scratch_operands = 1 : i64, tpu.core_type = #tpu.core_type<tc>, window_params = [{transform_indices = @transform_0, window_bounds = array<i64: 1, 256, 32>}, {pipeline_mode = #tpu.pipeline_mode<synchronous>, transform_indices = @transform_1, window_bounds = array<i64: 32, 128>}, {pipeline_mode = #tpu.pipeline_mode<synchronous>, transform_indices = @transform_2, window_bounds = array<i64: 1, 128>}, {pipeline_mode = #tpu.pipeline_mode<synchronous>, transform_indices = @transform_3, window_bounds = array<i64: 128, 1280>}, {pipeline_mode = #tpu.pipeline_mode<synchronous>, transform_indices = @transform_4, window_bounds = array<i64: 1, 1280>}, {pipeline_mode = #tpu.pipeline_mode<synchronous>, transform_indices = @transform_5, window_bounds = array<i64: 1280, 512>}, {pipeline_mode = #tpu.pipeline_mode<synchronous>, transform_indices = @transform_6, window_bounds = array<i64: 1, 512>}, {pipeline_mode = #tpu.pipeline_mode<synchronous>, transform_indices = @transform_7, window_bounds = array<i64: 512, 128>}, {pipeline_mode = #tpu.pipeline_mode<synchronous>, transform_indices = @transform_8, window_bounds = array<i64: 1, 128>}, {transform_indices = @transform_9, window_bounds = array<i64: 1, 1, 128>}]} {
    %c0_i32 = arith.constant 0 : i32
    %0 = arith.cmpi eq, %arg1, %c0_i32 : i32
    %1 = arith.extui %0 : i1 to i32
    %c0_i32_0 = arith.constant 0 : i32
    %2 = arith.cmpi ne, %1, %c0_i32_0 : i32
    scf.if %2 {
      %cst_22 = arith.constant 0.000000e+00 : f32
      %45 = vector.broadcast %cst_22 : f32 to vector<1x1280xf32>
      %c0_23 = arith.constant 0 : index
      %c0_24 = arith.constant 0 : index
      %46 = vector.load %arg12[%c0_23, %c0_24] : memref<1x1280xf32, #tpu.memory_space<vmem>>, vector<1x1280xf32>
      tpu.vector_store %arg12[%c0_23, %c0_24], %45 {strides = array<i32>} : memref<1x1280xf32, #tpu.memory_space<vmem>>, vector<1x1280xf32>,
    } else {
    }
    %c0 = arith.constant 0 : index
    %c0_1 = arith.constant 0 : index
    %c0_2 = arith.constant 0 : index
    %3 = vector.load %arg2[%c0, %c0_1, %c0_2] : memref<1x256x32xbf16, #tpu.memory_space<vmem>>, vector<1x256x32xbf16>
    %4 = vector.shape_cast %3 : vector<1x256x32xbf16> to vector<256x32xbf16>
    %c0_3 = arith.constant 0 : index
    %c0_4 = arith.constant 0 : index
    %5 = vector.load %arg3[%c0_3, %c0_4] : memref<32x128xbf16, #tpu.memory_space<vmem>>, vector<32x128xbf16>
    %cst = arith.constant dense<0.000000e+00> : vector<256x128xf32>
    %6 = tpu.matmul %4, %5, %cst {dimension_numbers = #tpu.dot_dimension_numbers<[1], [0], [0], [1], [0, 0, 1, 1], [], []>} : vector<256x32xbf16>, vector<32x128xbf16>, vector<256x128xf32> -> vector<256x128xf32>
    %c0_5 = arith.constant 0 : index
    %c0_6 = arith.constant 0 : index
    %7 = vector.load %arg4[%c0_5, %c0_6] : memref<1x128xf32, #tpu.memory_space<vmem>>, vector<1x128xf32>
    %8 = vector.broadcast %7 : vector<1x128xf32> to vector<256x128xf32>
    %9 = arith.addf %6, %8 : vector<256x128xf32>
    %10 = arith.negf %9 : vector<256x128xf32>
    %11 = math.exp %10 : vector<256x128xf32>
    %cst_7 = arith.constant 1.000000e+00 : f32
    %12 = vector.broadcast %cst_7 : f32 to vector<256x128xf32>
    %13 = arith.addf %12, %11 : vector<256x128xf32>
    %14 = arith.divf %12, %13 : vector<256x128xf32>
    %15 = arith.mulf %9, %14 : vector<256x128xf32>
    %16 = arith.truncf %15 : vector<256x128xf32> to vector<256x128xbf16>
    %c0_8 = arith.constant 0 : index
    %c0_9 = arith.constant 0 : index
    %17 = vector.load %arg5[%c0_8, %c0_9] : memref<128x1280xbf16, #tpu.memory_space<vmem>>, vector<128x1280xbf16>
    %cst_10 = arith.constant dense<0.000000e+00> : vector<256x1280xf32>
    %18 = tpu.matmul %16, %17, %cst_10 {dimension_numbers = #tpu.dot_dimension_numbers<[1], [0], [0], [1], [0, 0, 1, 1], [], []>} : vector<256x128xbf16>, vector<128x1280xbf16>, vector<256x1280xf32> -> vector<256x1280xf32>
    %c0_11 = arith.constant 0 : index
    %c0_12 = arith.constant 0 : index
    %19 = vector.load %arg6[%c0_11, %c0_12] : memref<1x1280xf32, #tpu.memory_space<vmem>>, vector<1x1280xf32>
    %20 = vector.broadcast %19 : vector<1x1280xf32> to vector<256x1280xf32>
    %21 = arith.addf %18, %20 : vector<256x1280xf32>
    %22 = arith.negf %21 : vector<256x1280xf32>
    %23 = math.exp %22 : vector<256x1280xf32>
    %cst_13 = arith.constant 1.000000e+00 : f32
    %24 = vector.broadcast %cst_13 : f32 to vector<256x1280xf32>
    %25 = arith.addf %24, %23 : vector<256x1280xf32>
    %26 = arith.divf %24, %25 : vector<256x1280xf32>
    %27 = arith.mulf %21, %26 : vector<256x1280xf32>
    %c256_i32 = arith.constant 256 : i32
    %28 = arith.muli %arg1, %c256_i32 : i32
    %29 = tpu.iota {dimensions = array<i32: 1>} : vector<1x256xi32>
    %30 = vector.broadcast %28 : i32 to vector<1x256xi32>
    %31 = arith.addi %30, %29 : vector<1x256xi32>
    %c256_i32_14 = arith.constant 256 : i32
    %32 = vector.broadcast %c256_i32_14 : i32 to vector<1x256xi32>
    %33 = arith.cmpi slt, %31, %32 : vector<1x256xi32>
    %34 = arith.extui %33 : vector<1x256xi1> to vector<1x256xi32>
    %35 = arith.sitofp %34 : vector<1x256xi32> to vector<1x256xf32>
    %36 = arith.truncf %35 : vector<1x256xf32> to vector<1x256xbf16>
    %c0_15 = arith.constant 0 : index
    %c0_16 = arith.constant 0 : index
    %37 = vector.load %arg12[%c0_15, %c0_16] : memref<1x1280xf32, #tpu.memory_space<vmem>>, vector<1x1280xf32>
    %38 = arith.truncf %27 : vector<256x1280xf32> to vector<256x1280xbf16>
    %cst_17 = arith.constant dense<0.000000e+00> : vector<1x1280xf32>
    %39 = tpu.matmul %36, %38, %cst_17 {dimension_numbers = #tpu.dot_dimension_numbers<[1], [0], [0], [1], [0, 0, 1, 1], [], []>} : vector<1x256xbf16>, vector<256x1280xbf16>, vector<1x1280xf32> -> vector<1x1280xf32>
    %40 = arith.addf %37, %39 : vector<1x1280xf32>
    %c0_18 = arith.constant 0 : index
    %c0_19 = arith.constant 0 : index
    %41 = vector.load %arg12[%c0_18, %c0_19] : memref<1x1280xf32, #tpu.memory_space<vmem>>, vector<1x1280xf32>
    tpu.vector_store %arg12[%c0_18, %c0_19], %40 {strides = array<i32>} : memref<1x1280xf32, #tpu.memory_space<vmem>>, vector<1x1280xf32>,
    %c0_i32_20 = arith.constant 0 : i32
    %42 = arith.cmpi eq, %arg1, %c0_i32_20 : i32
    %43 = arith.extui %42 : i1 to i32
    %c0_i32_21 = arith.constant 0 : i32
    %44 = arith.cmpi ne, %43, %c0_i32_21 : i32
    scf.if %44 {
      %c0_22 = arith.constant 0 : index
      %c0_23 = arith.constant 0 : index
      %45 = vector.load %arg12[%c0_22, %c0_23] : memref<1x1280xf32, #tpu.memory_space<vmem>>, vector<1x1280xf32>
      %cst_24 = arith.constant 3.906250e-03 : f32
      %46 = vector.broadcast %cst_24 : f32 to vector<1x1280xf32>
      %47 = arith.mulf %45, %46 : vector<1x1280xf32>
      %48 = arith.truncf %47 : vector<1x1280xf32> to vector<1x1280xbf16>
      %c0_25 = arith.constant 0 : index
      %c0_26 = arith.constant 0 : index
      %49 = vector.load %arg7[%c0_25, %c0_26] : memref<1280x512xbf16, #tpu.memory_space<vmem>>, vector<1280x512xbf16>
      %cst_27 = arith.constant dense<0.000000e+00> : vector<1x512xf32>
      %50 = tpu.matmul %48, %49, %cst_27 {dimension_numbers = #tpu.dot_dimension_numbers<[1], [0], [0], [1], [0, 0, 1, 1], [], []>} : vector<1x1280xbf16>, vector<1280x512xbf16>, vector<1x512xf32> -> vector<1x512xf32>
      %c0_28 = arith.constant 0 : index
      %c0_29 = arith.constant 0 : index
      %51 = vector.load %arg8[%c0_28, %c0_29] : memref<1x512xf32, #tpu.memory_space<vmem>>, vector<1x512xf32>
      %52 = arith.addf %50, %51 : vector<1x512xf32>
      %53 = arith.negf %52 : vector<1x512xf32>
      %54 = math.exp %53 : vector<1x512xf32>
      %cst_30 = arith.constant 1.000000e+00 : f32
      %55 = vector.broadcast %cst_30 : f32 to vector<1x512xf32>
      %56 = arith.addf %55, %54 : vector<1x512xf32>
      %57 = arith.divf %55, %56 : vector<1x512xf32>
      %58 = arith.mulf %52, %57 : vector<1x512xf32>
      %59 = arith.truncf %58 : vector<1x512xf32> to vector<1x512xbf16>
      %c0_31 = arith.constant 0 : index
      %c0_32 = arith.constant 0 : index
      %60 = vector.load %arg9[%c0_31, %c0_32] : memref<512x128xbf16, #tpu.memory_space<vmem>>, vector<512x128xbf16>
      %cst_33 = arith.constant dense<0.000000e+00> : vector<1x128xf32>
      %61 = tpu.matmul %59, %60, %cst_33 {dimension_numbers = #tpu.dot_dimension_numbers<[1], [0], [0], [1], [0, 0, 1, 1], [], []>} : vector<1x512xbf16>, vector<512x128xbf16>, vector<1x128xf32> -> vector<1x128xf32>
      %c0_34 = arith.constant 0 : index
      %c0_35 = arith.constant 0 : index
      %62 = vector.load %arg10[%c0_34, %c0_35] : memref<1x128xf32, #tpu.memory_space<vmem>>, vector<1x128xf32>
      %63 = arith.addf %61, %62 : vector<1x128xf32>
      %64 = vector.shape_cast %63 : vector<1x128xf32> to vector<1x1x128xf32>
      %c0_36 = arith.constant 0 : index
      %c0_37 = arith.constant 0 : index
      %c0_38 = arith.constant 0 : index
      %65 = vector.load %arg11[%c0_36, %c0_37, %c0_38] : memref<1x1x128xf32, #tpu.memory_space<vmem>>, vector<1x1x128xf32>
      tpu.vector_store %arg11[%c0_36, %c0_37, %c0_38], %64 {strides = array<i32>} : memref<1x1x128xf32, #tpu.memory_space<vmem>>, vector<1x1x128xf32>,
    } else {
    }
    return
  }
  func.func @transform_0(%arg0: i32, %arg1: i32) -> (i32, i32, i32) {
    %c0_i32 = arith.constant 0 : i32
    %c0_i32_0 = arith.constant 0 : i32
    return %arg0, %arg1, %c0_i32 : i32, i32, i32
  }
  func.func @transform_1(%arg0: i32, %arg1: i32) -> (i32, i32) {
    %c0_i32 = arith.constant 0 : i32
    %c0_i32_0 = arith.constant 0 : i32
    %c0_i32_1 = arith.constant 0 : i32
    return %c0_i32, %c0_i32_0 : i32, i32
  }
  func.func @transform_2(%arg0: i32, %arg1: i32) -> (i32, i32) {
    %c0_i32 = arith.constant 0 : i32
    %c0_i32_0 = arith.constant 0 : i32
    %c0_i32_1 = arith.constant 0 : i32
    return %c0_i32, %c0_i32_0 : i32, i32
  }
  func.func @transform_3(%arg0: i32, %arg1: i32) -> (i32, i32) {
    %c0_i32 = arith.constant 0 : i32
    %c0_i32_0 = arith.constant 0 : i32
    %c0_i32_1 = arith.constant 0 : i32
    return %c0_i32, %c0_i32_0 : i32, i32
  }
  func.func @transform_4(%arg0: i32, %arg1: i32) -> (i32, i32) {
    %c0_i32 = arith.constant 0 : i32
    %c0_i32_0 = arith.constant 0 : i32
    %c0_i32_1 = arith.constant 0 : i32
    return %c0_i32, %c0_i32_0 : i32, i32
  }
  func.func @transform_5(%arg0: i32, %arg1: i32) -> (i32, i32) {
    %c0_i32 = arith.constant 0 : i32
    %c0_i32_0 = arith.constant 0 : i32
    %c0_i32_1 = arith.constant 0 : i32
    return %c0_i32, %c0_i32_0 : i32, i32
  }
  func.func @transform_6(%arg0: i32, %arg1: i32) -> (i32, i32) {
    %c0_i32 = arith.constant 0 : i32
    %c0_i32_0 = arith.constant 0 : i32
    %c0_i32_1 = arith.constant 0 : i32
    return %c0_i32, %c0_i32_0 : i32, i32
  }
  func.func @transform_7(%arg0: i32, %arg1: i32) -> (i32, i32) {
    %c0_i32 = arith.constant 0 : i32
    %c0_i32_0 = arith.constant 0 : i32
    %c0_i32_1 = arith.constant 0 : i32
    return %c0_i32, %c0_i32_0 : i32, i32
  }
  func.func @transform_8(%arg0: i32, %arg1: i32) -> (i32, i32) {
    %c0_i32 = arith.constant 0 : i32
    %c0_i32_0 = arith.constant 0 : i32
    %c0_i32_1 = arith.constant 0 : i32
    return %c0_i32, %c0_i32_0 : i32, i32
  }
  func.func @transform_9(%arg0: i32, %arg1: i32) -> (i32, i32, i32) {
    %c0_i32 = arith.constant 0 : i32
    %c0_i32_0 = arith.constant 0 : i32
    %c0_i32_1 = arith.constant 0 : i32
    return %arg0, %c0_i32, %c0_i32_0 : i32, i32, i32
  }
}

</mosaic_0001>

<bundles_post_ra>
// kernel: tpu_custom_call.1
= control target key start
LH: loop header
LB: loop body
LE: loop exit
PB: predicated region body
PF: predicated region fallthrough
CT: control target
= control target key end

     0   :  { %s15767_s0 = inlined_call_operand.vmem [shape: bf16[2,256,32], index: 0, kind: input, shape index: {}]   ;;  %s15768_s1 = inlined_call_operand.hbm [shape: bf16[32,128], index: 1, kind: input, shape index: {}]   ;;  %s15769_s2 = inlined_call_operand.hbm [shape: f32[1,128], index: 2, kind: input, shape index: {}]   ;;  %s15770_s3 = inlined_call_operand.hbm [shape: bf16[128,1280], index: 3, kind: input, shape index: {}]   ;;  %s15771_s4 = inlined_call_operand.hbm [shape: f32[1,1280], index: 4, kind: input, shape index: {}]   ;;  %s15772_s5 = inlined_call_operand.hbm [shape: bf16[1280,512], index: 5, kind: input, shape index: {}]   ;;  %s15773_s6 = inlined_call_operand.hbm [shape: f32[1,512], index: 6, kind: input, shape index: {}]   ;;  %s15774_s7 = inlined_call_operand.hbm [shape: bf16[512,128], index: 7, kind: input, shape index: {}]   ;;  %s15775_s8 = inlined_call_operand.hbm [shape: f32[1,128], index: 8, kind: input, shape index: {}]   ;;  %s15776_s9 = inlined_call_operand.hbm [shape: f32[2,1,128], index: 9, kind: output, shape index: {}]  }
   0x1   :  { %15889 = sst [smem:[#allocation143_spill]] %s15768_s1 }
   0x2   :  { %15890 = sst [smem:[#allocation144_spill]] %s15769_s2 }
   0x3   :  { %15891 = sst [smem:[#allocation145_spill]] %s15770_s3 }
   0x4   :  { %15892 = sst [smem:[#allocation146_spill]] %s15771_s4 }
   0x5   :  { %14 = vsyncpa [#allocation4], 0 }
   0x6   :  { %15 = vsyncpa [#allocation7], 0 }
   0x7   :  { %16 = vsyncpa [#allocation10], 0 }
   0x8   :  { %17 = vsyncpa [#allocation13], 0 }
   0x9   :  { %18 = vsyncpa [#allocation16], 0 }
   0xa   :  { %19 = vsyncpa [#allocation5], 0 }
   0xb   :  { %21 = vsyncpa [#allocation5 + $0x1], 0  ;;  %s11818_s30 = smov 0   ;;  %s11820_s10 = smov 0  }
   0xc   :  { %s11822_s11 = smov 0   ;;  %s11824_s12 = smov 0  }
   0xd   :  { %s11826_s13 = smov 0   ;;  %s11828_s14 = smov 0  }
   0xe LB: > { %15893 = sst [smem:[#allocation24_spill]] %s11735_s11  ;;  %s8220_s15 = sadd.s32 4294967295, %s11747_s14   ;;  %s11747_s14 = sphi %s11828_s14, %s27_s14   ;;  %s11743_s13 = sphi %s11826_s13, %s16607_s13   ;;  %s11739_s12 = sphi %s11824_s12, %s16606_s12   ;;  %s11735_s11 = sphi %s11822_s11, %s16605_s11   ;;  %s11731_s10 = sphi %s11820_s10, %s16609_s10   ;;  %s11727_s30 = sphi %s11818_s30, %s16608_s30  }
   0xf   : > { %15894 = sst [smem:[#allocation25_spill]] %s11743_s13  ;;  %s8221_s16 = sadd.s32 4294967294, %s11747_s14  }
  0x10   : > { %s39_s17 = sadd.s32 1, %s11743_s13  ;;  %s242_s18 = sadd.s32 1, %s11735_s11 }
  0x11   : > { %p41_p0 = scmp.ge.s32.totalorder %s39_s17, 2  ;;  %p252_p1 = scmp.ne.s32.totalorder %s11735_s11, %s11731_s10 }
  0x12   : > { %p253_p2 = scmp.eq.s32.totalorder %s8220_s15, 1  ;;  %p258_p3 = scmp.ne.s32.totalorder %s11731_s10, %s11727_s30 }
  0x13   : > { %s16611_s17 = smov (%p41_p0, %s39_s17), 0  ;;  %p259_p5 = scmp.eq.s32.totalorder %s8221_s16, 1 }
  0x14   : > { %15895 = sst [smem:[#allocation26_spill]] %s16611_s17  ;;  %p11858_p4 = por %p253_p2, %p252_p1 }
  0x15   : > { %s239_s20 = ssub.s32 %s11743_s13, %s16611_s17  ;;  %p8222_p6 = scmp.ge.s32.totalorder %s11747_s14, 1 }
  0x16   : > { %s15896_s19 = scalar_select %p11858_p4, 1, 0 }
  0x17   : > { %p240_p7 = scmp.eq.s32.totalorder %s239_s20, 0  ;;  %p11865_p8 = por %p259_p5, %p258_p3 }
  0x18   : > { %p266_p9 = scmp.lt.s32.totalorder %s11747_s14, 3  ;;  %p11877_p11 = scmp.eq.s32.totalorder %s8220_s15, 0 }
  0x19   : > { %s15897_s21 = scalar_select %p11865_p8, 1, 0 }
  0x1a   : > { %s11871_s22 = scalar_select %p240_p7, %s11735_s11, %s242_s18  }
  0x1b   : > { %15898 = sst [smem:[#allocation27_spill]] %s15897_s21  ;;  %p11873_p10 = pnand %p8222_p6, %p266_p9 }
  0x1c   : > { %15899 = sst [smem:[#allocation28_spill]] %s11871_s22  ;;  %s11749_s25 = smov [#allocation6]  }
  0x1d   : > { %s15900_s23 = scalar_select %p11873_p10, 1, 0 }
  0x1e   : > { %s15901_s24 = scalar_select %p11877_p11, 1, 0 }
  0x1f   : > { %p9238_p12 = pneg %p11873_p10  ;;  %s292_s26 = sshll.u32 %s11749_s25, 4  ;;  %s293_s26 = int_to_ptr.vmem [resolvable:$true] %s292_s26 }
  0x20   : > { %s11750_s27 = smov [#allocation9]   ;;  %s11751_s15 = smov [#allocation12]  }
  0x21   : > { %s316_s28 = sshll.u32 %s11750_s27, 4  ;;  %p11885_p13 = pnand %p11877_p11, %p9238_p12  ;;  %s11889_s28 = int_to_ptr.vmem [resolvable:$true] %s316_s28 }
  0x22   : > { %s11891_s16 = sshll.u32 %s11751_s15, 4  ;;  %s15903_s2 = sld [smem:[#allocation144_spill]]  ;;  %s341_s16 = int_to_ptr.vmem [resolvable:$true] %s11891_s16 }
  0x23   : > { %p11901_p1 = pneg %p11885_p13 }
  0x28   : > { %s11425_s17 = scalar_lea.hbm %s15903_s2, 16 }
  0x29   : > { %p11426_p0 = scmp.ne.s32.totalorder %s15903_s2, %s11425_s17  ;;  %p11432_p5 = scmp.lt.u32.totalorder %s11425_s17, %s15903_s2 }
  0x2b   : > { %p11428_p2 = pnand %p11901_p1, %p11426_p0 }
  0x2d   : > { %p11429_p3 = pneg %p11428_p2 }
  0x2f   : > { %p11434_p6 = pnand %p11432_p5, %p11429_p3 }
  0x31   : > { %11437 = shalt.err (!%p11434_p6)
}
  0x32   : > { %s11438_s18 = scalar_lea.vmem %s293_s26, 16  ;;  %s11445_s13 = scalar_lea.vmem %s293_s26, 32 }
  0x33   : > { %p11439_p7 = scmp.ne.s32.totalorder %s293_s26, %s11438_s18  ;;  %p11446_p8 = scmp.lt.s32.totalorder %s293_s26, %s293_s26 }
  0x34   : > { %p11447_p4 = scmp.lt.s32.totalorder %s11445_s13, %s11438_s18 }
  0x35   : > { %p11441_p9 = pnand %p11439_p7, %p11901_p1 }
  0x36   : > { %p11448_p11 = por %p11447_p4, %p11446_p8 }
  0x37   : > { %p11442_p12 = pneg %p11441_p9 }
  0x39   : > { %p11449_p10 = pnand %p11448_p11, %p11442_p12 }
  0x3b   : > { %11452 = shalt.err (!%p11449_p10)
}
  0x3c   : > { %9244 = dma.hbm_to_vmem [thread:$0]  (!%p11885_p13), %s15903_s2, 16, %s293_s26, [#allocation7]  }
  0x3d   : > { %s15905_s4 = sld [smem:[#allocation146_spill]] }
  0x43   : > { %s11453_s15 = scalar_lea.hbm %s15905_s4, 160 }
  0x44   : > { %p11454_p0 = scmp.ne.s32.totalorder %s15905_s4, %s11453_s15  ;;  %p11460_p8 = scmp.lt.u32.totalorder %s11453_s15, %s15905_s4 }
  0x46   : > { %p11456_p2 = pnand %p11454_p0, %p11901_p1 }
  0x48   : > { %p11457_p4 = pneg %p11456_p2 }
  0x4a   : > { %p11462_p10 = pnand %p11460_p8, %p11457_p4 }
  0x4c   : > { %11465 = shalt.err (!%p11462_p10)
}
  0x4d   : > { %s11466_s26 = scalar_lea.vmem %s11889_s28, 160  ;;  %p11474_p6 = scmp.lt.s32.totalorder %s11889_s28, %s11889_s28 }
  0x4e   : > { %p11467_p11 = scmp.ne.s32.totalorder %s11889_s28, %s11466_s26  ;;  %p11475_p7 = scmp.lt.s32.totalorder %s11466_s26, %s11466_s26 }
  0x50   : > { %p11469_p3 = pnand %p11467_p11, %p11901_p1  ;;  %p11476_p9 = por %p11475_p7, %p11474_p6 }
  0x52   : > { %p11470_p5 = pneg %p11469_p3 }
  0x54   : > { %p11477_p12 = pnand %p11476_p9, %p11470_p5 }
  0x56   : > { %11480 = shalt.err (!%p11477_p12)
}
  0x57   : > { %9250 = dma.hbm_to_vmem [thread:$0]  (!%p11885_p13), %s15905_s4, 160, %s11889_s28, [#allocation10]  }
  0x58   : > { %s11481_s17 = scalar_lea.hbm %s15773_s6, 64 }
  0x59   : > { %p11482_p0 = scmp.ne.s32.totalorder %s15773_s6, %s11481_s17  ;;  %p11488_p8 = scmp.lt.u32.totalorder %s11481_s17, %s15773_s6 }
  0x5b   : > { %p11484_p2 = pnand %p11482_p0, %p11901_p1 }
  0x5d   : > { %p11485_p4 = pneg %p11484_p2 }
  0x5f   : > { %p11490_p10 = pnand %p11488_p8, %p11485_p4 }
  0x61   : > { %11493 = shalt.err (!%p11490_p10)
}
  0x62   : > { %s11494_s26 = scalar_lea.vmem %s341_s16, 64  ;;  %p11502_p6 = scmp.lt.s32.totalorder %s341_s16, %s341_s16 }
  0x63   : > { %p11495_p11 = scmp.ne.s32.totalorder %s341_s16, %s11494_s26  ;;  %p11503_p7 = scmp.lt.s32.totalorder %s11494_s26, %s11494_s26 }
  0x65   : > { %p11497_p3 = pnand %p11495_p11, %p11901_p1  ;;  %p11504_p9 = por %p11503_p7, %p11502_p6 }
  0x67   : > { %p11498_p5 = pneg %p11497_p3 }
  0x69   : > { %p11505_p12 = pnand %p11504_p9, %p11498_p5 }
  0x6b   : > { %11508 = shalt.err (!%p11505_p12)
}
  0x6c   : > { %9256 = dma.hbm_to_vmem [thread:$0]  (!%p11885_p13), %s15773_s6, 64, %s341_s16, [#allocation13]  }
  0x6d   : > { %s11752_s21 = smov [#allocation3]   ;;  %s15906_s1 = sld [smem:[#allocation143_spill]] }
  0x6e   : > { %s278_s20 = sshll.u32 %s11752_s21, 4  ;;  %s279_s20 = int_to_ptr.vmem [resolvable:$true] %s278_s20 }
  0x73   : > { %s11509_s22 = scalar_lea.hbm %s15906_s1, 256 }
  0x74   : > { %p11510_p0 = scmp.ne.s32.totalorder %s15906_s1, %s11509_s22  ;;  %p11516_p8 = scmp.lt.u32.totalorder %s11509_s22, %s15906_s1 }
  0x76   : > { %p11512_p2 = pnand %p11510_p0, %p11901_p1 }
  0x78   : > { %p11513_p4 = pneg %p11512_p2 }
  0x7a   : > { %p11518_p10 = pnand %p11516_p8, %p11513_p4 }
  0x7c   : > { %11521 = shalt.err (!%p11518_p10)
}
  0x7d   : > { %s11522_s16 = scalar_lea.vmem %s279_s20, 256  ;;  %p11530_p6 = scmp.lt.s32.totalorder %s279_s20, %s279_s20 }
  0x7e   : > { %p11523_p11 = scmp.ne.s32.totalorder %s279_s20, %s11522_s16  ;;  %p11531_p7 = scmp.lt.s32.totalorder %s11522_s16, %s11522_s16 }
  0x80   : > { %p11525_p3 = pnand %p11523_p11, %p11901_p1  ;;  %p11532_p9 = por %p11531_p7, %p11530_p6 }
  0x82   : > { %p11526_p5 = pneg %p11525_p3 }
  0x84   : > { %p11533_p12 = pnand %p11532_p9, %p11526_p5 }
  0x86   : > { %11536 = shalt.err (!%p11533_p12)
}
  0x87   : > { %s15785_s28 = smov 64   ;;  %s15786_s11 = smov 4  }
  0x88   : > { %9241 = dma.hbm_to_vmem [thread:$0]  (!%p11885_p13), %s15906_s1, 256, %s279_s20, [#allocation4], %s15785_s28, %s15785_s28, %s15786_s11  }
  0x89   : > { %s11755_s17 = smov [#allocation8]   ;;  %s15907_s3 = sld [smem:[#allocation145_spill]] }
  0x8a   : > { %s302_s22 = sshll.u32 %s11755_s17, 4  ;;  %s303_s22 = int_to_ptr.vmem [resolvable:$true] %s302_s22 }
  0x8f   : > { %s11537_s13 = scalar_lea.hbm %s15907_s3, 10240 }
  0x90   : > { %p11538_p0 = scmp.ne.s32.totalorder %s15907_s3, %s11537_s13  ;;  %p11544_p8 = scmp.lt.u32.totalorder %s11537_s13, %s15907_s3 }
  0x92   : > { %p11540_p2 = pnand %p11538_p0, %p11901_p1 }
  0x94   : > { %p11541_p4 = pneg %p11540_p2 }
  0x96   : > { %p11546_p10 = pnand %p11544_p8, %p11541_p4 }
  0x98   : > { %11549 = shalt.err (!%p11546_p10)
}
  0x99   : > { %s11550_s20 = scalar_lea.vmem %s303_s22, 10240  ;;  %p11558_p6 = scmp.lt.s32.totalorder %s303_s22, %s303_s22 }
  0x9a   : > { %p11551_p11 = scmp.ne.s32.totalorder %s303_s22, %s11550_s20  ;;  %p11559_p7 = scmp.lt.s32.totalorder %s11550_s20, %s11550_s20 }
  0x9c   : > { %p11553_p3 = pnand %p11551_p11, %p11901_p1  ;;  %p11560_p9 = por %p11559_p7, %p11558_p6 }
  0x9e   : > { %p11554_p5 = pneg %p11553_p3 }
  0xa0   : > { %p11561_p12 = pnand %p11560_p9, %p11554_p5 }
  0xa2   : > { %11564 = shalt.err (!%p11561_p12)
}
  0xa3   : > { %s11756_s21 = smov 640   ;;  %s11757_s25 = smov 40  }
  0xa4   : > { %9247 = dma.hbm_to_vmem [thread:$0]  (!%p11885_p13), %s15907_s3, 10240, %s303_s22, [#allocation7], %s11756_s21, %s11756_s21, %s11757_s25  }
  0xa5   : > { %s11758_s17 = smov [#allocation11]   ;;  %s11565_s26 = scalar_lea.hbm %s15772_s5, 40960 }
  0xa6   : > { %s326_s15 = sshll.u32 %s11758_s17, 4  ;;  %p11566_p0 = scmp.ne.s32.totalorder %s15772_s5, %s11565_s26  ;;  %s327_s15 = int_to_ptr.vmem [resolvable:$true] %s326_s15 }
  0xa7   : > { %p11572_p8 = scmp.lt.u32.totalorder %s11565_s26, %s15772_s5 }
  0xa8   : > { %p11568_p2 = pnand %p11566_p0, %p11901_p1 }
  0xaa   : > { %p11569_p4 = pneg %p11568_p2 }
  0xac   : > { %p11574_p10 = pnand %p11572_p8, %p11569_p4 }
  0xae   : > { %11577 = shalt.err (!%p11574_p10)
}
  0xaf   : > { %s11578_s22 = scalar_lea.vmem %s327_s15, 40960  ;;  %p11586_p6 = scmp.lt.s32.totalorder %s327_s15, %s327_s15 }
  0xb0   : > { %p11579_p11 = scmp.ne.s32.totalorder %s327_s15, %s11578_s22  ;;  %p11587_p7 = scmp.lt.s32.totalorder %s11578_s22, %s11578_s22 }
  0xb2   : > { %p11581_p3 = pnand %p11579_p11, %p11901_p1  ;;  %p11588_p9 = por %p11587_p7, %p11586_p6 }
  0xb4   : > { %p11582_p5 = pneg %p11581_p3 }
  0xb6   : > { %p11589_p12 = pnand %p11588_p9, %p11582_p5 }
  0xb8   : > { %11592 = shalt.err (!%p11589_p12)
}
  0xb9   : > { %s11759_s21 = smov 256   ;;  %s11760_s25 = smov 16  }
  0xba   : > { %9253 = dma.hbm_to_vmem [thread:$0]  (!%p11885_p13), %s15772_s5, 40960, %s327_s15, [#allocation10], %s11759_s21, %s11759_s21, %s11760_s25  }
  0xbb   : > { %s11761_s2 = smov [#allocation14]   ;;  %s11762_s17 = smov [#allocation15]  }
  0xbc   : > { %s350_s4 = sshll.u32 %s11761_s2, 4  ;;  %s364_s18 = sshll.u32 %s11762_s17, 4  ;;  %s351_s4 = int_to_ptr.vmem [resolvable:$true] %s350_s4  ;;  %s365_s18 = int_to_ptr.vmem [resolvable:$true] %s364_s18 }
  0xbd   : > { %s11593_s16 = scalar_lea.hbm %s15774_s7, 4096 }
  0xbe   : > { %p11594_p0 = scmp.ne.s32.totalorder %s15774_s7, %s11593_s16  ;;  %p11600_p8 = scmp.lt.u32.totalorder %s11593_s16, %s15774_s7 }
  0xc0   : > { %p11596_p2 = pnand %p11594_p0, %p11901_p1 }
  0xc2   : > { %p11597_p4 = pneg %p11596_p2 }
  0xc4   : > { %p11602_p10 = pnand %p11600_p8, %p11597_p4 }
  0xc6   : > { %11605 = shalt.err (!%p11602_p10)
}
  0xc7   : > { %s11606_s15 = scalar_lea.vmem %s351_s4, 4096  ;;  %p11614_p6 = scmp.lt.s32.totalorder %s351_s4, %s351_s4 }
  0xc8   : > { %p11607_p11 = scmp.ne.s32.totalorder %s351_s4, %s11606_s15  ;;  %p11615_p7 = scmp.lt.s32.totalorder %s11606_s15, %s11606_s15 }
  0xca   : > { %p11609_p3 = pnand %p11607_p11, %p11901_p1  ;;  %p11616_p9 = por %p11615_p7, %p11614_p6 }
  0xcc   : > { %p11610_p5 = pneg %p11609_p3 }
  0xce   : > { %p11617_p12 = pnand %p11616_p9, %p11610_p5 }
  0xd0   : > { %11620 = shalt.err (!%p11617_p12)
}
  0xd1   : > { %s15908_s21 = smov 4   ;;  %s15909_s25 = smov 64  }
  0xd2   : > { %9259 = dma.hbm_to_vmem [thread:$0]  (!%p11885_p13), %s15774_s7, 4096, %s351_s4, [#allocation13], %s15909_s25, %s15909_s25, %s15908_s21  }
  0xd3   : > { %s11621_s2 = scalar_lea.hbm %s15775_s8, 16 }
  0xd4   : > { %p11622_p0 = scmp.ne.s32.totalorder %s15775_s8, %s11621_s2  ;;  %p11628_p8 = scmp.lt.u32.totalorder %s11621_s2, %s15775_s8 }
  0xd6   : > { %p11624_p2 = pnand %p11622_p0, %p11901_p1 }
  0xd8   : > { %p11625_p4 = pneg %p11624_p2 }
  0xda   : > { %p11630_p10 = pnand %p11628_p8, %p11625_p4 }
  0xdc   : > { %11633 = shalt.err (!%p11630_p10)
}
  0xdd   : > { %s11634_s20 = scalar_lea.vmem %s365_s18, 16  ;;  %s11641_s4 = scalar_lea.vmem %s365_s18, 32 }
  0xde   : > { %p11635_p11 = scmp.ne.s32.totalorder %s365_s18, %s11634_s20  ;;  %p11642_p6 = scmp.lt.s32.totalorder %s365_s18, %s365_s18 }
  0xdf   : > { %p11643_p7 = scmp.lt.s32.totalorder %s11641_s4, %s11634_s20 }
  0xe0   : > { %p11637_p3 = pnand %p11635_p11, %p11901_p1 }
  0xe1   : > { %p11644_p9 = por %p11643_p7, %p11642_p6 }
  0xe2   : > { %p11638_p5 = pneg %p11637_p3 }
  0xe4   : > { %p11645_p12 = pnand %p11644_p9, %p11638_p5 }
  0xe6   : > { %11648 = shalt.err (!%p11645_p12)
}
  0xe7   : > { %9262 = dma.hbm_to_vmem [thread:$0]  (!%p11885_p13), %s15775_s8, 16, %s365_s18, [#allocation16]  }
  0xe8   : > { %p15910_p0 = scmp.ne.s32.totalorder %s15900_s23, 0 }
  0xea   : > { %390 = sbr.rel (%p15910_p0) target bundleno = 2233 (0x8b9), region = 56 }
  0xf1   : > { %p15911_p2 = scmp.ne.s32.totalorder %s15901_s24, 0 }
  0xf3   : > { %11702 = dma.done.wait (%p15911_p2), [#allocation4], 256  }
  0xf4   : > { %11704 = vsyncadd (%p15911_p2), [#allocation4], 4294967040 }
  0xf5   : > { %11706 = dma.done.wait (%p15911_p2), [#allocation7], 10256  }
  0xf6   : > { %11708 = vsyncadd (%p15911_p2), [#allocation7], 4294957040 }
  0xf7   : > { %11710 = dma.done.wait (%p15911_p2), [#allocation10], 41120  }
  0xf8   : > { %11712 = vsyncadd (%p15911_p2), [#allocation10], 4294926176 }
  0xf9   : > { %11714 = dma.done.wait (%p15911_p2), [#allocation13], 4160  }
  0xfa   : > { %11716 = vsyncadd (%p15911_p2), [#allocation13], 4294963136 }
  0xfb   : > { %11718 = dma.done.wait (%p15911_p2), [#allocation16], 16  }
  0xfc   : > { %11720 = vsyncadd (%p15911_p2), [#allocation16], 4294967280  ;;  %p458_p13 = scmp.lt.s32.totalorder %s11739_s12, 1  ;;  %v9350_v0 = vld [vmem:[#allocation3] sm:$0xff]   ;;  %v9351_v1 = vld [vmem:[#allocation3 + $0x8] sm:$0xff]   ;;  %vm613_vm0 = vcmask 261120  }
  0xfd   : > { %9132 = vmatprep.subr.bf16.mxu0 %v9350_v0  ;;  %v9368_v7 = vld [vmem:[#allocation8 + $0x8] ss:$40 sps:$4 sm:$0xff]   ;;  %v9370_v8 = vld [vmem:[#allocation8 + $0xc] ss:$40 sps:$4 sm:$0xff]   ;;  %v9373_v10 = vld [vmem:[#allocation8 + $0x5c] ss:$40 sps:$4 sm:$0xff]  }
  0xfe   : > { %s459_s23 = scalar_select %p458_p13, %s11739_s12, 1  ;;  %9133 = vmatpush3.bf16.msra.mxu0 %v9350_v0  ;;  %v9371_v12 = vld [vmem:[#allocation8 + $0x58] ss:$40 sps:$4 sm:$0xff]   ;;  %v9376_v13 = vld [vmem:[#allocation8 + $0xac] ss:$40 sps:$4 sm:$0xff]   ;;  %v15788_v50 = vmov 0  }
  0xff   : > { %9134 = vmatprep.subr.bf16.mxu0 %v9351_v1  ;;  %v9374_v14 = vld [vmem:[#allocation8 + $0xa8] ss:$40 sps:$4 sm:$0xff]   ;;  %v9380_v24 = vld [vmem:[#allocation8 + $0x4] ss:$40 sps:$4 sm:$0xff]   ;;  %v9383_v26 = vld [vmem:[#allocation8 + $0x54] ss:$40 sps:$4 sm:$0xff]   ;;  %1629 = vmatprep.mubr.bf16.mxu1 %v15788_v50 }
 0x100   : > { %s9069_s29 = sshll.u32 %s459_s23, 7  ;;  %v9382_v25 = vld [vmem:[#allocation8] ss:$40 sps:$4 sm:$0xff]   ;;  %1597 = vmatprep.subr.bf16.mxu1 %v9380_v24  ;;  %v9388_v27 = vld [vmem:[#allocation8 + $0x50] ss:$40 sps:$4 sm:$0xff]   ;;  %s455_s24 = sand.u32 1, %s11731_s10  }
 0x101   : > { %s12082_s21 = scalar_lea.vmem %s15767_s0, %s9069_s29  ;;  %1598 = vmatpush1.bf16.msra.mxu1 %v9382_v25  ;;  %v9389_v28 = vld [vmem:[#allocation8 + $0xa4] ss:$40 sps:$4 sm:$0xff]   ;;  %v9391_v29 = vld [vmem:[#allocation8 + $0xa0] ss:$40 sps:$4 sm:$0xff]   ;;  %v9392_v32 = vld [vmem:[#allocation8 + $0xf4] ss:$40 sps:$4 sm:$0xff]  }
 0x102   : > { %v9352_v2 = vld [vmem:[%s12082_s21] sm:$0xff]   ;;  %v9353_v3 = vld [vmem:[%s12082_s21 + $0x8] sm:$0xff]   ;;  %9135 = vmatpush3.bf16.msra.mxu0 %v9351_v1  ;;  %v9354_v4 = vld [vmem:[%s12082_s21 + $0x10] sm:$0xff]   ;;  %1599 = vmatprep.subr.bf16.mxu1 %v9383_v26  ;;  %s9066_s25 = sshll.u32 %s11739_s12, 4  ;;  %s456_s1 = scalar_lea.vmem [#allocation17], %s455_s24 }
 0x103   : > { %9136 = vmatprep.mubr.msk.bf16.mxu0 %vm613_vm0, %v9352_v2  ;;  %v9355_v5 = vld [vmem:[%s12082_s21 + $0x18] sm:$0xff]   ;;  %v9356_v6 = vld [vmem:[%s12082_s21 + $0x20] sm:$0xff]   ;;  %v9357_v9 = vld [vmem:[%s12082_s21 + $0x28] sm:$0xff]   ;;  %1790 = vmatprep.subr.bf16.mxu0 %v9370_v8  ;;  %s8072_s3 = sshll.u32 %s456_s1, 4  ;;  %s15720_s2 = scalar_lea.hbm %s15776_s9, %s9066_s25  ;;  %s15722_s3 = int_to_ptr.vmem [resolvable:$true] %s8072_s3 }
 0x104   : > { %v9358_v11 = vld [vmem:[%s12082_s21 + $0x30] sm:$0xff]   ;;  %v9359_v15 = vld [vmem:[%s12082_s21 + $0x38] sm:$0xff]   ;;  %v9360_v16 = vld [vmem:[%s12082_s21 + $0x40] sm:$0xff]   ;;  %s8060_s17 = scalar_lea.sflag [#allocation5], %s455_s24  ;;  %s11649_s13 = scalar_lea.vmem %s15722_s3, 16 }
 0x105   : > { %9137 = vmatmul.mubr.msk.bf16.vlgmr.msra.gmra.mrb[0].mxu0 %vm613_vm0, %v9353_v3  ;;  %v9361_v17 = vld [vmem:[%s12082_s21 + $0x48] sm:$0xff]   ;;  %v9362_v18 = vld [vmem:[%s12082_s21 + $0x50] sm:$0xff]   ;;  %v9363_v19 = vld [vmem:[%s12082_s21 + $0x58] sm:$0xff]   ;;  %1600 = vmatpush1.bf16.msra.mxu1 %v9388_v27  ;;  %p11650_p1 = scmp.ne.s32.totalorder %s15722_s3, %s11649_s13  ;;  %p16601_p4 = scmp.ne.s32.totalorder %s15896_s19, 0 }
 0x106   : > { %9140 = vmatprep.mubr.msk.bf16.mxu0 %vm613_vm0, %v9354_v4  ;;  %1791 = vmatpush1.bf16.msra.mxu0 %v9368_v7  ;;  %v9364_v20 = vld [vmem:[%s12082_s21 + $0x60] sm:$0xff]   ;;  %v9365_v21 = vld [vmem:[%s12082_s21 + $0x68] sm:$0xff]   ;;  %v9366_v22 = vld [vmem:[%s12082_s21 + $0x70] sm:$0xff]   ;;  %s11767_s12 = smov [#allocation17]  }
 0x107   : > { %1792 = vmatprep.subr.bf16.mxu0 %v9373_v10  ;;  %v9367_v23 = vld [vmem:[%s12082_s21 + $0x78] sm:$0xff]   ;;  %1601 = vmatprep.subr.bf16.mxu1 %v9389_v28  ;;  %v9397_v33 = vld [vmem:[#allocation8 + $0xf0] ss:$40 sps:$4 sm:$0xff]   ;;  %v9387_v34 = vld [vmem:[#allocation8 + $0x14c] ss:$40 sps:$4 sm:$0xff]   ;;  %p11651_p8 = pnand %p11650_p1, %p16601_p4  ;;  %s11653_s26 = sshll.u32 %s11767_s12, 4  ;;  %s11654_s26 = int_to_ptr.vmem [resolvable:$false] %s11653_s26 }
 0x108   : > { %v9379_v30 = vld [vmem:[#allocation8 + $0xfc] ss:$40 sps:$4 sm:$0xff]   ;;  %v9377_v31 = vld [vmem:[#allocation8 + $0xf8] ss:$40 sps:$4 sm:$0xff]   ;;  %v9385_v35 = vld [vmem:[#allocation8 + $0x148] ss:$40 sps:$4 sm:$0xff]   ;;  %p11656_p11 = scmp.lt.s32.totalorder %s15722_s3, %s11654_s26 }
 0x109   : > { %1602 = vmatpush1.bf16.msra.mxu1 %v9391_v29  ;;  %v9398_v36 = vld [vmem:[#allocation8 + $0x144] ss:$40 sps:$4 sm:$0xff]   ;;  %v9400_v37 = vld [vmem:[#allocation8 + $0x140] ss:$40 sps:$4 sm:$0xff]   ;;  %v9401_v39 = vld [vmem:[#allocation8 + $0x194] ss:$40 sps:$4 sm:$0xff]   ;;  %p11652_p10 = pneg %p11651_p8 }
 0x10a   : > { %1793 = vmatpush1.bf16.msra.mxu0 %v9371_v12  ;;  %1603 = vmatprep.subr.bf16.mxu1 %v9392_v32  ;;  %v9396_v38 = vld [vmem:[#allocation8 + $0x19c] ss:$40 sps:$4 sm:$0xff]   ;;  %v9394_v40 = vld [vmem:[#allocation8 + $0x198] ss:$40 sps:$4 sm:$0xff]   ;;  %v9405_v42 = vld [vmem:[#allocation8 + $0x1ec] ss:$40 sps:$4 sm:$0xff]  }
 0x10b   : > { %1794 = vmatprep.subr.bf16.mxu0 %v9376_v13  ;;  %v9406_v41 = vld [vmem:[#allocation8 + $0x190] ss:$40 sps:$4 sm:$0xff]   ;;  %v9407_v43 = vld [vmem:[#allocation8 + $0x1e4] ss:$40 sps:$4 sm:$0xff]   ;;  %v9409_v45 = vld [vmem:[#allocation8 + $0x1e0] ss:$40 sps:$4 sm:$0xff]  }
 0x10c   : > { %v9403_v44 = vld [vmem:[#allocation8 + $0x1e8] ss:$40 sps:$4 sm:$0xff]   ;;  %v9410_v46 = vld [vmem:[#allocation8 + $0x234] ss:$40 sps:$4 sm:$0xff]   ;;  %v9412_v48 = vld [vmem:[#allocation8 + $0x238] ss:$40 sps:$4 sm:$0xff]  }
 0x10d   : > { %9141 = vmatmul.mubr.msk.bf16.gmra.mrb[4].mxu0 %vm613_vm0, %v9355_v5  ;;  %1604 = vmatpush1.bf16.msra.mxu1 %v9397_v33  ;;  %v9414_v47 = vld [vmem:[#allocation8 + $0x23c] ss:$40 sps:$4 sm:$0xff]   ;;  %v9415_v49 = vld [vmem:[#allocation8 + $0x230] ss:$40 sps:$4 sm:$0xff]   ;;  %s11655_s16 = scalar_lea.vmem %s11654_s26, 32 }
 0x10e   : > { %9144 = vmatprep.mubr.msk.bf16.mxu0 %vm613_vm0, %v9356_v6  ;;  %1795 = vmatpush1.bf16.msra.mxu0 %v9374_v14  ;;  %v9418_v51 = vld [vmem:[#allocation8 + $0x14] ss:$40 sps:$4 sm:$0xff]   ;;  %p11657_p3 = scmp.lt.s32.totalorder %s11655_s16, %s11649_s13 }
 0x10f   : > { %1796 = vmatprep.subr.bf16.mxu0 %v9379_v30  ;;  %1605 = vmatprep.subr.bf16.mxu1 %v9398_v36  ;;  %v9421_v52 = vld [vmem:[#allocation8 + $0x1c] ss:$40 sps:$4 sm:$0xff]  }
 0x110   : > { %v12118_v53 = vld [vmem:[#allocation6] ss:$0 sm:$0xff]  ;;  %p11658_p5 = por %p11657_p3, %p11656_p11 }
 0x111   : > { %1606 = vmatpush1.bf16.msra.mxu1 %v9400_v37 }
 0x112   : > { %1797 = vmatpush1.bf16.msra.mxu0 %v9377_v31  ;;  %1607 = vmatprep.subr.bf16.mxu1 %v9401_v39  ;;  %p11659_p6 = pnand %p11658_p5, %p11652_p10 }
 0x113   : > { %1798 = vmatprep.subr.bf16.mxu0 %v9387_v34 }
 0x115   : > { %9145 = vmatmul.mubr.msk.bf16.gmra.mrb[8].mxu0 %vm613_vm0, %v9357_v9  ;;  %1608 = vmatpush1.bf16.msra.mxu1 %v9406_v41 }
 0x116   : > { %9148 = vmatprep.mubr.msk.bf16.mxu0 %vm613_vm0, %v9358_v11  ;;  %1799 = vmatpush1.bf16.msra.mxu0 %v9385_v35 }
 0x117   : > { %1800 = vmatprep.subr.bf16.mxu0 %v9396_v38  ;;  %1609 = vmatprep.subr.bf16.mxu1 %v9407_v43 }
 0x119   : > { %1610 = vmatpush1.bf16.msra.mxu1 %v9409_v45 }
 0x11a   : > { %1801 = vmatpush1.bf16.msra.mxu0 %v9394_v40  ;;  %1611 = vmatprep.subr.bf16.mxu1 %v9410_v46 }
 0x11b   : > { %1802 = vmatprep.subr.bf16.mxu0 %v9405_v42 }
 0x11d   : > { %9149 = vmatmul.mubr.msk.bf16.gmra.mrb[12].mxu0 %vm613_vm0, %v9359_v15  ;;  %1612 = vmatpush1.bf16.msra.mxu1 %v9415_v49 }
 0x11e   : > { %9152 = vmatprep.mubr.msk.bf16.mxu0 %vm613_vm0, %v9360_v16  ;;  %1803 = vmatpush1.bf16.msra.mxu0 %v9403_v44 }
 0x11f   : > { %1804 = vmatprep.subr.bf16.mxu0 %v9414_v47  ;;  %1983 = vmatprep.subr.bf16.mxu1 %v9418_v51 }
 0x122   : > { %1805 = vmatpush1.bf16.msra.mxu0 %v9412_v48 }
 0x123   : > { %2176 = vmatprep.subr.bf16.mxu0 %v9421_v52 }
 0x125   : > { %9153 = vmatmul.mubr.msk.bf16.gmra.mrb[16].mxu0 %vm613_vm0, %v9361_v17 }
 0x126   : > { %9156 = vmatprep.mubr.msk.bf16.mxu0 %vm613_vm0, %v9362_v18 }
 0x12d   : > { %9157 = vmatmul.mubr.msk.bf16.gmra.mrb[20].mxu0 %vm613_vm0, %v9363_v19 }
 0x12e   : > { %9160 = vmatprep.mubr.msk.bf16.mxu0 %vm613_vm0, %v9364_v20 }
 0x135   : > { %9161 = vmatmul.mubr.msk.bf16.gmra.mrb[24].mxu0 %vm613_vm0, %v9365_v21 }
 0x136   : > { %9164 = vmatprep.mubr.msk.bf16.mxu0 %vm613_vm0, %v9366_v22 }
 0x13d   : > { %9165 = vmatmul.mubr.msk.bf16.gmra.mrb[28].mxu0 %vm613_vm0, %v9367_v23 }
 0x13e   : > { %1822 = vmatprep.mubr.bf16.mxu0 %v15788_v50 }
 0x1d8   : > { %v9138_v54 = vpop.f32.mrb[0].mxu0 }
 0x1d9   : > { %v12121_v55 = vadd.f32 %v9138_v54, %v12118_v53  ;;  %v696_v56 = vpop.f32.mrb[1].mxu0 }
 0x1da   : > { %v12124_v57 = vadd.f32 %v12118_v53, %v696_v56  ;;  %v9139_v58 = vpop.f32.mrb[2].mxu0 }
 0x1db   : > { %v8280_v59 = vmul.f32 -1.442695, %v12121_v55  ;;  %v12128_v60 = vadd.f32 %v9139_v58, %v12118_v53  ;;  %v699_v61 = vpop.f32.mrb[3].mxu0 }
 0x1dc   : > { %v8278_v62 = vmul.f32 -1.442695, %v12124_v57  ;;  %v12132_v63 = vadd.f32 %v12118_v53, %v699_v61 }
 0x1dd   : > { %10000 = vpow2.f32 %v8280_v59  ;;  %v8281_v0 = vmul.f32 -1.442695, %v12128_v60 }
 0x1de   : > { %10002 = vpow2.f32 %v8278_v62  ;;  %v8279_v1 = vmul.f32 -1.442695, %v12132_v63 }
 0x1df   : > { %10004 = vpow2.f32 %v8281_v0 }
 0x1e0   : > { %10006 = vpow2.f32 %v8279_v1  ;;  %v9142_v2 = vpop.f32.mrb[4].mxu0 }
 0x1e1   : > { %v12137_v3 = vadd.f32 %v9142_v2, %v12118_v53  ;;  %v712_v4 = vpop.f32.mrb[5].mxu0 }
 0x1e2   : > { %v12140_v5 = vadd.f32 %v12118_v53, %v712_v4  ;;  %v9143_v6 = vpop.f32.mrb[6].mxu0 }
 0x1e3   : > { %v8284_v7 = vmul.f32 -1.442695, %v12137_v3  ;;  %v12144_v8 = vadd.f32 %v9143_v6, %v12118_v53  ;;  %v715_v9 = vpop.f32.mrb[7].mxu0 }
 0x1e4   : > { %v8282_v10 = vmul.f32 -1.442695, %v12140_v5  ;;  %v12148_v11 = vadd.f32 %v12118_v53, %v715_v9 }
 0x1e5   : > { %10008 = vpow2.f32 %v8284_v7  ;;  %v8285_v12 = vmul.f32 -1.442695, %v12144_v8 }
 0x1e6   : > { %10010 = vpow2.f32 %v8282_v10  ;;  %v8283_v13 = vmul.f32 -1.442695, %v12148_v11 }
 0x1e7   : > { %v10001_v14 = vpop.eup %10000  ;;  %10012 = vpow2.f32 %v8285_v12 }
 0x1e8   : > { %v10003_v15 = vpop.eup %10002  ;;  %v921_v16 = vadd.f32 1.0, %v10001_v14  ;;  %10014 = vpow2.f32 %v8283_v13  ;;  %v9146_v17 = vpop.f32.mrb[8].mxu0 }
 0x1e9   : > { %v10005_v18 = vpop.eup %10004  ;;  %v919_v19 = vadd.f32 1.0, %v10003_v15  ;;  %v12153_v20 = vadd.f32 %v9146_v17, %v12118_v53  ;;  %v728_v21 = vpop.f32.mrb[9].mxu0  ;;  %v9419_v15 = vld [vmem:[#allocation8 + $0x18] ss:$40 sps:$4 sm:$0xff]  }
 0x1ea   : > { %v10007_v22 = vpop.eup %10006  ;;  %10016 = vrcp.f32 %v921_v16  ;;  %v922_v23 = vadd.f32 1.0, %v10005_v18  ;;  %v12156_v24 = vadd.f32 %v12118_v53, %v728_v21  ;;  %v9147_v25 = vpop.f32.mrb[10].mxu0  ;;  %v9424_v18 = vld [vmem:[#allocation8 + $0x64] ss:$40 sps:$4 sm:$0xff]  }
 0x1eb   : > { %10018 = vrcp.f32 %v919_v19  ;;  %v920_v26 = vadd.f32 1.0, %v10007_v22  ;;  %v8288_v27 = vmul.f32 -1.442695, %v12153_v20  ;;  %v12160_v28 = vadd.f32 %v9147_v25, %v12118_v53  ;;  %v731_v29 = vpop.f32.mrb[11].mxu0 }
 0x1ec   : > { %10020 = vrcp.f32 %v922_v23  ;;  %v8286_v30 = vmul.f32 -1.442695, %v12156_v24  ;;  %v12164_v31 = vadd.f32 %v12118_v53, %v731_v29 }
 0x1ed   : > { %10022 = vrcp.f32 %v920_v26  ;;  %v8289_v32 = vmul.f32 -1.442695, %v12160_v28  ;;  %v9427_v26 = vld [vmem:[#allocation8 + $0x6c] ss:$40 sps:$4 sm:$0xff]  }
 0x1ee   : > { %10024 = vpow2.f32 %v8288_v27  ;;  %v8287_v33 = vmul.f32 -1.442695, %v12164_v31 }
 0x1ef   : > { %v10009_v34 = vpop.eup %10008  ;;  %10026 = vpow2.f32 %v8286_v30 }
 0x1f0   : > { %v10011_v35 = vpop.eup %10010  ;;  %v925_v36 = vadd.f32 1.0, %v10009_v34  ;;  %10028 = vpow2.f32 %v8289_v32  ;;  %v9150_v37 = vpop.f32.mrb[12].mxu0 }
 0x1f1   : > { %v10013_v38 = vpop.eup %10012  ;;  %v923_v39 = vadd.f32 1.0, %v10011_v35  ;;  %10030 = vpow2.f32 %v8287_v33  ;;  %v12169_v40 = vadd.f32 %v9150_v37, %v12118_v53  ;;  %v744_v41 = vpop.f32.mrb[13].mxu0  ;;  %v9422_v35 = vld [vmem:[#allocation8 + $0x60] ss:$40 sps:$4 sm:$0xff]  }
 0x1f2   : > { %v10015_v42 = vpop.eup %10014  ;;  %10032 = vrcp.f32 %v925_v36  ;;  %v926_v43 = vadd.f32 1.0, %v10013_v38  ;;  %v12172_v44 = vadd.f32 %v12118_v53, %v744_v41  ;;  %v9151_v45 = vpop.f32.mrb[14].mxu0  ;;  %v9425_v36 = vld [vmem:[#allocation8 + $0x68] ss:$40 sps:$4 sm:$0xff]   ;;  %v9433_v41 = vld [vmem:[#allocation8 + $0xbc] ss:$40 sps:$4 sm:$0xff]  }
 0x1f3   : > { %10034 = vrcp.f32 %v923_v39  ;;  %v924_v46 = vadd.f32 1.0, %v10015_v42  ;;  %v8292_v47 = vmul.f32 -1.442695, %v12169_v40  ;;  %v12176_v48 = vadd.f32 %v9151_v45, %v12118_v53  ;;  %v747_v49 = vpop.f32.mrb[15].mxu0  ;;  %v9430_v39 = vld [vmem:[#allocation8 + $0xb4] ss:$40 sps:$4 sm:$0xff]  }
 0x1f4   : > { %v10017_v51 = vpop.eup %10016  ;;  %10036 = vrcp.f32 %v926_v43  ;;  %v8290_v52 = vmul.f32 -1.442695, %v12172_v44  ;;  %v12180_v54 = vadd.f32 %v12118_v53, %v747_v49 }
 0x1f5   : > { %v10019_v56 = vpop.eup %10018  ;;  %10038 = vrcp.f32 %v924_v46  ;;  %v8293_v58 = vmul.f32 -1.442695, %v12176_v48  ;;  %v1017_v0 = vmul.f32 %v10017_v51, %v12121_v55  ;;  %v9416_v55 = vld [vmem:[#allocation8 + $0x10] ss:$40 sps:$4 sm:$0xff]  }
 0x1f6   : > { %v10021_v59 = vpop.eup %10020  ;;  %10040 = vpow2.f32 %v8292_v47  ;;  %v8291_v61 = vmul.f32 -1.442695, %v12180_v54  ;;  %v1015_v4 = vmul.f32 %v10019_v56, %v12124_v57 }
 0x1f7   : > { %v10023_v62 = vpop.eup %10022  ;;  %v1018_v1 = vmul.f32 %v10021_v59, %v12128_v60  ;;  %10042 = vpow2.f32 %v8290_v52 }
 0x1f8   : > { %v10025_v2 = vpop.eup %10024  ;;  %v1016_v6 = vmul.f32 %v10023_v62, %v12132_v63  ;;  %10044 = vpow2.f32 %v8293_v58  ;;  %v9154_v7 = vpop.f32.mrb[16].mxu0 }
 0x1f9   : > { %v10027_v9 = vpop.eup %10026  ;;  %v12188_v10 = vpack.c.bf16 %v1018_v1, %v1017_v0  ;;  %v929_v12 = vadd.f32 1.0, %v10025_v2  ;;  %10046 = vpow2.f32 %v8291_v61  ;;  %v12191_v13 = vadd.f32 %v9154_v7, %v12118_v53  ;;  %v760_v14 = vpop.f32.mrb[17].mxu0  ;;  %v9431_v1 = vld [vmem:[#allocation8 + $0xb8] ss:$40 sps:$4 sm:$0xff]   ;;  %v9436_v2 = vld [vmem:[#allocation8 + $0x104] ss:$40 sps:$4 sm:$0xff]  }
 0x1fa   : > { %v10029_v60 = vpop.eup %10028  ;;  %v12193_v16 = vpack.c.bf16 %v1016_v6, %v1015_v4  ;;  %v927_v17 = vadd.f32 1.0, %v10027_v9  ;;  %v12196_v57 = vadd.f32 %v12118_v53, %v760_v14  ;;  %v9155_v63 = vpop.f32.mrb[18].mxu0  ;;  %v9439_v14 = vld [vmem:[#allocation8 + $0x10c] ss:$40 sps:$4 sm:$0xff]  }
 0x1fb   : > { %v10031_v19 = vpop.eup %10030  ;;  %10048 = vrcp.f32 %v929_v12  ;;  %v930_v21 = vadd.f32 1.0, %v10029_v60  ;;  %v8296_v22 = vmul.f32 -1.442695, %v12191_v13  ;;  %v12200_v23 = vadd.f32 %v9155_v63, %v12118_v53  ;;  %v763_v25 = vpop.f32.mrb[19].mxu0 }
 0x1fc   : > { %v10033_v27 = vpop.eup %10032  ;;  %10050 = vrcp.f32 %v927_v17  ;;  %v928_v29 = vadd.f32 1.0, %v10031_v19  ;;  %v8294_v30 = vmul.f32 -1.442695, %v12196_v57  ;;  %1630 = vmatmul.mubr.bf16.vlgmr.msra.gmra.mrb[0].mxu1 %v12193_v16  ;;  %1823 = vmatmul.mubr.bf16.vlgmr.msra.gmra.mrb[32].mxu0 %v12193_v16  ;;  %v12206_v32 = vadd.f32 %v12118_v53, %v763_v25 }
 0x1fd   : > { %v10035_v33 = vpop.eup %10034  ;;  %10052 = vrcp.f32 %v930_v21  ;;  %v8297_v34 = vmul.f32 -1.442695, %v12200_v23  ;;  %1984 = vmatpush1.bf16.msra.mxu1 %v9416_v55  ;;  %2177 = vmatpush1.bf16.msra.mxu0 %v9419_v15  ;;  %v1021_v43 = vmul.f32 %v10033_v27, %v12137_v3  ;;  %v9434_v21 = vld [vmem:[#allocation8 + $0x100] ss:$40 sps:$4 sm:$0xff]   ;;  %v9445_v27 = vld [vmem:[#allocation8 + $0x15c] ss:$40 sps:$4 sm:$0xff]  }
 0x1fe   : > { %v10037_v37 = vpop.eup %10036  ;;  %10054 = vrcp.f32 %v928_v29  ;;  %v8295_v38 = vmul.f32 -1.442695, %v12206_v32  ;;  %1639 = vmatprep.mubr.bf16.mxu1 %v15788_v50  ;;  %1832 = vmatprep.mubr.bf16.mxu0 %v15788_v50  ;;  %v1019_v47 = vmul.f32 %v10035_v33, %v12140_v5 }
 0x1ff   : > { %v10039_v42 = vpop.eup %10038  ;;  %v1022_v45 = vmul.f32 %v10037_v37, %v12144_v8  ;;  %10056 = vpow2.f32 %v8296_v22  ;;  %1985 = vmatprep.subr.bf16.mxu1 %v9424_v18  ;;  %2178 = vmatprep.subr.bf16.mxu0 %v9427_v26  ;;  %v9428_v8 = vld [vmem:[#allocation8 + $0xb0] ss:$40 sps:$4 sm:$0xff]   ;;  %v9442_v26 = vld [vmem:[#allocation8 + $0x154] ss:$40 sps:$4 sm:$0xff]  }
 0x200   : > { %v10041_v46 = vpop.eup %10040  ;;  %v1020_v49 = vmul.f32 %v10039_v42, %v12148_v11  ;;  %10058 = vpow2.f32 %v8294_v30  ;;  %v9158_v51 = vpop.f32.mrb[20].mxu0  ;;  %v9437_v22 = vld [vmem:[#allocation8 + $0x108] ss:$40 sps:$4 sm:$0xff]  }
 0x201   : > { %v10043_v52 = vpop.eup %10042  ;;  %v12216_v56 = vpack.c.bf16 %v1022_v45, %v1021_v43  ;;  %v933_v58 = vadd.f32 1.0, %v10041_v46  ;;  %10060 = vpow2.f32 %v8297_v34  ;;  %v12219_v59 = vadd.f32 %v9158_v51, %v12118_v53  ;;  %v776_v3 = vpop.f32.mrb[21].mxu0  ;;  %1986 = vmatpush1.bf16.msra.mxu1 %v9422_v35  ;;  %2179 = vmatpush1.bf16.msra.mxu0 %v9425_v36  ;;  %v9440_v45 = vld [vmem:[#allocation8 + $0x150] ss:$40 sps:$4 sm:$0xff]  }
 0x202   : > { %v10045_v61 = vpop.eup %10044  ;;  %v12221_v62 = vpack.c.bf16 %v1020_v49, %v1019_v47  ;;  %v931_v5 = vadd.f32 1.0, %v10043_v52  ;;  %10062 = vpow2.f32 %v8295_v38  ;;  %v12224_v11 = vadd.f32 %v12118_v53, %v776_v3  ;;  %v9159_v0 = vpop.f32.mrb[22].mxu0  ;;  %1987 = vmatprep.subr.bf16.mxu1 %v9430_v39  ;;  %2180 = vmatprep.subr.bf16.mxu0 %v9433_v41  ;;  %v9448_v52 = vld [vmem:[#allocation8 + $0x1a4] ss:$40 sps:$4 sm:$0xff]  }
 0x203   : > { %v10047_v4 = vpop.eup %10046  ;;  %10064 = vrcp.f32 %v933_v58  ;;  %v934_v6 = vadd.f32 1.0, %v10045_v61  ;;  %v8300_v7 = vmul.f32 -1.442695, %v12219_v59  ;;  %v12228_v9 = vadd.f32 %v9159_v0, %v12118_v53  ;;  %v779_v12 = vpop.f32.mrb[23].mxu0  ;;  %v9451_v58 = vld [vmem:[#allocation8 + $0x1ac] ss:$40 sps:$4 sm:$0xff]  }
 0x204   : > { %10066 = vrcp.f32 %v931_v5  ;;  %v932_v55 = vadd.f32 1.0, %v10047_v4  ;;  %1640 = vmatmul.mubr.bf16.gmra.mrb[4].mxu1 %v12188_v10  ;;  %1833 = vmatmul.mubr.bf16.gmra.mrb[36].mxu0 %v12188_v10  ;;  %v8298_v15 = vmul.f32 -1.442695, %v12224_v11  ;;  %v12234_v60 = vadd.f32 %v12118_v53, %v779_v12  ;;  %v9449_v12 = vld [vmem:[#allocation8 + $0x1a8] ss:$40 sps:$4 sm:$0xff]  }
 0x205   : > { %v10049_v17 = vpop.eup %10048  ;;  %10068 = vrcp.f32 %v934_v6  ;;  %1649 = vmatprep.mubr.bf16.mxu1 %v15788_v50  ;;  %1842 = vmatprep.mubr.bf16.mxu0 %v15788_v50  ;;  %v8301_v63 = vmul.f32 -1.442695, %v12228_v9 }
 0x206   : > { %v10051_v18 = vpop.eup %10050  ;;  %10070 = vrcp.f32 %v932_v55  ;;  %v8299_v19 = vmul.f32 -1.442695, %v12234_v60  ;;  %1988 = vmatpush1.bf16.msra.mxu1 %v9428_v8  ;;  %2181 = vmatpush1.bf16.msra.mxu0 %v9431_v1  ;;  %v1025_v30 = vmul.f32 %v10049_v17, %v12153_v20  ;;  %v9457_v17 = vld [vmem:[#allocation8 + $0x1fc] ss:$40 sps:$4 sm:$0xff]  }
 0x207   : > { %v10053_v25 = vpop.eup %10052  ;;  %10072 = vpow2.f32 %v8300_v7  ;;  %1989 = vmatprep.subr.bf16.mxu1 %v9436_v2  ;;  %2182 = vmatprep.subr.bf16.mxu0 %v9439_v14  ;;  %v1023_v36 = vmul.f32 %v10051_v18, %v12156_v24  ;;  %v9443_v24 = vld [vmem:[#allocation8 + $0x158] ss:$40 sps:$4 sm:$0xff]  }
 0x208   : > { %v10055_v29 = vpop.eup %10054  ;;  %v1026_v33 = vmul.f32 %v10053_v25, %v12160_v28  ;;  %10074 = vpow2.f32 %v8298_v15  ;;  %v9162_v34 = vpop.f32.mrb[24].mxu0  ;;  %v9446_v7 = vld [vmem:[#allocation8 + $0x1a0] ss:$40 sps:$4 sm:$0xff]   ;;  %v9454_v15 = vld [vmem:[#allocation8 + $0x1f4] ss:$40 sps:$4 sm:$0xff]  }
 0x209   : > { %v10057_v35 = vpop.eup %10056  ;;  %v1024_v37 = vmul.f32 %v10055_v29, %v12164_v31  ;;  %10076 = vpow2.f32 %v8301_v63  ;;  %v12245_v38 = vadd.f32 %v9162_v34, %v12118_v53  ;;  %v792_v39 = vpop.f32.mrb[25].mxu0 }
 0x20a   : > { %v10059_v41 = vpop.eup %10058  ;;  %v12247_v42 = vpack.c.bf16 %v1026_v33, %v1025_v30  ;;  %v937_v43 = vadd.f32 1.0, %v10057_v35  ;;  %10078 = vpow2.f32 %v8299_v19  ;;  %v12250_v20 = vadd.f32 %v12118_v53, %v792_v39  ;;  %v9163_v28 = vpop.f32.mrb[26].mxu0  ;;  %1990 = vmatpush1.bf16.msra.mxu1 %v9434_v21  ;;  %2183 = vmatpush1.bf16.msra.mxu0 %v9437_v22  ;;  %v9452_v35 = vld [vmem:[#allocation8 + $0x1f0] ss:$40 sps:$4 sm:$0xff]  }
 0x20b   : > { %v10061_v46 = vpop.eup %10060  ;;  %v12252_v31 = vpack.c.bf16 %v1024_v37, %v1023_v36  ;;  %v935_v47 = vadd.f32 1.0, %v10059_v41  ;;  %v12255_v49 = vadd.f32 %v9163_v28, %v12118_v53  ;;  %v795_v51 = vpop.f32.mrb[27].mxu0  ;;  %1991 = vmatprep.subr.bf16.mxu1 %v9442_v26  ;;  %2184 = vmatprep.subr.bf16.mxu0 %v9445_v27  ;;  %v8304_v61 = vmul.f32 -1.442695, %v12245_v38  ;;  %v9460_v41 = vld [vmem:[#allocation8 + $0x244] ss:$40 sps:$4 sm:$0xff]  }
 0x20c   : > { %15912 = vst [vmem:[#allocation29_spill] sm:$0xff] %v12247_v42  ;;  %v10063_v3 = vpop.eup %10062  ;;  %10080 = vrcp.f32 %v937_v43  ;;  %v938_v8 = vadd.f32 1.0, %v10061_v46  ;;  %1650 = vmatmul.mubr.bf16.gmra.mrb[8].mxu1 %v12221_v62  ;;  %1843 = vmatmul.mubr.bf16.gmra.mrb[40].mxu0 %v12221_v62  ;;  %v12261_v5 = vadd.f32 %v12118_v53, %v795_v51  ;;  %v8302_v2 = vmul.f32 -1.442695, %v12250_v20  ;;  %v9463_v43 = vld [vmem:[#allocation8 + $0x24c] ss:$40 sps:$4 sm:$0xff]  }
 0x20d   : > { %v10065_v0 = vpop.eup %10064  ;;  %10082 = vrcp.f32 %v935_v47  ;;  %v936_v1 = vadd.f32 1.0, %v10063_v3  ;;  %1659 = vmatprep.mubr.bf16.mxu1 %v15788_v50  ;;  %1852 = vmatprep.mubr.bf16.mxu0 %v15788_v50  ;;  %v8305_v6 = vmul.f32 -1.442695, %v12255_v49 }
 0x20e   : > { %v10067_v4 = vpop.eup %10066  ;;  %10084 = vrcp.f32 %v938_v8  ;;  %1992 = vmatpush1.bf16.msra.mxu1 %v9440_v45  ;;  %2185 = vmatpush1.bf16.msra.mxu0 %v9443_v24  ;;  %v8303_v55 = vmul.f32 -1.442695, %v12261_v5  ;;  %v1029_v18 = vmul.f32 %v10065_v0, %v12169_v40  ;;  %v9458_v8 = vld [vmem:[#allocation8 + $0x240] ss:$40 sps:$4 sm:$0xff]  }
 0x20f   : > { %v10069_v14 = vpop.eup %10068  ;;  %10086 = vrcp.f32 %v936_v1  ;;  %1993 = vmatprep.subr.bf16.mxu1 %v9448_v52  ;;  %2186 = vmatprep.subr.bf16.mxu0 %v9451_v58  ;;  %v1027_v25 = vmul.f32 %v10067_v4, %v12172_v44  ;;  %v9455_v44 = vld [vmem:[#allocation8 + $0x1f8] ss:$40 sps:$4 sm:$0xff]  }
 0x210   : > { %v10071_v63 = vpop.eup %10070  ;;  %v1030_v19 = vmul.f32 %v10069_v14, %v12176_v48  ;;  %10088 = vpow2.f32 %v8304_v61  ;;  %v9166_v21 = vpop.f32.mrb[28].mxu0  ;;  %v9461_v61 = vld [vmem:[#allocation8 + $0x248] ss:$40 sps:$4 sm:$0xff]  }
 0x211   : > { %v10073_v22 = vpop.eup %10072  ;;  %v1028_v26 = vmul.f32 %v10071_v63, %v12180_v54  ;;  %10090 = vpow2.f32 %v8302_v2  ;;  %v12273_v27 = vadd.f32 %v9166_v21, %v12118_v53  ;;  %v808_v29 = vpop.f32.mrb[29].mxu0 }
 0x212   : > { %v10075_v30 = vpop.eup %10074  ;;  %v12275_v33 = vpack.c.bf16 %v1030_v19, %v1029_v18  ;;  %v941_v34 = vadd.f32 1.0, %v10073_v22  ;;  %10092 = vpow2.f32 %v8305_v6  ;;  %v12278_v40 = vadd.f32 %v12118_v53, %v808_v29  ;;  %v9167_v48 = vpop.f32.mrb[30].mxu0  ;;  %1994 = vmatpush1.bf16.msra.mxu1 %v9446_v7  ;;  %2187 = vmatpush1.bf16.msra.mxu0 %v9449_v12 }
 0x213   : > { %v10077_v36 = vpop.eup %10076  ;;  %v12280_v54 = vpack.c.bf16 %v1028_v26, %v1027_v25  ;;  %v939_v37 = vadd.f32 1.0, %v10075_v30  ;;  %10094 = vpow2.f32 %v8303_v55  ;;  %v811_v39 = vpop.f32.mrb[31].mxu0  ;;  %1995 = vmatprep.subr.bf16.mxu1 %v9454_v15  ;;  %2188 = vmatprep.subr.bf16.mxu0 %v9457_v17  ;;  %v8308_v24 = vmul.f32 -1.442695, %v12273_v27 }
 0x214   : > { %15913 = vst [vmem:[#allocation30_spill] sm:$0xff] %v12275_v33  ;;  %v10079_v28 = vpop.eup %10078  ;;  %10096 = vrcp.f32 %v941_v34  ;;  %v942_v45 = vadd.f32 1.0, %v10077_v36  ;;  %1660 = vmatmul.mubr.bf16.gmra.mrb[12].mxu1 %v12216_v56  ;;  %1853 = vmatmul.mubr.bf16.gmra.mrb[44].mxu0 %v12216_v56  ;;  %v12286_v46 = vadd.f32 %v9167_v48, %v12118_v53  ;;  %v8306_v51 = vmul.f32 -1.442695, %v12278_v40 }
 0x215   : > { %15914 = vst [vmem:[#allocation31_spill] sm:$0xff] %v12280_v54  ;;  %10098 = vrcp.f32 %v939_v37  ;;  %v940_v47 = vadd.f32 1.0, %v10079_v28  ;;  %1669 = vmatprep.mubr.bf16.mxu1 %v15788_v50  ;;  %1862 = vmatprep.mubr.bf16.mxu0 %v15788_v50  ;;  %v12292_v52 = vadd.f32 %v12118_v53, %v811_v39 }
 0x216   : > { %v10081_v58 = vpop.eup %10080  ;;  %10100 = vrcp.f32 %v942_v45  ;;  %v8309_v3 = vmul.f32 -1.442695, %v12286_v46  ;;  %1996 = vmatpush1.bf16.msra.mxu1 %v9452_v35  ;;  %2189 = vmatpush1.bf16.msra.mxu0 %v9455_v44 }
 0x217   : > { %v10083_v0 = vpop.eup %10082  ;;  %v1033_v1 = vmul.f32 %v10081_v58, %v12191_v13  ;;  %10102 = vrcp.f32 %v940_v47  ;;  %v8307_v2 = vmul.f32 -1.442695, %v12292_v52  ;;  %1997 = vmatprep.subr.bf16.mxu1 %v9460_v41  ;;  %2190 = vmatprep.subr.bf16.mxu0 %v9463_v43 }
 0x218   : > { %v10085_v4 = vpop.eup %10084  ;;  %v1031_v53 = vmul.f32 %v10083_v0, %v12196_v57  ;;  %10104 = vpow2.f32 %v8308_v24 }
 0x219   : > { %v10087_v6 = vpop.eup %10086  ;;  %v1034_v7 = vmul.f32 %v10085_v4, %v12200_v23  ;;  %10106 = vpow2.f32 %v8306_v51 }
 0x21a   : > { %v10089_v12 = vpop.eup %10088  ;;  %v1032_v14 = vmul.f32 %v10087_v6, %v12206_v32  ;;  %10108 = vpow2.f32 %v8309_v3  ;;  %1998 = vmatpush1.bf16.msra.mxu1 %v9458_v8  ;;  %2191 = vmatpush1.bf16.msra.mxu0 %v9461_v61  ;;  %v9466_v8 = vld [vmem:[#allocation8 + $0x24] ss:$40 sps:$4 sm:$0xff]  }
 0x21b   : > { %v10091_v13 = vpop.eup %10090  ;;  %v12300_v55 = vpack.c.bf16 %v1034_v7, %v1033_v1  ;;  %v945_v15 = vadd.f32 1.0, %v10089_v12  ;;  %10110 = vpow2.f32 %v8307_v2  ;;  %2369 = vmatprep.subr.bf16.mxu1 %v9466_v8  ;;  %v9470_v7 = vld [vmem:[#allocation8 + $0xc0] ss:$40 sps:$4 sm:$0xff]   ;;  %v9475_v12 = vld [vmem:[#allocation8 + $0x114] ss:$40 sps:$4 sm:$0xff]  }
 0x21c   : > { %v10093_v17 = vpop.eup %10092  ;;  %v12302_v63 = vpack.c.bf16 %v1032_v14, %v1031_v53  ;;  %v943_v57 = vadd.f32 1.0, %v10091_v13  ;;  %1670 = vmatmul.mubr.bf16.gmra.mrb[16].mxu1 %v12252_v31  ;;  %1863 = vmatmul.mubr.bf16.gmra.mrb[48].mxu0 %v12252_v31  ;;  %v9473_v14 = vld [vmem:[#allocation8 + $0x110] ss:$40 sps:$4 sm:$0xff]   ;;  %v9478_v13 = vld [vmem:[#allocation8 + $0x164] ss:$40 sps:$4 sm:$0xff]  }
 0x21d   : > { %15915 = vst [vmem:[#allocation32_spill] sm:$0xff] %v12300_v55  ;;  %v10095_v23 = vpop.eup %10094  ;;  %10112 = vrcp.f32 %v945_v15  ;;  %v946_v18 = vadd.f32 1.0, %v10093_v17  ;;  %1679 = vmatprep.mubr.bf16.mxu1 %v15788_v50  ;;  %1872 = vmatprep.mubr.bf16.mxu0 %v15788_v50  ;;  %v9476_v15 = vld [vmem:[#allocation8 + $0x160] ss:$40 sps:$4 sm:$0xff]   ;;  %v9481_v17 = vld [vmem:[#allocation8 + $0x1b4] ss:$40 sps:$4 sm:$0xff]  }
 0x21e   : > { %15916 = vst [vmem:[#allocation33_spill] sm:$0xff] %v12302_v63  ;;  %v10097_v32 = vpop.eup %10096  ;;  %10114 = vrcp.f32 %v943_v57  ;;  %v944_v19 = vadd.f32 1.0, %v10095_v23  ;;  %v9479_v57 = vld [vmem:[#allocation8 + $0x1b0] ss:$40 sps:$4 sm:$0xff]   ;;  %v9484_v23 = vld [vmem:[#allocation8 + $0x204] ss:$40 sps:$4 sm:$0xff]  }
 0x21f   : > { %v10099_v21 = vpop.eup %10098  ;;  %v1037_v22 = vmul.f32 %v10097_v32, %v12219_v59  ;;  %10116 = vrcp.f32 %v946_v18  ;;  %v9482_v18 = vld [vmem:[#allocation8 + $0x200] ss:$40 sps:$4 sm:$0xff]   ;;  %v9487_v32 = vld [vmem:[#allocation8 + $0x254] ss:$40 sps:$4 sm:$0xff]  }
 0x220   : > { %v10101_v25 = vpop.eup %10100  ;;  %v1035_v26 = vmul.f32 %v10099_v21, %v12224_v11  ;;  %10118 = vrcp.f32 %v944_v19  ;;  %v9485_v19 = vld [vmem:[#allocation8 + $0x250] ss:$40 sps:$4 sm:$0xff]   ;;  %v15787_v21 = vlaneseq }
 0x221   : > { %v10103_v29 = vpop.eup %10102  ;;  %v1038_v30 = vmul.f32 %v10101_v25, %v12228_v9 }
 0x222   : > { %v10105_v34 = vpop.eup %10104  ;;  %v1036_v48 = vmul.f32 %v10103_v29, %v12234_v60  ;;  %v1143_v29 = vld [vmem:[#allocation9] sm:$0xff] }
 0x223   : > { %v10107_v35 = vpop.eup %10106  ;;  %v12312_v44 = vpack.c.bf16 %v1038_v30, %v1037_v22  ;;  %v949_v36 = vadd.f32 1.0, %v10105_v34  ;;  %v12415_v22 = vshrl.u32 %v15787_v21, 7 }
 0x224   : > { %v10109_v37 = vpop.eup %10108  ;;  %v12314_v39 = vpack.c.bf16 %v1036_v48, %v1035_v26  ;;  %1680 = vmatmul.mubr.bf16.gmra.mrb[20].mxu1 %v12247_v42  ;;  %1873 = vmatmul.mubr.bf16.gmra.mrb[52].mxu0 %v12247_v42  ;;  %v947_v59 = vadd.f32 1.0, %v10107_v35 }
 0x225   : > { %15917 = vst [vmem:[#allocation34_spill] sm:$0xff] %v12312_v44  ;;  %v10111_v11 = vpop.eup %10110  ;;  %10120 = vrcp.f32 %v949_v36  ;;  %1689 = vmatprep.mubr.bf16.mxu1 %v15788_v50  ;;  %1882 = vmatprep.mubr.bf16.mxu0 %v15788_v50  ;;  %v950_v9 = vadd.f32 1.0, %v10109_v37  ;;  %15923 = vst [vmem:[#allocation40_spill] sm:$0xff] %v12415_v22  ;;  %v12420_v25 = vsub.s32 0, %v12415_v22  ;;  %v12423_v26 = vsub.s32 2, %v12415_v22 }
 0x226   : > { %15918 = vst [vmem:[#allocation35_spill] sm:$0xff] %v12314_v39  ;;  %10122 = vrcp.f32 %v947_v59  ;;  %v948_v60 = vadd.f32 1.0, %v10111_v11  ;;  %v12426_v30 = vsub.s32 1, %v12415_v22  ;;  %v12429_v34 = vsub.s32 3, %v12415_v22 }
 0x227   : > { %v10113_v41 = vpop.eup %10112  ;;  %10124 = vrcp.f32 %v950_v9  ;;  %15924 = vst [vmem:[#allocation41_spill] sm:$0xff] %v12420_v25  ;;  %15925 = vst [vmem:[#allocation42_spill] sm:$0xff] %v12423_v26  ;;  %v12434_v48 = vrot.slane %v1143_v29, %v12420_v25  ;;  %v12437_v35 = vrot.slane %v1143_v29, %v12423_v26  ;;  %v15933_v22 = vmov 0  }
 0x228   : > { %v10115_v43 = vpop.eup %10114  ;;  %v1041_v28 = vmul.f32 %v10113_v41, %v12245_v38  ;;  %10126 = vrcp.f32 %v948_v60  ;;  %15926 = vst [vmem:[#allocation43_spill] sm:$0xff] %v12426_v30  ;;  %15927 = vst [vmem:[#allocation44_spill] sm:$0xff] %v12429_v34  ;;  %v12440_v36 = vrot.slane %v1143_v29, %v12426_v30  ;;  %v12443_v37 = vrot.slane %v1143_v29, %v12429_v34 }
 0x229   : > { %v10117_v45 = vpop.eup %10116  ;;  %v1039_v24 = vmul.f32 %v10115_v43, %v12250_v20 }
 0x22a   : > { %v10119_v47 = vpop.eup %10118  ;;  %v1042_v51 = vmul.f32 %v10117_v45, %v12255_v49 }
 0x22b   : > { %v1040_v58 = vmul.f32 %v10119_v47, %v12261_v5 }
 0x22c   : > { %v12324_v3 = vpack.c.bf16 %v1042_v51, %v1041_v28  ;;  %1690 = vmatmul.mubr.bf16.gmra.mrb[24].mxu1 %v12280_v54  ;;  %1883 = vmatmul.mubr.bf16.gmra.mrb[56].mxu0 %v12280_v54 }
 0x22d   : > { %v12328_v61 = vpack.c.bf16 %v1040_v58, %v1039_v24  ;;  %1699 = vmatprep.mubr.bf16.mxu1 %v15788_v50  ;;  %1892 = vmatprep.mubr.bf16.mxu0 %v15788_v50 }
 0x22e   : > { %15919 = vst [vmem:[#allocation36_spill] sm:$0xff] %v12324_v3 }
 0x22f   : > { %15920 = vst [vmem:[#allocation37_spill] sm:$0xff] %v12328_v61  ;;  %v10121_v38 = vpop.eup %10120 }
 0x230   : > { %v10123_v20 = vpop.eup %10122  ;;  %v1045_v49 = vmul.f32 %v10121_v38, %v12273_v27  ;;  %v9464_v27 = vld [vmem:[#allocation8 + $0x20] ss:$40 sps:$4 sm:$0xff]  }
 0x231   : > { %v10125_v0 = vpop.eup %10124  ;;  %v1043_v5 = vmul.f32 %v10123_v20, %v12278_v40  ;;  %v9469_v40 = vld [vmem:[#allocation8 + $0x74] ss:$40 sps:$4 sm:$0xff]  }
 0x232   : > { %v10127_v1 = vpop.eup %10126  ;;  %v1046_v2 = vmul.f32 %v10125_v0, %v12286_v46  ;;  %v9467_v46 = vld [vmem:[#allocation8 + $0x70] ss:$40 sps:$4 sm:$0xff]  }
 0x233   : > { %v1044_v4 = vmul.f32 %v10127_v1, %v12292_v52  ;;  %v9472_v52 = vld [vmem:[#allocation8 + $0xc4] ss:$40 sps:$4 sm:$0xff]  }
 0x234   : > { %v12336_v53 = vpack.c.bf16 %v1046_v2, %v1045_v49  ;;  %1700 = vmatmul.mubr.bf16.gmra.mrb[28].mxu1 %v12275_v33  ;;  %1893 = vmatmul.mubr.bf16.gmra.mrb[60].mxu0 %v12275_v33 }
 0x235   : > { %v12340_v6 = vpack.c.bf16 %v1044_v4, %v1043_v5  ;;  %1709 = vmatprep.mubr.bf16.mxu1 %v15788_v50  ;;  %1902 = vmatprep.mubr.bf16.mxu0 %v15788_v50 }
 0x236   : > { %15921 = vst [vmem:[#allocation38_spill] sm:$0xff] %v12336_v53 }
 0x237   : > { %15922 = vst [vmem:[#allocation39_spill] sm:$0xff] %v12340_v6 }
 0x23c   : > { %1710 = vmatmul.mubr.bf16.gmra.mrb[32].mxu1 %v12302_v63  ;;  %1903 = vmatmul.mubr.bf16.gmra.mrb[64].mxu0 %v12302_v63 }
 0x23d   : > { %1719 = vmatprep.mubr.bf16.mxu1 %v15788_v50  ;;  %1912 = vmatprep.mubr.bf16.mxu0 %v15788_v50 }
 0x244   : > { %1720 = vmatmul.mubr.bf16.gmra.mrb[36].mxu1 %v12300_v55  ;;  %1913 = vmatmul.mubr.bf16.gmra.mrb[68].mxu0 %v12300_v55 }
 0x245   : > { %1729 = vmatprep.mubr.bf16.mxu1 %v15788_v50  ;;  %1922 = vmatprep.mubr.bf16.mxu0 %v15788_v50 }
 0x24c   : > { %1730 = vmatmul.mubr.bf16.gmra.mrb[40].mxu1 %v12314_v39  ;;  %1923 = vmatmul.mubr.bf16.gmra.mrb[72].mxu0 %v12314_v39 }
 0x24d   : > { %1739 = vmatprep.mubr.bf16.mxu1 %v15788_v50  ;;  %1932 = vmatprep.mubr.bf16.mxu0 %v15788_v50 }
 0x254   : > { %1740 = vmatmul.mubr.bf16.gmra.mrb[44].mxu1 %v12312_v44  ;;  %1933 = vmatmul.mubr.bf16.gmra.mrb[76].mxu0 %v12312_v44 }
 0x255   : > { %1749 = vmatprep.mubr.bf16.mxu1 %v15788_v50  ;;  %1942 = vmatprep.mubr.bf16.mxu0 %v15788_v50 }
 0x25c   : > { %1750 = vmatmul.mubr.bf16.gmra.mrb[48].mxu1 %v12328_v61  ;;  %1943 = vmatmul.mubr.bf16.gmra.mrb[80].mxu0 %v12328_v61 }
 0x25d   : > { %1759 = vmatprep.mubr.bf16.mxu1 %v15788_v50  ;;  %1952 = vmatprep.mubr.bf16.mxu0 %v15788_v50 }
 0x264   : > { %1760 = vmatmul.mubr.bf16.gmra.mrb[52].mxu1 %v12324_v3  ;;  %1953 = vmatmul.mubr.bf16.gmra.mrb[84].mxu0 %v12324_v3 }
 0x265   : > { %1769 = vmatprep.mubr.bf16.mxu1 %v15788_v50  ;;  %1962 = vmatprep.mubr.bf16.mxu0 %v15788_v50 }
 0x26c   : > { %1770 = vmatmul.mubr.bf16.gmra.mrb[56].mxu1 %v12340_v6  ;;  %1963 = vmatmul.mubr.bf16.gmra.mrb[88].mxu0 %v12340_v6 }
 0x26d   : > { %1779 = vmatprep.mubr.bf16.mxu1 %v15788_v50  ;;  %1972 = vmatprep.mubr.bf16.mxu0 %v15788_v50 }
 0x274   : > { %1780 = vmatmul.mubr.bf16.gmra.mrb[60].mxu1 %v12336_v53  ;;  %1973 = vmatmul.mubr.bf16.gmra.mrb[92].mxu0 %v12336_v53 }
 0x275   : > { %2015 = vmatprep.mubr.bf16.mxu1 %v15788_v50  ;;  %2208 = vmatprep.mubr.bf16.mxu0 %v15788_v50 }
 0x27c   : > { %2016 = vmatmul.mubr.bf16.vlgmr.msra.gmra.mrb[64].mxu1 %v12193_v16  ;;  %2209 = vmatmul.mubr.bf16.vlgmr.msra.gmra.mrb[96].mxu0 %v12193_v16 }
 0x27d   : > { %2025 = vmatprep.mubr.bf16.mxu1 %v15788_v50  ;;  %2218 = vmatprep.mubr.bf16.mxu0 %v15788_v50 }
 0x27e   : > { %2370 = vmatpush1.bf16.msra.mxu1 %v9464_v27 }
 0x27f   : > { %2371 = vmatprep.subr.bf16.mxu1 %v9469_v40 }
 0x282   : > { %2372 = vmatpush1.bf16.msra.mxu1 %v9467_v46 }
 0x283   : > { %2373 = vmatprep.subr.bf16.mxu1 %v9472_v52 }
 0x284   : > { %2026 = vmatmul.mubr.bf16.gmra.mrb[68].mxu1 %v12188_v10  ;;  %2219 = vmatmul.mubr.bf16.gmra.mrb[100].mxu0 %v12188_v10 }
 0x285   : > { %2035 = vmatprep.mubr.bf16.mxu1 %v15788_v50  ;;  %2228 = vmatprep.mubr.bf16.mxu0 %v15788_v50 }
 0x286   : > { %2374 = vmatpush1.bf16.msra.mxu1 %v9470_v7 }
 0x287   : > { %2375 = vmatprep.subr.bf16.mxu1 %v9475_v12 }
 0x28a   : > { %2376 = vmatpush1.bf16.msra.mxu1 %v9473_v14 }
 0x28b   : > { %2377 = vmatprep.subr.bf16.mxu1 %v9478_v13 }
 0x28c   : > { %2036 = vmatmul.mubr.bf16.gmra.mrb[72].mxu1 %v12221_v62  ;;  %2229 = vmatmul.mubr.bf16.gmra.mrb[104].mxu0 %v12221_v62 }
 0x28d   : > { %2045 = vmatprep.mubr.bf16.mxu1 %v15788_v50  ;;  %2238 = vmatprep.mubr.bf16.mxu0 %v15788_v50 }
 0x28e   : > { %2378 = vmatpush1.bf16.msra.mxu1 %v9476_v15 }
 0x28f   : > { %2379 = vmatprep.subr.bf16.mxu1 %v9481_v17 }
 0x292   : > { %2380 = vmatpush1.bf16.msra.mxu1 %v9479_v57 }
 0x293   : > { %2381 = vmatprep.subr.bf16.mxu1 %v9484_v23 }
 0x294   : > { %2046 = vmatmul.mubr.bf16.gmra.mrb[76].mxu1 %v12216_v56  ;;  %2239 = vmatmul.mubr.bf16.gmra.mrb[108].mxu0 %v12216_v56 }
 0x295   : > { %2055 = vmatprep.mubr.bf16.mxu1 %v15788_v50  ;;  %2248 = vmatprep.mubr.bf16.mxu0 %v15788_v50 }
 0x296   : > { %2382 = vmatpush1.bf16.msra.mxu1 %v9482_v18 }
 0x297   : > { %2383 = vmatprep.subr.bf16.mxu1 %v9487_v32 }
 0x29a   : > { %2384 = vmatpush1.bf16.msra.mxu1 %v9485_v19 }
 0x29c   : > { %2056 = vmatmul.mubr.bf16.gmra.mrb[80].mxu1 %v12252_v31  ;;  %2249 = vmatmul.mubr.bf16.gmra.mrb[112].mxu0 %v12252_v31 }
 0x29d   : > { %2065 = vmatprep.mubr.bf16.mxu1 %v15788_v50  ;;  %2258 = vmatprep.mubr.bf16.mxu0 %v15788_v50 }
 0x2a4   : > { %2066 = vmatmul.mubr.bf16.gmra.mrb[84].mxu1 %v12247_v42  ;;  %2259 = vmatmul.mubr.bf16.gmra.mrb[116].mxu0 %v12247_v42 }
 0x2a5   : > { %2075 = vmatprep.mubr.bf16.mxu1 %v15788_v50  ;;  %2268 = vmatprep.mubr.bf16.mxu0 %v15788_v50 }
 0x2ac   : > { %2076 = vmatmul.mubr.bf16.gmra.mrb[88].mxu1 %v12280_v54  ;;  %2269 = vmatmul.mubr.bf16.gmra.mrb[120].mxu0 %v12280_v54 }
 0x2ad   : > { %2085 = vmatprep.mubr.bf16.mxu1 %v15788_v50  ;;  %2278 = vmatprep.mubr.bf16.mxu0 %v15788_v50 }
 0x2b4   : > { %2086 = vmatmul.mubr.bf16.gmra.mrb[92].mxu1 %v12275_v33  ;;  %2279 = vmatmul.mubr.bf16.gmra.mrb[124].mxu0 %v12275_v33 }
 0x2b5   : > { %2095 = vmatprep.mubr.bf16.mxu1 %v15788_v50  ;;  %2288 = vmatprep.mubr.bf16.mxu0 %v15788_v50 }
 0x2bc   : > { %2096 = vmatmul.mubr.bf16.gmra.mrb[96].mxu1 %v12302_v63  ;;  %2289 = vmatmul.mubr.bf16.gmra.mrb[128].mxu0 %v12302_v63 }
 0x2bd   : > { %2105 = vmatprep.mubr.bf16.mxu1 %v15788_v50  ;;  %2298 = vmatprep.mubr.bf16.mxu0 %v15788_v50 }
 0x2c4   : > { %2106 = vmatmul.mubr.bf16.gmra.mrb[100].mxu1 %v12300_v55  ;;  %2299 = vmatmul.mubr.bf16.gmra.mrb[132].mxu0 %v12300_v55 }
 0x2c5   : > { %2115 = vmatprep.mubr.bf16.mxu1 %v15788_v50  ;;  %2308 = vmatprep.mubr.bf16.mxu0 %v15788_v50 }
 0x2cc   : > { %2116 = vmatmul.mubr.bf16.gmra.mrb[104].mxu1 %v12314_v39  ;;  %2309 = vmatmul.mubr.bf16.gmra.mrb[136].mxu0 %v12314_v39 }
 0x2cd   : > { %2125 = vmatprep.mubr.bf16.mxu1 %v15788_v50  ;;  %2318 = vmatprep.mubr.bf16.mxu0 %v15788_v50 }
 0x2cf   : > { %v1631_v59 = vpop.f32.mrb[0].mxu1  ;;  %v1824_v11 = vpop.f32.mrb[32].mxu0 }
 0x2d0   : > { %v12448_v9 = vadd.f32 %v1631_v59, %v12434_v48  ;;  %v12451_v60 = vadd.f32 %v1824_v11, %v12437_v35  ;;  %v1633_v41 = vpop.f32.mrb[1].mxu1  ;;  %v1826_v43 = vpop.f32.mrb[33].mxu0 }
 0x2d1   : > { %v12454_v28 = vadd.f32 %v1633_v41, %v12440_v36  ;;  %v12457_v45 = vadd.f32 %v1826_v43, %v12443_v37  ;;  %v1635_v24 = vpop.f32.mrb[2].mxu1  ;;  %v1828_v47 = vpop.f32.mrb[34].mxu0 }
 0x2d2   : > { %v8390_v51 = vmul.f32 -1.442695, %v12448_v9  ;;  %v8392_v58 = vmul.f32 -1.442695, %v12451_v60  ;;  %v12462_v8 = vadd.f32 %v1635_v24, %v12434_v48  ;;  %v12465_v38 = vadd.f32 %v1828_v47, %v12437_v35  ;;  %v1637_v20 = vpop.f32.mrb[3].mxu1  ;;  %v1830_v49 = vpop.f32.mrb[35].mxu0 }
 0x2d3   : > { %15928 = vst [vmem:[#allocation45_spill] sm:$0xff] %v12457_v45  ;;  %v8391_v0 = vmul.f32 -1.442695, %v12454_v28  ;;  %v8393_v5 = vmul.f32 -1.442695, %v12457_v45  ;;  %v12470_v1 = vadd.f32 %v1637_v20, %v12440_v36  ;;  %v12473_v2 = vadd.f32 %v1830_v49, %v12443_v37 }
 0x2d4   : > { %10128 = vpow2.f32 %v8390_v51  ;;  %v8400_v4 = vmul.f32 -1.442695, %v12462_v8  ;;  %2126 = vmatmul.mubr.bf16.gmra.mrb[108].mxu1 %v12312_v44  ;;  %2319 = vmatmul.mubr.bf16.gmra.mrb[140].mxu0 %v12312_v44  ;;  %v8402_v27 = vmul.f32 -1.442695, %v12465_v38 }
 0x2d5   : > { %15929 = vst [vmem:[#allocation46_spill] sm:$0xff] %v12473_v2  ;;  %10130 = vpow2.f32 %v8392_v58  ;;  %2135 = vmatprep.mubr.bf16.mxu1 %v15788_v50  ;;  %2328 = vmatprep.mubr.bf16.mxu0 %v15788_v50  ;;  %v8401_v40 = vmul.f32 -1.442695, %v12470_v1  ;;  %v8403_v46 = vmul.f32 -1.442695, %v12473_v2 }
 0x2d6   : > { %10132 = vpow2.f32 %v8391_v0 }
 0x2d7   : > { %10134 = vpow2.f32 %v8393_v5  ;;  %v1641_v52 = vpop.f32.mrb[4].mxu1  ;;  %v1834_v7 = vpop.f32.mrb[36].mxu0 }
 0x2d8   : > { %10136 = vpow2.f32 %v8400_v4  ;;  %v12484_v12 = vadd.f32 %v1641_v52, %v12434_v48  ;;  %v12487_v14 = vadd.f32 %v1834_v7, %v12437_v35  ;;  %v1643_v13 = vpop.f32.mrb[5].mxu1  ;;  %v1836_v15 = vpop.f32.mrb[37].mxu0 }
 0x2d9   : > { %10138 = vpow2.f32 %v8402_v27  ;;  %v12490_v17 = vadd.f32 %v1643_v13, %v12440_v36  ;;  %v12493_v57 = vadd.f32 %v1836_v15, %v12443_v37  ;;  %v1645_v23 = vpop.f32.mrb[6].mxu1  ;;  %v1838_v18 = vpop.f32.mrb[38].mxu0 }
 0x2da   : > { %10140 = vpow2.f32 %v8401_v40  ;;  %v8410_v32 = vmul.f32 -1.442695, %v12484_v12  ;;  %v8412_v19 = vmul.f32 -1.442695, %v12487_v14  ;;  %v12498_v29 = vadd.f32 %v1645_v23, %v12434_v48  ;;  %v1647_v59 = vpop.f32.mrb[7].mxu1  ;;  %v1840_v11 = vpop.f32.mrb[39].mxu0 }
 0x2db   : > { %15930 = vst [vmem:[#allocation47_spill] sm:$0xff] %v12493_v57  ;;  %10142 = vpow2.f32 %v8403_v46  ;;  %v8411_v41 = vmul.f32 -1.442695, %v12490_v17  ;;  %v8413_v43 = vmul.f32 -1.442695, %v12493_v57 }
 0x2dc   : > { %10144 = vpow2.f32 %v8410_v32  ;;  %v8420_v24 = vmul.f32 -1.442695, %v12498_v29  ;;  %2136 = vmatmul.mubr.bf16.gmra.mrb[112].mxu1 %v12328_v61  ;;  %2329 = vmatmul.mubr.bf16.gmra.mrb[144].mxu0 %v12328_v61 }
 0x2dd   : > { %10146 = vpow2.f32 %v8412_v19  ;;  %2145 = vmatprep.mubr.bf16.mxu1 %v15788_v50  ;;  %2338 = vmatprep.mubr.bf16.mxu0 %v15788_v50 }
 0x2de   : > { %v10129_v47 = vpop.eup %10128  ;;  %10148 = vpow2.f32 %v8411_v41 }
 0x2df   : > { %v10131_v51 = vpop.eup %10130  ;;  %v3522_v58 = vadd.f32 1.0, %v10129_v47  ;;  %10150 = vpow2.f32 %v8413_v43  ;;  %v1651_v20 = vpop.f32.mrb[8].mxu1 }
 0x2e0   : > { %v1844_v49 = vpop.f32.mrb[40].mxu0  ;;  %v10133_v0 = vpop.eup %10132  ;;  %v3524_v5 = vadd.f32 1.0, %v10131_v51  ;;  %10152 = vpow2.f32 %v8420_v24 }
 0x2e1   : > { %v1653_v4 = vpop.f32.mrb[9].mxu1  ;;  %v1846_v27 = vpop.f32.mrb[41].mxu0  ;;  %10154 = vrcp.f32 %v3522_v58  ;;  %v3523_v46 = vadd.f32 1.0, %v10133_v0  ;;  %v12516_v58 = vadd.f32 %v1838_v18, %v12437_v35  ;;  %v12524_v18 = vadd.f32 %v1840_v11, %v12443_v37 }
 0x2e2   : > { %v10135_v40 = vpop.eup %10134  ;;  %v1655_v52 = vpop.f32.mrb[10].mxu1  ;;  %10156 = vrcp.f32 %v3524_v5  ;;  %v12542_v26 = vadd.f32 %v1653_v4, %v12440_v36  ;;  %v12550_v25 = vadd.f32 %v1846_v27, %v12443_v37 }
 0x2e3   : > { %v12507_v7 = vpop.f32.mrb[42].mxu0  ;;  %v10137_v13 = vpop.eup %10136  ;;  %v3525_v15 = vadd.f32 1.0, %v10135_v40  ;;  %10158 = vrcp.f32 %v3523_v46  ;;  %15931 = vst [vmem:[#allocation48_spill] sm:$0xff] %v12524_v18  ;;  %v12556_v4 = vadd.f32 %v1655_v52, %v12434_v48 }
 0x2e4   : > { %v12509_v23 = vpop.f32.mrb[11].mxu1  ;;  %v10139_v32 = vpop.eup %10138  ;;  %v3532_v19 = vadd.f32 1.0, %v10137_v13  ;;  %2146 = vmatmul.mubr.bf16.gmra.mrb[116].mxu1 %v12324_v3  ;;  %2339 = vmatmul.mubr.bf16.gmra.mrb[148].mxu0 %v12324_v3  ;;  %v12521_v13 = vadd.f32 %v1647_v59, %v12440_v36  ;;  %15932 = vst [vmem:[#allocation49_spill] sm:$0xff] %v12550_v25  ;;  %v8431_v52 = vmul.f32 -1.442695, %v12542_v26  ;;  %v12569_v3 = vadd.f32 %v12507_v7, %v12437_v35 }
 0x2e5   : > { %v12511_v41 = vpop.f32.mrb[43].mxu0  ;;  %v10141_v43 = vpop.eup %10140  ;;  %10160 = vrcp.f32 %v3525_v15  ;;  %v3534_v24 = vadd.f32 1.0, %v10139_v32  ;;  %2155 = vmatprep.mubr.bf16.mxu1 %v15788_v50  ;;  %2348 = vmatprep.mubr.bf16.mxu0 %v15788_v50 }
 0x2e6   : > { %v10143_v47 = vpop.eup %10142  ;;  %10162 = vrcp.f32 %v3532_v19  ;;  %v3533_v51 = vadd.f32 1.0, %v10141_v43  ;;  %v8421_v30 = vmul.f32 -1.442695, %v12521_v13  ;;  %v12578_v57 = vadd.f32 %v12511_v41, %v12443_v37 }
 0x2e7   : > { %v10145_v0 = vpop.eup %10144  ;;  %10164 = vrcp.f32 %v3534_v24  ;;  %v3535_v5 = vadd.f32 1.0, %v10143_v47  ;;  %v1661_v15 = vpop.f32.mrb[12].mxu1  ;;  %v8422_v47 = vmul.f32 -1.442695, %v12516_v58 }
 0x2e8   : > { %v10147_v40 = vpop.eup %10146  ;;  %10166 = vrcp.f32 %v3533_v51  ;;  %v3542_v46 = vadd.f32 1.0, %v10145_v0  ;;  %v12526_v43 = vpop.f32.mrb[44].mxu0  ;;  %v12532_v51 = vadd.f32 %v1651_v20, %v12434_v48  ;;  %15935 = vst [vmem:[#allocation51_spill] sm:$0xff] %v12578_v57 }
 0x2e9   : > { %v10149_v32 = vpop.eup %10148  ;;  %10168 = vrcp.f32 %v3535_v5  ;;  %v3544_v19 = vadd.f32 1.0, %v10147_v40  ;;  %v12528_v21 = vpop.f32.mrb[13].mxu1  ;;  %v12539_v40 = vadd.f32 %v1844_v49, %v12437_v35  ;;  %v8423_v49 = vmul.f32 -1.442695, %v12524_v18 }
 0x2ea   : > { %v10151_v50 = vpop.eup %10150  ;;  %10170 = vrcp.f32 %v3542_v46  ;;  %v3543_v24 = vadd.f32 1.0, %v10149_v32  ;;  %v12534_v59 = vpop.f32.mrb[45].mxu0  ;;  %v12574_v18 = vadd.f32 %v12509_v23, %v12440_v36 }
 0x2eb   : > { %v12536_v0 = vpop.f32.mrb[14].mxu1  ;;  %v10153_v5 = vpop.eup %10152  ;;  %10172 = vrcp.f32 %v3544_v19  ;;  %v3545_v11 = vadd.f32 1.0, %v10151_v50 }
 0x2ec   : > { %v12544_v46 = vpop.f32.mrb[46].mxu0  ;;  %v12546_v32 = vpop.f32.mrb[15].mxu1  ;;  %10174 = vrcp.f32 %v3543_v24  ;;  %v3552_v20 = vadd.f32 1.0, %v10153_v5  ;;  %2156 = vmatmul.mubr.bf16.gmra.mrb[120].mxu1 %v12340_v6  ;;  %2349 = vmatmul.mubr.bf16.gmra.mrb[152].mxu0 %v12340_v6  ;;  %v8430_v5 = vmul.f32 -1.442695, %v12532_v51 }
 0x2ed   : > { %v10155_v34 = vpop.eup %10154  ;;  %v12552_v19 = vpop.f32.mrb[47].mxu0  ;;  %10176 = vrcp.f32 %v3545_v11  ;;  %2165 = vmatprep.mubr.bf16.mxu1 %v15933_v22  ;;  %2358 = vmatprep.mubr.bf16.mxu0 %v15933_v22  ;;  %v8432_v11 = vmul.f32 -1.442695, %v12539_v40 }
 0x2ee   : > { %v10157_v50 = vpop.eup %10156  ;;  %10178 = vrcp.f32 %v3552_v20  ;;  %v8433_v20 = vmul.f32 -1.442695, %v12550_v25  ;;  %v12585_v7 = vmul.f32 %v10155_v34, %v12448_v9  ;;  %v8440_v25 = vmul.f32 -1.442695, %v12556_v4 }
 0x2ef   : > { %v10159_v24 = vpop.eup %10158  ;;  %10180 = vpow2.f32 %v8422_v47  ;;  %v12580_v47 = vpop.f32.mrb[16].mxu1  ;;  %v12596_v61 = vmul.f32 %v10157_v50, %v12451_v60  ;;  %v12602_v34 = vadd.f32 %v1661_v15, %v12434_v48  ;;  %v8442_v60 = vmul.f32 -1.442695, %v12569_v3 }
 0x2f0   : > { %v12563_v27 = vpop.eup %10160  ;;  %10182 = vpow2.f32 %v8421_v30  ;;  %v12582_v2 = vpop.f32.mrb[48].mxu0 }
 0x2f1   : > { %15934 = vst [vmem:[#allocation50_spill] sm:$0xff] %v12563_v27  ;;  %v10163_v6 = vpop.eup %10162  ;;  %10184 = vpow2.f32 %v8423_v49  ;;  %v12591_v23 = vpop.f32.mrb[17].mxu1  ;;  %15936 = vst [vmem:[#allocation52_spill] sm:$0xff] %v12596_v61  ;;  %v4483_v61 = vmul.f32 %v10159_v24, %v12454_v28 }
 0x2f2   : > { %v10165_v27 = vpop.eup %10164  ;;  %v12588_v30 = vmul.f32 %v10163_v6, %v12462_v8  ;;  %v12593_v45 = vpop.f32.mrb[49].mxu0  ;;  %10186 = vpow2.f32 %v8430_v5 }
 0x2f3   : > { %v10167_v41 = vpop.eup %10166  ;;  %v12599_v44 = vmul.f32 %v10165_v27, %v12465_v38  ;;  %v12604_v6 = vpop.f32.mrb[18].mxu1  ;;  %10188 = vpow2.f32 %v8432_v11  ;;  %v12615_v38 = vadd.f32 %v12526_v43, %v12437_v35  ;;  %v8443_v11 = vmul.f32 -1.442695, %v12578_v57 }
 0x2f4   : > { %v12606_v9 = vpop.f32.mrb[50].mxu0  ;;  %v12608_v8 = vpop.eup %10168  ;;  %v4819_v49 = vpack.c.bf16 %v12588_v30, %v12585_v7  ;;  %10190 = vpow2.f32 %v8431_v52  ;;  %2166 = vmatmul.mubr.bf16.gmra.mrb[124].mxu1 %v12336_v53  ;;  %2359 = vmatmul.mubr.bf16.gmra.mrb[156].mxu0 %v12336_v53  ;;  %v4493_v7 = vmul.f32 %v10167_v41, %v12470_v1  ;;  %v8450_v30 = vmul.f32 -1.442695, %v12602_v34 }
 0x2f5   : > { %15937 = vst [vmem:[#allocation53_spill] sm:$0xff] %v12599_v44  ;;  %15938 = vst [vmem:[#allocation54_spill] sm:$0xff] %v12608_v8  ;;  %v12617_v50 = vpop.f32.mrb[19].mxu1  ;;  %v12619_v15 = vpop.f32.mrb[51].mxu0  ;;  %v8441_v8 = vmul.f32 -1.442695, %v12574_v18  ;;  %10192 = vpow2.f32 %v8433_v20  ;;  %2401 = vmatprep.mubr.bf16.mxu1 %v15933_v22 }
 0x2f6   : > { %v10171_v5 = vpop.eup %10170  ;;  %10194 = vpow2.f32 %v8440_v25  ;;  %v8452_v20 = vmul.f32 -1.442695, %v12615_v38  ;;  %v4820_v28 = vpack.c.bf16 %v4493_v7, %v4483_v61 }
 0x2f7   : > { %v12624_v39 = vpop.eup %10172  ;;  %10196 = vpow2.f32 %v8442_v60  ;;  %v12638_v44 = vpop.f32.mrb[20].mxu1  ;;  %v12643_v25 = vmul.f32 %v10171_v5, %v12484_v12 }
 0x2f8   : > { %v12629_v43 = vpop.eup %10174  ;;  %10198 = vpow2.f32 %v8441_v8  ;;  %v12640_v53 = vpop.f32.mrb[52].mxu0  ;;  %4979 = vmatprep.subr.bf16.mxu0 %v4820_v28 }
 0x2f9   : > { %v12634_v52 = vpop.eup %10176  ;;  %10200 = vpow2.f32 %v8443_v11  ;;  %v12648_v41 = vpop.f32.mrb[21].mxu1  ;;  %4980 = vmatpush1.bf16.msra.mxu0 %v4819_v49 }
 0x2fa   : > { %15939 = vst [vmem:[#allocation55_spill] sm:$0xff] %v12634_v52  ;;  %v10179_v27 = vpop.eup %10178  ;;  %v12650_v60 = vpop.f32.mrb[53].mxu0  ;;  %10202 = vpow2.f32 %v8450_v30 }
 0x2fb   : > { %v10181_v57 = vpop.eup %10180  ;;  %v12646_v1 = vmul.f32 %v10179_v27, %v12498_v29  ;;  %v12652_v24 = vpop.f32.mrb[22].mxu1  ;;  %10204 = vpow2.f32 %v8452_v20 }
 0x2fc   : > { %v10183_v52 = vpop.eup %10182  ;;  %v3554_v55 = vadd.f32 1.0, %v10181_v57  ;;  %v12654_v8 = vpop.f32.mrb[54].mxu0  ;;  %2402 = vmatmul.mubr.bf16.vlgmr.msra.gmra.mrb[128].mxu1 %v12193_v16 }
 0x2fd   : > { %v10185_v63 = vpop.eup %10184  ;;  %v3553_v5 = vadd.f32 1.0, %v10183_v52  ;;  %v12658_v29 = vpop.f32.mrb[23].mxu1  ;;  %2411 = vmatprep.mubr.bf16.mxu1 %v15933_v22 }
 0x2fe   : > { %v12660_v27 = vpop.f32.mrb[55].mxu0  ;;  %v10187_v11 = vpop.eup %10186  ;;  %10206 = vrcp.f32 %v3554_v55  ;;  %v3555_v33 = vadd.f32 1.0, %v10185_v63  ;;  %v12666_v55 = vadd.f32 %v12528_v21, %v12440_v36  ;;  %v12670_v63 = vadd.f32 %v12534_v59, %v12443_v37 }
 0x2ff   : > { %v10189_v57 = vpop.eup %10188  ;;  %10208 = vrcp.f32 %v3553_v5  ;;  %v3562_v61 = vadd.f32 1.0, %v10187_v11  ;;  %v12672_v16 = vpop.f32.mrb[24].mxu1  ;;  %v12678_v5 = vadd.f32 %v12536_v0, %v12434_v48  ;;  %v12686_v59 = vadd.f32 %v12544_v46, %v12437_v35 }
 0x300   : > { %v10191_v7 = vpop.eup %10190  ;;  %10210 = vrcp.f32 %v3555_v33  ;;  %v3564_v30 = vadd.f32 1.0, %v10189_v57  ;;  %15940 = vst [vmem:[#allocation56_spill] sm:$0xff] %v12670_v63  ;;  %v12674_v33 = vpop.f32.mrb[56].mxu0  ;;  %v8453_v46 = vmul.f32 -1.442695, %v12670_v63 }
 0x301   : > { %v10193_v52 = vpop.eup %10192  ;;  %10212 = vrcp.f32 %v3562_v61  ;;  %v3563_v20 = vadd.f32 1.0, %v10191_v7  ;;  %v12680_v11 = vpop.f32.mrb[25].mxu1  ;;  %v12690_v7 = vadd.f32 %v12546_v32, %v12440_v36 }
 0x302   : > { %v10195_v12 = vpop.eup %10194  ;;  %10214 = vrcp.f32 %v3564_v30  ;;  %v3565_v54 = vadd.f32 1.0, %v10193_v52  ;;  %15941 = vst [vmem:[#allocation57_spill] sm:$0xff] %v12680_v11  ;;  %v12682_v57 = vpop.f32.mrb[57].mxu0 }
 0x303   : > { %v10197_v49 = vpop.eup %10196  ;;  %10216 = vrcp.f32 %v3563_v20  ;;  %v3572_v28 = vadd.f32 1.0, %v10195_v12  ;;  %15942 = vst [vmem:[#allocation58_spill] sm:$0xff] %v12682_v57  ;;  %v12692_v12 = vpop.f32.mrb[26].mxu1  ;;  %v8461_v63 = vmul.f32 -1.442695, %v12690_v7 }
 0x304   : > { %v10199_v21 = vpop.eup %10198  ;;  %10218 = vrcp.f32 %v3565_v54  ;;  %v3574_v61 = vadd.f32 1.0, %v10197_v49  ;;  %15943 = vst [vmem:[#allocation59_spill] sm:$0xff] %v12692_v12  ;;  %v12694_v30 = vpop.f32.mrb[58].mxu0  ;;  %v8451_v49 = vmul.f32 -1.442695, %v12666_v55  ;;  %2412 = vmatmul.mubr.bf16.gmra.mrb[132].mxu1 %v12188_v10  ;;  %v12720_v10 = vadd.f32 %v12580_v47, %v12434_v48 }
 0x305   : > { %v10201_v0 = vpop.eup %10200  ;;  %10220 = vrcp.f32 %v3572_v28  ;;  %v3573_v52 = vadd.f32 1.0, %v10199_v21  ;;  %v12696_v20 = vpop.f32.mrb[27].mxu1  ;;  %v8460_v12 = vmul.f32 -1.442695, %v12678_v5  ;;  %v12705_v28 = vadd.f32 %v12552_v19, %v12443_v37  ;;  %2421 = vmatprep.mubr.bf16.mxu1 %v15933_v22 }
 0x306   : > { %v10203_v57 = vpop.eup %10202  ;;  %10222 = vrcp.f32 %v3574_v61  ;;  %v3575_v54 = vadd.f32 1.0, %v10201_v0  ;;  %v12700_v11 = vpop.f32.mrb[59].mxu0  ;;  %v8462_v0 = vmul.f32 -1.442695, %v12686_v59 }
 0x307   : > { %15944 = vst [vmem:[#allocation60_spill] sm:$0xff] %v12700_v11  ;;  %v10205_v32 = vpop.eup %10204  ;;  %10224 = vrcp.f32 %v3573_v52  ;;  %v3582_v42 = vadd.f32 1.0, %v10203_v57  ;;  %15945 = vst [vmem:[#allocation61_spill] sm:$0xff] %v12705_v28  ;;  %v12713_v57 = vmul.f32 %v12624_v39, %v12487_v14  ;;  %v12729_v39 = vadd.f32 %v12582_v2, %v12437_v35  ;;  %v12731_v14 = vpop.f32.mrb[28].mxu1 }
 0x308   : > { %v10207_v21 = vpop.eup %10206  ;;  %10226 = vrcp.f32 %v3575_v54  ;;  %v3584_v61 = vadd.f32 1.0, %v10205_v32  ;;  %v4503_v54 = vmul.f32 %v12629_v43, %v12490_v17  ;;  %v12743_v17 = vadd.f32 %v12593_v45, %v12443_v37 }
 0x309   : > { %v10209_v11 = vpop.eup %10208  ;;  %15946 = vst [vmem:[#allocation62_spill] sm:$0xff] %v12713_v57  ;;  %v12716_v52 = vmul.f32 %v10207_v21, %v12516_v58  ;;  %10228 = vrcp.f32 %v3582_v42  ;;  %v12733_v58 = vpop.f32.mrb[60].mxu0  ;;  %v12739_v21 = vadd.f32 %v12591_v23, %v12440_v36  ;;  %v8470_v45 = vmul.f32 -1.442695, %v12720_v10 }
 0x30a   : > { %v12722_v19 = vpop.eup %10210  ;;  %v4513_v32 = vmul.f32 %v10209_v11, %v12521_v13  ;;  %10230 = vrcp.f32 %v3584_v61  ;;  %15949 = vst [vmem:[#allocation65_spill] sm:$0xff] %v12743_v17  ;;  %v12745_v13 = vpop.f32.mrb[29].mxu1  ;;  %v8463_v11 = vmul.f32 -1.442695, %v12705_v28  ;;  %v12752_v61 = vadd.f32 %v12604_v6, %v12434_v48 }
 0x30b   : > { %15947 = vst [vmem:[#allocation63_spill] sm:$0xff] %v12716_v52  ;;  %15948 = vst [vmem:[#allocation64_spill] sm:$0xff] %v12722_v19  ;;  %v10213_v42 = vpop.eup %10212  ;;  %10232 = vpow2.f32 %v8451_v49  ;;  %v12747_v2 = vpop.f32.mrb[61].mxu0  ;;  %v12761_v52 = vadd.f32 %v12606_v9, %v12437_v35  ;;  %v8472_v6 = vmul.f32 -1.442695, %v12729_v39  ;;  %v12774_v9 = vadd.f32 %v12617_v50, %v12440_v36 }
 0x30c   : > { %v10215_v43 = vpop.eup %10214  ;;  %10234 = vpow2.f32 %v8453_v46  ;;  %v4830_v49 = vpack.c.bf16 %v4513_v32, %v4503_v54  ;;  %v12754_v47 = vpop.f32.mrb[30].mxu1  ;;  %v8473_v32 = vmul.f32 -1.442695, %v12743_v17  ;;  %2422 = vmatmul.mubr.bf16.gmra.mrb[136].mxu1 %v12221_v62 }
 0x30d   : > { %v12756_v23 = vpop.f32.mrb[62].mxu0  ;;  %v10217_v57 = vpop.eup %10216  ;;  %10236 = vpow2.f32 %v8460_v12  ;;  %v8471_v12 = vmul.f32 -1.442695, %v12739_v21  ;;  %2431 = vmatprep.mubr.bf16.mxu1 %v15933_v22  ;;  %v12785_v50 = vmul.f32 %v10215_v43, %v12539_v40  ;;  %v8482_v62 = vmul.f32 -1.442695, %v12761_v52 }
 0x30e   : > { %v12763_v46 = vpop.f32.mrb[31].mxu1  ;;  %v12765_v28 = vpop.f32.mrb[63].mxu0  ;;  %10238 = vpow2.f32 %v8462_v0  ;;  %4981 = vmatprep.subr.bf16.mxu0 %v4830_v49  ;;  %v8481_v43 = vmul.f32 -1.442695, %v12774_v9 }
 0x30f   : > { %15950 = vst [vmem:[#allocation66_spill] sm:$0xff] %v12763_v46  ;;  %15951 = vst [vmem:[#allocation67_spill] sm:$0xff] %v12765_v28  ;;  %v12767_v19 = vpop.eup %10218  ;;  %10240 = vpow2.f32 %v8461_v63  ;;  %v15953_v46 = vpack.c.bf16 %v12646_v1, %v12643_v25  ;;  %v8480_v63 = vmul.f32 -1.442695, %v12752_v61 }
 0x310   : > { %15952 = vst [vmem:[#allocation68_spill] sm:$0xff] %v12767_v19  ;;  %v10221_v54 = vpop.eup %10220  ;;  %v4522_v19 = vmul.f32 %v10213_v42, %v12532_v51  ;;  %10242 = vpow2.f32 %v8463_v11  ;;  %15954 = vst [vmem:[#allocation69_spill] sm:$0xff] %v12785_v50  ;;  %v4523_v51 = vmul.f32 %v10217_v57, %v12542_v26  ;;  %v12795_v42 = vpop.f32.mrb[32].mxu1 }
 0x311   : > { %4982 = vmatpush1.bf16.msra.mxu0 %v15953_v46  ;;  %v10223_v0 = vpop.eup %10222  ;;  %v4532_v49 = vmul.f32 %v10221_v54, %v12556_v4  ;;  %10244 = vpow2.f32 %v8470_v45  ;;  %v12797_v11 = vpop.f32.mrb[64].mxu0 }
 0x312   : > { %v10225_v17 = vpop.eup %10224  ;;  %v12788_v28 = vmul.f32 %v10223_v0, %v12569_v3  ;;  %10246 = vpow2.f32 %v8472_v6  ;;  %v12804_v45 = vpop.f32.mrb[33].mxu1 }
 0x313   : > { %v12791_v25 = vpop.eup %10226  ;;  %v4839_v4 = vpack.c.bf16 %v4532_v49, %v4522_v19  ;;  %v4533_v1 = vmul.f32 %v10225_v17, %v12574_v18  ;;  %10248 = vpow2.f32 %v8471_v12  ;;  %v12806_v46 = vpop.f32.mrb[65].mxu0 }
 0x314   : > { %15955 = vst [vmem:[#allocation70_spill] sm:$0xff] %v12788_v28  ;;  %15956 = vst [vmem:[#allocation71_spill] sm:$0xff] %v12791_v25  ;;  %v12799_v40 = vpop.eup %10228  ;;  %10250 = vpow2.f32 %v8473_v32  ;;  %v12810_v57 = vpop.f32.mrb[34].mxu1  ;;  %2432 = vmatmul.mubr.bf16.gmra.mrb[140].mxu1 %v12216_v56 }
 0x315   : > { %v12808_v26 = vpop.eup %10230  ;;  %v4840_v18 = vpack.c.bf16 %v4533_v1, %v4523_v51  ;;  %v12812_v19 = vpop.f32.mrb[66].mxu0  ;;  %10252 = vpow2.f32 %v8480_v63  ;;  %2441 = vmatprep.mubr.bf16.mxu1 %v15933_v22 }
 0x316   : > { %v10233_v17 = vpop.eup %10232  ;;  %v12814_v6 = vpop.f32.mrb[35].mxu1  ;;  %10254 = vpow2.f32 %v8482_v62 }
 0x317   : > { %v12816_v54 = vpop.f32.mrb[67].mxu0  ;;  %v10235_v12 = vpop.eup %10234  ;;  %v3583_v0 = vadd.f32 1.0, %v10233_v17  ;;  %4983 = vmatprep.subr.bf16.mxu0 %v4840_v18  ;;  %10256 = vpow2.f32 %v8481_v43 }
 0x318   : > { %v10237_v49 = vpop.eup %10236  ;;  %v3585_v3 = vadd.f32 1.0, %v10235_v12  ;;  %4984 = vmatpush1.bf16.msra.mxu0 %v4839_v4  ;;  %v12820_v17 = vpop.f32.mrb[36].mxu1 }
 0x319   : > { %v10239_v32 = vpop.eup %10238  ;;  %10258 = vrcp.f32 %v3583_v0  ;;  %v3592_v51 = vadd.f32 1.0, %v10237_v49  ;;  %v12822_v62 = vpop.f32.mrb[68].mxu0  ;;  %v12828_v0 = vadd.f32 %v12619_v15, %v12443_v37 }
 0x31a   : > { %v10241_v63 = vpop.eup %10240  ;;  %10260 = vrcp.f32 %v3585_v3  ;;  %v3594_v1 = vadd.f32 1.0, %v10239_v32  ;;  %v12824_v43 = vpop.f32.mrb[37].mxu1 }
 0x31b   : > { %v10243_v50 = vpop.eup %10242  ;;  %10262 = vrcp.f32 %v3592_v51  ;;  %v3593_v28 = vadd.f32 1.0, %v10241_v63  ;;  %15957 = vst [vmem:[#allocation72_spill] sm:$0xff] %v12824_v43  ;;  %15958 = vst [vmem:[#allocation73_spill] sm:$0xff] %v12828_v0  ;;  %v12830_v3 = vpop.f32.mrb[69].mxu0  ;;  %v12834_v51 = vadd.f32 %v12638_v44, %v12434_v48 }
 0x31c   : > { %v10245_v18 = vpop.eup %10244  ;;  %10264 = vrcp.f32 %v3594_v1  ;;  %v3595_v4 = vadd.f32 1.0, %v10243_v50  ;;  %15959 = vst [vmem:[#allocation74_spill] sm:$0xff] %v12830_v3  ;;  %v12838_v50 = vadd.f32 %v12640_v53, %v12437_v35  ;;  %v12840_v63 = vpop.f32.mrb[38].mxu1  ;;  %v12854_v53 = vadd.f32 %v12650_v60, %v12443_v37  ;;  %2442 = vmatmul.mubr.bf16.gmra.mrb[144].mxu1 %v12252_v31 }
 0x31d   : > { %v10247_v56 = vpop.eup %10246  ;;  %10266 = vrcp.f32 %v3593_v28  ;;  %v3602_v12 = vadd.f32 1.0, %v10245_v18  ;;  %15960 = vst [vmem:[#allocation75_spill] sm:$0xff] %v12840_v63  ;;  %v12842_v28 = vpop.f32.mrb[70].mxu0  ;;  %v12846_v18 = vadd.f32 %v12648_v41, %v12440_v36  ;;  %2451 = vmatprep.mubr.bf16.mxu1 %v15933_v22 }
 0x31e   : > { %v10249_v49 = vpop.eup %10248  ;;  %10268 = vrcp.f32 %v3595_v4  ;;  %v3604_v32 = vadd.f32 1.0, %v10247_v56  ;;  %15961 = vst [vmem:[#allocation76_spill] sm:$0xff] %v12842_v28  ;;  %v12848_v4 = vpop.f32.mrb[39].mxu1  ;;  %15964 = vst [vmem:[#allocation79_spill] sm:$0xff] %v12854_v53  ;;  %v12858_v28 = vadd.f32 %v12652_v24, %v12434_v48  ;;  %v8492_v24 = vmul.f32 -1.442695, %v12838_v50 }
 0x31f   : > { %v10251_v1 = vpop.eup %10250  ;;  %10270 = vrcp.f32 %v3602_v12  ;;  %v3603_v15 = vadd.f32 1.0, %v10249_v49  ;;  %15962 = vst [vmem:[#allocation77_spill] sm:$0xff] %v12848_v4  ;;  %v12850_v56 = vpop.f32.mrb[71].mxu0  ;;  %v8483_v49 = vmul.f32 -1.442695, %v12828_v0 }
 0x320   : > { %15963 = vst [vmem:[#allocation78_spill] sm:$0xff] %v12850_v56  ;;  %v10253_v44 = vpop.eup %10252  ;;  %10272 = vrcp.f32 %v3604_v32  ;;  %v3605_v25 = vadd.f32 1.0, %v10251_v1  ;;  %v12864_v56 = vadd.f32 %v12654_v8, %v12437_v35  ;;  %v8490_v1 = vmul.f32 -1.442695, %v12834_v51  ;;  %v12872_v0 = vpop.f32.mrb[72].mxu0 }
 0x321   : > { %v10255_v12 = vpop.eup %10254  ;;  %10274 = vrcp.f32 %v3603_v15  ;;  %v3612_v41 = vadd.f32 1.0, %v10253_v44  ;;  %v8491_v15 = vmul.f32 -1.442695, %v12846_v18  ;;  %v12870_v44 = vpop.f32.mrb[40].mxu1  ;;  %15966 = vst [vmem:[#allocation81_spill] sm:$0xff] %v12872_v0  ;;  %v12889_v0 = vadd.f32 %v12660_v27, %v12443_v37 }
 0x322   : > { %v10257_v32 = vpop.eup %10256  ;;  %10276 = vrcp.f32 %v3605_v25  ;;  %v3614_v60 = vadd.f32 1.0, %v10255_v12  ;;  %15965 = vst [vmem:[#allocation80_spill] sm:$0xff] %v12870_v44  ;;  %v8493_v63 = vmul.f32 -1.442695, %v12854_v53  ;;  %v8500_v25 = vmul.f32 -1.442695, %v12858_v28 }
 0x323   : > { %v10259_v4 = vpop.eup %10258  ;;  %10278 = vrcp.f32 %v3612_v41  ;;  %v3613_v31 = vadd.f32 1.0, %v10257_v32  ;;  %v12878_v12 = vpop.f32.mrb[41].mxu1  ;;  %v8502_v41 = vmul.f32 -1.442695, %v12864_v56  ;;  %v12885_v32 = vadd.f32 %v12658_v29, %v12440_v36  ;;  %15970 = vst [vmem:[#allocation85_spill] sm:$0xff] %v12889_v0 }
 0x324   : > { %v12874_v8 = vpop.eup %10260  ;;  %10280 = vrcp.f32 %v3614_v60  ;;  %15968 = vst [vmem:[#allocation83_spill] sm:$0xff] %v12878_v12  ;;  %v12880_v3 = vpop.f32.mrb[73].mxu0  ;;  %v12900_v12 = vadd.f32 %v12672_v16, %v12434_v48  ;;  %v4543_v16 = vmul.f32 %v10259_v4, %v12666_v55 }
 0x325   : > { %15967 = vst [vmem:[#allocation82_spill] sm:$0xff] %v12874_v8  ;;  %15969 = vst [vmem:[#allocation84_spill] sm:$0xff] %v12880_v3  ;;  %v10263_v43 = vpop.eup %10262  ;;  %10282 = vrcp.f32 %v3613_v31  ;;  %v12891_v60 = vpop.f32.mrb[42].mxu1  ;;  %v4542_v3 = vmul.f32 %v12799_v40, %v12602_v34  ;;  %v12915_v34 = vadd.f32 %v12674_v33, %v12437_v35  ;;  %v15976_v33 = vld [vmem:[#allocation57_spill] sm:$0xff] }
 0x326   : > { %15971 = vst [vmem:[#allocation86_spill] sm:$0xff] %v12891_v60  ;;  %v12893_v53 = vpop.f32.mrb[74].mxu0  ;;  %v10265_v44 = vpop.eup %10264  ;;  %v4552_v31 = vmul.f32 %v10263_v43, %v12678_v5  ;;  %10284 = vpow2.f32 %v8483_v49  ;;  %v12908_v60 = vmul.f32 %v12808_v26, %v12615_v38  ;;  %v15975_v49 = vld [vmem:[#allocation29_spill] sm:$0xff]  ;;  %v8501_v26 = vmul.f32 -1.442695, %v12885_v32 }
 0x327   : > { %15972 = vst [vmem:[#allocation87_spill] sm:$0xff] %v12893_v53  ;;  %v12902_v29 = vpop.f32.mrb[43].mxu1  ;;  %v12904_v8 = vpop.f32.mrb[75].mxu0  ;;  %v12911_v53 = vmul.f32 %v10265_v44, %v12686_v59  ;;  %10286 = vpow2.f32 %v8490_v1  ;;  %2452 = vmatmul.mubr.bf16.gmra.mrb[148].mxu1 %v15975_v49  ;;  %v12927_v1 = vadd.f32 %v15976_v33, %v12440_v36 }
 0x328   : > { %v10267_v27 = vpop.eup %10266  ;;  %15973 = vst [vmem:[#allocation88_spill] sm:$0xff] %v12908_v60  ;;  %v4849_v40 = vpack.c.bf16 %v4552_v31, %v4542_v3  ;;  %10288 = vpow2.f32 %v8492_v24  ;;  %2461 = vmatprep.mubr.bf16.mxu1 %v15933_v22  ;;  %v15977_v3 = vld [vmem:[#allocation58_spill] sm:$0xff]  ;;  %v12936_v31 = vpop.f32.mrb[44].mxu1 }
 0x329   : > { %15974 = vst [vmem:[#allocation89_spill] sm:$0xff] %v12911_v53  ;;  %v12917_v5 = vpop.eup %10268  ;;  %v4553_v43 = vmul.f32 %v10267_v27, %v12690_v7  ;;  %10290 = vpow2.f32 %v8491_v15  ;;  %v8503_v7 = vmul.f32 -1.442695, %v12889_v0  ;;  %v12933_v4 = vadd.f32 %v15977_v3, %v12443_v37  ;;  %v12938_v27 = vpop.f32.mrb[76].mxu0 }
 0x32a   : > { %v10271_v38 = vpop.eup %10270  ;;  %10292 = vpow2.f32 %v8493_v63  ;;  %v8510_v15 = vmul.f32 -1.442695, %v12900_v12  ;;  %v8512_v63 = vmul.f32 -1.442695, %v12915_v34  ;;  %v12943_v33 = vpop.f32.mrb[45].mxu1 }
 0x32b   : > { %v10273_v55 = vpop.eup %10272  ;;  %15978 = vst [vmem:[#allocation29_spill] sm:$0xff] %v12933_v4  ;;  %v4850_v24 = vpack.c.bf16 %v4553_v43, %v4543_v16  ;;  %10294 = vpow2.f32 %v8500_v25  ;;  %15979 = vst [vmem:[#allocation57_spill] sm:$0xff] %v12943_v33  ;;  %v12945_v59 = vpop.f32.mrb[77].mxu0  ;;  %v8511_v25 = vmul.f32 -1.442695, %v12927_v1  ;;  %v4562_v53 = vmul.f32 %v10271_v38, %v12720_v10 }
 0x32c   : > { %v10275_v44 = vpop.eup %10274  ;;  %10296 = vpow2.f32 %v8502_v41  ;;  %15980 = vst [vmem:[#allocation58_spill] sm:$0xff] %v12945_v59  ;;  %v12948_v16 = vpop.f32.mrb[46].mxu1  ;;  %v12960_v33 = vmul.f32 %v10273_v55, %v12729_v39 }
 0x32d   : > { %v12940_v49 = vpop.eup %10276  ;;  %4985 = vmatprep.subr.bf16.mxu0 %v4850_v24  ;;  %10298 = vpow2.f32 %v8501_v26  ;;  %v12950_v43 = vpop.f32.mrb[78].mxu0  ;;  %v8513_v24 = vmul.f32 -1.442695, %v12933_v4  ;;  %v4563_v10 = vmul.f32 %v10275_v44, %v12739_v21 }
 0x32e   : > { %v10279_v3 = vpop.eup %10278  ;;  %4986 = vmatpush1.bf16.msra.mxu0 %v4849_v40  ;;  %15981 = vst [vmem:[#allocation90_spill] sm:$0xff] %v12950_v43  ;;  %10300 = vpow2.f32 %v8503_v7  ;;  %v12955_v0 = vpop.f32.mrb[47].mxu1  ;;  %15983 = vst [vmem:[#allocation92_spill] sm:$0xff] %v12960_v33  ;;  %v15985_v7 = vld [vmem:[#allocation31_spill] sm:$0xff] }
 0x32f   : > { %v10281_v60 = vpop.eup %10280  ;;  %v4572_v41 = vmul.f32 %v10279_v3, %v12752_v61  ;;  %v12957_v59 = vpop.f32.mrb[79].mxu0  ;;  %10302 = vpow2.f32 %v8510_v15  ;;  %2462 = vmatmul.mubr.bf16.gmra.mrb[152].mxu1 %v15985_v7 }
 0x330   : > { %15982 = vst [vmem:[#allocation91_spill] sm:$0xff] %v12957_v59  ;;  %v10283_v26 = vpop.eup %10282  ;;  %v12963_v40 = vmul.f32 %v10281_v60, %v12761_v52  ;;  %10304 = vpow2.f32 %v8512_v63  ;;  %2471 = vmatprep.mubr.bf16.mxu1 %v15933_v22 }
 0x331   : > { %v10285_v43 = vpop.eup %10284  ;;  %v4859_v38 = vpack.c.bf16 %v4572_v41, %v4562_v53  ;;  %v4573_v61 = vmul.f32 %v10283_v26, %v12774_v9  ;;  %10306 = vpow2.f32 %v8511_v25  ;;  %v12971_v53 = vpop.f32.mrb[48].mxu1 }
 0x332   : > { %15984 = vst [vmem:[#allocation93_spill] sm:$0xff] %v12963_v40  ;;  %v10287_v3 = vpop.eup %10286  ;;  %v3615_v4 = vadd.f32 1.0, %v10285_v43  ;;  %10308 = vpow2.f32 %v8513_v24  ;;  %15986 = vst [vmem:[#allocation31_spill] sm:$0xff] %v12971_v53  ;;  %v12973_v9 = vpop.f32.mrb[80].mxu0 }
 0x333   : > { %v10289_v52 = vpop.eup %10288  ;;  %v3622_v39 = vadd.f32 1.0, %v10287_v3  ;;  %v4860_v60 = vpack.c.bf16 %v4573_v61, %v4563_v10  ;;  %15987 = vst [vmem:[#allocation94_spill] sm:$0xff] %v12973_v9  ;;  %v12975_v63 = vpop.f32.mrb[49].mxu1  ;;  %v15991_v10 = vld [vmem:[#allocation59_spill] sm:$0xff]  ;;  %v13072_v9 = vadd.f32 %v12795_v42, %v12434_v48 }
 0x334   : > { %v10291_v55 = vpop.eup %10290  ;;  %10310 = vrcp.f32 %v3615_v4  ;;  %v3624_v21 = vadd.f32 1.0, %v10289_v52  ;;  %15988 = vst [vmem:[#allocation95_spill] sm:$0xff] %v12975_v63  ;;  %v12977_v25 = vpop.f32.mrb[81].mxu0  ;;  %v12983_v61 = vadd.f32 %v15991_v10, %v12434_v48  ;;  %v13000_v10 = vadd.f32 %v12696_v20, %v12440_v36 }
 0x335   : > { %v10293_v44 = vpop.eup %10292  ;;  %10312 = vrcp.f32 %v3622_v39  ;;  %v3623_v15 = vadd.f32 1.0, %v10291_v55  ;;  %4987 = vmatprep.subr.bf16.mxu0 %v4860_v60  ;;  %15989 = vst [vmem:[#allocation96_spill] sm:$0xff] %v12977_v25  ;;  %v12979_v24 = vpop.f32.mrb[50].mxu1  ;;  %v12989_v39 = vadd.f32 %v12694_v30, %v12437_v35  ;;  %v13013_v20 = vadd.f32 %v12731_v14, %v12434_v48 }
 0x336   : > { %v10295_v43 = vpop.eup %10294  ;;  %10314 = vrcp.f32 %v3624_v21  ;;  %v3625_v41 = vadd.f32 1.0, %v10293_v44  ;;  %4988 = vmatpush1.bf16.msra.mxu0 %v4859_v38  ;;  %15990 = vst [vmem:[#allocation97_spill] sm:$0xff] %v12979_v24  ;;  %v12985_v7 = vpop.f32.mrb[82].mxu0  ;;  %v15995_v44 = vld [vmem:[#allocation30_spill] sm:$0xff]  ;;  %v8520_v30 = vmul.f32 -1.442695, %v12983_v61  ;;  %v13031_v14 = vadd.f32 %v12747_v2, %v12443_v37 }
 0x337   : > { %v10297_v4 = vpop.eup %10296  ;;  %10316 = vrcp.f32 %v3623_v15  ;;  %v3632_v26 = vadd.f32 1.0, %v10295_v43  ;;  %15992 = vst [vmem:[#allocation59_spill] sm:$0xff] %v12985_v7  ;;  %v12991_v60 = vpop.f32.mrb[51].mxu1  ;;  %2472 = vmatmul.mubr.bf16.gmra.mrb[156].mxu1 %v15995_v44  ;;  %v15996_v44 = vld [vmem:[#allocation60_spill] sm:$0xff] }
 0x338   : > { %v10299_v3 = vpop.eup %10298  ;;  %10318 = vrcp.f32 %v3625_v41  ;;  %v3634_v52 = vadd.f32 1.0, %v10297_v4  ;;  %15993 = vst [vmem:[#allocation98_spill] sm:$0xff] %v12991_v60  ;;  %v12993_v38 = vpop.f32.mrb[83].mxu0  ;;  %2481 = vmatprep.mubr.bf16.mxu1 %v15933_v22  ;;  %16001 = vst [vmem:[#allocation102_spill] sm:$0xff] %v13031_v14 }
 0x339   : > { %15994 = vst [vmem:[#allocation99_spill] sm:$0xff] %v12993_v38  ;;  %v10301_v55 = vpop.eup %10300  ;;  %10320 = vrcp.f32 %v3632_v26  ;;  %v3633_v21 = vadd.f32 1.0, %v10299_v3  ;;  %v8522_v3 = vmul.f32 -1.442695, %v12989_v39  ;;  %v13009_v33 = vpop.f32.mrb[84].mxu0 }
 0x33a   : > { %v10303_v15 = vpop.eup %10302  ;;  %10322 = vrcp.f32 %v3634_v52  ;;  %v3635_v43 = vadd.f32 1.0, %v10301_v55  ;;  %v13005_v52 = vadd.f32 %v15996_v44, %v12443_v37  ;;  %v13007_v55 = vpop.f32.mrb[52].mxu1  ;;  %15998 = vst [vmem:[#allocation60_spill] sm:$0xff] %v13009_v33 }
 0x33b   : > { %v10305_v41 = vpop.eup %10304  ;;  %10324 = vrcp.f32 %v3633_v21  ;;  %v3642_v4 = vadd.f32 1.0, %v10303_v15  ;;  %15997 = vst [vmem:[#allocation30_spill] sm:$0xff] %v13007_v55  ;;  %v13021_v40 = vpop.f32.mrb[85].mxu0 }
 0x33c   : > { %v10307_v59 = vpop.eup %10306  ;;  %10326 = vrcp.f32 %v3635_v43  ;;  %v3644_v26 = vadd.f32 1.0, %v10305_v41  ;;  %v13017_v43 = vadd.f32 %v12733_v58, %v12437_v35  ;;  %v13019_v41 = vpop.f32.mrb[53].mxu1  ;;  %16000 = vst [vmem:[#allocation101_spill] sm:$0xff] %v13021_v40  ;;  %v13038_v40 = vadd.f32 %v12754_v47, %v12434_v48  ;;  %v16006_v47 = vld [vmem:[#allocation33_spill] sm:$0xff] }
 0x33d   : > { %v10309_v21 = vpop.eup %10308  ;;  %10328 = vrcp.f32 %v3642_v4  ;;  %v3643_v15 = vadd.f32 1.0, %v10307_v59  ;;  %15999 = vst [vmem:[#allocation100_spill] sm:$0xff] %v13019_v41  ;;  %v13027_v4 = vadd.f32 %v12745_v13, %v12440_v36  ;;  %v13033_v59 = vpop.f32.mrb[54].mxu1  ;;  %v8521_v41 = vmul.f32 -1.442695, %v13000_v10 }
 0x33e   : > { %v13023_v44 = vpop.eup %10310  ;;  %10330 = vrcp.f32 %v3644_v26  ;;  %v3645_v55 = vadd.f32 1.0, %v10309_v21  ;;  %16002 = vst [vmem:[#allocation103_spill] sm:$0xff] %v13033_v59  ;;  %v13040_v26 = vpop.f32.mrb[86].mxu0  ;;  %v8523_v33 = vmul.f32 -1.442695, %v13005_v52  ;;  %v13050_v59 = vadd.f32 %v12756_v23, %v12437_v35  ;;  %v16007_v23 = vld [vmem:[#allocation66_spill] sm:$0xff] }
 0x33f   : > { %v10313_v58 = vpop.eup %10312  ;;  %10332 = vrcp.f32 %v3643_v15  ;;  %16003 = vst [vmem:[#allocation104_spill] sm:$0xff] %v13040_v26  ;;  %v13042_v21 = vpop.f32.mrb[55].mxu1  ;;  %v8530_v15 = vmul.f32 -1.442695, %v13013_v20  ;;  %2482 = vmatmul.mubr.bf16.gmra.mrb[160].mxu1 %v16006_v47  ;;  %v8533_v26 = vmul.f32 -1.442695, %v13031_v14  ;;  %v13062_v7 = vadd.f32 %v16007_v23, %v12440_v36 }
 0x340   : > { %16004 = vst [vmem:[#allocation105_spill] sm:$0xff] %v13042_v21  ;;  %v10315_v13 = vpop.eup %10314  ;;  %10334 = vrcp.f32 %v3645_v55  ;;  %v13045_v2 = vpop.f32.mrb[87].mxu0  ;;  %v8532_v21 = vmul.f32 -1.442695, %v13017_v43  ;;  %v8531_v55 = vmul.f32 -1.442695, %v13027_v4  ;;  %2491 = vmatprep.mubr.bf16.mxu1 %v15933_v22  ;;  %v4582_v25 = vmul.f32 %v10313_v58, %v12834_v51 }
 0x341   : > { %16005 = vst [vmem:[#allocation106_spill] sm:$0xff] %v13045_v2  ;;  %v10317_v38 = vpop.eup %10316  ;;  %10336 = vpow2.f32 %v8520_v30  ;;  %v8540_v2 = vmul.f32 -1.442695, %v13038_v40  ;;  %v16008_v47 = vld [vmem:[#allocation67_spill] sm:$0xff]  ;;  %v13076_v53 = vpop.f32.mrb[88].mxu0  ;;  %v13079_v14 = vmul.f32 %v10315_v13, %v12838_v50 }
 0x342   : > { %v13053_v60 = vpop.eup %10318  ;;  %10338 = vpow2.f32 %v8522_v3  ;;  %v13066_v24 = vadd.f32 %v16008_v47, %v12443_v37  ;;  %16010 = vst [vmem:[#allocation66_spill] sm:$0xff] %v13076_v53  ;;  %v8542_v51 = vmul.f32 -1.442695, %v13050_v59  ;;  %v4583_v58 = vmul.f32 %v10317_v38, %v12846_v18 }
 0x343   : > { %v10321_v30 = vpop.eup %10320  ;;  %10340 = vpow2.f32 %v8521_v41  ;;  %v13074_v41 = vpop.f32.mrb[56].mxu1  ;;  %16011 = vst [vmem:[#allocation67_spill] sm:$0xff] %v13079_v14  ;;  %v8550_v38 = vmul.f32 -1.442695, %v13072_v9 }
 0x344   : > { %v10323_v3 = vpop.eup %10322  ;;  %v4592_v63 = vmul.f32 %v10321_v30, %v12858_v28  ;;  %10342 = vpow2.f32 %v8523_v33  ;;  %16009 = vst [vmem:[#allocation33_spill] sm:$0xff] %v13074_v41  ;;  %v13085_v28 = vpop.f32.mrb[57].mxu1  ;;  %v16087_v41 = vld [vmem:[#allocation87_spill] sm:$0xff] }
 0x345   : > { %v10325_v23 = vpop.eup %10324  ;;  %v13082_v47 = vmul.f32 %v10323_v3, %v12864_v56  ;;  %10344 = vpow2.f32 %v8530_v15  ;;  %16013 = vst [vmem:[#allocation108_spill] sm:$0xff] %v13085_v28  ;;  %v13087_v33 = vpop.f32.mrb[89].mxu0  ;;  %v8541_v3 = vmul.f32 -1.442695, %v13062_v7 }
 0x346   : > { %16014 = vst [vmem:[#allocation109_spill] sm:$0xff] %v13087_v33  ;;  %v13089_v42 = vpop.eup %10326  ;;  %v4869_v30 = vpack.c.bf16 %v4592_v63, %v4582_v25  ;;  %v4593_v53 = vmul.f32 %v10325_v23, %v12885_v32  ;;  %10346 = vpow2.f32 %v8532_v21  ;;  %v13093_v50 = vpop.f32.mrb[58].mxu1  ;;  %v8543_v32 = vmul.f32 -1.442695, %v13066_v24  ;;  %v16019_v21 = vld [vmem:[#allocation32_spill] sm:$0xff] }
 0x347   : > { %16012 = vst [vmem:[#allocation107_spill] sm:$0xff] %v13082_v47  ;;  %16015 = vst [vmem:[#allocation110_spill] sm:$0xff] %v13093_v50  ;;  %v13095_v13 = vpop.f32.mrb[90].mxu0  ;;  %v13097_v56 = vpop.eup %10328  ;;  %10348 = vpow2.f32 %v8531_v55  ;;  %2492 = vmatmul.mubr.bf16.gmra.mrb[164].mxu1 %v16019_v21 }
 0x348   : > { %16016 = vst [vmem:[#allocation111_spill] sm:$0xff] %v13095_v13  ;;  %v13102_v33 = vpop.f32.mrb[59].mxu1  ;;  %v13104_v28 = vpop.f32.mrb[91].mxu0  ;;  %10350 = vpow2.f32 %v8533_v26  ;;  %v4870_v63 = vpack.c.bf16 %v4593_v53, %v4583_v58  ;;  %2501 = vmatprep.mubr.bf16.mxu1 %v15933_v22 }
 0x349   : > { %16017 = vst [vmem:[#allocation112_spill] sm:$0xff] %v13102_v33  ;;  %16018 = vst [vmem:[#allocation113_spill] sm:$0xff] %v13104_v28  ;;  %v13106_v18 = vpop.eup %10330  ;;  %10352 = vpow2.f32 %v8540_v2  ;;  %v13116_v53 = vpop.f32.mrb[60].mxu1  ;;  %v16034_v33 = vld [vmem:[#allocation34_spill] sm:$0xff] }
 0x34a   : > { %v13109_v25 = vpop.eup %10332  ;;  %10354 = vpow2.f32 %v8542_v51  ;;  %4989 = vmatprep.subr.bf16.mxu0 %v4870_v63  ;;  %16020 = vst [vmem:[#allocation32_spill] sm:$0xff] %v13116_v53  ;;  %v13118_v14 = vpop.f32.mrb[92].mxu0 }
 0x34b   : > { %v13113_v55 = vpop.eup %10334  ;;  %10356 = vpow2.f32 %v8541_v3  ;;  %4990 = vmatpush1.bf16.msra.mxu0 %v4869_v30  ;;  %16021 = vst [vmem:[#allocation114_spill] sm:$0xff] %v13118_v14  ;;  %v13120_v21 = vpop.f32.mrb[61].mxu1 }
 0x34c   : > { %v10337_v23 = vpop.eup %10336  ;;  %10358 = vpow2.f32 %v8543_v32  ;;  %16022 = vst [vmem:[#allocation115_spill] sm:$0xff] %v13120_v21  ;;  %v13122_v63 = vpop.f32.mrb[93].mxu0 }
 0x34d   : > { %v10339_v26 = vpop.eup %10338  ;;  %v3652_v15 = vadd.f32 1.0, %v10337_v23  ;;  %10360 = vpow2.f32 %v8550_v38  ;;  %16023 = vst [vmem:[#allocation116_spill] sm:$0xff] %v13122_v63  ;;  %v13124_v28 = vpop.f32.mrb[62].mxu1 }
 0x34e   : > { %v10341_v58 = vpop.eup %10340  ;;  %v3654_v2 = vadd.f32 1.0, %v10339_v26  ;;  %16024 = vst [vmem:[#allocation117_spill] sm:$0xff] %v13124_v28  ;;  %v13126_v32 = vpop.f32.mrb[94].mxu0  ;;  %v16028_v28 = vld [vmem:[#allocation35_spill] sm:$0xff] }
 0x34f   : > { %v10343_v47 = vpop.eup %10342  ;;  %10362 = vrcp.f32 %v3652_v15  ;;  %v3653_v51 = vadd.f32 1.0, %v10341_v58  ;;  %16025 = vst [vmem:[#allocation118_spill] sm:$0xff] %v13126_v32  ;;  %v13128_v23 = vpop.f32.mrb[63].mxu1  ;;  %v13134_v58 = vadd.f32 %v12797_v11, %v12437_v35  ;;  %2502 = vmatmul.mubr.bf16.gmra.mrb[168].mxu1 %v16028_v28  ;;  %v13148_v11 = vadd.f32 %v12810_v57, %v12434_v48 }
 0x350   : > { %v10345_v30 = vpop.eup %10344  ;;  %10364 = vrcp.f32 %v3654_v2  ;;  %v3655_v3 = vadd.f32 1.0, %v10343_v47  ;;  %16026 = vst [vmem:[#allocation119_spill] sm:$0xff] %v13128_v23  ;;  %v13130_v14 = vpop.f32.mrb[95].mxu0  ;;  %v13139_v23 = vadd.f32 %v12804_v45, %v12440_v36  ;;  %2511 = vmatprep.mubr.bf16.mxu1 %v15933_v22  ;;  %v13152_v45 = vadd.f32 %v12812_v19, %v12437_v35 }
 0x351   : > { %v10347_v26 = vpop.eup %10346  ;;  %10366 = vrcp.f32 %v3653_v51  ;;  %v3662_v38 = vadd.f32 1.0, %v10345_v30  ;;  %16027 = vst [vmem:[#allocation120_spill] sm:$0xff] %v13130_v14  ;;  %v13143_v51 = vadd.f32 %v12806_v46, %v12443_v37  ;;  %v8552_v14 = vmul.f32 -1.442695, %v13134_v58  ;;  %v13161_v57 = vpop.f32.mrb[96].mxu0 }
 0x352   : > { %v10349_v21 = vpop.eup %10348  ;;  %10368 = vrcp.f32 %v3655_v3  ;;  %v3664_v15 = vadd.f32 1.0, %v10347_v26  ;;  %v13154_v26 = vpop.f32.mrb[64].mxu1  ;;  %16031 = vst [vmem:[#allocation122_spill] sm:$0xff] %v13161_v57  ;;  %v8551_v19 = vmul.f32 -1.442695, %v13139_v23 }
 0x353   : > { %v10351_v2 = vpop.eup %10350  ;;  %10370 = vrcp.f32 %v3662_v38  ;;  %v3663_v47 = vadd.f32 1.0, %v10349_v21  ;;  %16029 = vst [vmem:[#allocation35_spill] sm:$0xff] %v13143_v51  ;;  %16030 = vst [vmem:[#allocation121_spill] sm:$0xff] %v13154_v26  ;;  %v8553_v26 = vmul.f32 -1.442695, %v13143_v51 }
 0x354   : > { %v10353_v30 = vpop.eup %10352  ;;  %10372 = vrcp.f32 %v3664_v15  ;;  %v3665_v3 = vadd.f32 1.0, %v10351_v2  ;;  %v13159_v15 = vadd.f32 %v12814_v6, %v12440_v36  ;;  %v13163_v2 = vpop.f32.mrb[65].mxu1  ;;  %v13170_v6 = vadd.f32 %v12816_v54, %v12443_v37 }
 0x355   : > { %v10355_v28 = vpop.eup %10354  ;;  %10374 = vrcp.f32 %v3663_v47  ;;  %v3672_v21 = vadd.f32 1.0, %v10353_v30  ;;  %16032 = vst [vmem:[#allocation123_spill] sm:$0xff] %v13163_v2  ;;  %v8562_v2 = vmul.f32 -1.442695, %v13152_v45 }
 0x356   : > { %v10357_v46 = vpop.eup %10356  ;;  %10376 = vrcp.f32 %v3665_v3  ;;  %v3674_v38 = vadd.f32 1.0, %v10355_v28  ;;  %v8560_v28 = vmul.f32 -1.442695, %v13148_v11  ;;  %v8561_v54 = vmul.f32 -1.442695, %v13159_v15 }
 0x357   : > { %v10359_v47 = vpop.eup %10358  ;;  %10378 = vrcp.f32 %v3672_v21  ;;  %v3673_v30 = vadd.f32 1.0, %v10357_v46  ;;  %v13175_v21 = vadd.f32 %v12820_v17, %v12434_v48  ;;  %v13177_v46 = vpop.f32.mrb[97].mxu0  ;;  %2512 = vmatmul.mubr.bf16.gmra.mrb[172].mxu1 %v16034_v33 }
 0x358   : > { %v10361_v32 = vpop.eup %10360  ;;  %10380 = vrcp.f32 %v3674_v38  ;;  %v3675_v3 = vadd.f32 1.0, %v10359_v47  ;;  %16033 = vst [vmem:[#allocation124_spill] sm:$0xff] %v13177_v46  ;;  %v4602_v38 = vmul.f32 %v13097_v56, %v12900_v12  ;;  %v13193_v46 = vadd.f32 %v12822_v62, %v12437_v35  ;;  %v13195_v12 = vpop.f32.mrb[66].mxu1  ;;  %2521 = vmatprep.mubr.bf16.mxu1 %v15933_v22 }
 0x359   : > { %v10363_v63 = vpop.eup %10362  ;;  %10382 = vrcp.f32 %v3673_v30  ;;  %v3682_v57 = vadd.f32 1.0, %v10361_v32  ;;  %v13186_v30 = vmul.f32 %v13106_v18, %v12915_v34  ;;  %16037 = vst [vmem:[#allocation126_spill] sm:$0xff] %v13195_v12  ;;  %v4603_v34 = vmul.f32 %v13109_v25, %v12927_v1  ;;  %v16084_v12 = vld [vmem:[#allocation83_spill] sm:$0xff] }
 0x35a   : > { %v10365_v53 = vpop.eup %10364  ;;  %v4612_v47 = vmul.f32 %v10363_v63, %v12983_v61  ;;  %10384 = vrcp.f32 %v3675_v3  ;;  %v13197_v61 = vpop.f32.mrb[98].mxu0 }
 0x35b   : > { %v10367_v32 = vpop.eup %10366  ;;  %16035 = vst [vmem:[#allocation34_spill] sm:$0xff] %v13186_v30  ;;  %v13189_v17 = vmul.f32 %v10365_v53, %v12989_v39  ;;  %10386 = vrcp.f32 %v3682_v57  ;;  %16038 = vst [vmem:[#allocation127_spill] sm:$0xff] %v13197_v61  ;;  %v16039_v53 = vld [vmem:[#allocation72_spill] sm:$0xff]  ;;  %v16041_v57 = vld [vmem:[#allocation74_spill] sm:$0xff]  ;;  %v13215_v61 = vpop.f32.mrb[67].mxu1 }
 0x35c   : > { %v13200_v33 = vpop.eup %10368  ;;  %v4879_v56 = vpack.c.bf16 %v4612_v47, %v4602_v38  ;;  %v4613_v39 = vmul.f32 %v10367_v32, %v13000_v10  ;;  %10388 = vpow2.f32 %v8552_v14  ;;  %v13209_v63 = vadd.f32 %v16039_v53, %v12440_v36  ;;  %16043 = vst [vmem:[#allocation128_spill] sm:$0xff] %v13215_v61  ;;  %v13217_v1 = vpop.f32.mrb[99].mxu0  ;;  %v16045_v14 = vld [vmem:[#allocation75_spill] sm:$0xff]  ;;  %v16046_v53 = vld [vmem:[#allocation76_spill] sm:$0xff] }
 0x35d   : > { %16036 = vst [vmem:[#allocation125_spill] sm:$0xff] %v13189_v17  ;;  %v10371_v18 = vpop.eup %10370  ;;  %10390 = vpow2.f32 %v8551_v19  ;;  %v13213_v3 = vadd.f32 %v16041_v57, %v12443_v37  ;;  %16044 = vst [vmem:[#allocation129_spill] sm:$0xff] %v13217_v1  ;;  %v8563_v10 = vmul.f32 -1.442695, %v13170_v6  ;;  %v13222_v38 = vadd.f32 %v16045_v14, %v12434_v48  ;;  %v16048_v1 = vld [vmem:[#allocation37_spill] sm:$0xff]  ;;  %v13245_v61 = vpop.f32.mrb[68].mxu1 }
 0x35e   : > { %16040 = vst [vmem:[#allocation72_spill] sm:$0xff] %v13209_v63  ;;  %v10373_v25 = vpop.eup %10372  ;;  %10392 = vpow2.f32 %v8553_v26  ;;  %v4880_v19 = vpack.c.bf16 %v4613_v39, %v4603_v34  ;;  %v8570_v32 = vmul.f32 -1.442695, %v13175_v21  ;;  %v13227_v57 = vadd.f32 %v16046_v53, %v12437_v35  ;;  %16051 = vst [vmem:[#allocation130_spill] sm:$0xff] %v13245_v61 }
 0x35f   : > { %16042 = vst [vmem:[#allocation74_spill] sm:$0xff] %v13213_v3  ;;  %v10375_v47 = vpop.eup %10374  ;;  %10394 = vpow2.f32 %v8560_v28  ;;  %v8572_v26 = vmul.f32 -1.442695, %v13193_v46  ;;  %v8571_v14 = vmul.f32 -1.442695, %v13209_v63  ;;  %v4622_v39 = vmul.f32 %v10371_v18, %v13013_v20  ;;  %2522 = vmatmul.mubr.bf16.gmra.mrb[176].mxu1 %v16048_v1  ;;  %v13247_v20 = vpop.f32.mrb[100].mxu0 }
 0x360   : > { %v13229_v62 = vpop.eup %10376  ;;  %10396 = vpow2.f32 %v8562_v2  ;;  %4991 = vmatprep.subr.bf16.mxu0 %v4880_v19  ;;  %v8573_v34 = vmul.f32 -1.442695, %v13213_v3  ;;  %v8580_v53 = vmul.f32 -1.442695, %v13222_v38  ;;  %v13239_v19 = vmul.f32 %v10373_v25, %v13017_v43  ;;  %16052 = vst [vmem:[#allocation131_spill] sm:$0xff] %v13247_v20  ;;  %2531 = vmatprep.mubr.bf16.mxu1 %v15933_v22  ;;  %v13254_v1 = vpop.f32.mrb[69].mxu1 }
 0x361   : > { %16047 = vst [vmem:[#allocation75_spill] sm:$0xff] %v13229_v62  ;;  %v10379_v30 = vpop.eup %10378  ;;  %10398 = vpow2.f32 %v8561_v54  ;;  %4992 = vmatpush1.bf16.msra.mxu0 %v4879_v56  ;;  %v8582_v56 = vmul.f32 -1.442695, %v13227_v57  ;;  %16053 = vst [vmem:[#allocation132_spill] sm:$0xff] %v13254_v1 }
 0x362   : > { %v10381_v28 = vpop.eup %10380  ;;  %v4632_v17 = vmul.f32 %v10379_v30, %v13038_v40  ;;  %10400 = vpow2.f32 %v8563_v10  ;;  %16049 = vst [vmem:[#allocation76_spill] sm:$0xff] %v13239_v19  ;;  %v4623_v30 = vmul.f32 %v10375_v47, %v13027_v4  ;;  %v16063_v10 = vld [vmem:[#allocation54_spill] sm:$0xff] }
 0x363   : > { %v10383_v2 = vpop.eup %10382  ;;  %v13242_v54 = vmul.f32 %v10381_v28, %v13050_v59  ;;  %10402 = vpow2.f32 %v8570_v32  ;;  %v13256_v59 = vpop.f32.mrb[101].mxu0 }
 0x364   : > { %v13250_v40 = vpop.eup %10384  ;;  %v4889_v18 = vpack.c.bf16 %v4632_v17, %v4622_v39  ;;  %v4633_v43 = vmul.f32 %v10383_v2, %v13062_v7  ;;  %10404 = vpow2.f32 %v8572_v26  ;;  %16054 = vst [vmem:[#allocation133_spill] sm:$0xff] %v13256_v59  ;;  %v13262_v32 = vpop.f32.mrb[70].mxu1  ;;  %v16059_v2 = vld [vmem:[#allocation45_spill] sm:$0xff]  ;;  %v16060_v59 = vld [vmem:[#allocation50_spill] sm:$0xff] }
 0x365   : > { %16050 = vst [vmem:[#allocation37_spill] sm:$0xff] %v13242_v54  ;;  %v13258_v25 = vpop.eup %10386  ;;  %10406 = vpow2.f32 %v8571_v14  ;;  %16055 = vst [vmem:[#allocation134_spill] sm:$0xff] %v13262_v32  ;;  %v13264_v28 = vpop.f32.mrb[102].mxu0  ;;  %v13272_v1 = vmul.f32 %v16060_v59, %v16059_v2  ;;  %v16062_v14 = vld [vmem:[#allocation46_spill] sm:$0xff]  ;;  %v16068_v2 = vld [vmem:[#allocation48_spill] sm:$0xff] }
 0x366   : > { %16056 = vst [vmem:[#allocation135_spill] sm:$0xff] %v13264_v28  ;;  %v10389_v20 = vpop.eup %10388  ;;  %10408 = vpow2.f32 %v8573_v34  ;;  %v4890_v4 = vpack.c.bf16 %v4633_v43, %v4623_v30  ;;  %v13266_v17 = vpop.f32.mrb[71].mxu1  ;;  %v13276_v19 = vmul.f32 %v16063_v10, %v16062_v14  ;;  %v16064_v30 = vld [vmem:[#allocation47_spill] sm:$0xff]  ;;  %v16069_v28 = vld [vmem:[#allocation64_spill] sm:$0xff] }
 0x367   : > { %16057 = vst [vmem:[#allocation136_spill] sm:$0xff] %v13266_v17  ;;  %v13268_v7 = vpop.f32.mrb[103].mxu0  ;;  %v10391_v47 = vpop.eup %10390  ;;  %v3684_v26 = vadd.f32 1.0, %v10389_v20  ;;  %10410 = vpow2.f32 %v8580_v53  ;;  %16061 = vst [vmem:[#allocation45_spill] sm:$0xff] %v13272_v1  ;;  %v16065_v43 = vld [vmem:[#allocation55_spill] sm:$0xff]  ;;  %v16066_v53 = vld [vmem:[#allocation77_spill] sm:$0xff]  ;;  %v13288_v10 = vmul.f32 %v16069_v28, %v16068_v2 }
 0x368   : > { %16058 = vst [vmem:[#allocation137_spill] sm:$0xff] %v13268_v7  ;;  %v10393_v39 = vpop.eup %10392  ;;  %v3683_v54 = vadd.f32 1.0, %v10391_v47  ;;  %10412 = vpow2.f32 %v8582_v56  ;;  %4993 = vmatprep.subr.bf16.mxu0 %v4890_v4  ;;  %v13280_v17 = vmul.f32 %v16065_v43, %v16064_v30  ;;  %v13284_v7 = vadd.f32 %v16066_v53, %v12440_v36  ;;  %v16070_v47 = vld [vmem:[#allocation49_spill] sm:$0xff]  ;;  %v16071_v56 = vld [vmem:[#allocation68_spill] sm:$0xff]  ;;  %v16074_v43 = vld [vmem:[#allocation71_spill] sm:$0xff] }
 0x369   : > { %v10395_v34 = vpop.eup %10394  ;;  %10414 = vrcp.f32 %v3684_v26  ;;  %v3685_v20 = vadd.f32 1.0, %v10393_v39  ;;  %4994 = vmatpush1.bf16.msra.mxu0 %v4889_v18  ;;  %v13292_v4 = vmul.f32 %v16071_v56, %v16070_v47  ;;  %v16072_v30 = vld [vmem:[#allocation36_spill] sm:$0xff]  ;;  %v16073_v39 = vld [vmem:[#allocation51_spill] sm:$0xff]  ;;  %v16076_v18 = vld [vmem:[#allocation82_spill] sm:$0xff] }
 0x36a   : > { %16067 = vst [vmem:[#allocation50_spill] sm:$0xff] %v13284_v7  ;;  %v10397_v59 = vpop.eup %10396  ;;  %10416 = vrcp.f32 %v3683_v54  ;;  %v3692_v14 = vadd.f32 1.0, %v10395_v34  ;;  %2532 = vmatmul.mubr.bf16.gmra.mrb[180].mxu1 %v16072_v30  ;;  %v13297_v32 = vmul.f32 %v16074_v43, %v16073_v39  ;;  %v16075_v53 = vld [vmem:[#allocation56_spill] sm:$0xff]  ;;  %v16078_v54 = vld [vmem:[#allocation78_spill] sm:$0xff]  ;;  %v16081_v43 = vld [vmem:[#allocation61_spill] sm:$0xff] }
 0x36b   : > { %v10399_v26 = vpop.eup %10398  ;;  %v13301_v61 = vmul.f32 %v16076_v18, %v16075_v53  ;;  %10418 = vrcp.f32 %v3685_v20  ;;  %v3694_v28 = vadd.f32 1.0, %v10397_v59  ;;  %2541 = vmatprep.mubr.bf16.mxu1 %v15933_v22  ;;  %v13306_v34 = vadd.f32 %v16078_v54, %v12443_v37  ;;  %v16080_v56 = vld [vmem:[#allocation80_spill] sm:$0xff] }
 0x36c   : > { %v10401_v2 = vpop.eup %10400  ;;  %10420 = vrcp.f32 %v3692_v14  ;;  %v3693_v47 = vadd.f32 1.0, %v10399_v26  ;;  %v13310_v30 = vadd.f32 %v16080_v56, %v12434_v48  ;;  %v13314_v53 = vmul.f32 %v12917_v5, %v16081_v43  ;;  %v16083_v26 = vld [vmem:[#allocation81_spill] sm:$0xff]  ;;  %v16085_v5 = vld [vmem:[#allocation84_spill] sm:$0xff] }
 0x36d   : > { %16077 = vst [vmem:[#allocation46_spill] sm:$0xff] %v13301_v61  ;;  %16079 = vst [vmem:[#allocation54_spill] sm:$0xff] %v13306_v34  ;;  %v10403_v39 = vpop.eup %10402  ;;  %10422 = vrcp.f32 %v3694_v28  ;;  %v3695_v20 = vadd.f32 1.0, %v10401_v2  ;;  %v8581_v59 = vmul.f32 -1.442695, %v13284_v7  ;;  %v13319_v54 = vadd.f32 %v16083_v26, %v12437_v35  ;;  %v16086_v2 = vld [vmem:[#allocation86_spill] sm:$0xff] }
 0x36e   : > { %16082 = vst [vmem:[#allocation47_spill] sm:$0xff] %v13314_v53  ;;  %v10405_v18 = vpop.eup %10404  ;;  %10424 = vrcp.f32 %v3693_v47  ;;  %v3702_v14 = vadd.f32 1.0, %v10403_v39  ;;  %v13323_v56 = vadd.f32 %v16084_v12, %v12440_v36  ;;  %v13327_v28 = vadd.f32 %v16085_v5, %v12443_v37 }
 0x36f   : > { %v10407_v13 = vpop.eup %10406  ;;  %10426 = vrcp.f32 %v3695_v20  ;;  %v3704_v50 = vadd.f32 1.0, %v10405_v18  ;;  %v13331_v43 = vadd.f32 %v16086_v2, %v12434_v48  ;;  %v8583_v26 = vmul.f32 -1.442695, %v13306_v34  ;;  %v16088_v20 = vld [vmem:[#allocation65_spill] sm:$0xff]  ;;  %v16090_v34 = vld [vmem:[#allocation39_spill] sm:$0xff] }
 0x370   : > { %v10409_v47 = vpop.eup %10408  ;;  %10428 = vrcp.f32 %v3702_v14  ;;  %v3703_v39 = vadd.f32 1.0, %v10407_v13  ;;  %v13336_v12 = vadd.f32 %v16087_v41, %v12437_v35  ;;  %v13340_v18 = vmul.f32 %v12940_v49, %v16088_v20 }
 0x371   : > { %v10411_v3 = vpop.eup %10410  ;;  %10430 = vrcp.f32 %v3704_v50  ;;  %v3705_v5 = vadd.f32 1.0, %v10409_v47  ;;  %v8590_v7 = vmul.f32 -1.442695, %v13310_v30  ;;  %v8592_v13 = vmul.f32 -1.442695, %v13319_v54  ;;  %v16091_v47 = vld [vmem:[#allocation73_spill] sm:$0xff] }
 0x372   : > { %16089 = vst [vmem:[#allocation55_spill] sm:$0xff] %v13340_v18  ;;  %v10413_v2 = vpop.eup %10412  ;;  %10432 = vrcp.f32 %v3703_v39  ;;  %v3712_v63 = vadd.f32 1.0, %v10411_v3  ;;  %v8591_v14 = vmul.f32 -1.442695, %v13323_v56  ;;  %2542 = vmatmul.mubr.bf16.gmra.mrb[184].mxu1 %v16090_v34  ;;  %v8593_v62 = vmul.f32 -1.442695, %v13327_v28 }
 0x373   : > { %v10415_v41 = vpop.eup %10414  ;;  %10434 = vrcp.f32 %v3705_v5  ;;  %v3714_v51 = vadd.f32 1.0, %v10413_v2  ;;  %v8600_v49 = vmul.f32 -1.442695, %v13331_v43  ;;  %2551 = vmatprep.mubr.bf16.mxu1 %v15933_v22  ;;  %v13351_v39 = vmul.f32 %v13023_v44, %v16091_v47 }
 0x374   : > { %v10417_v50 = vpop.eup %10416  ;;  %10436 = vrcp.f32 %v3712_v63  ;;  %v8602_v3 = vmul.f32 -1.442695, %v13336_v12  ;;  %v13356_v34 = vadd.f32 %v12902_v29, %v12440_v36  ;;  %v13362_v5 = vadd.f32 %v12904_v8, %v12443_v37 }
 0x375   : > { %16092 = vst [vmem:[#allocation77_spill] sm:$0xff] %v13351_v39  ;;  %v13358_v20 = vpop.eup %10418  ;;  %10438 = vrcp.f32 %v3714_v51  ;;  %v13366_v22 = vadd.f32 %v12936_v31, %v12434_v48  ;;  %v4642_v2 = vmul.f32 %v13258_v25, %v13072_v9  ;;  %v13374_v29 = vadd.f32 %v12938_v27, %v12437_v35  ;;  %v13387_v27 = vpop.f32.mrb[72].mxu1 }
 0x376   : > { %v10421_v63 = vpop.eup %10420  ;;  %10440 = vpow2.f32 %v8581_v59  ;;  %v13379_v47 = vmul.f32 %v10415_v41, %v13134_v58  ;;  %v13389_v25 = vpop.f32.mrb[104].mxu0  ;;  %v8601_v59 = vmul.f32 -1.442695, %v13356_v34  ;;  %v16095_v58 = vld [vmem:[#allocation57_spill] sm:$0xff] }
 0x377   : > { %v10423_v51 = vpop.eup %10422  ;;  %v4652_v31 = vmul.f32 %v10421_v63, %v13148_v11  ;;  %10442 = vpow2.f32 %v8583_v26  ;;  %v4643_v26 = vmul.f32 %v10417_v50, %v13139_v23  ;;  %v13408_v8 = vadd.f32 %v16095_v58, %v12440_v36 }
 0x378   : > { %16093 = vst [vmem:[#allocation48_spill] sm:$0xff] %v13379_v47  ;;  %v10425_v1 = vpop.eup %10424  ;;  %v13385_v9 = vmul.f32 %v10423_v51, %v13152_v45  ;;  %10444 = vpow2.f32 %v8590_v7  ;;  %v13399_v45 = vpop.f32.mrb[73].mxu1  ;;  %v8610_v58 = vmul.f32 -1.442695, %v13366_v22 }
 0x379   : > { %v13395_v11 = vpop.eup %10426  ;;  %v4899_v41 = vpack.c.bf16 %v4652_v31, %v4642_v2  ;;  %v4653_v63 = vmul.f32 %v10425_v1, %v13159_v15  ;;  %10446 = vpow2.f32 %v8592_v13  ;;  %v13401_v7 = vpop.f32.mrb[105].mxu0  ;;  %v16096_v15 = vld [vmem:[#allocation38_spill] sm:$0xff]  ;;  %v8603_v13 = vmul.f32 -1.442695, %v13362_v5 }
 0x37a   : > { %16094 = vst [vmem:[#allocation64_spill] sm:$0xff] %v13385_v9  ;;  %v10429_v51 = vpop.eup %10428  ;;  %10448 = vpow2.f32 %v8591_v14  ;;  %v13410_v23 = vpop.f32.mrb[74].mxu1  ;;  %2552 = vmatmul.mubr.bf16.gmra.mrb[188].mxu1 %v16096_v15  ;;  %v8612_v9 = vmul.f32 -1.442695, %v13374_v29 }
 0x37b   : > { %v13412_v50 = vpop.f32.mrb[106].mxu0  ;;  %v10431_v1 = vpop.eup %10430  ;;  %10450 = vpow2.f32 %v8593_v62  ;;  %v4900_v2 = vpack.c.bf16 %v4653_v63, %v4643_v26  ;;  %v8611_v62 = vmul.f32 -1.442695, %v13408_v8  ;;  %v13428_v63 = vmul.f32 %v10429_v51, %v13175_v21  ;;  %v16105_v21 = vld [vmem:[#allocation90_spill] sm:$0xff] }
 0x37c   : > { %v13416_v31 = vpop.f32.mrb[75].mxu1  ;;  %v13418_v14 = vpop.f32.mrb[107].mxu0  ;;  %10452 = vpow2.f32 %v8600_v49  ;;  %v13434_v39 = vmul.f32 %v10431_v1, %v13193_v46 }
 0x37d   : > { %v13420_v44 = vpop.eup %10432  ;;  %10454 = vpow2.f32 %v8602_v3  ;;  %4995 = vmatprep.subr.bf16.mxu0 %v4900_v2  ;;  %v13441_v2 = vpop.f32.mrb[108].mxu0 }
 0x37e   : > { %v13423_v47 = vpop.eup %10434  ;;  %10456 = vpow2.f32 %v8601_v59  ;;  %4996 = vmatpush1.bf16.msra.mxu0 %v4899_v41  ;;  %16097 = vst [vmem:[#allocation49_spill] sm:$0xff] %v13434_v39  ;;  %v13439_v59 = vpop.f32.mrb[76].mxu1  ;;  %16100 = vst [vmem:[#allocation51_spill] sm:$0xff] %v13441_v2  ;;  %v16109_v39 = vld [vmem:[#allocation79_spill] sm:$0xff] }
 0x37f   : > { %v10437_v15 = vpop.eup %10436  ;;  %10458 = vpow2.f32 %v8603_v13  ;;  %16099 = vst [vmem:[#allocation36_spill] sm:$0xff] %v13439_v59  ;;  %v13449_v46 = vpop.f32.mrb[77].mxu1  ;;  %v16137_v2 = vld [vmem:[#allocation99_spill] sm:$0xff] }
 0x380   : > { %v10439_v26 = vpop.eup %10438  ;;  %v13431_v18 = vmul.f32 %v10437_v15, %v13222_v38  ;;  %10460 = vpow2.f32 %v8610_v58  ;;  %v16101_v38 = vld [vmem:[#allocation58_spill] sm:$0xff]  ;;  %16102 = vst [vmem:[#allocation71_spill] sm:$0xff] %v13449_v46  ;;  %v13451_v1 = vpop.f32.mrb[109].mxu0  ;;  %v13463_v46 = vadd.f32 %v16105_v21, %v12437_v35  ;;  %v13479_v21 = vmul.f32 %v13053_v60, %v16109_v39  ;;  %v16116_v39 = vld [vmem:[#allocation75_spill] sm:$0xff] }
 0x381   : > { %v10441_v49 = vpop.eup %10440  ;;  %v13437_v3 = vmul.f32 %v10439_v26, %v13227_v57  ;;  %10462 = vpow2.f32 %v8612_v9  ;;  %v13447_v13 = vadd.f32 %v16101_v38, %v12443_v37  ;;  %16103 = vst [vmem:[#allocation56_spill] sm:$0xff] %v13451_v1  ;;  %v13457_v26 = vadd.f32 %v12948_v16, %v12434_v48  ;;  %v16115_v60 = vld [vmem:[#allocation102_spill] sm:$0xff] }
 0x382   : > { %v10443_v41 = vpop.eup %10442  ;;  %v3713_v51 = vadd.f32 1.0, %v10441_v49  ;;  %10464 = vpow2.f32 %v8611_v62  ;;  %v13459_v49 = vpop.f32.mrb[78].mxu1  ;;  %v13467_v1 = vadd.f32 %v12955_v0, %v12440_v36  ;;  %v13475_v16 = vmul.f32 %v13200_v33, %v13005_v52  ;;  %16110 = vst [vmem:[#allocation61_spill] sm:$0xff] %v13479_v21 }
 0x383   : > { %16098 = vst [vmem:[#allocation68_spill] sm:$0xff] %v13437_v3  ;;  %v10445_v57 = vpop.eup %10444  ;;  %v3715_v15 = vadd.f32 1.0, %v10443_v41  ;;  %16104 = vst [vmem:[#allocation82_spill] sm:$0xff] %v13459_v49  ;;  %v16106_v41 = vld [vmem:[#allocation85_spill] sm:$0xff]  ;;  %v13483_v0 = vmul.f32 %v13250_v40, %v13066_v24  ;;  %v13491_v52 = vmul.f32 %v13395_v11, %v13170_v6  ;;  %v16118_v24 = vld [vmem:[#allocation35_spill] sm:$0xff]  ;;  %v13573_v59 = vadd.f32 %v16137_v2, %v12443_v37 }
 0x384   : > { %v10447_v9 = vpop.eup %10446  ;;  %10466 = vrcp.f32 %v3713_v51  ;;  %v3722_v38 = vadd.f32 1.0, %v10445_v57  ;;  %v13471_v62 = vmul.f32 %v13089_v42, %v16106_v41  ;;  %16108 = vst [vmem:[#allocation80_spill] sm:$0xff] %v13475_v16  ;;  %v16112_v42 = vld [vmem:[#allocation29_spill] sm:$0xff]  ;;  %v13499_v40 = vmul.f32 %v13358_v20, %v16118_v24 }
 0x385   : > { %v10449_v58 = vpop.eup %10448  ;;  %10468 = vrcp.f32 %v3715_v15  ;;  %v3724_v51 = vadd.f32 1.0, %v10447_v9  ;;  %16111 = vst [vmem:[#allocation81_spill] sm:$0xff] %v13483_v0  ;;  %v13487_v41 = vmul.f32 %v13113_v55, %v16112_v42  ;;  %16114 = vst [vmem:[#allocation84_spill] sm:$0xff] %v13491_v52  ;;  %v13495_v9 = vmul.f32 %v16116_v39, %v16115_v60  ;;  %v13525_v52 = vpop.f32.mrb[110].mxu0  ;;  %v16125_v0 = vld [vmem:[#allocation50_spill] sm:$0xff] }
 0x386   : > { %16107 = vst [vmem:[#allocation78_spill] sm:$0xff] %v13471_v62  ;;  %v10451_v57 = vpop.eup %10450  ;;  %10470 = vrcp.f32 %v3722_v38  ;;  %v3723_v3 = vadd.f32 1.0, %v10449_v58  ;;  %16119 = vst [vmem:[#allocation87_spill] sm:$0xff] %v13499_v40  ;;  %v8620_v39 = vmul.f32 -1.442695, %v13457_v26 }
 0x387   : > { %v10453_v49 = vpop.eup %10452  ;;  %16113 = vst [vmem:[#allocation83_spill] sm:$0xff] %v13487_v41  ;;  %10472 = vrcp.f32 %v3724_v51  ;;  %v3725_v33 = vadd.f32 1.0, %v10451_v57  ;;  %16117 = vst [vmem:[#allocation86_spill] sm:$0xff] %v13495_v9  ;;  %v8622_v24 = vmul.f32 -1.442695, %v13463_v46 }
 0x388   : > { %v10455_v15 = vpop.eup %10454  ;;  %10474 = vrcp.f32 %v3723_v3  ;;  %v3732_v58 = vadd.f32 1.0, %v10453_v49  ;;  %v8613_v3 = vmul.f32 -1.442695, %v13447_v13  ;;  %v8621_v42 = vmul.f32 -1.442695, %v13467_v1  ;;  %v16121_v49 = vld [vmem:[#allocation31_spill] sm:$0xff] }
 0x389   : > { %v10457_v38 = vpop.eup %10456  ;;  %10476 = vrcp.f32 %v3725_v33  ;;  %v3734_v55 = vadd.f32 1.0, %v10455_v15  ;;  %16123 = vst [vmem:[#allocation65_spill] sm:$0xff] %v13525_v52  ;;  %v16130_v52 = vld [vmem:[#allocation97_spill] sm:$0xff] }
 0x38a   : > { %v10459_v51 = vpop.eup %10458  ;;  %10478 = vrcp.f32 %v3732_v58  ;;  %v3733_v57 = vadd.f32 1.0, %v10457_v38  ;;  %v13543_v62 = vadd.f32 %v16130_v52, %v12434_v48 }
 0x38b   : > { %v10461_v60 = vpop.eup %10460  ;;  %10480 = vrcp.f32 %v3734_v55  ;;  %v3735_v20 = vadd.f32 1.0, %v10459_v51  ;;  %v16120_v55 = vld [vmem:[#allocation91_spill] sm:$0xff] }
 0x38c   : > { %v10463_v33 = vpop.eup %10462  ;;  %10482 = vrcp.f32 %v3733_v57  ;;  %v3742_v15 = vadd.f32 1.0, %v10461_v60  ;;  %v13515_v51 = vadd.f32 %v16120_v55, %v12443_v37  ;;  %v13519_v57 = vadd.f32 %v16121_v49, %v12434_v48  ;;  %v16122_v60 = vld [vmem:[#allocation94_spill] sm:$0xff] }
 0x38d   : > { %v10465_v58 = vpop.eup %10464  ;;  %10484 = vrcp.f32 %v3735_v20  ;;  %v3744_v38 = vadd.f32 1.0, %v10463_v33  ;;  %v13523_v40 = vadd.f32 %v16122_v60, %v12437_v35  ;;  %v16124_v33 = vld [vmem:[#allocation72_spill] sm:$0xff]  ;;  %v16127_v49 = vld [vmem:[#allocation54_spill] sm:$0xff] }
 0x38e   : > { %v10467_v11 = vpop.eup %10466  ;;  %10486 = vrcp.f32 %v3742_v15  ;;  %v3743_v6 = vadd.f32 1.0, %v10465_v58  ;;  %v4663_v9 = vmul.f32 %v13420_v44, %v16124_v33  ;;  %v16126_v15 = vld [vmem:[#allocation95_spill] sm:$0xff]  ;;  %v16129_v60 = vld [vmem:[#allocation96_spill] sm:$0xff]  ;;  %v13545_v44 = vpop.f32.mrb[79].mxu1 }
 0x38f   : > { %v10469_v20 = vpop.eup %10468  ;;  %v4673_v55 = vmul.f32 %v10467_v11, %v16125_v0  ;;  %10488 = vrcp.f32 %v3744_v38  ;;  %v13532_v58 = vadd.f32 %v16126_v15, %v12440_v36  ;;  %v13539_v21 = vadd.f32 %v16129_v60, %v12443_v37  ;;  %16131 = vst [vmem:[#allocation73_spill] sm:$0xff] %v13545_v44  ;;  %v13547_v0 = vpop.f32.mrb[111].mxu0  ;;  %v16133_v38 = vld [vmem:[#allocation74_spill] sm:$0xff]  ;;  %v16135_v60 = vld [vmem:[#allocation59_spill] sm:$0xff] }
 0x390   : > { %v10471_v41 = vpop.eup %10470  ;;  %v13535_v16 = vmul.f32 %v10469_v20, %v16127_v49  ;;  %10490 = vrcp.f32 %v3743_v6  ;;  %16132 = vst [vmem:[#allocation57_spill] sm:$0xff] %v13547_v0  ;;  %v13551_v33 = vmul.f32 %v13423_v47, %v16133_v38  ;;  %v8623_v6 = vmul.f32 -1.442695, %v13515_v51 }
 0x391   : > { %v10473_v11 = vpop.eup %10472  ;;  %10492 = vpow2.f32 %v8613_v3  ;;  %v4910_v20 = vpack.c.bf16 %v4673_v55, %v4663_v9  ;;  %v8630_v49 = vmul.f32 -1.442695, %v13519_v57  ;;  %v8632_v52 = vmul.f32 -1.442695, %v13523_v40  ;;  %v16136_v3 = vld [vmem:[#allocation98_spill] sm:$0xff] }
 0x392   : > { %16128 = vst [vmem:[#allocation39_spill] sm:$0xff] %v13535_v16  ;;  %16134 = vst [vmem:[#allocation38_spill] sm:$0xff] %v13551_v33  ;;  %v10475_v15 = vpop.eup %10474  ;;  %10494 = vpow2.f32 %v8620_v39  ;;  %v13558_v44 = vadd.f32 %v16135_v60, %v12437_v35  ;;  %v8631_v47 = vmul.f32 -1.442695, %v13532_v58  ;;  %v13565_v38 = vadd.f32 %v16136_v3, %v12440_v36  ;;  %v13587_v16 = vpop.f32.mrb[80].mxu1 }
 0x393   : > { %v13560_v0 = vpop.eup %10476  ;;  %10496 = vpow2.f32 %v8622_v24  ;;  %4997 = vmatprep.subr.bf16.mxu0 %v4910_v20  ;;  %v8633_v55 = vmul.f32 -1.442695, %v13539_v21  ;;  %v8640_v60 = vmul.f32 -1.442695, %v13543_v62  ;;  %v16138_v24 = vpack.c.bf16 %v13431_v18, %v13428_v63  ;;  %16141 = vst [vmem:[#allocation85_spill] sm:$0xff] %v13587_v16  ;;  %v13589_v18 = vpop.f32.mrb[112].mxu0 }
 0x394   : > { %v10479_v39 = vpop.eup %10478  ;;  %10498 = vpow2.f32 %v8621_v42  ;;  %v4682_v20 = vmul.f32 %v10471_v41, %v13310_v30  ;;  %v13581_v42 = vmul.f32 %v10473_v11, %v13319_v54  ;;  %v8642_v2 = vmul.f32 -1.442695, %v13558_v44  ;;  %16142 = vst [vmem:[#allocation79_spill] sm:$0xff] %v13589_v18  ;;  %v13597_v11 = vpop.f32.mrb[113].mxu0 }
 0x395   : > { %4998 = vmatpush1.bf16.msra.mxu0 %v16138_v24  ;;  %v10481_v3 = vpop.eup %10480  ;;  %v4692_v61 = vmul.f32 %v10479_v39, %v13331_v43  ;;  %10500 = vpow2.f32 %v8623_v6  ;;  %v15864_v63 = vmov 1.0|1.0   ;;  %v4683_v43 = vmul.f32 %v10475_v15, %v13323_v56  ;;  %16144 = vst [vmem:[#allocation102_spill] sm:$0xff] %v13597_v11 }
 0x396   : > { %v10483_v9 = vpop.eup %10482  ;;  %16139 = vst [vmem:[#allocation58_spill] sm:$0xff] %v13581_v42  ;;  %v13584_v33 = vmul.f32 %v10481_v3, %v13336_v12  ;;  %10502 = vpow2.f32 %v8630_v49  ;;  %5011 = vmatprep.mubr.bf16.mxu0 %v15864_v63  ;;  %5093 = vmatprep.mubr.bf16.mxu1 %v15864_v63  ;;  %v13595_v12 = vpop.f32.mrb[81].mxu1  ;;  %v8641_v39 = vmul.f32 -1.442695, %v13565_v38  ;;  %v8643_v56 = vmul.f32 -1.442695, %v13573_v59 }
 0x397   : > { %v10485_v30 = vpop.eup %10484  ;;  %v4919_v54 = vpack.c.bf16 %v4692_v61, %v4682_v20  ;;  %v4693_v41 = vmul.f32 %v10483_v9, %v13356_v34  ;;  %10504 = vpow2.f32 %v8632_v52  ;;  %16143 = vst [vmem:[#allocation29_spill] sm:$0xff] %v13595_v12  ;;  %v13604_v24 = vpop.f32.mrb[82].mxu1 }
 0x398   : > { %16140 = vst [vmem:[#allocation90_spill] sm:$0xff] %v13584_v33  ;;  %v13599_v6 = vpop.eup %10486  ;;  %10506 = vpow2.f32 %v8631_v47  ;;  %16145 = vst [vmem:[#allocation75_spill] sm:$0xff] %v13604_v24  ;;  %v13606_v3 = vpop.f32.mrb[114].mxu0 }
 0x399   : > { %16146 = vst [vmem:[#allocation35_spill] sm:$0xff] %v13606_v3  ;;  %v13608_v61 = vpop.eup %10488  ;;  %10508 = vpow2.f32 %v8633_v55  ;;  %v4920_v34 = vpack.c.bf16 %v4693_v41, %v4683_v43  ;;  %v13611_v15 = vpop.f32.mrb[83].mxu1  ;;  %v13618_v43 = vmul.f32 %v10485_v30, %v13362_v5 }
 0x39a   : > { %16147 = vst [vmem:[#allocation91_spill] sm:$0xff] %v13611_v15  ;;  %v13613_v52 = vpop.f32.mrb[115].mxu0  ;;  %v13615_v9 = vpop.eup %10490  ;;  %10510 = vpow2.f32 %v8640_v60 }
 0x39b   : > { %16148 = vst [vmem:[#allocation31_spill] sm:$0xff] %v13613_v52  ;;  %v10493_v47 = vpop.eup %10492  ;;  %10512 = vpow2.f32 %v8642_v2  ;;  %4999 = vmatprep.subr.bf16.mxu0 %v4920_v34  ;;  %16149 = vst [vmem:[#allocation94_spill] sm:$0xff] %v13618_v43  ;;  %v13620_v33 = vpop.f32.mrb[84].mxu1 }
 0x39c   : > { %v10495_v20 = vpop.eup %10494  ;;  %v3745_v49 = vadd.f32 1.0, %v10493_v47  ;;  %10514 = vpow2.f32 %v8641_v39  ;;  %5000 = vmatpush1.bf16.msra.mxu0 %v4919_v54  ;;  %16150 = vst [vmem:[#allocation72_spill] sm:$0xff] %v13620_v33  ;;  %v13622_v52 = vpop.f32.mrb[116].mxu0  ;;  %v13626_v54 = vmul.f32 %v13560_v0, %v13327_v28  ;;  %v16154_v28 = vld [vmem:[#allocation60_spill] sm:$0xff] }
 0x39d   : > { %v10497_v63 = vpop.eup %10496  ;;  %v3752_v42 = vadd.f32 1.0, %v10495_v20  ;;  %10516 = vpow2.f32 %v8643_v56  ;;  %16151 = vst [vmem:[#allocation50_spill] sm:$0xff] %v13622_v52  ;;  %v13636_v0 = vadd.f32 %v16154_v28, %v12437_v35  ;;  %v16158_v28 = vld [vmem:[#allocation104_spill] sm:$0xff]  ;;  %v13669_v24 = vpop.f32.mrb[85].mxu1 }
 0x39e   : > { %v10499_v55 = vpop.eup %10498  ;;  %10518 = vrcp.f32 %v3745_v49  ;;  %v3754_v41 = vadd.f32 1.0, %v10497_v63  ;;  %16152 = vst [vmem:[#allocation95_spill] sm:$0xff] %v13626_v54  ;;  %v16153_v49 = vld [vmem:[#allocation30_spill] sm:$0xff]  ;;  %v13652_v52 = vadd.f32 %v16158_v28, %v12437_v35  ;;  %16161 = vst [vmem:[#allocation54_spill] sm:$0xff] %v13669_v24  ;;  %v13671_v11 = vpop.f32.mrb[117].mxu0 }
 0x39f   : > { %v10501_v60 = vpop.eup %10500  ;;  %10520 = vrcp.f32 %v3752_v42  ;;  %v3753_v2 = vadd.f32 1.0, %v10499_v55  ;;  %v13630_v47 = vadd.f32 %v16153_v49, %v12434_v48  ;;  %v16157_v49 = vld [vmem:[#allocation103_spill] sm:$0xff]  ;;  %v8652_v54 = vmul.f32 -1.442695, %v13636_v0  ;;  %16162 = vst [vmem:[#allocation96_spill] sm:$0xff] %v13671_v11  ;;  %v16166_v11 = vld [vmem:[#allocation66_spill] sm:$0xff] }
 0x3a0   : > { %v10503_v34 = vpop.eup %10502  ;;  %10522 = vrcp.f32 %v3754_v41  ;;  %v3755_v39 = vadd.f32 1.0, %v10501_v60  ;;  %v16155_v41 = vld [vmem:[#allocation100_spill] sm:$0xff]  ;;  %v13648_v42 = vadd.f32 %v16157_v49, %v12434_v48  ;;  %v13689_v53 = vadd.f32 %v16166_v11, %v12437_v35 }
 0x3a1   : > { %v10505_v56 = vpop.eup %10504  ;;  %10524 = vrcp.f32 %v3753_v2  ;;  %v3762_v5 = vadd.f32 1.0, %v10503_v34  ;;  %v13640_v60 = vadd.f32 %v16155_v41, %v12440_v36  ;;  %v16159_v41 = vld [vmem:[#allocation105_spill] sm:$0xff]  ;;  %v16169_v11 = vld [vmem:[#allocation108_spill] sm:$0xff] }
 0x3a2   : > { %v10507_v30 = vpop.eup %10506  ;;  %10526 = vrcp.f32 %v3755_v39  ;;  %v3764_v63 = vadd.f32 1.0, %v10505_v56  ;;  %v16156_v39 = vld [vmem:[#allocation101_spill] sm:$0xff]  ;;  %v13656_v33 = vadd.f32 %v16159_v41, %v12440_v36  ;;  %v8660_v41 = vmul.f32 -1.442695, %v13648_v42 }
 0x3a3   : > { %v10509_v20 = vpop.eup %10508  ;;  %10528 = vrcp.f32 %v3762_v5  ;;  %v3763_v55 = vadd.f32 1.0, %v10507_v30  ;;  %v13644_v56 = vadd.f32 %v16156_v39, %v12443_v37  ;;  %v8650_v39 = vmul.f32 -1.442695, %v13630_v47 }
 0x3a4   : > { %v10511_v2 = vpop.eup %10510  ;;  %10530 = vrcp.f32 %v3764_v63  ;;  %v3765_v34 = vadd.f32 1.0, %v10509_v20 }
 0x3a5   : > { %v10513_v5 = vpop.eup %10512  ;;  %10532 = vrcp.f32 %v3763_v55  ;;  %v3772_v30 = vadd.f32 1.0, %v10511_v2  ;;  %v8651_v55 = vmul.f32 -1.442695, %v13640_v60  ;;  %v8653_v43 = vmul.f32 -1.442695, %v13644_v56 }
 0x3a6   : > { %v10515_v63 = vpop.eup %10514  ;;  %10534 = vrcp.f32 %v3765_v34  ;;  %v3774_v20 = vadd.f32 1.0, %v10513_v5  ;;  %v8662_v34 = vmul.f32 -1.442695, %v13652_v52  ;;  %v8661_v5 = vmul.f32 -1.442695, %v13656_v33 }
 0x3a7   : > { %v10517_v15 = vpop.eup %10516  ;;  %10536 = vrcp.f32 %v3772_v30  ;;  %v3773_v49 = vadd.f32 1.0, %v10515_v63  ;;  %v16160_v30 = vld [vmem:[#allocation106_spill] sm:$0xff] }
 0x3a8   : > { %v10519_v2 = vpop.eup %10518  ;;  %10538 = vrcp.f32 %v3774_v20  ;;  %v3775_v28 = vadd.f32 1.0, %v10517_v15  ;;  %v13667_v63 = vadd.f32 %v16160_v30, %v12443_v37  ;;  %v4702_v15 = vmul.f32 %v13599_v6, %v13366_v22  ;;  %v13691_v22 = vpop.f32.mrb[86].mxu1 }
 0x3a9   : > { %v10521_v3 = vpop.eup %10520  ;;  %10540 = vrcp.f32 %v3773_v49  ;;  %v16163_v49 = vld [vmem:[#allocation33_spill] sm:$0xff]  ;;  %v13682_v30 = vmul.f32 %v13608_v61, %v13374_v29  ;;  %16167 = vst [vmem:[#allocation59_spill] sm:$0xff] %v13691_v22 }
 0x3aa   : > { %v10523_v20 = vpop.eup %10522  ;;  %v4712_v12 = vmul.f32 %v10521_v3, %v13457_v26  ;;  %10542 = vrcp.f32 %v3775_v28  ;;  %v13678_v18 = vadd.f32 %v16163_v49, %v12434_v48  ;;  %v13693_v26 = vpop.f32.mrb[118].mxu0  ;;  %v4703_v3 = vmul.f32 %v13615_v9, %v13408_v8 }
 0x3ab   : > { %v10525_v16 = vpop.eup %10524  ;;  %16164 = vst [vmem:[#allocation97_spill] sm:$0xff] %v13682_v30  ;;  %v13685_v24 = vmul.f32 %v10523_v20, %v13463_v46  ;;  %10544 = vpow2.f32 %v8650_v39  ;;  %16168 = vst [vmem:[#allocation98_spill] sm:$0xff] %v13693_v26  ;;  %v13702_v39 = vadd.f32 %v16169_v11, %v12440_v36  ;;  %v16170_v20 = vld [vmem:[#allocation109_spill] sm:$0xff]  ;;  %v13708_v26 = vpop.f32.mrb[87].mxu1  ;;  %v13722_v46 = vmul.f32 %v10519_v2, %v13447_v13 }
 0x3ac   : > { %v10527_v6 = vpop.eup %10526  ;;  %v4929_v28 = vpack.c.bf16 %v4712_v12, %v4702_v15  ;;  %v4713_v29 = vmul.f32 %v10525_v16, %v13467_v1  ;;  %10546 = vpow2.f32 %v8652_v54  ;;  %v13706_v49 = vadd.f32 %v16170_v20, %v12443_v37  ;;  %16171 = vst [vmem:[#allocation99_spill] sm:$0xff] %v13708_v26  ;;  %v13710_v8 = vpop.f32.mrb[119].mxu0  ;;  %v16174_v15 = vld [vmem:[#allocation110_spill] sm:$0xff] }
 0x3ad   : > { %16165 = vst [vmem:[#allocation74_spill] sm:$0xff] %v13685_v24  ;;  %v10529_v61 = vpop.eup %10528  ;;  %10548 = vpow2.f32 %v8651_v55  ;;  %16172 = vst [vmem:[#allocation30_spill] sm:$0xff] %v13710_v8  ;;  %v13713_v1 = vmul.f32 %v10527_v6, %v13515_v51  ;;  %v8663_v16 = vmul.f32 -1.442695, %v13667_v63  ;;  %v8670_v55 = vmul.f32 -1.442695, %v13678_v18 }
 0x3ae   : > { %v10531_v12 = vpop.eup %10530  ;;  %10550 = vpow2.f32 %v8653_v43  ;;  %v4930_v9 = vpack.c.bf16 %v4713_v29, %v4703_v3  ;;  %v13719_v11 = vadd.f32 %v16174_v15, %v12434_v48  ;;  %16175 = vst [vmem:[#allocation100_spill] sm:$0xff] %v13722_v46  ;;  %v8672_v51 = vmul.f32 -1.442695, %v13689_v53  ;;  %v13740_v8 = vpop.f32.mrb[120].mxu0  ;;  %v16202_v24 = vld [vmem:[#allocation121_spill] sm:$0xff] }
 0x3af   : > { %16173 = vst [vmem:[#allocation60_spill] sm:$0xff] %v13713_v1  ;;  %v10533_v54 = vpop.eup %10532  ;;  %10552 = vpow2.f32 %v8660_v41  ;;  %v8671_v6 = vmul.f32 -1.442695, %v13702_v39  ;;  %v8673_v41 = vmul.f32 -1.442695, %v13706_v49  ;;  %v4722_v29 = vmul.f32 %v10529_v61, %v13519_v57  ;;  %16179 = vst [vmem:[#allocation105_spill] sm:$0xff] %v13740_v8 }
 0x3b0   : > { %v10535_v20 = vpop.eup %10534  ;;  %10554 = vpow2.f32 %v8662_v34  ;;  %5001 = vmatprep.subr.bf16.mxu0 %v4930_v9  ;;  %v13732_v34 = vmul.f32 %v10531_v12, %v13523_v40  ;;  %v8680_v9 = vmul.f32 -1.442695, %v13719_v11  ;;  %v13746_v40 = vpop.f32.mrb[121].mxu0 }
 0x3b1   : > { %v10537_v43 = vpop.eup %10536  ;;  %10556 = vpow2.f32 %v8661_v5  ;;  %5002 = vmatpush1.bf16.msra.mxu0 %v4929_v28  ;;  %v13738_v28 = vpop.f32.mrb[88].mxu1  ;;  %16181 = vst [vmem:[#allocation33_spill] sm:$0xff] %v13746_v40 }
 0x3b2   : > { %v10539_v3 = vpop.eup %10538  ;;  %v4732_v15 = vmul.f32 %v10537_v43, %v13543_v62  ;;  %10558 = vpow2.f32 %v8663_v16  ;;  %16176 = vst [vmem:[#allocation101_spill] sm:$0xff] %v13732_v34  ;;  %16178 = vst [vmem:[#allocation104_spill] sm:$0xff] %v13738_v28  ;;  %v4723_v62 = vmul.f32 %v10533_v54, %v13532_v58  ;;  %v13744_v43 = vpop.f32.mrb[89].mxu1  ;;  %v16200_v34 = vld [vmem:[#allocation119_spill] sm:$0xff] }
 0x3b3   : > { %v10541_v2 = vpop.eup %10540  ;;  %v13735_v5 = vmul.f32 %v10539_v3, %v13558_v44  ;;  %10560 = vpow2.f32 %v8670_v55  ;;  %16180 = vst [vmem:[#allocation106_spill] sm:$0xff] %v13744_v43  ;;  %v13750_v55 = vpop.f32.mrb[90].mxu1 }
 0x3b4   : > { %v10543_v57 = vpop.eup %10542  ;;  %v4939_v61 = vpack.c.bf16 %v4732_v15, %v4722_v29  ;;  %v4733_v16 = vmul.f32 %v10541_v2, %v13565_v38  ;;  %10562 = vpow2.f32 %v8672_v51  ;;  %16182 = vst [vmem:[#allocation66_spill] sm:$0xff] %v13750_v55  ;;  %v13752_v3 = vpop.f32.mrb[122].mxu0 }
 0x3b5   : > { %16177 = vst [vmem:[#allocation103_spill] sm:$0xff] %v13735_v5  ;;  %v10545_v44 = vpop.eup %10544  ;;  %10564 = vpow2.f32 %v8671_v6  ;;  %16183 = vst [vmem:[#allocation108_spill] sm:$0xff] %v13752_v3  ;;  %v13754_v54 = vpop.f32.mrb[91].mxu1  ;;  %v13757_v15 = vmul.f32 %v10543_v57, %v13573_v59  ;;  %v16186_v3 = vld [vmem:[#allocation111_spill] sm:$0xff]  ;;  %v13829_v5 = vadd.f32 %v16200_v34, %v12440_v36 }
 0x3b6   : > { %v10547_v13 = vpop.eup %10546  ;;  %v3782_v8 = vadd.f32 1.0, %v10545_v44  ;;  %10566 = vpow2.f32 %v8673_v41  ;;  %v4940_v58 = vpack.c.bf16 %v4733_v16, %v4723_v62  ;;  %16184 = vst [vmem:[#allocation109_spill] sm:$0xff] %v13754_v54  ;;  %v13761_v44 = vadd.f32 %v16186_v3, %v12437_v35  ;;  %v13804_v54 = vpop.f32.mrb[123].mxu0 }
 0x3b7   : > { %v10549_v38 = vpop.eup %10548  ;;  %v3784_v51 = vadd.f32 1.0, %v10547_v13  ;;  %10568 = vpow2.f32 %v8680_v9  ;;  %16185 = vst [vmem:[#allocation110_spill] sm:$0xff] %v13757_v15  ;;  %v13764_v62 = vmul.f32 %v10535_v20, %v13539_v21 }
 0x3b8   : > { %v10551_v29 = vpop.eup %10550  ;;  %10570 = vrcp.f32 %v3782_v8  ;;  %v3783_v2 = vadd.f32 1.0, %v10549_v38  ;;  %5003 = vmatprep.subr.bf16.mxu0 %v4940_v58  ;;  %v16188_v38 = vld [vmem:[#allocation112_spill] sm:$0xff] }
 0x3b9   : > { %v10553_v6 = vpop.eup %10552  ;;  %10572 = vrcp.f32 %v3784_v51  ;;  %v3785_v12 = vadd.f32 1.0, %v10551_v29  ;;  %5004 = vmatpush1.bf16.msra.mxu0 %v4939_v61  ;;  %16187 = vst [vmem:[#allocation111_spill] sm:$0xff] %v13764_v62  ;;  %v8682_v61 = vmul.f32 -1.442695, %v13761_v44  ;;  %v13771_v21 = vadd.f32 %v16188_v38, %v12440_v36  ;;  %16197 = vst [vmem:[#allocation112_spill] sm:$0xff] %v13804_v54 }
 0x3ba   : > { %v10555_v41 = vpop.eup %10554  ;;  %10574 = vrcp.f32 %v3783_v2  ;;  %v3792_v13 = vadd.f32 1.0, %v10553_v6  ;;  %v16190_v2 = vld [vmem:[#allocation32_spill] sm:$0xff] }
 0x3bb   : > { %v10557_v9 = vpop.eup %10556  ;;  %10576 = vrcp.f32 %v3785_v12  ;;  %v3794_v59 = vadd.f32 1.0, %v10555_v41  ;;  %v16189_v12 = vld [vmem:[#allocation113_spill] sm:$0xff]  ;;  %v13779_v6 = vadd.f32 %v16190_v2, %v12434_v48 }
 0x3bc   : > { %v10559_v8 = vpop.eup %10558  ;;  %10578 = vrcp.f32 %v3792_v13  ;;  %v3793_v57 = vadd.f32 1.0, %v10557_v9  ;;  %v13775_v29 = vadd.f32 %v16189_v12, %v12443_v37  ;;  %v16191_v9 = vld [vmem:[#allocation114_spill] sm:$0xff] }
 0x3bd   : > { %v10561_v58 = vpop.eup %10560  ;;  %10580 = vrcp.f32 %v3794_v59  ;;  %v3795_v3 = vadd.f32 1.0, %v10559_v8  ;;  %v13783_v59 = vadd.f32 %v16191_v9, %v12437_v35  ;;  %v16192_v8 = vld [vmem:[#allocation40_spill] sm:$0xff]  ;;  %v16195_v9 = vld [vmem:[#allocation117_spill] sm:$0xff] }
 0x3be   : > { %v10563_v20 = vpop.eup %10562  ;;  %10582 = vrcp.f32 %v3793_v57  ;;  %v3802_v51 = vadd.f32 1.0, %v10561_v58  ;;  %v16193_v58 = vld [vmem:[#allocation115_spill] sm:$0xff]  ;;  %v13797_v40 = vadd.f32 %v16195_v9, %v12434_v48  ;;  %v16198_v48 = vsub.s32 4, %v16192_v8 }
 0x3bf   : > { %v10565_v41 = vpop.eup %10564  ;;  %10584 = vrcp.f32 %v3795_v3  ;;  %v3804_v13 = vadd.f32 1.0, %v10563_v20  ;;  %v13788_v12 = vadd.f32 %v16193_v58, %v12440_v36  ;;  %v16194_v3 = vld [vmem:[#allocation116_spill] sm:$0xff]  ;;  %v16196_v58 = vld [vmem:[#allocation118_spill] sm:$0xff] }
 0x3c0   : > { %v10567_v16 = vpop.eup %10566  ;;  %10586 = vrcp.f32 %v3802_v51  ;;  %v3803_v57 = vadd.f32 1.0, %v10565_v41  ;;  %v13793_v20 = vadd.f32 %v16194_v3, %v12443_v37  ;;  %v8681_v41 = vmul.f32 -1.442695, %v13771_v21  ;;  %v13807_v3 = vld [vmem:[#allocation9] sm:$0xff] }
 0x3c1   : > { %v10569_v2 = vpop.eup %10568  ;;  %10588 = vrcp.f32 %v3804_v13  ;;  %v3805_v55 = vadd.f32 1.0, %v10567_v16  ;;  %v13802_v43 = vadd.f32 %v16196_v58, %v12437_v35  ;;  %v8683_v13 = vmul.f32 -1.442695, %v13775_v29 }
 0x3c2   : > { %v10571_v38 = vpop.eup %10570  ;;  %10590 = vrcp.f32 %v3803_v57  ;;  %v3812_v51 = vadd.f32 1.0, %v10569_v2  ;;  %v13812_v9 = vrot.slane %v13807_v3, %v16198_v48  ;;  %v8690_v2 = vmul.f32 -1.442695, %v13779_v6 }
 0x3c3   : > { %v10573_v16 = vpop.eup %10572  ;;  %10592 = vrcp.f32 %v3805_v55  ;;  %v8692_v35 = vmul.f32 -1.442695, %v13783_v59  ;;  %v16199_v58 = vsub.s32 6, %v16192_v8  ;;  %v8691_v28 = vmul.f32 -1.442695, %v13788_v12 }
 0x3c4   : > { %v10575_v57 = vpop.eup %10574  ;;  %10594 = vrcp.f32 %v3812_v51  ;;  %v8693_v26 = vmul.f32 -1.442695, %v13793_v20  ;;  %v8700_v48 = vmul.f32 -1.442695, %v13797_v40  ;;  %v8702_v51 = vmul.f32 -1.442695, %v13802_v43 }
 0x3c5   : > { %v13819_v54 = vrot.slane %v13807_v3, %v16199_v58  ;;  %v13821_v55 = vpop.eup %10576  ;;  %10596 = vpow2.f32 %v8682_v61  ;;  %v16201_v58 = vld [vmem:[#allocation120_spill] sm:$0xff]  ;;  %v4742_v61 = vmul.f32 %v10571_v38, %v13630_v47  ;;  %v13839_v46 = vadd.f32 %v16202_v24, %v13812_v9  ;;  %v13851_v47 = vpop.f32.mrb[92].mxu1 }
 0x3c6   : > { %v10579_v22 = vpop.eup %10578  ;;  %10598 = vpow2.f32 %v8681_v41  ;;  %v13833_v62 = vadd.f32 %v16201_v58, %v12443_v37  ;;  %v13842_v1 = vmul.f32 %v10573_v16, %v13636_v0  ;;  %v16205_v37 = vld [vmem:[#allocation122_spill] sm:$0xff]  ;;  %16206 = vst [vmem:[#allocation114_spill] sm:$0xff] %v13851_v47  ;;  %v4743_v24 = vmul.f32 %v10575_v57, %v13640_v60  ;;  %v13857_v0 = vpop.f32.mrb[93].mxu1 }
 0x3c7   : > { %v10581_v15 = vpop.eup %10580  ;;  %v4752_v30 = vmul.f32 %v10579_v22, %v13648_v42  ;;  %10600 = vpow2.f32 %v8683_v13  ;;  %v13849_v34 = vadd.f32 %v16205_v37, %v13819_v54  ;;  %v13853_v42 = vpop.f32.mrb[124].mxu0  ;;  %16208 = vst [vmem:[#allocation116_spill] sm:$0xff] %v13857_v0 }
 0x3c8   : > { %v10583_v41 = vpop.eup %10582  ;;  %16203 = vst [vmem:[#allocation113_spill] sm:$0xff] %v13842_v1  ;;  %v13845_v36 = vmul.f32 %v10581_v15, %v13652_v52  ;;  %10602 = vpow2.f32 %v8690_v2  ;;  %16207 = vst [vmem:[#allocation115_spill] sm:$0xff] %v13853_v42  ;;  %v13859_v52 = vpop.f32.mrb[125].mxu0  ;;  %v8701_v2 = vmul.f32 -1.442695, %v13829_v5 }
 0x3c9   : > { %v10585_v22 = vpop.eup %10584  ;;  %v4949_v38 = vpack.c.bf16 %v4752_v30, %v4742_v61  ;;  %v4753_v13 = vmul.f32 %v10583_v41, %v13656_v33  ;;  %10604 = vpow2.f32 %v8692_v35  ;;  %16209 = vst [vmem:[#allocation117_spill] sm:$0xff] %v13859_v52  ;;  %v13864_v58 = vpop.f32.mrb[94].mxu1  ;;  %v8703_v33 = vmul.f32 -1.442695, %v13833_v62 }
 0x3ca   : > { %16204 = vst [vmem:[#allocation32_spill] sm:$0xff] %v13845_v36  ;;  %v10587_v15 = vpop.eup %10586  ;;  %10606 = vpow2.f32 %v8691_v28  ;;  %16210 = vst [vmem:[#allocation118_spill] sm:$0xff] %v13864_v58  ;;  %v13866_v37 = vpop.f32.mrb[126].mxu0  ;;  %v8394_v28 = vmul.f32 -1.442695, %v13839_v46 }
 0x3cb   : > { %16211 = vst [vmem:[#allocation119_spill] sm:$0xff] %v13866_v37  ;;  %v13868_v60 = vpop.eup %10588  ;;  %10608 = vpow2.f32 %v8693_v26  ;;  %v4950_v30 = vpack.c.bf16 %v4753_v13, %v4743_v24  ;;  %v13871_v57 = vpop.f32.mrb[95].mxu1  ;;  %v8396_v16 = vmul.f32 -1.442695, %v13849_v34  ;;  %v13883_v13 = vmul.f32 %v10587_v15, %v13678_v18 }
 0x3cc   : > { %16212 = vst [vmem:[#allocation120_spill] sm:$0xff] %v13871_v57  ;;  %v13873_v35 = vpop.f32.mrb[127].mxu0  ;;  %v13875_v61 = vpop.eup %10590  ;;  %10610 = vpow2.f32 %v8700_v48  ;;  %v16216_v18 = vsub.s32 5, %v16192_v8 }
 0x3cd   : > { %16213 = vst [vmem:[#allocation121_spill] sm:$0xff] %v13873_v35  ;;  %v13878_v41 = vpop.eup %10592  ;;  %10612 = vpow2.f32 %v8702_v51  ;;  %5005 = vmatprep.subr.bf16.mxu0 %v4950_v30  ;;  %v13889_v58 = vpop.f32.mrb[96].mxu1 }
 0x3ce   : > { %v10595_v26 = vpop.eup %10594  ;;  %10614 = vpow2.f32 %v8701_v2  ;;  %5006 = vmatpush1.bf16.msra.mxu0 %v4949_v38  ;;  %16214 = vst [vmem:[#allocation122_spill] sm:$0xff] %v13889_v58  ;;  %v13891_v37 = vpop.f32.mrb[128].mxu0 }
 0x3cf   : > { %v10597_v24 = vpop.eup %10596  ;;  %v13886_v35 = vmul.f32 %v10595_v26, %v13719_v11  ;;  %10616 = vpow2.f32 %v8703_v33  ;;  %16215 = vst [vmem:[#allocation138_spill] sm:$0xff] %v13891_v37  ;;  %v13898_v11 = vrot.slane %v13807_v3, %v16216_v18  ;;  %v13900_v15 = vpop.f32.mrb[97].mxu1  ;;  %v13905_v26 = vmul.f32 %v10585_v22, %v13667_v63  ;;  %v16221_v22 = vld [vmem:[#allocation123_spill] sm:$0xff] }
 0x3d0   : > { %v10599_v57 = vpop.eup %10598  ;;  %v3814_v51 = vadd.f32 1.0, %v10597_v24  ;;  %10618 = vpow2.f32 %v8394_v28  ;;  %16217 = vst [vmem:[#allocation139_spill] sm:$0xff] %v13900_v15  ;;  %v13902_v33 = vpop.f32.mrb[129].mxu0  ;;  %v13914_v15 = vmul.f32 %v13821_v55, %v13644_v56  ;;  %v16226_v55 = vld [vmem:[#allocation129_spill] sm:$0xff] }
 0x3d1   : > { %v10601_v30 = vpop.eup %10600  ;;  %v3813_v2 = vadd.f32 1.0, %v10599_v57  ;;  %10620 = vpow2.f32 %v8396_v16  ;;  %16218 = vst [vmem:[#allocation140_spill] sm:$0xff] %v13902_v33  ;;  %v16219_v16 = vsub.s32 7, %v16192_v8  ;;  %v13963_v36 = vpop.f32.mrb[98].mxu1 }
 0x3d2   : > { %v10603_v28 = vpop.eup %10602  ;;  %10622 = vrcp.f32 %v3814_v51  ;;  %v3815_v24 = vadd.f32 1.0, %v10601_v30  ;;  %16220 = vst [vmem:[#allocation141_spill] sm:$0xff] %v13914_v15  ;;  %v13918_v51 = vadd.f32 %v16221_v22, %v13898_v11  ;;  %v16222_v30 = vld [vmem:[#allocation126_spill] sm:$0xff] }
 0x3d3   : > { %v10605_v48 = vpop.eup %10604  ;;  %10624 = vrcp.f32 %v3813_v2  ;;  %v3822_v38 = vadd.f32 1.0, %v10603_v28  ;;  %v13910_v57 = vrot.slane %v13807_v3, %v16219_v16  ;;  %v13922_v2 = vadd.f32 %v16222_v30, %v13812_v9  ;;  %v16223_v16 = vld [vmem:[#allocation127_spill] sm:$0xff] }
 0x3d4   : > { %v10607_v18 = vpop.eup %10606  ;;  %10626 = vrcp.f32 %v3815_v24  ;;  %v3824_v33 = vadd.f32 1.0, %v10605_v48  ;;  %v13926_v56 = vadd.f32 %v16223_v16, %v13819_v54  ;;  %v16224_v24 = vld [vmem:[#allocation124_spill] sm:$0xff]  ;;  %v8395_v52 = vmul.f32 -1.442695, %v13918_v51  ;;  %16231 = vst [vmem:[#allocation127_spill] sm:$0xff] %v13963_v36 }
 0x3d5   : > { %v10609_v37 = vpop.eup %10608  ;;  %10628 = vrcp.f32 %v3822_v38  ;;  %v3823_v63 = vadd.f32 1.0, %v10607_v18  ;;  %v13932_v18 = vadd.f32 %v16224_v24, %v13910_v57  ;;  %v8404_v58 = vmul.f32 -1.442695, %v13922_v2 }
 0x3d6   : > { %v10611_v3 = vpop.eup %10610  ;;  %10630 = vrcp.f32 %v3824_v33  ;;  %v3825_v28 = vadd.f32 1.0, %v10609_v37  ;;  %v16225_v33 = vld [vmem:[#allocation128_spill] sm:$0xff] }
 0x3d7   : > { %v10613_v48 = vpop.eup %10612  ;;  %10632 = vrcp.f32 %v3823_v63  ;;  %v3832_v38 = vadd.f32 1.0, %v10611_v3  ;;  %v13936_v37 = vadd.f32 %v16225_v33, %v13898_v11  ;;  %v13941_v63 = vadd.f32 %v16226_v55, %v13910_v57 }
 0x3d8   : > { %v10615_v22 = vpop.eup %10614  ;;  %10634 = vrcp.f32 %v3825_v28  ;;  %v3834_v30 = vadd.f32 1.0, %v10613_v48  ;;  %v8406_v28 = vmul.f32 -1.442695, %v13926_v56  ;;  %v8397_v0 = vmul.f32 -1.442695, %v13932_v18 }
 0x3d9   : > { %v10617_v8 = vpop.eup %10616  ;;  %10636 = vrcp.f32 %v3832_v38  ;;  %v3833_v16 = vadd.f32 1.0, %v10615_v22  ;;  %v16227_v38 = vld [vmem:[#allocation130_spill] sm:$0xff]  ;;  %v8405_v47 = vmul.f32 -1.442695, %v13936_v37 }
 0x3da   : > { %v10619_v3 = vpop.eup %10618  ;;  %10638 = vrcp.f32 %v3834_v30  ;;  %v3835_v24 = vadd.f32 1.0, %v10617_v8  ;;  %v13948_v22 = vadd.f32 %v16227_v38, %v13812_v9  ;;  %v16228_v8 = vld [vmem:[#allocation131_spill] sm:$0xff]  ;;  %v8407_v38 = vmul.f32 -1.442695, %v13941_v63 }
 0x3db   : > { %v10621_v48 = vpop.eup %10620  ;;  %10640 = vrcp.f32 %v3833_v16  ;;  %v3526_v33 = vadd.f32 1.0, %v10619_v3  ;;  %v13953_v30 = vadd.f32 %v16228_v8, %v13819_v54  ;;  %v13957_v16 = vmul.f32 %v13868_v60, %v13689_v53  ;;  %v16233_v53 = vld [vmem:[#allocation132_spill] sm:$0xff] }
 0x3dc   : > { %v10623_v42 = vpop.eup %10622  ;;  %10642 = vrcp.f32 %v3835_v24  ;;  %v3528_v55 = vadd.f32 1.0, %v10621_v48  ;;  %v13965_v24 = vpop.f32.mrb[130].mxu0  ;;  %v4763_v8 = vmul.f32 %v13875_v61, %v13702_v39  ;;  %v13972_v60 = vadd.f32 %v16233_v53, %v13898_v11 }
 0x3dd   : > { %v10625_v1 = vpop.eup %10624  ;;  %16229 = vst [vmem:[#allocation123_spill] sm:$0xff] %v13957_v16  ;;  %v13960_v3 = vmul.f32 %v10623_v42, %v13761_v44  ;;  %10644 = vrcp.f32 %v3526_v33  ;;  %16232 = vst [vmem:[#allocation124_spill] sm:$0xff] %v13965_v24  ;;  %v16234_v24 = vld [vmem:[#allocation133_spill] sm:$0xff]  ;;  %v13983_v39 = vpop.f32.mrb[99].mxu1  ;;  %v13989_v61 = vmul.f32 %v13878_v41, %v13706_v49 }
 0x3de   : > { %v10627_v48 = vpop.eup %10626  ;;  %v4773_v15 = vmul.f32 %v10625_v1, %v13771_v21  ;;  %10646 = vrcp.f32 %v3528_v55  ;;  %v13981_v36 = vadd.f32 %v16234_v24, %v13910_v57  ;;  %16235 = vst [vmem:[#allocation128_spill] sm:$0xff] %v13983_v39  ;;  %v13985_v1 = vpop.f32.mrb[131].mxu0  ;;  %v16237_v55 = vld [vmem:[#allocation134_spill] sm:$0xff]  ;;  %v8414_v24 = vmul.f32 -1.442695, %v13948_v22 }
 0x3df   : > { %16230 = vst [vmem:[#allocation126_spill] sm:$0xff] %v13960_v3  ;;  %v10629_v44 = vpop.eup %10628  ;;  %v13977_v33 = vmul.f32 %v10627_v48, %v13775_v29  ;;  %10648 = vpow2.f32 %v8395_v52  ;;  %16236 = vst [vmem:[#allocation129_spill] sm:$0xff] %v13985_v1  ;;  %v13993_v53 = vadd.f32 %v16237_v55, %v13812_v9  ;;  %v16238_v48 = vld [vmem:[#allocation135_spill] sm:$0xff]  ;;  %v8416_v39 = vmul.f32 -1.442695, %v13953_v30 }
 0x3e0   : > { %v10631_v21 = vpop.eup %10630  ;;  %10650 = vpow2.f32 %v8397_v0  ;;  %v4960_v29 = vpack.c.bf16 %v4773_v15, %v4763_v8  ;;  %v13998_v42 = vadd.f32 %v16238_v48, %v13819_v54  ;;  %v8415_v41 = vmul.f32 -1.442695, %v13972_v60  ;;  %v16239_v15 = vld [vmem:[#allocation136_spill] sm:$0xff] }
 0x3e1   : > { %v10633_v52 = vpop.eup %10632  ;;  %10652 = vpow2.f32 %v8404_v58  ;;  %v8417_v58 = vmul.f32 -1.442695, %v13981_v36  ;;  %v14007_v8 = vadd.f32 %v16239_v15, %v13898_v11  ;;  %v16240_v55 = vpack.c.bf16 %v13886_v35, %v13883_v13  ;;  %v14022_v35 = vpop.f32.mrb[100].mxu1 }
 0x3e2   : > { %v10635_v1 = vpop.eup %10634  ;;  %10654 = vpow2.f32 %v8406_v28  ;;  %5007 = vmatprep.subr.bf16.mxu0 %v4960_v29  ;;  %v4782_v29 = vmul.f32 %v10629_v44, %v13779_v6  ;;  %v14016_v16 = vmul.f32 %v10631_v21, %v13783_v59  ;;  %v8426_v15 = vmul.f32 -1.442695, %v13998_v42  ;;  %16241 = vst [vmem:[#allocation130_spill] sm:$0xff] %v14022_v35  ;;  %v14024_v13 = vpop.f32.mrb[132].mxu0  ;;  %v16343_v35 = vld [vmem:[#allocation31_spill] sm:$0xff] }
 0x3e3   : > { %v10637_v0 = vpop.eup %10636  ;;  %10656 = vpow2.f32 %v8405_v47  ;;  %5008 = vmatpush1.bf16.msra.mxu0 %v16240_v55  ;;  %v8424_v47 = vmul.f32 -1.442695, %v13993_v53  ;;  %16242 = vst [vmem:[#allocation131_spill] sm:$0xff] %v14024_v13  ;;  %v14030_v59 = vpop.f32.mrb[133].mxu0 }
 0x3e4   : > { %v10639_v28 = vpop.eup %10638  ;;  %v4792_v48 = vmul.f32 %v10637_v0, %v13797_v40  ;;  %10658 = vpow2.f32 %v8407_v38  ;;  %v4783_v40 = vmul.f32 %v10633_v52, %v13788_v12  ;;  %v14028_v0 = vpop.f32.mrb[101].mxu1  ;;  %16244 = vst [vmem:[#allocation133_spill] sm:$0xff] %v14030_v59 }
 0x3e5   : > { %v10641_v49 = vpop.eup %10640  ;;  %v14019_v3 = vmul.f32 %v10639_v28, %v13802_v43  ;;  %10660 = vpow2.f32 %v8414_v24  ;;  %16243 = vst [vmem:[#allocation132_spill] sm:$0xff] %v14028_v0  ;;  %v8425_v24 = vmul.f32 -1.442695, %v14007_v8  ;;  %v14037_v55 = vpop.f32.mrb[102].mxu1 }
 0x3e6   : > { %v10643_v6 = vpop.eup %10642  ;;  %v4969_v38 = vpack.c.bf16 %v4792_v48, %v4782_v29  ;;  %v4793_v44 = vmul.f32 %v10641_v49, %v13829_v5  ;;  %10662 = vpow2.f32 %v8416_v39  ;;  %16245 = vst [vmem:[#allocation134_spill] sm:$0xff] %v14037_v55  ;;  %v14039_v28 = vpop.f32.mrb[134].mxu0 }
 0x3e7   : > { %v14032_v43 = vpop.eup %10644  ;;  %10664 = vpow2.f32 %v8415_v41  ;;  %16246 = vst [vmem:[#allocation135_spill] sm:$0xff] %v14039_v28  ;;  %v14043_v39 = vpop.f32.mrb[103].mxu1  ;;  %v14048_v21 = vmul.f32 %v10643_v6, %v13833_v62 }
 0x3e8   : > { %v14041_v12 = vpop.eup %10646  ;;  %10666 = vpow2.f32 %v8417_v58  ;;  %v4970_v5 = vpack.c.bf16 %v4793_v44, %v4783_v40  ;;  %16247 = vst [vmem:[#allocation136_spill] sm:$0xff] %v14043_v39  ;;  %v14045_v52 = vpop.f32.mrb[135].mxu0  ;;  %v16249_v40 = vld [vmem:[#allocation45_spill] sm:$0xff] }
 0x3e9   : > { %16248 = vst [vmem:[#allocation142_spill] sm:$0xff] %v14045_v52  ;;  %v10649_v49 = vpop.eup %10648  ;;  %10668 = vpow2.f32 %v8424_v47  ;;  %v16250_v44 = vpack.c.bf16 %v13276_v19, %v16249_v40  ;;  %v14054_v47 = vmul.f32 %v10635_v1, %v13793_v20 }
 0x3ea   : > { %v10651_v29 = vpop.eup %10650  ;;  %v3527_v48 = vadd.f32 1.0, %v10649_v49  ;;  %10670 = vpow2.f32 %v8426_v15  ;;  %5009 = vmatprep.subr.bf16.mxu0 %v4970_v5  ;;  %v14056_v5 = vpop.f32.mrb[104].mxu1 }
 0x3eb   : > { %v10653_v41 = vpop.eup %10652  ;;  %v3529_v55 = vadd.f32 1.0, %v10651_v29  ;;  %10672 = vpow2.f32 %v8425_v24  ;;  %5010 = vmatpush1.bf16.msra.mxu0 %v4969_v38  ;;  %16251 = vst [vmem:[#allocation45_spill] sm:$0xff] %v14056_v5  ;;  %v16252_v24 = vmov 1.0|1.0   ;;  %v16253_v29 = vld [vmem:[#allocation53_spill] sm:$0xff] }
 0x3ec   : > { %v10655_v28 = vpop.eup %10654  ;;  %10674 = vrcp.f32 %v3527_v48  ;;  %v3536_v58 = vadd.f32 1.0, %v10653_v41  ;;  %5020 = vmatprep.subr.bf16.mxu0 %v16250_v44  ;;  %v16254_v48 = vld [vmem:[#allocation52_spill] sm:$0xff]  ;;  %v14074_v44 = vadd.f32 %v13387_v27, %v13812_v9  ;;  %v14090_v27 = vadd.f32 %v13410_v23, %v13812_v9 }
 0x3ed   : > { %v10657_v52 = vpop.eup %10656  ;;  %10676 = vrcp.f32 %v3529_v55  ;;  %v3538_v15 = vadd.f32 1.0, %v10655_v28  ;;  %v16255_v19 = vpack.c.bf16 %v16253_v29, %v16254_v48  ;;  %v16256_v28 = vpack.c.bf16 %v13288_v10, %v13280_v17  ;;  %v16258_v29 = vld [vmem:[#allocation63_spill] sm:$0xff]  ;;  %v16259_v48 = vld [vmem:[#allocation62_spill] sm:$0xff] }
 0x3ee   : > { %v10659_v62 = vpop.eup %10658  ;;  %10678 = vrcp.f32 %v3536_v58  ;;  %v3537_v6 = vadd.f32 1.0, %v10657_v52  ;;  %5012 = vmatmul.mubr.bf16.vlgmr.msra.gmra.mrb[160].mxu0 %v16252_v24  ;;  %v16257_v58 = vld [vmem:[#allocation137_spill] sm:$0xff]  ;;  %v14082_v17 = vadd.f32 %v13399_v45, %v13898_v11  ;;  %v14097_v45 = vadd.f32 %v13412_v50, %v13819_v54 }
 0x3ef   : > { %v10661_v38 = vpop.eup %10660  ;;  %10680 = vrcp.f32 %v3538_v15  ;;  %v3539_v49 = vadd.f32 1.0, %v10659_v62  ;;  %5021 = vmatpush1.bf16.msra.mxu0 %v16255_v19  ;;  %5052 = vmatprep.mubr.bf16.mxu0 %v16252_v24  ;;  %v14070_v40 = vadd.f32 %v16257_v58, %v13910_v57  ;;  %v16260_v19 = vpack.c.bf16 %v16258_v29, %v16259_v48  ;;  %v16264_v29 = vld [vmem:[#allocation69_spill] sm:$0xff] }
 0x3f0   : > { %v10663_v1 = vpop.eup %10662  ;;  %10682 = vrcp.f32 %v3537_v6  ;;  %v3546_v55 = vadd.f32 1.0, %v10661_v38  ;;  %5022 = vmatprep.subr.bf16.mxu0 %v16256_v28  ;;  %v14078_v6 = vadd.f32 %v13389_v25, %v13819_v54 }
 0x3f1   : > { %v10665_v52 = vpop.eup %10664  ;;  %10684 = vrcp.f32 %v3539_v49  ;;  %v3548_v41 = vadd.f32 1.0, %v10663_v1  ;;  %v14086_v49 = vadd.f32 %v13401_v7, %v13910_v57  ;;  %v16261_v7 = vpack.c.bf16 %v13297_v32, %v13292_v4 }
 0x3f2   : > { %v10667_v15 = vpop.eup %10666  ;;  %10686 = vrcp.f32 %v3546_v55  ;;  %v3547_v62 = vadd.f32 1.0, %v10665_v52  ;;  %v14101_v55 = vadd.f32 %v13416_v31, %v13898_v11  ;;  %v8427_v52 = vmul.f32 -1.442695, %v14070_v40 }
 0x3f3   : > { %v10669_v10 = vpop.eup %10668  ;;  %10688 = vrcp.f32 %v3548_v41  ;;  %v3549_v38 = vadd.f32 1.0, %v10667_v15  ;;  %5023 = vmatpush1.bf16.msra.mxu0 %v16260_v19  ;;  %v8434_v15 = vmul.f32 -1.442695, %v14074_v44  ;;  %v8436_v50 = vmul.f32 -1.442695, %v14078_v6 }
 0x3f4   : > { %v10671_v25 = vpop.eup %10670  ;;  %10690 = vrcp.f32 %v3547_v62  ;;  %v3556_v1 = vadd.f32 1.0, %v10669_v10  ;;  %5024 = vmatprep.subr.bf16.mxu0 %v16261_v7  ;;  %v14109_v62 = vpop.f32.mrb[136].mxu0  ;;  %v8435_v10 = vmul.f32 -1.442695, %v14082_v17  ;;  %v8437_v32 = vmul.f32 -1.442695, %v14086_v49 }
 0x3f5   : > { %v10673_v23 = vpop.eup %10672  ;;  %10692 = vrcp.f32 %v3549_v38  ;;  %v3558_v28 = vadd.f32 1.0, %v10671_v25  ;;  %16262 = vst [vmem:[#allocation53_spill] sm:$0xff] %v14109_v62  ;;  %v8444_v4 = vmul.f32 -1.442695, %v14090_v27  ;;  %v16263_v38 = vld [vmem:[#allocation70_spill] sm:$0xff]  ;;  %v14121_v7 = vadd.f32 %v13418_v14, %v13910_v57  ;;  %v14126_v62 = vpop.f32.mrb[105].mxu1 }
 0x3f6   : > { %v10675_v41 = vpop.eup %10674  ;;  %10694 = vrcp.f32 %v3556_v1  ;;  %v3557_v58 = vadd.f32 1.0, %v10673_v23  ;;  %v16265_v48 = vpack.c.bf16 %v16263_v38, %v16264_v29  ;;  %v8446_v25 = vmul.f32 -1.442695, %v14097_v45  ;;  %v16266_v23 = vld [vmem:[#allocation47_spill] sm:$0xff]  ;;  %16269 = vst [vmem:[#allocation52_spill] sm:$0xff] %v14126_v62  ;;  %v14128_v5 = vpop.f32.mrb[137].mxu0 }
 0x3f7   : > { %v10677_v31 = vpop.eup %10676  ;;  %10696 = vrcp.f32 %v3558_v28  ;;  %v8445_v1 = vmul.f32 -1.442695, %v14101_v55  ;;  %v16267_v28 = vld [vmem:[#allocation46_spill] sm:$0xff]  ;;  %16270 = vst [vmem:[#allocation137_spill] sm:$0xff] %v14128_v5  ;;  %v16340_v62 = vld [vmem:[#allocation95_spill] sm:$0xff] }
 0x3f8   : > { %5025 = vmatpush1.bf16.msra.mxu0 %v16265_v48  ;;  %v10679_v19 = vpop.eup %10678  ;;  %10698 = vrcp.f32 %v3557_v58  ;;  %v16268_v20 = vpack.c.bf16 %v16266_v23, %v16267_v28  ;;  %v4486_v58 = vmul.f32 %v14032_v43, %v13839_v46  ;;  %v16271_v48 = vld [vmem:[#allocation36_spill] sm:$0xff]  ;;  %v14139_v23 = vmul.f32 %v14041_v12, %v13849_v34  ;;  %v16272_v28 = vld [vmem:[#allocation51_spill] sm:$0xff]  ;;  %v14148_v46 = vpop.f32.mrb[106].mxu1  ;;  %v16275_v34 = vld [vmem:[#allocation89_spill] sm:$0xff] }
 0x3f9   : > { %v10681_v38 = vpop.eup %10680  ;;  %v4496_v29 = vmul.f32 %v10679_v19, %v13922_v2  ;;  %10700 = vpow2.f32 %v8427_v52  ;;  %v14135_v39 = vadd.f32 %v16271_v48, %v13812_v9  ;;  %v14146_v5 = vadd.f32 %v16272_v28, %v13819_v54  ;;  %16273 = vst [vmem:[#allocation63_spill] sm:$0xff] %v14148_v46  ;;  %v14150_v2 = vpop.f32.mrb[138].mxu0  ;;  %v16276_v12 = vld [vmem:[#allocation88_spill] sm:$0xff]  ;;  %v16278_v28 = vld [vmem:[#allocation71_spill] sm:$0xff] }
 0x3fa   : > { %5026 = vmatprep.subr.bf16.mxu0 %v16268_v20  ;;  %v10683_v14 = vpop.eup %10682  ;;  %v14142_v20 = vmul.f32 %v10681_v38, %v13926_v56  ;;  %10702 = vpow2.f32 %v8434_v15  ;;  %16274 = vst [vmem:[#allocation62_spill] sm:$0xff] %v14150_v2  ;;  %v4487_v52 = vmul.f32 %v10675_v41, %v13918_v51  ;;  %v16277_v56 = vpack.c.bf16 %v16275_v34, %v16276_v12  ;;  %v16279_v2 = vld [vmem:[#allocation56_spill] sm:$0xff]  ;;  %v16280_v41 = vld [vmem:[#allocation77_spill] sm:$0xff] }
 0x3fb   : > { %v10685_v43 = vpop.eup %10684  ;;  %v4823_v19 = vpack.c.bf16 %v4496_v29, %v4486_v58  ;;  %v4497_v48 = vmul.f32 %v10683_v14, %v13936_v37  ;;  %10704 = vpow2.f32 %v8436_v50  ;;  %v14161_v46 = vadd.f32 %v16278_v28, %v13898_v11  ;;  %v16281_v37 = vld [vmem:[#allocation55_spill] sm:$0xff]  ;;  %v14170_v58 = vpop.f32.mrb[107].mxu1  ;;  %v16289_v38 = vld [vmem:[#allocation61_spill] sm:$0xff] }
 0x3fc   : > { %5027 = vmatpush1.bf16.msra.mxu0 %v16277_v56  ;;  %v10687_v15 = vpop.eup %10686  ;;  %10706 = vpow2.f32 %v8435_v10  ;;  %v14165_v51 = vadd.f32 %v16279_v2, %v13910_v57  ;;  %v16282_v50 = vpack.c.bf16 %v16280_v41, %v16281_v37  ;;  %16283 = vst [vmem:[#allocation70_spill] sm:$0xff] %v14170_v58  ;;  %v14172_v29 = vpop.f32.mrb[139].mxu0  ;;  %v14175_v34 = vmul.f32 %v10685_v43, %v13941_v63  ;;  %v16286_v63 = vld [vmem:[#allocation92_spill] sm:$0xff] }
 0x3fd   : > { %16284 = vst [vmem:[#allocation69_spill] sm:$0xff] %v14172_v29  ;;  %v10689_v14 = vpop.eup %10688  ;;  %10708 = vpow2.f32 %v8437_v32  ;;  %v8447_v10 = vmul.f32 -1.442695, %v14121_v7  ;;  %v4824_v12 = vpack.c.bf16 %v4497_v48, %v4487_v52  ;;  %v8454_v2 = vmul.f32 -1.442695, %v14135_v39  ;;  %v16288_v48 = vld [vmem:[#allocation78_spill] sm:$0xff] }
 0x3fe   : > { %5028 = vmatprep.subr.bf16.mxu0 %v16282_v50  ;;  %v10691_v56 = vpop.eup %10690  ;;  %10710 = vpow2.f32 %v8444_v4  ;;  %v14182_v41 = vmul.f32 %v10677_v31, %v13932_v18  ;;  %v8456_v37 = vmul.f32 -1.442695, %v14146_v5  ;;  %v16285_v50 = vld [vmem:[#allocation93_spill] sm:$0xff]  ;;  %v8455_v52 = vmul.f32 -1.442695, %v14161_v46 }
 0x3ff   : > { %v14179_v28 = vpop.eup %10692  ;;  %10712 = vpow2.f32 %v8446_v25  ;;  %5061 = vmatprep.subr.bf16.mxu1 %v4824_v12  ;;  %v16287_v43 = vpack.c.bf16 %v16285_v50, %v16286_v63  ;;  %v8457_v4 = vmul.f32 -1.442695, %v14165_v51  ;;  %v16290_v29 = vpack.c.bf16 %v16288_v48, %v16289_v38  ;;  %v14205_v38 = vpop.f32.mrb[140].mxu0 }
 0x400   : > { %v10695_v32 = vpop.eup %10694  ;;  %10714 = vpow2.f32 %v8445_v1  ;;  %5062 = vmatpush1.bf16.msra.mxu1 %v4823_v19  ;;  %v4506_v31 = vmul.f32 %v10687_v15, %v13948_v22  ;;  %v14198_v1 = vmul.f32 %v10689_v14, %v13953_v30  ;;  %v14203_v19 = vpop.f32.mrb[108].mxu1  ;;  %16292 = vst [vmem:[#allocation46_spill] sm:$0xff] %v14205_v38  ;;  %v4507_v22 = vmul.f32 %v10691_v56, %v13972_v60  ;;  %v16299_v60 = vld [vmem:[#allocation83_spill] sm:$0xff] }
 0x401   : > { %5029 = vmatpush1.bf16.msra.mxu0 %v16287_v43  ;;  %v10697_v18 = vpop.eup %10696  ;;  %v4516_v25 = vmul.f32 %v10695_v32, %v13993_v53  ;;  %10716 = vpow2.f32 %v8447_v10  ;;  %16291 = vst [vmem:[#allocation47_spill] sm:$0xff] %v14203_v19  ;;  %v16293_v10 = vld [vmem:[#allocation107_spill] sm:$0xff]  ;;  %v14212_v30 = vpop.f32.mrb[109].mxu1  ;;  %v16330_v19 = vld [vmem:[#allocation38_spill] sm:$0xff] }
 0x402   : > { %5030 = vmatprep.subr.bf16.mxu0 %v16290_v29  ;;  %v10699_v50 = vpop.eup %10698  ;;  %v14201_v63 = vmul.f32 %v10697_v18, %v13998_v42  ;;  %10718 = vpow2.f32 %v8454_v2  ;;  %v16294_v43 = vld [vmem:[#allocation67_spill] sm:$0xff]  ;;  %16296 = vst [vmem:[#allocation36_spill] sm:$0xff] %v14212_v30  ;;  %v14214_v42 = vpop.f32.mrb[141].mxu0  ;;  %v16298_v18 = vld [vmem:[#allocation80_spill] sm:$0xff] }
 0x403   : > { %v10701_v29 = vpop.eup %10700  ;;  %v4833_v53 = vpack.c.bf16 %v4516_v25, %v4506_v31  ;;  %v4517_v15 = vmul.f32 %v10699_v50, %v14007_v8  ;;  %10720 = vpow2.f32 %v8456_v37  ;;  %v16295_v32 = vpack.c.bf16 %v16293_v10, %v16294_v43  ;;  %16297 = vst [vmem:[#allocation51_spill] sm:$0xff] %v14214_v42  ;;  %v14221_v8 = vpop.f32.mrb[110].mxu1 }
 0x404   : > { %v10703_v14 = vpop.eup %10702  ;;  %v3559_v48 = vadd.f32 1.0, %v10701_v29  ;;  %10722 = vpow2.f32 %v8455_v52  ;;  %v16300_v56 = vpack.c.bf16 %v16298_v18, %v16299_v60  ;;  %16301 = vst [vmem:[#allocation89_spill] sm:$0xff] %v14221_v8  ;;  %v14223_v37 = vpop.f32.mrb[142].mxu0  ;;  %v16303_v52 = vld [vmem:[#allocation125_spill] sm:$0xff]  ;;  %v16304_v29 = vld [vmem:[#allocation34_spill] sm:$0xff]  ;;  %v16323_v8 = vld [vmem:[#allocation64_spill] sm:$0xff] }
 0x405   : > { %5031 = vmatpush1.bf16.msra.mxu0 %v16295_v32  ;;  %16302 = vst [vmem:[#allocation88_spill] sm:$0xff] %v14223_v37  ;;  %v10705_v31 = vpop.eup %10704  ;;  %v3566_v25 = vadd.f32 1.0, %v10703_v14  ;;  %10724 = vpow2.f32 %v8457_v4  ;;  %v4834_v50 = vpack.c.bf16 %v4517_v15, %v4507_v22  ;;  %v16305_v12 = vpack.c.bf16 %v16303_v52, %v16304_v29  ;;  %v16307_v4 = vld [vmem:[#allocation81_spill] sm:$0xff]  ;;  %v16308_v22 = vld [vmem:[#allocation86_spill] sm:$0xff]  ;;  %v16313_v29 = vld [vmem:[#allocation76_spill] sm:$0xff] }
 0x406   : > { %5032 = vmatprep.subr.bf16.mxu0 %v16300_v56  ;;  %v10707_v10 = vpop.eup %10706  ;;  %10726 = vrcp.f32 %v3559_v48  ;;  %v3568_v43 = vadd.f32 1.0, %v10705_v31  ;;  %v16306_v56 = vld [vmem:[#allocation82_spill] sm:$0xff]  ;;  %v16309_v15 = vpack.c.bf16 %v16307_v4, %v16308_v22  ;;  %v16310_v31 = vld [vmem:[#allocation65_spill] sm:$0xff]  ;;  %v16315_v22 = vld [vmem:[#allocation84_spill] sm:$0xff] }
 0x407   : > { %v10709_v32 = vpop.eup %10708  ;;  %10728 = vrcp.f32 %v3566_v25  ;;  %v3567_v2 = vadd.f32 1.0, %v10707_v10  ;;  %5063 = vmatprep.subr.bf16.mxu1 %v4834_v50  ;;  %v14230_v37 = vadd.f32 %v16306_v56, %v13812_v9  ;;  %v14237_v25 = vadd.f32 %v16310_v31, %v13819_v54  ;;  %v16311_v10 = vld [vmem:[#allocation73_spill] sm:$0xff] }
 0x408   : > { %v10711_v18 = vpop.eup %10710  ;;  %10730 = vrcp.f32 %v3568_v43  ;;  %v3569_v60 = vadd.f32 1.0, %v10709_v32  ;;  %5064 = vmatpush1.bf16.msra.mxu1 %v4833_v53  ;;  %v14241_v43 = vadd.f32 %v16311_v10, %v13898_v11  ;;  %v16312_v52 = vld [vmem:[#allocation37_spill] sm:$0xff] }
 0x409   : > { %5033 = vmatpush1.bf16.msra.mxu0 %v16305_v12  ;;  %v10713_v14 = vpop.eup %10712  ;;  %10732 = vrcp.f32 %v3567_v2  ;;  %v3576_v48 = vadd.f32 1.0, %v10711_v18  ;;  %v16314_v56 = vpack.c.bf16 %v16312_v52, %v16313_v29  ;;  %v8464_v4 = vmul.f32 -1.442695, %v14230_v37 }
 0x40a   : > { %5034 = vmatprep.subr.bf16.mxu0 %v16309_v15  ;;  %v10715_v12 = vpop.eup %10714  ;;  %10734 = vrcp.f32 %v3569_v60  ;;  %v3578_v50 = vadd.f32 1.0, %v10713_v14  ;;  %v16316_v15 = vld [vmem:[#allocation87_spill] sm:$0xff]  ;;  %v8466_v10 = vmul.f32 -1.442695, %v14237_v25 }
 0x40b   : > { %v10717_v32 = vpop.eup %10716  ;;  %10736 = vrcp.f32 %v3576_v48  ;;  %v3577_v53 = vadd.f32 1.0, %v10715_v12  ;;  %v16317_v60 = vpack.c.bf16 %v16315_v22, %v16316_v15  ;;  %v16318_v48 = vld [vmem:[#allocation57_spill] sm:$0xff] }
 0x40c   : > { %v10719_v2 = vpop.eup %10718  ;;  %10738 = vrcp.f32 %v3578_v50  ;;  %v3579_v18 = vadd.f32 1.0, %v10717_v32  ;;  %v14253_v12 = vadd.f32 %v16318_v48, %v13910_v57  ;;  %v8465_v50 = vmul.f32 -1.442695, %v14241_v43  ;;  %v16319_v32 = vld [vmem:[#allocation85_spill] sm:$0xff] }
 0x40d   : > { %5035 = vmatpush1.bf16.msra.mxu0 %v16314_v56  ;;  %v10721_v14 = vpop.eup %10720  ;;  %10740 = vrcp.f32 %v3577_v53  ;;  %v3586_v31 = vadd.f32 1.0, %v10719_v2  ;;  %v14258_v56 = vadd.f32 %v16319_v32, %v13812_v9  ;;  %v16320_v53 = vld [vmem:[#allocation79_spill] sm:$0xff]  ;;  %v16326_v32 = vld [vmem:[#allocation102_spill] sm:$0xff] }
 0x40e   : > { %5036 = vmatprep.subr.bf16.mxu0 %v16317_v60  ;;  %v10723_v52 = vpop.eup %10722  ;;  %10742 = vrcp.f32 %v3579_v18  ;;  %v3588_v29 = vadd.f32 1.0, %v10721_v14  ;;  %v14262_v2 = vadd.f32 %v16320_v53, %v13819_v54  ;;  %v16321_v60 = vld [vmem:[#allocation29_spill] sm:$0xff]  ;;  %v16324_v18 = vld [vmem:[#allocation48_spill] sm:$0xff]  ;;  %v14273_v38 = vadd.f32 %v16326_v32, %v13910_v57  ;;  %v16329_v53 = vld [vmem:[#allocation39_spill] sm:$0xff]  ;;  %v14295_v32 = vpop.f32.mrb[143].mxu0 }
 0x40f   : > { %v10725_v22 = vpop.eup %10724  ;;  %10744 = vrcp.f32 %v3586_v31  ;;  %v3587_v15 = vadd.f32 1.0, %v10723_v52  ;;  %v14266_v48 = vadd.f32 %v16321_v60, %v13898_v11  ;;  %v16325_v14 = vpack.c.bf16 %v16323_v8, %v16324_v18  ;;  %v16328_v31 = vld [vmem:[#allocation75_spill] sm:$0xff]  ;;  %16335 = vst [vmem:[#allocation93_spill] sm:$0xff] %v14295_v32 }
 0x410   : > { %v10727_v42 = vpop.eup %10726  ;;  %10746 = vrcp.f32 %v3588_v29  ;;  %v3589_v30 = vadd.f32 1.0, %v10725_v22  ;;  %16327 = vst [vmem:[#allocation56_spill] sm:$0xff] %v14273_v38  ;;  %v14277_v52 = vadd.f32 %v16328_v31, %v13812_v9  ;;  %v16331_v58 = vpack.c.bf16 %v16329_v53, %v16330_v19  ;;  %v16332_v22 = vld [vmem:[#allocation35_spill] sm:$0xff] }
 0x411   : > { %16322 = vst [vmem:[#allocation71_spill] sm:$0xff] %v14266_v48  ;;  %5037 = vmatpush1.bf16.msra.mxu0 %v16325_v14  ;;  %v10729_v60 = vpop.eup %10728  ;;  %v14284_v8 = vmul.f32 %v14179_v28, %v13981_v36  ;;  %v14287_v29 = vmul.f32 %v10727_v42, %v14070_v40  ;;  %10748 = vrcp.f32 %v3587_v15  ;;  %v14291_v18 = vadd.f32 %v16332_v22, %v13819_v54  ;;  %v14293_v14 = vpop.f32.mrb[111].mxu1  ;;  %v16336_v28 = vld [vmem:[#allocation68_spill] sm:$0xff]  ;;  %v16337_v40 = vld [vmem:[#allocation49_spill] sm:$0xff] }
 0x412   : > { %5038 = vmatprep.subr.bf16.mxu0 %v16331_v58  ;;  %16334 = vst [vmem:[#allocation55_spill] sm:$0xff] %v14293_v14  ;;  %v10731_v31 = vpop.eup %10730  ;;  %10750 = vrcp.f32 %v3589_v30  ;;  %v8467_v58 = vmul.f32 -1.442695, %v14253_v12  ;;  %v8474_v36 = vmul.f32 -1.442695, %v14258_v56  ;;  %v16338_v42 = vpack.c.bf16 %v16336_v28, %v16337_v40  ;;  %v16339_v14 = vld [vmem:[#allocation94_spill] sm:$0xff] }
 0x413   : > { %16333 = vst [vmem:[#allocation77_spill] sm:$0xff] %v14291_v18  ;;  %v10733_v19 = vpop.eup %10732  ;;  %10752 = vpow2.f32 %v8464_v4  ;;  %v8476_v22 = vmul.f32 -1.442695, %v14262_v2  ;;  %v8475_v32 = vmul.f32 -1.442695, %v14266_v48  ;;  %v16341_v4 = vpack.c.bf16 %v16339_v14, %v16340_v62 }
 0x414   : > { %v10735_v53 = vpop.eup %10734  ;;  %10754 = vpow2.f32 %v8466_v10  ;;  %v8477_v30 = vmul.f32 -1.442695, %v14273_v38  ;;  %v8484_v28 = vmul.f32 -1.442695, %v14277_v52  ;;  %v8486_v40 = vmul.f32 -1.442695, %v14291_v18 }
 0x415   : > { %5039 = vmatpush1.bf16.msra.mxu0 %v16338_v42  ;;  %v10737_v59 = vpop.eup %10736  ;;  %10756 = vpow2.f32 %v8465_v50  ;;  %v16342_v42 = vld [vmem:[#allocation91_spill] sm:$0xff]  ;;  %v4526_v0 = vmul.f32 %v10729_v60, %v14074_v44  ;;  %v14320_v62 = vadd.f32 %v16343_v35, %v13910_v57  ;;  %v14323_v50 = vmul.f32 %v10731_v31, %v14078_v6  ;;  %v16345_v44 = vld [vmem:[#allocation90_spill] sm:$0xff]  ;;  %v14337_v35 = vpop.f32.mrb[144].mxu0 }
 0x416   : > { %5040 = vmatprep.subr.bf16.mxu0 %v16341_v4  ;;  %v14314_v15 = vadd.f32 %v16342_v42, %v13898_v11  ;;  %v10739_v10 = vpop.eup %10738  ;;  %v4536_v13 = vmul.f32 %v10737_v59, %v14090_v27  ;;  %10758 = vpow2.f32 %v8467_v58  ;;  %v16344_v42 = vld [vmem:[#allocation72_spill] sm:$0xff]  ;;  %v16346_v60 = vld [vmem:[#allocation58_spill] sm:$0xff]  ;;  %v14335_v27 = vpop.f32.mrb[112].mxu1  ;;  %16349 = vst [vmem:[#allocation78_spill] sm:$0xff] %v14337_v35  ;;  %v4527_v6 = vmul.f32 %v10733_v19, %v14082_v17 }
 0x417   : > { %v10741_v14 = vpop.eup %10740  ;;  %v14326_v4 = vmul.f32 %v10739_v10, %v14097_v45  ;;  %10760 = vpow2.f32 %v8474_v36  ;;  %v14330_v38 = vadd.f32 %v16344_v42, %v13812_v9  ;;  %v16347_v59 = vpack.c.bf16 %v16345_v44, %v16346_v60  ;;  %16348 = vst [vmem:[#allocation92_spill] sm:$0xff] %v14335_v27  ;;  %v16350_v36 = vld [vmem:[#allocation60_spill] sm:$0xff]  ;;  %v14344_v42 = vpop.f32.mrb[113].mxu1 }
 0x418   : > { %v10743_v58 = vpop.eup %10742  ;;  %v4843_v31 = vpack.c.bf16 %v4536_v13, %v4526_v0  ;;  %v4537_v45 = vmul.f32 %v10741_v14, %v14101_v55  ;;  %10762 = vpow2.f32 %v8476_v22  ;;  %v16351_v10 = vld [vmem:[#allocation100_spill] sm:$0xff]  ;;  %16353 = vst [vmem:[#allocation61_spill] sm:$0xff] %v14344_v42  ;;  %v14346_v18 = vpop.f32.mrb[145].mxu0  ;;  %v8485_v17 = vmul.f32 -1.442695, %v14314_v15 }
 0x419   : > { %5041 = vmatpush1.bf16.msra.mxu0 %v16347_v59  ;;  %v16352_v48 = vpack.c.bf16 %v16350_v36, %v16351_v10  ;;  %16354 = vst [vmem:[#allocation107_spill] sm:$0xff] %v14346_v18  ;;  %v14348_v44 = vpop.eup %10744  ;;  %10764 = vpow2.f32 %v8475_v32  ;;  %v14353_v13 = vpop.f32.mrb[114].mxu1  ;;  %v8494_v32 = vmul.f32 -1.442695, %v14330_v38  ;;  %v16359_v36 = vld [vmem:[#allocation74_spill] sm:$0xff]  ;;  %v16360_v10 = vld [vmem:[#allocation97_spill] sm:$0xff] }
 0x41a   : > { %16355 = vst [vmem:[#allocation67_spill] sm:$0xff] %v14353_v13  ;;  %v14355_v0 = vpop.f32.mrb[146].mxu0  ;;  %v14357_v55 = vpop.eup %10746  ;;  %10766 = vpow2.f32 %v8477_v30  ;;  %v4844_v19 = vpack.c.bf16 %v4537_v45, %v4527_v6  ;;  %v16361_v60 = vpack.c.bf16 %v16359_v36, %v16360_v10  ;;  %v14373_v30 = vmul.f32 %v10743_v58, %v14121_v7  ;;  %v16362_v6 = vld [vmem:[#allocation110_spill] sm:$0xff]  ;;  %v16363_v45 = vld [vmem:[#allocation111_spill] sm:$0xff]  ;;  %v16366_v58 = vld [vmem:[#allocation101_spill] sm:$0xff] }
 0x41b   : > { %5042 = vmatprep.subr.bf16.mxu0 %v16352_v48  ;;  %16356 = vst [vmem:[#allocation80_spill] sm:$0xff] %v14355_v0  ;;  %v8487_v48 = vmul.f32 -1.442695, %v14320_v62  ;;  %v14360_v22 = vpop.f32.mrb[115].mxu1  ;;  %v14362_v14 = vpop.f32.mrb[147].mxu0  ;;  %10768 = vpow2.f32 %v8484_v28  ;;  %v14379_v13 = vmul.f32 %v10735_v53, %v14086_v49  ;;  %v16365_v7 = vld [vmem:[#allocation103_spill] sm:$0xff] }
 0x41c   : > { %16357 = vst [vmem:[#allocation83_spill] sm:$0xff] %v14360_v22  ;;  %16358 = vst [vmem:[#allocation125_spill] sm:$0xff] %v14362_v14  ;;  %v14364_v59 = vpop.eup %10748  ;;  %10770 = vpow2.f32 %v8486_v40  ;;  %5065 = vmatprep.subr.bf16.mxu1 %v4844_v19  ;;  %v16364_v22 = vpack.c.bf16 %v16362_v6, %v16363_v45  ;;  %v16367_v40 = vpack.c.bf16 %v16365_v7, %v16366_v58  ;;  %v14384_v19 = vpop.f32.mrb[116].mxu1  ;;  %v16373_v7 = vld [vmem:[#allocation50_spill] sm:$0xff] }
 0x41d   : > { %5043 = vmatpush1.bf16.msra.mxu0 %v16361_v60  ;;  %v14370_v0 = vpop.eup %10750  ;;  %10772 = vpow2.f32 %v8485_v17  ;;  %5066 = vmatpush1.bf16.msra.mxu1 %v4843_v31  ;;  %16368 = vst [vmem:[#allocation34_spill] sm:$0xff] %v14384_v19  ;;  %v14386_v6 = vpop.f32.mrb[148].mxu0  ;;  %v16370_v17 = vld [vmem:[#allocation141_spill] sm:$0xff]  ;;  %v14397_v58 = vadd.f32 %v16373_v7, %v13819_v54  ;;  %v16379_v7 = vld [vmem:[#allocation59_spill] sm:$0xff] }
 0x41e   : > { %5044 = vmatprep.subr.bf16.mxu0 %v16364_v22  ;;  %v10753_v14 = vpop.eup %10752  ;;  %10774 = vpow2.f32 %v8487_v48  ;;  %16369 = vst [vmem:[#allocation82_spill] sm:$0xff] %v14386_v6  ;;  %v16371_v49 = vpack.c.bf16 %v13905_v26, %v16370_v17  ;;  %v14393_v48 = vpop.f32.mrb[117].mxu1  ;;  %v16374_v26 = vld [vmem:[#allocation54_spill] sm:$0xff]  ;;  %v16375_v17 = vld [vmem:[#allocation96_spill] sm:$0xff] }
 0x41f   : > { %v10755_v28 = vpop.eup %10754  ;;  %v3596_v36 = vadd.f32 1.0, %v10753_v14  ;;  %10776 = vpow2.f32 %v8494_v32  ;;  %16372 = vst [vmem:[#allocation81_spill] sm:$0xff] %v14393_v48  ;;  %v14412_v48 = vadd.f32 %v16379_v7, %v13812_v9 }
 0x420   : > { %v10757_v60 = vpop.eup %10756  ;;  %v3598_v10 = vadd.f32 1.0, %v10755_v28 }
 0x421   : > { %5045 = vmatpush1.bf16.msra.mxu0 %v16367_v40  ;;  %v10759_v22 = vpop.eup %10758  ;;  %10778 = vrcp.f32 %v3596_v36  ;;  %v3597_v31 = vadd.f32 1.0, %v10757_v60  ;;  %v14401_v40 = vadd.f32 %v16374_v26, %v13898_v11  ;;  %v8504_v18 = vmul.f32 -1.442695, %v14412_v48 }
 0x422   : > { %5046 = vmatprep.subr.bf16.mxu0 %v16371_v49  ;;  %v10761_v14 = vpop.eup %10760  ;;  %10780 = vrcp.f32 %v3598_v10  ;;  %v3599_v32 = vadd.f32 1.0, %v10759_v22  ;;  %v14405_v49 = vadd.f32 %v16375_v17, %v13910_v57  ;;  %v16376_v10 = vld [vmem:[#allocation32_spill] sm:$0xff]  ;;  %v16377_v22 = vld [vmem:[#allocation113_spill] sm:$0xff]  ;;  %v16381_v17 = vld [vmem:[#allocation98_spill] sm:$0xff] }
 0x423   : > { %v10763_v45 = vpop.eup %10762  ;;  %10782 = vrcp.f32 %v3597_v31  ;;  %v3606_v28 = vadd.f32 1.0, %v10761_v14  ;;  %v16378_v53 = vpack.c.bf16 %v16376_v10, %v16377_v22  ;;  %v14419_v6 = vadd.f32 %v16381_v17, %v13819_v54 }
 0x424   : > { %v10765_v36 = vpop.eup %10764  ;;  %10784 = vrcp.f32 %v3599_v32  ;;  %v3608_v60 = vadd.f32 1.0, %v10763_v45  ;;  %v16380_v32 = vpack.c.bf16 %v13977_v33, %v13989_v61  ;;  %v8496_v22 = vmul.f32 -1.442695, %v14397_v58 }
 0x425   : > { %5047 = vmatpush1.bf16.msra.mxu0 %v16378_v53  ;;  %v10767_v31 = vpop.eup %10766  ;;  %10786 = vrcp.f32 %v3606_v28  ;;  %v3607_v14 = vadd.f32 1.0, %v10765_v36  ;;  %v16382_v53 = vld [vmem:[#allocation99_spill] sm:$0xff]  ;;  %v8495_v61 = vmul.f32 -1.442695, %v14401_v40  ;;  %v8506_v35 = vmul.f32 -1.442695, %v14419_v6 }
 0x426   : > { %5048 = vmatprep.subr.bf16.mxu0 %v16380_v32  ;;  %v10769_v45 = vpop.eup %10768  ;;  %10788 = vrcp.f32 %v3608_v60  ;;  %v3609_v26 = vadd.f32 1.0, %v10767_v31  ;;  %v14423_v10 = vadd.f32 %v16382_v53, %v13898_v11  ;;  %v8497_v60 = vmul.f32 -1.442695, %v14405_v49  ;;  %v16383_v31 = vld [vmem:[#allocation126_spill] sm:$0xff]  ;;  %v16384_v32 = vld [vmem:[#allocation123_spill] sm:$0xff] }
 0x427   : > { %v10771_v28 = vpop.eup %10770  ;;  %10790 = vrcp.f32 %v3607_v14  ;;  %v3616_v36 = vadd.f32 1.0, %v10769_v45  ;;  %v16385_v17 = vpack.c.bf16 %v16383_v31, %v16384_v32  ;;  %v16386_v14 = vld [vmem:[#allocation30_spill] sm:$0xff] }
 0x428   : > { %v10773_v7 = vpop.eup %10772  ;;  %10792 = vrcp.f32 %v3609_v26  ;;  %v3618_v33 = vadd.f32 1.0, %v10771_v28  ;;  %v14434_v45 = vadd.f32 %v16386_v14, %v13910_v57  ;;  %v16387_v26 = vpack.c.bf16 %v14048_v21, %v14054_v47  ;;  %v16389_v14 = vld [vmem:[#allocation105_spill] sm:$0xff]  ;;  %v14449_v21 = vpop.f32.mrb[149].mxu0 }
 0x429   : > { %5049 = vmatpush1.bf16.msra.mxu0 %v16385_v17  ;;  %v10775_v19 = vpop.eup %10774  ;;  %10794 = vrcp.f32 %v3616_v36  ;;  %v3617_v53 = vadd.f32 1.0, %v10773_v7  ;;  %v8505_v31 = vmul.f32 -1.442695, %v14423_v10  ;;  %v16388_v7 = vld [vmem:[#allocation104_spill] sm:$0xff]  ;;  %v14447_v27 = vadd.f32 %v16389_v14, %v13819_v54  ;;  %16390 = vst [vmem:[#allocation86_spill] sm:$0xff] %v14449_v21 }
 0x42a   : > { %5050 = vmatprep.subr.bf16.mxu0 %v16387_v26  ;;  %v10777_v28 = vpop.eup %10776  ;;  %10796 = vrcp.f32 %v3618_v33  ;;  %v3619_v42 = vadd.f32 1.0, %v10775_v19  ;;  %v14443_v17 = vadd.f32 %v16388_v7, %v13812_v9  ;;  %v4546_v19 = vmul.f32 %v14348_v44, %v14135_v39  ;;  %v16393_v39 = vld [vmem:[#allocation33_spill] sm:$0xff]  ;;  %v14475_v44 = vpop.f32.mrb[118].mxu1 }
 0x42b   : > { %v10779_v32 = vpop.eup %10778  ;;  %10798 = vrcp.f32 %v3617_v53  ;;  %v3626_v36 = vadd.f32 1.0, %v10777_v28  ;;  %v16391_v53 = vld [vmem:[#allocation106_spill] sm:$0xff]  ;;  %v16392_v28 = vpack.c.bf16 %v14019_v3, %v14016_v16  ;;  %v14463_v14 = vmul.f32 %v14357_v55, %v14146_v5  ;;  %v14477_v16 = vpop.f32.mrb[150].mxu0 }
 0x42c   : > { %v10781_v47 = vpop.eup %10780  ;;  %v4556_v33 = vmul.f32 %v10779_v32, %v14230_v37  ;;  %10800 = vrcp.f32 %v3619_v42  ;;  %v14456_v26 = vadd.f32 %v16391_v53, %v13898_v11  ;;  %v14470_v37 = vadd.f32 %v16393_v39, %v13910_v57 }
 0x42d   : > { %5051 = vmatpush1.bf16.msra.mxu0 %v16392_v28  ;;  %v10783_v7 = vpop.eup %10782  ;;  %v14466_v21 = vmul.f32 %v10781_v47, %v14237_v25  ;;  %10802 = vrcp.f32 %v3626_v36  ;;  %v16394_v42 = vpack.c.bf16 %v14175_v34, %v14182_v41  ;;  %v4547_v5 = vmul.f32 %v14364_v59, %v14161_v46  ;;  %v14492_v47 = vpop.f32.mrb[119].mxu1 }
 0x42e   : > { %v10785_v3 = vpop.eup %10784  ;;  %v4853_v55 = vpack.c.bf16 %v4556_v33, %v4546_v19  ;;  %v4557_v25 = vmul.f32 %v10783_v7, %v14241_v43  ;;  %10804 = vpow2.f32 %v8496_v22  ;;  %v14484_v36 = vmul.f32 %v14370_v0, %v14165_v51  ;;  %v14494_v46 = vpop.f32.mrb[151].mxu0  ;;  %v16395_v51 = vld [vmem:[#allocation66_spill] sm:$0xff]  ;;  %v16397_v33 = vld [vmem:[#allocation108_spill] sm:$0xff] }
 0x42f   : > { %5102 = vmatprep.subr.bf16.mxu0 %v16394_v42  ;;  %v10787_v32 = vpop.eup %10786  ;;  %v4855_v34 = vpack.c.bf16 %v14466_v21, %v14463_v14  ;;  %v14489_v41 = vmul.f32 %v10785_v3, %v14253_v12  ;;  %10806 = vpow2.f32 %v8495_v61  ;;  %v8507_v59 = vmul.f32 -1.442695, %v14434_v45  ;;  %v16407_v21 = vld [vmem:[#allocation112_spill] sm:$0xff] }
 0x430   : > { %5053 = vmatmul.mubr.bf16.vlgmr.msra.gmra.mrb[164].mxu0 %v16252_v24  ;;  %v10789_v43 = vpop.eup %10788  ;;  %10808 = vpow2.f32 %v8497_v60  ;;  %v14499_v0 = vadd.f32 %v16395_v51, %v13812_v9  ;;  %v4854_v22 = vpack.c.bf16 %v4557_v25, %v4547_v5  ;;  %v16396_v12 = vpack.c.bf16 %v14142_v20, %v14139_v23  ;;  %v16400_v25 = vld [vmem:[#allocation77_spill] sm:$0xff] }
 0x431   : > { %5134 = vmatprep.mubr.bf16.mxu0 %v16252_v24  ;;  %v10791_v61 = vpop.eup %10790  ;;  %10810 = vpow2.f32 %v8504_v18  ;;  %v8514_v19 = vmul.f32 -1.442695, %v14443_v17  ;;  %v14508_v60 = vadd.f32 %v16397_v33, %v13819_v54  ;;  %v16398_v53 = vpack.c.bf16 %v14287_v29, %v14284_v8 }
 0x432   : > { %5103 = vmatpush1.bf16.msra.mxu0 %v16396_v12  ;;  %v4856_v28 = vpack.c.bf16 %v14489_v41, %v14484_v36  ;;  %v10793_v7 = vpop.eup %10792  ;;  %10812 = vpow2.f32 %v8506_v35  ;;  %v8516_v23 = vmul.f32 -1.442695, %v14447_v27  ;;  %5067 = vmatprep.subr.bf16.mxu1 %v4854_v22  ;;  %v8515_v18 = vmul.f32 -1.442695, %v14456_v26  ;;  %v16403_v12 = vld [vmem:[#allocation56_spill] sm:$0xff] }
 0x433   : > { %5104 = vmatprep.subr.bf16.mxu0 %v16398_v53  ;;  %v10795_v20 = vpop.eup %10794  ;;  %10814 = vpow2.f32 %v8505_v31  ;;  %v8517_v39 = vmul.f32 -1.442695, %v14470_v37  ;;  %5068 = vmatpush1.bf16.msra.mxu1 %v4853_v55  ;;  %v4566_v3 = vmul.f32 %v10787_v32, %v14258_v56  ;;  %v8524_v29 = vmul.f32 -1.442695, %v14499_v0  ;;  %v14532_v32 = vpop.f32.mrb[152].mxu0 }
 0x434   : > { %v10797_v42 = vpop.eup %10796  ;;  %v4576_v8 = vmul.f32 %v10795_v20, %v14277_v52  ;;  %10816 = vpow2.f32 %v8507_v59  ;;  %v16399_v35 = vpack.c.bf16 %v14201_v63, %v14198_v1  ;;  %v4568_v31 = vmul.f32 %v10789_v43, %v14262_v2  ;;  %v14530_v52 = vpop.f32.mrb[120].mxu1  ;;  %v16402_v59 = vld [vmem:[#allocation71_spill] sm:$0xff] }
 0x435   : > { %v10799_v5 = vpop.eup %10798  ;;  %v4578_v36 = vmul.f32 %v10797_v42, %v16400_v25  ;;  %10818 = vpow2.f32 %v8514_v19  ;;  %v8526_v55 = vmul.f32 -1.442695, %v14508_v60  ;;  %v16401_v56 = vpack.c.bf16 %v14373_v30, %v14379_v13  ;;  %v14536_v2 = vpop.f32.mrb[121].mxu1 }
 0x436   : > { %5105 = vmatpush1.bf16.msra.mxu0 %v16399_v35  ;;  %v10801_v41 = vpop.eup %10800  ;;  %v4567_v1 = vmul.f32 %v10791_v61, %v16402_v59  ;;  %v4863_v63 = vpack.c.bf16 %v4576_v8, %v4566_v3  ;;  %v4577_v51 = vmul.f32 %v10799_v5, %v14314_v15  ;;  %10820 = vpow2.f32 %v8516_v23  ;;  %v14538_v43 = vpop.f32.mrb[153].mxu0 }
 0x437   : > { %5106 = vmatprep.subr.bf16.mxu0 %v16401_v56  ;;  %v14540_v22 = vpop.eup %10802  ;;  %v4569_v13 = vmul.f32 %v10793_v7, %v16403_v12  ;;  %v4865_v30 = vpack.c.bf16 %v4578_v36, %v4568_v31  ;;  %v4579_v19 = vmul.f32 %v10801_v41, %v14320_v62  ;;  %10822 = vpow2.f32 %v8515_v18  ;;  %v14544_v33 = vpop.f32.mrb[122].mxu1  ;;  %v16406_v41 = vld [vmem:[#allocation109_spill] sm:$0xff]  ;;  %v16409_v12 = vld [vmem:[#allocation115_spill] sm:$0xff] }
 0x438   : > { %v14546_v53 = vpop.f32.mrb[154].mxu0  ;;  %v10805_v61 = vpop.eup %10804  ;;  %10824 = vpow2.f32 %v8517_v39  ;;  %v4864_v15 = vpack.c.bf16 %v4577_v51, %v4567_v1  ;;  %v16404_v23 = vpack.c.bf16 %v14326_v4, %v14323_v50  ;;  %v14560_v59 = vadd.f32 %v16406_v41, %v13898_v11 }
 0x439   : > { %v14551_v20 = vpop.f32.mrb[123].mxu1  ;;  %v14553_v42 = vpop.f32.mrb[155].mxu0  ;;  %v3628_v3 = vadd.f32 1.0, %v10805_v61  ;;  %10826 = vpow2.f32 %v8524_v29  ;;  %v4866_v62 = vpack.c.bf16 %v4579_v19, %v4569_v13  ;;  %v14564_v14 = vadd.f32 %v16407_v21, %v13910_v57 }
 0x43a   : > { %5107 = vmatpush1.bf16.msra.mxu0 %v16404_v23  ;;  %16405 = vst [vmem:[#allocation65_spill] sm:$0xff] %v14553_v42  ;;  %v10807_v7 = vpop.eup %10806  ;;  %10828 = vpow2.f32 %v8526_v55  ;;  %5069 = vmatprep.subr.bf16.mxu1 %v4864_v15  ;;  %v14572_v13 = vadd.f32 %v16409_v12, %v13819_v54  ;;  %v16410_v15 = vld [vmem:[#allocation116_spill] sm:$0xff]  ;;  %v14624_v42 = vpop.f32.mrb[124].mxu1 }
 0x43b   : > { %5108 = vmatprep.subr.bf16.mxu0 %v4856_v28  ;;  %v10809_v18 = vpop.eup %10808  ;;  %v3627_v8 = vadd.f32 1.0, %v10807_v7  ;;  %10830 = vrcp.f32 %v3628_v3  ;;  %5070 = vmatpush1.bf16.msra.mxu1 %v4863_v63  ;;  %v16408_v63 = vld [vmem:[#allocation114_spill] sm:$0xff]  ;;  %v14576_v23 = vadd.f32 %v16410_v15, %v13898_v11  ;;  %v16415_v15 = vld [vmem:[#allocation121_spill] sm:$0xff]  ;;  %16419 = vst [vmem:[#allocation73_spill] sm:$0xff] %v14624_v42 }
 0x43c   : > { %v10811_v35 = vpop.eup %10810  ;;  %v3629_v39 = vadd.f32 1.0, %v10809_v18  ;;  %v14568_v51 = vadd.f32 %v16408_v63, %v13812_v9  ;;  %v16412_v18 = vld [vmem:[#allocation118_spill] sm:$0xff]  ;;  %v8536_v41 = vmul.f32 -1.442695, %v14572_v13 }
 0x43d   : > { %v10813_v5 = vpop.eup %10812  ;;  %10832 = vrcp.f32 %v3627_v8  ;;  %v3636_v50 = vadd.f32 1.0, %v10811_v35  ;;  %v14584_v8 = vadd.f32 %v16412_v18, %v13812_v9  ;;  %v16413_v35 = vld [vmem:[#allocation119_spill] sm:$0xff]  ;;  %v8535_v21 = vmul.f32 -1.442695, %v14576_v23 }
 0x43e   : > { %5109 = vmatpush1.bf16.msra.mxu0 %v4855_v34  ;;  %v10815_v4 = vpop.eup %10814  ;;  %10834 = vrcp.f32 %v3629_v39  ;;  %v3638_v29 = vadd.f32 1.0, %v10813_v5  ;;  %v14588_v39 = vadd.f32 %v16413_v35, %v13819_v54  ;;  %v4586_v35 = vmul.f32 %v14540_v22, %v14330_v38  ;;  %v14626_v38 = vpop.f32.mrb[156].mxu0 }
 0x43f   : > { %5110 = vmatprep.subr.bf16.mxu0 %v4866_v62  ;;  %v10817_v28 = vpop.eup %10816  ;;  %10836 = vrcp.f32 %v3636_v50  ;;  %v3637_v31 = vadd.f32 1.0, %v10815_v4  ;;  %v8525_v4 = vmul.f32 -1.442695, %v14560_v59  ;;  %v8544_v63 = vmul.f32 -1.442695, %v14584_v8  ;;  %16420 = vst [vmem:[#allocation37_spill] sm:$0xff] %v14626_v38 }
 0x440   : > { %v10819_v25 = vpop.eup %10818  ;;  %10838 = vrcp.f32 %v3638_v29  ;;  %v3639_v36 = vadd.f32 1.0, %v10817_v28  ;;  %v16414_v29 = vld [vmem:[#allocation120_spill] sm:$0xff]  ;;  %v8546_v12 = vmul.f32 -1.442695, %v14588_v39 }
 0x441   : > { %v10821_v55 = vpop.eup %10820  ;;  %10840 = vrcp.f32 %v3637_v31  ;;  %v3646_v56 = vadd.f32 1.0, %v10819_v25  ;;  %v14593_v28 = vadd.f32 %v16414_v29, %v13898_v11 }
 0x442   : > { %5111 = vmatpush1.bf16.msra.mxu0 %v4865_v30  ;;  %v10823_v34 = vpop.eup %10822  ;;  %10842 = vrcp.f32 %v3639_v36  ;;  %v3648_v1 = vadd.f32 1.0, %v10821_v55  ;;  %v16411_v30 = vld [vmem:[#allocation117_spill] sm:$0xff]  ;;  %v8527_v36 = vmul.f32 -1.442695, %v14564_v14 }
 0x443   : > { %v10825_v19 = vpop.eup %10824  ;;  %10844 = vrcp.f32 %v3646_v56  ;;  %v3647_v61 = vadd.f32 1.0, %v10823_v34  ;;  %v14580_v7 = vadd.f32 %v16411_v30, %v13910_v57  ;;  %v8534_v56 = vmul.f32 -1.442695, %v14568_v51 }
 0x444   : > { %v10827_v3 = vpop.eup %10826  ;;  %10846 = vrcp.f32 %v3648_v1  ;;  %v3649_v62 = vadd.f32 1.0, %v10825_v19  ;;  %v14605_v30 = vadd.f32 %v16415_v15, %v13910_v57 }
 0x445   : > { %v10829_v5 = vpop.eup %10828  ;;  %10848 = vrcp.f32 %v3647_v61  ;;  %v3656_v50 = vadd.f32 1.0, %v10827_v3  ;;  %v8537_v1 = vmul.f32 -1.442695, %v14580_v7  ;;  %v8545_v61 = vmul.f32 -1.442695, %v14593_v28  ;;  %v16416_v3 = vld [vmem:[#allocation122_spill] sm:$0xff] }
 0x446   : > { %v10831_v31 = vpop.eup %10830  ;;  %10850 = vrcp.f32 %v3649_v62  ;;  %v3658_v25 = vadd.f32 1.0, %v10829_v5  ;;  %v14609_v62 = vadd.f32 %v16416_v3, %v13812_v9  ;;  %v16418_v3 = vld [vmem:[#allocation139_spill] sm:$0xff] }
 0x447   : > { %v10833_v55 = vpop.eup %10832  ;;  %10852 = vrcp.f32 %v3656_v50  ;;  %v16417_v50 = vld [vmem:[#allocation138_spill] sm:$0xff]  ;;  %v14622_v24 = vadd.f32 %v16418_v3, %v13898_v11 }
 0x448   : > { %v10835_v34 = vpop.eup %10834  ;;  %10854 = vrcp.f32 %v3658_v25  ;;  %v4588_v25 = vmul.f32 %v10831_v31, %v14397_v58  ;;  %v4587_v22 = vmul.f32 %v10833_v55, %v14401_v40  ;;  %v14632_v58 = vpop.f32.mrb[157].mxu0 }
 0x449   : > { %v10837_v19 = vpop.eup %10836  ;;  %10856 = vpow2.f32 %v8525_v4  ;;  %v14616_v4 = vadd.f32 %v16417_v50, %v13819_v54  ;;  %v14630_v50 = vpop.f32.mrb[125].mxu1  ;;  %16422 = vst [vmem:[#allocation84_spill] sm:$0xff] %v14632_v58  ;;  %v4589_v31 = vmul.f32 %v10835_v34, %v14405_v49  ;;  %v8554_v49 = vmul.f32 -1.442695, %v14609_v62  ;;  %v16443_v58 = vld [vmem:[#allocation135_spill] sm:$0xff] }
 0x44a   : > { %v10839_v18 = vpop.eup %10838  ;;  %v4596_v5 = vmul.f32 %v10837_v19, %v14412_v48  ;;  %10858 = vpow2.f32 %v8527_v36  ;;  %16421 = vst [vmem:[#allocation76_spill] sm:$0xff] %v14630_v50  ;;  %v14636_v3 = vpop.f32.mrb[126].mxu1  ;;  %v14732_v50 = vadd.f32 %v16443_v58, %v13819_v54 }
 0x44b   : > { %v10841_v29 = vpop.eup %10840  ;;  %v4598_v15 = vmul.f32 %v10839_v18, %v14419_v6  ;;  %10860 = vpow2.f32 %v8534_v56  ;;  %16423 = vst [vmem:[#allocation87_spill] sm:$0xff] %v14636_v3  ;;  %v14638_v38 = vpop.f32.mrb[158].mxu0  ;;  %v8556_v34 = vmul.f32 -1.442695, %v14616_v4 }
 0x44c   : > { %v10843_v48 = vpop.eup %10842  ;;  %v4873_v36 = vpack.c.bf16 %v4596_v5, %v4586_v35  ;;  %v4597_v19 = vmul.f32 %v10841_v29, %v14423_v10  ;;  %10862 = vpow2.f32 %v8536_v41  ;;  %16424 = vst [vmem:[#allocation57_spill] sm:$0xff] %v14638_v38  ;;  %v8547_v10 = vmul.f32 -1.442695, %v14605_v30  ;;  %v14641_v41 = vpop.f32.mrb[127].mxu1 }
 0x44d   : > { %v10845_v6 = vpop.eup %10844  ;;  %v4875_v56 = vpack.c.bf16 %v4598_v15, %v4588_v25  ;;  %v4599_v18 = vmul.f32 %v10843_v48, %v14434_v45  ;;  %10864 = vpow2.f32 %v8535_v21  ;;  %16425 = vst [vmem:[#allocation85_spill] sm:$0xff] %v14641_v41  ;;  %v14643_v35 = vpop.f32.mrb[159].mxu0  ;;  %v8555_v29 = vmul.f32 -1.442695, %v14622_v24 }
 0x44e   : > { %v10847_v40 = vpop.eup %10846  ;;  %10866 = vpow2.f32 %v8537_v1  ;;  %v4874_v55 = vpack.c.bf16 %v4597_v19, %v4587_v22  ;;  %16426 = vst [vmem:[#allocation79_spill] sm:$0xff] %v14643_v35  ;;  %v14653_v15 = vmul.f32 %v10845_v6, %v14443_v17 }
 0x44f   : > { %v14645_v5 = vpop.eup %10848  ;;  %10868 = vpow2.f32 %v8544_v63  ;;  %v4876_v45 = vpack.c.bf16 %v4599_v18, %v4589_v31 }
 0x450   : > { %v14648_v21 = vpop.eup %10850  ;;  %10870 = vpow2.f32 %v8546_v12  ;;  %5071 = vmatprep.subr.bf16.mxu1 %v4874_v55  ;;  %v14659_v12 = vmul.f32 %v10847_v40, %v14447_v27 }
 0x451   : > { %v10853_v1 = vpop.eup %10852  ;;  %10872 = vpow2.f32 %v8545_v61  ;;  %5072 = vmatpush1.bf16.msra.mxu1 %v4873_v36  ;;  %5112 = vmatprep.subr.bf16.mxu0 %v4876_v45  ;;  %v14664_v61 = vpop.f32.mrb[128].mxu1 }
 0x452   : > { %v10855_v25 = vpop.eup %10854  ;;  %v14656_v63 = vmul.f32 %v10853_v1, %v14499_v0  ;;  %10874 = vpow2.f32 %v8547_v10  ;;  %5113 = vmatpush1.bf16.msra.mxu0 %v4875_v56  ;;  %16427 = vst [vmem:[#allocation29_spill] sm:$0xff] %v14664_v61  ;;  %v14668_v0 = vpop.f32.mrb[129].mxu1 }
 0x453   : > { %v10857_v48 = vpop.eup %10856  ;;  %v14662_v22 = vmul.f32 %v10855_v25, %v14508_v60  ;;  %10876 = vpow2.f32 %v8554_v49  ;;  %16428 = vst [vmem:[#allocation64_spill] sm:$0xff] %v14668_v0  ;;  %v14672_v56 = vpop.f32.mrb[130].mxu1 }
 0x454   : > { %v10859_v36 = vpop.eup %10858  ;;  %v3657_v19 = vadd.f32 1.0, %v10857_v48  ;;  %10878 = vpow2.f32 %v8556_v34  ;;  %16429 = vst [vmem:[#allocation48_spill] sm:$0xff] %v14672_v56  ;;  %v14674_v40 = vpop.f32.mrb[131].mxu1  ;;  %v16431_v34 = vld [vmem:[#allocation140_spill] sm:$0xff]  ;;  %v16432_v48 = vld [vmem:[#allocation127_spill] sm:$0xff]  ;;  %v16437_v56 = vld [vmem:[#allocation130_spill] sm:$0xff] }
 0x455   : > { %v10861_v6 = vpop.eup %10860  ;;  %v3659_v27 = vadd.f32 1.0, %v10859_v36  ;;  %10880 = vpow2.f32 %v8555_v29  ;;  %16430 = vst [vmem:[#allocation102_spill] sm:$0xff] %v14674_v40  ;;  %v14678_v1 = vadd.f32 %v16431_v34, %v13910_v57  ;;  %v14682_v36 = vadd.f32 %v16432_v48, %v13812_v9 }
 0x456   : > { %v10863_v60 = vpop.eup %10862  ;;  %10882 = vrcp.f32 %v3657_v19  ;;  %v3666_v18 = vadd.f32 1.0, %v10861_v6  ;;  %v16433_v19 = vld [vmem:[#allocation124_spill] sm:$0xff] }
 0x457   : > { %v10865_v10 = vpop.eup %10864  ;;  %10884 = vrcp.f32 %v3659_v27  ;;  %v3668_v55 = vadd.f32 1.0, %v10863_v60  ;;  %v14686_v6 = vadd.f32 %v16433_v19, %v13819_v54  ;;  %v8557_v17 = vmul.f32 -1.442695, %v14678_v1 }
 0x458   : > { %v10867_v49 = vpop.eup %10866  ;;  %10886 = vrcp.f32 %v3666_v18  ;;  %v3667_v45 = vadd.f32 1.0, %v10865_v10  ;;  %v16434_v18 = vld [vmem:[#allocation128_spill] sm:$0xff] }
 0x459   : > { %v10869_v25 = vpop.eup %10868  ;;  %10888 = vrcp.f32 %v3668_v55  ;;  %v3669_v29 = vadd.f32 1.0, %v10867_v49  ;;  %v14690_v10 = vadd.f32 %v16434_v18, %v13898_v11  ;;  %v14692_v55 = vpop.f32.mrb[132].mxu1 }
 0x45a   : > { %v10871_v27 = vpop.eup %10870  ;;  %10890 = vrcp.f32 %v3667_v45  ;;  %v3676_v60 = vadd.f32 1.0, %v10869_v25  ;;  %16435 = vst [vmem:[#allocation75_spill] sm:$0xff] %v14692_v55  ;;  %v8564_v45 = vmul.f32 -1.442695, %v14682_v36  ;;  %v8566_v25 = vmul.f32 -1.442695, %v14686_v6 }
 0x45b   : > { %v10873_v34 = vpop.eup %10872  ;;  %10892 = vrcp.f32 %v3669_v29  ;;  %v3678_v31 = vadd.f32 1.0, %v10871_v27  ;;  %v8565_v29 = vmul.f32 -1.442695, %v14690_v10  ;;  %v16436_v27 = vld [vmem:[#allocation129_spill] sm:$0xff] }
 0x45c   : > { %v10875_v49 = vpop.eup %10874  ;;  %10894 = vrcp.f32 %v3676_v60  ;;  %v3677_v48 = vadd.f32 1.0, %v10873_v34  ;;  %v14700_v55 = vadd.f32 %v16436_v27, %v13910_v57  ;;  %v16440_v27 = vld [vmem:[#allocation133_spill] sm:$0xff] }
 0x45d   : > { %v10877_v40 = vpop.eup %10876  ;;  %10896 = vrcp.f32 %v3678_v31  ;;  %v3679_v19 = vadd.f32 1.0, %v10875_v49  ;;  %v14704_v31 = vadd.f32 %v16437_v56, %v13812_v9  ;;  %v16438_v49 = vld [vmem:[#allocation131_spill] sm:$0xff]  ;;  %v14716_v38 = vadd.f32 %v16440_v27, %v13910_v57 }
 0x45e   : > { %v10879_v0 = vpop.eup %10878  ;;  %10898 = vrcp.f32 %v3677_v48  ;;  %v3686_v18 = vadd.f32 1.0, %v10877_v40  ;;  %v14708_v61 = vadd.f32 %v16438_v49, %v13819_v54  ;;  %v16439_v48 = vld [vmem:[#allocation132_spill] sm:$0xff]  ;;  %v4607_v56 = vmul.f32 %v14645_v5, %v14456_v26  ;;  %v16441_v49 = vld [vmem:[#allocation134_spill] sm:$0xff] }
 0x45f   : > { %v10881_v60 = vpop.eup %10880  ;;  %10900 = vrcp.f32 %v3679_v19  ;;  %v3688_v34 = vadd.f32 1.0, %v10879_v0  ;;  %v14712_v41 = vadd.f32 %v16439_v48, %v13898_v11  ;;  %v14723_v3 = vadd.f32 %v16441_v49, %v13812_v9 }
 0x460   : > { %v10883_v35 = vpop.eup %10882  ;;  %10902 = vrcp.f32 %v3686_v18  ;;  %v3687_v40 = vadd.f32 1.0, %v10881_v60  ;;  %v14725_v18 = vpop.f32.mrb[133].mxu1  ;;  %v4609_v48 = vmul.f32 %v14648_v21, %v14470_v37  ;;  %v8574_v37 = vmul.f32 -1.442695, %v14704_v31 }
 0x461   : > { %v10885_v0 = vpop.eup %10884  ;;  %v4617_v19 = vmul.f32 %v10883_v35, %v14560_v59  ;;  %10904 = vrcp.f32 %v3688_v34  ;;  %16442 = vst [vmem:[#allocation39_spill] sm:$0xff] %v14725_v18  ;;  %v14734_v26 = vpop.f32.mrb[134].mxu1  ;;  %v8567_v35 = vmul.f32 -1.442695, %v14700_v55 }
 0x462   : > { %v10887_v60 = vpop.eup %10886  ;;  %v4619_v27 = vmul.f32 %v10885_v0, %v14564_v14  ;;  %10906 = vrcp.f32 %v3687_v40  ;;  %16444 = vst [vmem:[#allocation38_spill] sm:$0xff] %v14734_v26  ;;  %v14737_v34 = vpop.f32.mrb[135].mxu1  ;;  %v16446_v14 = vld [vmem:[#allocation136_spill] sm:$0xff]  ;;  %v8576_v0 = vmul.f32 -1.442695, %v14708_v61 }
 0x463   : > { %v10889_v59 = vpop.eup %10888  ;;  %10908 = vpow2.f32 %v8557_v17  ;;  %v4884_v5 = vpack.c.bf16 %v4617_v19, %v4607_v56  ;;  %16445 = vst [vmem:[#allocation35_spill] sm:$0xff] %v14737_v34  ;;  %v14742_v21 = vadd.f32 %v16446_v14, %v13898_v11  ;;  %v8575_v17 = vmul.f32 -1.442695, %v14712_v41 }
 0x464   : > { %v10891_v49 = vpop.eup %10890  ;;  %10910 = vpow2.f32 %v8564_v45  ;;  %v4886_v40 = vpack.c.bf16 %v4619_v27, %v4609_v48  ;;  %v8577_v56 = vmul.f32 -1.442695, %v14716_v38  ;;  %v8584_v45 = vmul.f32 -1.442695, %v14723_v3 }
 0x465   : > { %v10893_v58 = vpop.eup %10892  ;;  %10912 = vpow2.f32 %v8566_v25  ;;  %5073 = vmatprep.subr.bf16.mxu1 %v4884_v5  ;;  %v8586_v19 = vmul.f32 -1.442695, %v14732_v50  ;;  %v16447_v14 = vpack.c.bf16 %v14656_v63, %v14653_v15  ;;  %v4626_v25 = vmul.f32 %v10887_v60, %v14568_v51  ;;  %v16448_v5 = vld [vmem:[#allocation142_spill] sm:$0xff]  ;;  %v14764_v51 = vpop.f32.mrb[136].mxu1 }
 0x466   : > { %v10895_v26 = vpop.eup %10894  ;;  %10914 = vpow2.f32 %v8565_v29  ;;  %5114 = vmatprep.subr.bf16.mxu0 %v4886_v40  ;;  %v14756_v29 = vadd.f32 %v16448_v5, %v13910_v57  ;;  %v16449_v34 = vpack.c.bf16 %v14662_v22, %v14659_v12  ;;  %v4628_v42 = vmul.f32 %v10889_v59, %v14572_v13  ;;  %16450 = vst [vmem:[#allocation68_spill] sm:$0xff] %v14764_v51  ;;  %v14768_v40 = vpop.f32.mrb[137].mxu1 }
 0x467   : > { %5074 = vmatpush1.bf16.msra.mxu1 %v16447_v14  ;;  %v10897_v48 = vpop.eup %10896  ;;  %v4636_v27 = vmul.f32 %v10895_v26, %v14584_v8  ;;  %10916 = vpow2.f32 %v8567_v35  ;;  %v8585_v63 = vmul.f32 -1.442695, %v14742_v21  ;;  %v4627_v60 = vmul.f32 %v10891_v49, %v14576_v23  ;;  %16451 = vst [vmem:[#allocation49_spill] sm:$0xff] %v14768_v40  ;;  %v14774_v59 = vpop.f32.mrb[138].mxu1 }
 0x468   : > { %5115 = vmatpush1.bf16.msra.mxu0 %v16449_v34  ;;  %v10899_v18 = vpop.eup %10898  ;;  %v4638_v15 = vmul.f32 %v10897_v48, %v14588_v39  ;;  %10918 = vpow2.f32 %v8574_v37  ;;  %v4629_v13 = vmul.f32 %v10893_v58, %v14580_v7  ;;  %16452 = vst [vmem:[#allocation94_spill] sm:$0xff] %v14774_v59  ;;  %v8587_v23 = vmul.f32 -1.442695, %v14756_v29 }
 0x469   : > { %v10901_v8 = vpop.eup %10900  ;;  %v4893_v26 = vpack.c.bf16 %v4636_v27, %v4626_v25  ;;  %v4637_v35 = vmul.f32 %v10899_v18, %v14593_v28  ;;  %10920 = vpow2.f32 %v8576_v0  ;;  %v14779_v28 = vpop.f32.mrb[139].mxu1 }
 0x46a   : > { %v14770_v12 = vpop.eup %10902  ;;  %v4895_v22 = vpack.c.bf16 %v4638_v15, %v4628_v42  ;;  %v4639_v39 = vmul.f32 %v10901_v8, %v14605_v30  ;;  %10922 = vpow2.f32 %v8575_v17  ;;  %16453 = vst [vmem:[#allocation95_spill] sm:$0xff] %v14779_v28  ;;  %v14783_v14 = vpop.f32.mrb[140].mxu1 }
 0x46b   : > { %v14776_v34 = vpop.eup %10904  ;;  %10924 = vpow2.f32 %v8577_v56  ;;  %v4894_v49 = vpack.c.bf16 %v4637_v35, %v4627_v60  ;;  %16454 = vst [vmem:[#allocation91_spill] sm:$0xff] %v14783_v14  ;;  %v14785_v25 = vpop.f32.mrb[141].mxu1  ;;  %v16458_v35 = vld [vmem:[#allocation45_spill] sm:$0xff] }
 0x46c   : > { %v14781_v18 = vpop.eup %10906  ;;  %10926 = vpow2.f32 %v8584_v45  ;;  %v4896_v37 = vpack.c.bf16 %v4639_v39, %v4629_v13  ;;  %16455 = vst [vmem:[#allocation31_spill] sm:$0xff] %v14785_v25  ;;  %v14787_v5 = vpop.f32.mrb[142].mxu1  ;;  %v14793_v13 = vadd.f32 %v16458_v35, %v13812_v9 }
 0x46d   : > { %v10909_v0 = vpop.eup %10908  ;;  %10928 = vpow2.f32 %v8586_v19  ;;  %5075 = vmatprep.subr.bf16.mxu1 %v4894_v49  ;;  %16456 = vst [vmem:[#allocation72_spill] sm:$0xff] %v14787_v5  ;;  %v14789_v8 = vpop.f32.mrb[143].mxu1 }
 0x46e   : > { %v10911_v42 = vpop.eup %10910  ;;  %v3689_v7 = vadd.f32 1.0, %v10909_v0  ;;  %10930 = vpow2.f32 %v8585_v63  ;;  %5076 = vmatpush1.bf16.msra.mxu1 %v4893_v26  ;;  %5116 = vmatprep.subr.bf16.mxu0 %v4896_v37  ;;  %16457 = vst [vmem:[#allocation90_spill] sm:$0xff] %v14789_v8  ;;  %v16460_v37 = vld [vmem:[#allocation52_spill] sm:$0xff] }
 0x46f   : > { %v10913_v30 = vpop.eup %10912  ;;  %v3696_v58 = vadd.f32 1.0, %v10911_v42  ;;  %10932 = vpow2.f32 %v8587_v23  ;;  %5117 = vmatpush1.bf16.msra.mxu0 %v4895_v22  ;;  %v16459_v22 = vld [vmem:[#allocation53_spill] sm:$0xff]  ;;  %v14801_v0 = vadd.f32 %v16460_v37, %v13898_v11 }
 0x470   : > { %v10915_v17 = vpop.eup %10914  ;;  %10934 = vrcp.f32 %v3689_v7  ;;  %v3698_v56 = vadd.f32 1.0, %v10913_v30  ;;  %v14797_v39 = vadd.f32 %v16459_v22, %v13819_v54  ;;  %v16461_v42 = vld [vmem:[#allocation137_spill] sm:$0xff] }
 0x471   : > { %v10917_v48 = vpop.eup %10916  ;;  %10936 = vrcp.f32 %v3696_v58  ;;  %v3697_v45 = vadd.f32 1.0, %v10915_v17  ;;  %v14805_v7 = vadd.f32 %v16461_v42, %v13910_v57  ;;  %v16462_v17 = vld [vmem:[#allocation63_spill] sm:$0xff]  ;;  %v8595_v42 = vmul.f32 -1.442695, %v14801_v0 }
 0x472   : > { %v10919_v19 = vpop.eup %10918  ;;  %10938 = vrcp.f32 %v3698_v56  ;;  %v3699_v27 = vadd.f32 1.0, %v10917_v48  ;;  %v14809_v56 = vadd.f32 %v16462_v17, %v13812_v9  ;;  %v8596_v22 = vmul.f32 -1.442695, %v14797_v39 }
 0x473   : > { %v10921_v15 = vpop.eup %10920  ;;  %10940 = vrcp.f32 %v3697_v45  ;;  %v3706_v63 = vadd.f32 1.0, %v10919_v19  ;;  %v16463_v19 = vld [vmem:[#allocation62_spill] sm:$0xff] }
 0x474   : > { %v10923_v60 = vpop.eup %10922  ;;  %10942 = vrcp.f32 %v3699_v27  ;;  %v3708_v26 = vadd.f32 1.0, %v10921_v15  ;;  %v14813_v27 = vadd.f32 %v16463_v19, %v13819_v54  ;;  %v16464_v15 = vld [vmem:[#allocation70_spill] sm:$0xff] }
 0x475   : > { %v10925_v23 = vpop.eup %10924  ;;  %10944 = vrcp.f32 %v3706_v63  ;;  %v3707_v49 = vadd.f32 1.0, %v10923_v60  ;;  %v14817_v63 = vadd.f32 %v16464_v15, %v13898_v11 }
 0x476   : > { %v10927_v30 = vpop.eup %10926  ;;  %10946 = vrcp.f32 %v3708_v26  ;;  %v3709_v58 = vadd.f32 1.0, %v10925_v23  ;;  %v8594_v26 = vmul.f32 -1.442695, %v14793_v13  ;;  %v14821_v23 = vpop.f32.mrb[144].mxu1 }
 0x477   : > { %v10929_v48 = vpop.eup %10928  ;;  %10948 = vrcp.f32 %v3707_v49  ;;  %v3716_v45 = vadd.f32 1.0, %v10927_v30  ;;  %16465 = vst [vmem:[#allocation58_spill] sm:$0xff] %v14821_v23  ;;  %v8597_v30 = vmul.f32 -1.442695, %v14805_v7  ;;  %v14825_v17 = vpop.f32.mrb[145].mxu1  ;;  %v16468_v23 = vld [vmem:[#allocation47_spill] sm:$0xff] }
 0x478   : > { %v10931_v60 = vpop.eup %10930  ;;  %10950 = vrcp.f32 %v3709_v58  ;;  %v3718_v35 = vadd.f32 1.0, %v10929_v48  ;;  %16466 = vst [vmem:[#allocation60_spill] sm:$0xff] %v14825_v17  ;;  %v8604_v58 = vmul.f32 -1.442695, %v14809_v56  ;;  %v16467_v48 = vld [vmem:[#allocation69_spill] sm:$0xff]  ;;  %v14836_v25 = vadd.f32 %v16468_v23, %v13812_v9  ;;  %v14838_v17 = vpop.f32.mrb[146].mxu1 }
 0x479   : > { %v10933_v37 = vpop.eup %10932  ;;  %10952 = vrcp.f32 %v3716_v45  ;;  %v3717_v49 = vadd.f32 1.0, %v10931_v60  ;;  %v14830_v8 = vadd.f32 %v16467_v48, %v13910_v57  ;;  %v8606_v45 = vmul.f32 -1.442695, %v14813_v27  ;;  %16469 = vst [vmem:[#allocation100_spill] sm:$0xff] %v14838_v17  ;;  %v16470_v48 = vld [vmem:[#allocation46_spill] sm:$0xff]  ;;  %v14847_v28 = vpop.f32.mrb[147].mxu1 }
 0x47a   : > { %v10935_v19 = vpop.eup %10934  ;;  %10954 = vrcp.f32 %v3718_v35  ;;  %v3719_v15 = vadd.f32 1.0, %v10933_v37  ;;  %v8605_v60 = vmul.f32 -1.442695, %v14817_v63  ;;  %v4646_v37 = vmul.f32 %v14770_v12, %v14609_v62  ;;  %16471 = vst [vmem:[#allocation74_spill] sm:$0xff] %v14847_v28  ;;  %v16472_v17 = vld [vmem:[#allocation36_spill] sm:$0xff] }
 0x47b   : > { %v10937_v5 = vpop.eup %10936  ;;  %10956 = vrcp.f32 %v3717_v49  ;;  %v14845_v49 = vadd.f32 %v16470_v48, %v13819_v54  ;;  %v4648_v23 = vmul.f32 %v14776_v34, %v14616_v4  ;;  %v14854_v51 = vadd.f32 %v16472_v17, %v13898_v11 }
 0x47c   : > { %v10939_v35 = vpop.eup %10938  ;;  %v4656_v14 = vmul.f32 %v10937_v5, %v14682_v36  ;;  %10958 = vrcp.f32 %v3719_v15  ;;  %v4647_v36 = vmul.f32 %v14781_v18, %v14622_v24  ;;  %v4649_v48 = vmul.f32 %v10935_v19, %v14678_v1 }
 0x47d   : > { %v10941_v59 = vpop.eup %10940  ;;  %v4658_v40 = vmul.f32 %v10939_v35, %v14686_v6  ;;  %10960 = vpow2.f32 %v8594_v26  ;;  %v8607_v34 = vmul.f32 -1.442695, %v14830_v8  ;;  %v16473_v26 = vld [vmem:[#allocation51_spill] sm:$0xff]  ;;  %v8615_v19 = vmul.f32 -1.442695, %v14854_v51 }
 0x47e   : > { %v10943_v62 = vpop.eup %10942  ;;  %v4903_v12 = vpack.c.bf16 %v4656_v14, %v4646_v37  ;;  %v4657_v5 = vmul.f32 %v10941_v59, %v14690_v10  ;;  %10962 = vpow2.f32 %v8596_v22  ;;  %v14864_v17 = vadd.f32 %v16473_v26, %v13910_v57  ;;  %v16474_v59 = vld [vmem:[#allocation89_spill] sm:$0xff] }
 0x47f   : > { %v10945_v15 = vpop.eup %10944  ;;  %v4905_v28 = vpack.c.bf16 %v4658_v40, %v4648_v23  ;;  %v4659_v4 = vmul.f32 %v10943_v62, %v14700_v55  ;;  %10964 = vpow2.f32 %v8595_v42  ;;  %v8614_v10 = vmul.f32 -1.442695, %v14836_v25  ;;  %v14871_v55 = vpop.f32.mrb[148].mxu1 }
 0x480   : > { %v10947_v6 = vpop.eup %10946  ;;  %10966 = vpow2.f32 %v8597_v30  ;;  %v4904_v24 = vpack.c.bf16 %v4657_v5, %v4647_v36  ;;  %v14869_v1 = vadd.f32 %v16474_v59, %v13812_v9  ;;  %v8616_v22 = vmul.f32 -1.442695, %v14845_v49  ;;  %v14874_v42 = vpop.f32.mrb[149].mxu1 }
 0x481   : > { %v10949_v18 = vpop.eup %10948  ;;  %10968 = vpow2.f32 %v8604_v58  ;;  %v4906_v40 = vpack.c.bf16 %v4659_v4, %v4649_v48  ;;  %16475 = vst [vmem:[#allocation97_spill] sm:$0xff] %v14874_v42  ;;  %v14877_v58 = vpop.f32.mrb[150].mxu1  ;;  %v4666_v37 = vmul.f32 %v10945_v15, %v14704_v31 }
 0x482   : > { %v10951_v14 = vpop.eup %10950  ;;  %10970 = vpow2.f32 %v8606_v45  ;;  %5077 = vmatprep.subr.bf16.mxu1 %v4904_v24  ;;  %16476 = vst [vmem:[#allocation110_spill] sm:$0xff] %v14877_v58  ;;  %v8617_v45 = vmul.f32 -1.442695, %v14864_v17  ;;  %v14882_v62 = vpop.f32.mrb[151].mxu1  ;;  %v4667_v4 = vmul.f32 %v10949_v18, %v14712_v41  ;;  %v16498_v58 = vld [vmem:[#allocation82_spill] sm:$0xff] }
 0x483   : > { %v10953_v30 = vpop.eup %10952  ;;  %10972 = vpow2.f32 %v8605_v60  ;;  %5078 = vmatpush1.bf16.msra.mxu1 %v4903_v12  ;;  %5118 = vmatprep.subr.bf16.mxu0 %v4906_v40  ;;  %16477 = vst [vmem:[#allocation111_spill] sm:$0xff] %v14882_v62  ;;  %v4668_v60 = vmul.f32 %v10947_v6, %v14708_v61  ;;  %v8624_v12 = vmul.f32 -1.442695, %v14869_v1  ;;  %v14891_v41 = vpop.f32.mrb[152].mxu1 }
 0x484   : > { %v10955_v35 = vpop.eup %10954  ;;  %v4676_v23 = vmul.f32 %v10953_v30, %v14723_v3  ;;  %10974 = vpow2.f32 %v8607_v34  ;;  %5119 = vmatpush1.bf16.msra.mxu0 %v4905_v28  ;;  %v4669_v28 = vmul.f32 %v10951_v14, %v14716_v38  ;;  %16478 = vst [vmem:[#allocation103_spill] sm:$0xff] %v14891_v41  ;;  %v14893_v40 = vpop.f32.mrb[153].mxu1 }
 0x485   : > { %v10957_v36 = vpop.eup %10956  ;;  %v4678_v5 = vmul.f32 %v10955_v35, %v14732_v50  ;;  %10976 = vpow2.f32 %v8614_v10  ;;  %16479 = vst [vmem:[#allocation101_spill] sm:$0xff] %v14893_v40  ;;  %v14895_v14 = vpop.f32.mrb[154].mxu1 }
 0x486   : > { %v10959_v48 = vpop.eup %10958  ;;  %v4913_v31 = vpack.c.bf16 %v4676_v23, %v4666_v37  ;;  %v4677_v3 = vmul.f32 %v10957_v36, %v14742_v21  ;;  %10978 = vpow2.f32 %v8616_v22  ;;  %16480 = vst [vmem:[#allocation141_spill] sm:$0xff] %v14895_v14  ;;  %v14901_v37 = vpop.f32.mrb[155].mxu1  ;;  %v16483_v36 = vld [vmem:[#allocation55_spill] sm:$0xff]  ;;  %v16497_v14 = vld [vmem:[#allocation34_spill] sm:$0xff] }
 0x487   : > { %v10961_v15 = vpop.eup %10960  ;;  %v4915_v34 = vpack.c.bf16 %v4678_v5, %v4668_v60  ;;  %v4679_v26 = vmul.f32 %v10959_v48, %v14756_v29  ;;  %10980 = vpow2.f32 %v8615_v19  ;;  %v16481_v19 = vld [vmem:[#allocation88_spill] sm:$0xff]  ;;  %16482 = vst [vmem:[#allocation50_spill] sm:$0xff] %v14901_v37  ;;  %v14905_v60 = vadd.f32 %v16483_v36, %v13898_v11 }
 0x488   : > { %v10963_v61 = vpop.eup %10962  ;;  %v3726_v6 = vadd.f32 1.0, %v10961_v15  ;;  %10982 = vpow2.f32 %v8617_v45  ;;  %v4914_v50 = vpack.c.bf16 %v4677_v3, %v4667_v4  ;;  %v14899_v35 = vadd.f32 %v16481_v19, %v13819_v54 }
 0x489   : > { %v10965_v24 = vpop.eup %10964  ;;  %v3728_v10 = vadd.f32 1.0, %v10963_v61  ;;  %10984 = vpow2.f32 %v8624_v12  ;;  %v4916_v59 = vpack.c.bf16 %v4679_v26, %v4669_v28  ;;  %v16484_v28 = vld [vmem:[#allocation93_spill] sm:$0xff]  ;;  %v14965_v40 = vadd.f32 %v16497_v14, %v13812_v9 }
 0x48a   : > { %v10967_v18 = vpop.eup %10966  ;;  %10986 = vrcp.f32 %v3726_v6  ;;  %v3727_v21 = vadd.f32 1.0, %v10965_v24  ;;  %5079 = vmatprep.subr.bf16.mxu1 %v4914_v50  ;;  %v8626_v15 = vmul.f32 -1.442695, %v14899_v35  ;;  %v8625_v6 = vmul.f32 -1.442695, %v14905_v60  ;;  %v16485_v50 = vld [vmem:[#allocation92_spill] sm:$0xff] }
 0x48b   : > { %v10969_v38 = vpop.eup %10968  ;;  %10988 = vrcp.f32 %v3728_v10  ;;  %v3729_v29 = vadd.f32 1.0, %v10967_v18  ;;  %5080 = vmatpush1.bf16.msra.mxu1 %v4913_v31  ;;  %5120 = vmatprep.subr.bf16.mxu0 %v4916_v59  ;;  %v14915_v24 = vadd.f32 %v16485_v50, %v13812_v9  ;;  %v14917_v10 = vpop.f32.mrb[156].mxu1 }
 0x48c   : > { %v10971_v22 = vpop.eup %10970  ;;  %10990 = vrcp.f32 %v3727_v21  ;;  %v3736_v30 = vadd.f32 1.0, %v10969_v38  ;;  %5121 = vmatpush1.bf16.msra.mxu0 %v4915_v34  ;;  %v14910_v34 = vadd.f32 %v16484_v28, %v13910_v57  ;;  %16486 = vst [vmem:[#allocation54_spill] sm:$0xff] %v14917_v10  ;;  %v16487_v21 = vld [vmem:[#allocation78_spill] sm:$0xff] }
 0x48d   : > { %v10973_v23 = vpop.eup %10972  ;;  %10992 = vrcp.f32 %v3729_v29  ;;  %v3738_v45 = vadd.f32 1.0, %v10971_v22  ;;  %v14921_v38 = vadd.f32 %v16487_v21, %v13819_v54  ;;  %v16488_v29 = vld [vmem:[#allocation61_spill] sm:$0xff] }
 0x48e   : > { %v10975_v5 = vpop.eup %10974  ;;  %10994 = vrcp.f32 %v3736_v30  ;;  %v3737_v12 = vadd.f32 1.0, %v10973_v23  ;;  %v14925_v22 = vadd.f32 %v16488_v29, %v13898_v11  ;;  %v14927_v30 = vpop.f32.mrb[157].mxu1 }
 0x48f   : > { %v10977_v48 = vpop.eup %10976  ;;  %10996 = vrcp.f32 %v3738_v45  ;;  %v3739_v4 = vadd.f32 1.0, %v10975_v5  ;;  %16489 = vst [vmem:[#allocation96_spill] sm:$0xff] %v14927_v30  ;;  %v16490_v45 = vld [vmem:[#allocation107_spill] sm:$0xff] }
 0x490   : > { %v10979_v31 = vpop.eup %10978  ;;  %10998 = vrcp.f32 %v3737_v12  ;;  %v3746_v3 = vadd.f32 1.0, %v10977_v48  ;;  %v14931_v36 = vadd.f32 %v16490_v45, %v13910_v57  ;;  %v16491_v5 = vld [vmem:[#allocation67_spill] sm:$0xff]  ;;  %v14937_v48 = vpop.f32.mrb[158].mxu1  ;;  %v8634_v45 = vmul.f32 -1.442695, %v14915_v24 }
 0x491   : > { %v10981_v26 = vpop.eup %10980  ;;  %11000 = vrcp.f32 %v3739_v4  ;;  %v3748_v61 = vadd.f32 1.0, %v10979_v31  ;;  %v14935_v12 = vadd.f32 %v16491_v5, %v13812_v9  ;;  %16492 = vst [vmem:[#allocation32_spill] sm:$0xff] %v14937_v48  ;;  %v14948_v21 = vpop.f32.mrb[159].mxu1  ;;  %v8635_v5 = vmul.f32 -1.442695, %v14925_v22 }
 0x492   : > { %v10983_v59 = vpop.eup %10982  ;;  %11002 = vrcp.f32 %v3746_v3  ;;  %v3747_v18 = vadd.f32 1.0, %v10981_v26  ;;  %v16493_v3 = vld [vmem:[#allocation80_spill] sm:$0xff]  ;;  %v16494_v26 = vld [vmem:[#allocation83_spill] sm:$0xff]  ;;  %16495 = vst [vmem:[#allocation113_spill] sm:$0xff] %v14948_v21  ;;  %v14973_v42 = vpop.f32.mrb[160].mxu1 }
 0x493   : > { %v10985_v19 = vpop.eup %10984  ;;  %11004 = vrcp.f32 %v3748_v61  ;;  %v3749_v23 = vadd.f32 1.0, %v10983_v59  ;;  %v14941_v28 = vadd.f32 %v16493_v3, %v13819_v54  ;;  %v14945_v61 = vadd.f32 %v16494_v26, %v13898_v11  ;;  %v14977_v14 = vpop.f32.mrb[161].mxu1 }
 0x494   : > { %v10987_v4 = vpop.eup %10986  ;;  %11006 = vrcp.f32 %v3747_v18  ;;  %v3756_v31 = vadd.f32 1.0, %v10985_v19  ;;  %v8627_v59 = vmul.f32 -1.442695, %v14910_v34  ;;  %v8636_v18 = vmul.f32 -1.442695, %v14921_v38 }
 0x495   : > { %v10989_v50 = vpop.eup %10988  ;;  %11008 = vrcp.f32 %v3749_v23  ;;  %v8637_v3 = vmul.f32 -1.442695, %v14931_v36  ;;  %v8644_v26 = vmul.f32 -1.442695, %v14935_v12  ;;  %v8646_v23 = vmul.f32 -1.442695, %v14941_v28 }
 0x496   : > { %v10991_v29 = vpop.eup %10990  ;;  %11010 = vrcp.f32 %v3756_v31  ;;  %v8645_v21 = vmul.f32 -1.442695, %v14945_v61  ;;  %v16496_v31 = vld [vmem:[#allocation125_spill] sm:$0xff]  ;;  %v4686_v37 = vmul.f32 %v10987_v4, %v14793_v13 }
 0x497   : > { %v10993_v19 = vpop.eup %10992  ;;  %11012 = vpow2.f32 %v8626_v15  ;;  %v14959_v30 = vadd.f32 %v16496_v31, %v13910_v57  ;;  %v14971_v31 = vadd.f32 %v16498_v58, %v13819_v54  ;;  %v14981_v58 = vpop.f32.mrb[162].mxu1 }
 0x498   : > { %v10995_v48 = vpop.eup %10994  ;;  %11014 = vpow2.f32 %v8625_v6  ;;  %v4688_v6 = vmul.f32 %v10989_v50, %v14797_v39  ;;  %v4689_v39 = vmul.f32 %v10993_v19, %v14805_v7 }
 0x499   : > { %v10997_v10 = vpop.eup %10996  ;;  %v4696_v15 = vmul.f32 %v10995_v48, %v14809_v56  ;;  %11016 = vpow2.f32 %v8627_v59  ;;  %v4687_v56 = vmul.f32 %v10991_v29, %v14801_v0  ;;  %v8647_v0 = vmul.f32 -1.442695, %v14959_v30  ;;  %v14986_v29 = vpop.f32.mrb[163].mxu1 }
 0x49a   : > { %v10999_v41 = vpop.eup %10998  ;;  %v4698_v62 = vmul.f32 %v10997_v10, %v14813_v27  ;;  %11018 = vpow2.f32 %v8634_v45 }
 0x49b   : > { %v11001_v13 = vpop.eup %11000  ;;  %v4923_v48 = vpack.c.bf16 %v4696_v15, %v4686_v37  ;;  %v4697_v4 = vmul.f32 %v10999_v41, %v14817_v63  ;;  %11020 = vpow2.f32 %v8636_v18  ;;  %v8654_v41 = vmul.f32 -1.442695, %v14965_v40 }
 0x49c   : > { %v11003_v59 = vpop.eup %11002  ;;  %v4925_v27 = vpack.c.bf16 %v4698_v62, %v4688_v6  ;;  %v4699_v10 = vmul.f32 %v11001_v13, %v14830_v8  ;;  %11022 = vpow2.f32 %v8635_v5  ;;  %v8656_v8 = vmul.f32 -1.442695, %v14971_v31 }
 0x49d   : > { %v14983_v50 = vpop.eup %11004  ;;  %11024 = vpow2.f32 %v8637_v3  ;;  %v4924_v37 = vpack.c.bf16 %v4697_v4, %v4687_v56  ;;  %v14995_v19 = vmul.f32 %v11003_v59, %v14836_v25 }
 0x49e   : > { %v14988_v63 = vpop.eup %11006  ;;  %11026 = vpow2.f32 %v8644_v26  ;;  %v4926_v7 = vpack.c.bf16 %v4699_v10, %v4689_v39  ;;  %v16499_v10 = vld [vmem:[#allocation81_spill] sm:$0xff] }
 0x49f   : > { %v14991_v62 = vpop.eup %11008  ;;  %11028 = vpow2.f32 %v8646_v23  ;;  %5081 = vmatprep.subr.bf16.mxu1 %v4924_v37  ;;  %v15000_v23 = vpop.f32.mrb[164].mxu1 }
 0x4a0   : > { %v11011_v45 = vpop.eup %11010  ;;  %11030 = vpow2.f32 %v8645_v21  ;;  %5082 = vmatpush1.bf16.msra.mxu1 %v4923_v48  ;;  %5122 = vmatprep.subr.bf16.mxu0 %v4926_v7  ;;  %v15004_v13 = vpop.f32.mrb[165].mxu1  ;;  %v16500_v7 = vld [vmem:[#allocation86_spill] sm:$0xff]  ;;  %v15047_v21 = vadd.f32 %v14530_v52, %v13812_v9 }
 0x4a1   : > { %v11013_v18 = vpop.eup %11012  ;;  %v14998_v5 = vmul.f32 %v11011_v45, %v14869_v1  ;;  %11032 = vpow2.f32 %v8647_v0  ;;  %5123 = vmatpush1.bf16.msra.mxu0 %v4925_v27  ;;  %v15006_v1 = vpop.f32.mrb[166].mxu1  ;;  %v15012_v0 = vadd.f32 %v16499_v10, %v13898_v11  ;;  %v15020_v45 = vadd.f32 %v14475_v44, %v13812_v9 }
 0x4a2   : > { %v11015_v3 = vpop.eup %11014  ;;  %v3758_v26 = vadd.f32 1.0, %v11013_v18  ;;  %11034 = vpow2.f32 %v8654_v41  ;;  %v15008_v59 = vpop.f32.mrb[167].mxu1 }
 0x4a3   : > { %v11017_v15 = vpop.eup %11016  ;;  %v3757_v6 = vadd.f32 1.0, %v11015_v3  ;;  %11036 = vpow2.f32 %v8656_v8  ;;  %v15016_v8 = vadd.f32 %v16500_v7, %v13910_v57  ;;  %v8655_v44 = vmul.f32 -1.442695, %v15012_v0 }
 0x4a4   : > { %v11019_v25 = vpop.eup %11018  ;;  %11038 = vrcp.f32 %v3758_v26  ;;  %v3759_v56 = vadd.f32 1.0, %v11017_v15  ;;  %v15024_v26 = vadd.f32 %v14477_v16, %v13819_v54  ;;  %v8664_v10 = vmul.f32 -1.442695, %v15020_v45 }
 0x4a5   : > { %v11021_v48 = vpop.eup %11020  ;;  %11040 = vrcp.f32 %v3757_v6  ;;  %v3766_v4 = vadd.f32 1.0, %v11019_v25  ;;  %v15028_v25 = vadd.f32 %v14492_v47, %v13898_v11  ;;  %v8657_v16 = vmul.f32 -1.442695, %v15016_v8 }
 0x4a6   : > { %v11023_v39 = vpop.eup %11022  ;;  %11042 = vrcp.f32 %v3759_v56  ;;  %v3768_v27 = vadd.f32 1.0, %v11021_v48  ;;  %v8666_v7 = vmul.f32 -1.442695, %v15024_v26 }
 0x4a7   : > { %v11025_v37 = vpop.eup %11024  ;;  %11044 = vrcp.f32 %v3766_v4  ;;  %v3767_v41 = vadd.f32 1.0, %v11023_v39  ;;  %v15031_v4 = vpop.f32.mrb[168].mxu1 }
 0x4a8   : > { %v11027_v18 = vpop.eup %11026  ;;  %11046 = vrcp.f32 %v3768_v27  ;;  %v3769_v3 = vadd.f32 1.0, %v11025_v37  ;;  %16501 = vst [vmem:[#allocation59_spill] sm:$0xff] %v15031_v4  ;;  %v15035_v37 = vpop.f32.mrb[169].mxu1 }
 0x4a9   : > { %v11029_v15 = vpop.eup %11028  ;;  %11048 = vrcp.f32 %v3767_v41  ;;  %v3776_v6 = vadd.f32 1.0, %v11027_v18  ;;  %16502 = vst [vmem:[#allocation98_spill] sm:$0xff] %v15035_v37  ;;  %v15040_v18 = vadd.f32 %v14494_v46, %v13910_v57  ;;  %v15053_v46 = vadd.f32 %v14532_v32, %v13819_v54 }
 0x4aa   : > { %v11031_v56 = vpop.eup %11030  ;;  %11050 = vrcp.f32 %v3769_v3  ;;  %v3778_v48 = vadd.f32 1.0, %v11029_v15  ;;  %v15042_v3 = vpop.f32.mrb[170].mxu1  ;;  %v4707_v32 = vmul.f32 %v14988_v63, %v14854_v51  ;;  %v15079_v51 = vadd.f32 %v14546_v53, %v13819_v54 }
 0x4ab   : > { %v11033_v39 = vpop.eup %11032  ;;  %11052 = vrcp.f32 %v3776_v6  ;;  %v3777_v27 = vadd.f32 1.0, %v11031_v56  ;;  %16503 = vst [vmem:[#allocation99_spill] sm:$0xff] %v15042_v3  ;;  %v8665_v56 = vmul.f32 -1.442695, %v15028_v25  ;;  %v15049_v37 = vpop.f32.mrb[171].mxu1  ;;  %v15057_v3 = vadd.f32 %v14536_v2, %v13898_v11 }
 0x4ac   : > { %v11035_v41 = vpop.eup %11034  ;;  %11054 = vrcp.f32 %v3778_v48  ;;  %v3779_v47 = vadd.f32 1.0, %v11033_v39  ;;  %16504 = vst [vmem:[#allocation126_spill] sm:$0xff] %v15049_v37  ;;  %v15064_v37 = vadd.f32 %v14538_v43, %v13910_v57  ;;  %v15071_v2 = vadd.f32 %v14544_v33, %v13812_v9 }
 0x4ad   : > { %v11037_v15 = vpop.eup %11036  ;;  %11056 = vrcp.f32 %v3777_v27  ;;  %v3786_v6 = vadd.f32 1.0, %v11035_v41  ;;  %v4708_v41 = vmul.f32 %v14983_v50, %v14845_v49  ;;  %v4709_v49 = vmul.f32 %v14991_v62, %v14864_v17 }
 0x4ae   : > { %v11039_v48 = vpop.eup %11038  ;;  %11058 = vrcp.f32 %v3779_v47  ;;  %v3788_v39 = vadd.f32 1.0, %v11037_v15  ;;  %v8674_v33 = vmul.f32 -1.442695, %v15047_v21  ;;  %v15084_v17 = vadd.f32 %v14551_v20, %v13898_v11 }
 0x4af   : > { %v11041_v27 = vpop.eup %11040  ;;  %v4718_v52 = vmul.f32 %v11039_v48, %v14899_v35  ;;  %11060 = vrcp.f32 %v3786_v6  ;;  %v8667_v6 = vmul.f32 -1.442695, %v15040_v18  ;;  %v8675_v48 = vmul.f32 -1.442695, %v15057_v3 }
 0x4b0   : > { %v11043_v47 = vpop.eup %11042  ;;  %v4717_v15 = vmul.f32 %v11041_v27, %v14905_v60  ;;  %11062 = vrcp.f32 %v3788_v39  ;;  %v8684_v27 = vmul.f32 -1.442695, %v15071_v2  ;;  %v16505_v20 = vpack.c.bf16 %v14998_v5, %v14995_v19 }
 0x4b1   : > { %v11045_v4 = vpop.eup %11044  ;;  %v4935_v35 = vpack.c.bf16 %v4718_v52, %v4708_v41  ;;  %v4719_v50 = vmul.f32 %v11043_v47, %v14910_v34  ;;  %11064 = vpow2.f32 %v8655_v44  ;;  %v15086_v34 = vpop.f32.mrb[172].mxu1  ;;  %v8685_v5 = vmul.f32 -1.442695, %v15084_v17 }
 0x4b2   : > { %v11047_v43 = vpop.eup %11046  ;;  %11066 = vpow2.f32 %v8657_v16  ;;  %v4934_v60 = vpack.c.bf16 %v4717_v15, %v4707_v32  ;;  %v8676_v16 = vmul.f32 -1.442695, %v15053_v46  ;;  %v15090_v53 = vpop.f32.mrb[173].mxu1  ;;  %v4726_v52 = vmul.f32 %v11045_v4, %v14915_v24 }
 0x4b3   : > { %v11049_v63 = vpop.eup %11048  ;;  %11068 = vpow2.f32 %v8664_v10  ;;  %v4936_v62 = vpack.c.bf16 %v4719_v50, %v4709_v49  ;;  %v8677_v10 = vmul.f32 -1.442695, %v15064_v37  ;;  %v15097_v41 = vpop.f32.mrb[174].mxu1  ;;  %v8686_v32 = vmul.f32 -1.442695, %v15079_v51 }
 0x4b4   : > { %v11051_v44 = vpop.eup %11050  ;;  %11070 = vpow2.f32 %v8666_v7  ;;  %5083 = vmatprep.subr.bf16.mxu1 %v4934_v60  ;;  %v4728_v49 = vmul.f32 %v11047_v43, %v14921_v38  ;;  %v4727_v60 = vmul.f32 %v11049_v63, %v14925_v22 }
 0x4b5   : > { %v11053_v39 = vpop.eup %11052  ;;  %11072 = vpow2.f32 %v8665_v56  ;;  %5084 = vmatpush1.bf16.msra.mxu1 %v16505_v20  ;;  %5124 = vmatprep.subr.bf16.mxu0 %v4936_v62  ;;  %v15102_v56 = vpop.f32.mrb[175].mxu1 }
 0x4b6   : > { %v11055_v7 = vpop.eup %11054  ;;  %v4736_v47 = vmul.f32 %v11053_v39, %v14935_v12  ;;  %11074 = vpow2.f32 %v8667_v6  ;;  %5125 = vmatpush1.bf16.msra.mxu0 %v4935_v35  ;;  %16506 = vst [vmem:[#allocation123_spill] sm:$0xff] %v15102_v56  ;;  %v4729_v35 = vmul.f32 %v11051_v44, %v14931_v36  ;;  %v15115_v22 = vpop.f32.mrb[176].mxu1 }
 0x4b7   : > { %v11057_v15 = vpop.eup %11056  ;;  %v4738_v19 = vmul.f32 %v11055_v7, %v14941_v28  ;;  %11076 = vpow2.f32 %v8674_v33  ;;  %16507 = vst [vmem:[#allocation30_spill] sm:$0xff] %v15115_v22 }
 0x4b8   : > { %v11059_v50 = vpop.eup %11058  ;;  %v4943_v24 = vpack.c.bf16 %v4736_v47, %v4726_v52  ;;  %v4737_v12 = vmul.f32 %v11057_v15, %v14945_v61  ;;  %11078 = vpow2.f32 %v8676_v16  ;;  %v15117_v16 = vpop.f32.mrb[177].mxu1 }
 0x4b9   : > { %v15109_v4 = vpop.eup %11060  ;;  %v4945_v6 = vpack.c.bf16 %v4738_v19, %v4728_v49  ;;  %v4739_v62 = vmul.f32 %v11059_v50, %v14959_v30  ;;  %11080 = vpow2.f32 %v8675_v48  ;;  %16508 = vst [vmem:[#allocation104_spill] sm:$0xff] %v15117_v16  ;;  %v15119_v30 = vpop.f32.mrb[178].mxu1 }
 0x4ba   : > { %v15113_v38 = vpop.eup %11062  ;;  %11082 = vpow2.f32 %v8677_v10  ;;  %v4944_v28 = vpack.c.bf16 %v4737_v12, %v4727_v60  ;;  %16509 = vst [vmem:[#allocation105_spill] sm:$0xff] %v15119_v30  ;;  %v16510_v10 = vld [vmem:[#allocation65_spill] sm:$0xff]  ;;  %v15125_v20 = vpop.f32.mrb[179].mxu1 }
 0x4bb   : > { %v11065_v43 = vpop.eup %11064  ;;  %11084 = vpow2.f32 %v8684_v27  ;;  %v4946_v33 = vpack.c.bf16 %v4739_v62, %v4729_v35  ;;  %v15123_v27 = vadd.f32 %v16510_v10, %v13910_v57  ;;  %16511 = vst [vmem:[#allocation106_spill] sm:$0xff] %v15125_v20  ;;  %v16512_v12 = vld [vmem:[#allocation73_spill] sm:$0xff]  ;;  %v16527_v20 = vld [vmem:[#allocation48_spill] sm:$0xff] }
 0x4bc   : > { %v11067_v63 = vpop.eup %11066  ;;  %v3787_v61 = vadd.f32 1.0, %v11065_v43  ;;  %11086 = vpow2.f32 %v8686_v32  ;;  %5085 = vmatprep.subr.bf16.mxu1 %v4944_v28  ;;  %v15130_v35 = vadd.f32 %v16512_v12, %v13812_v9  ;;  %v1144_v28 = vld [vmem:[#allocation9 + $0x8] sm:$0x3]  ;;  %v15136_v43 = vpop.f32.mrb[180].mxu1 }
 0x4bd   : > { %v11069_v36 = vpop.eup %11068  ;;  %v3789_v44 = vadd.f32 1.0, %v11067_v63  ;;  %11088 = vpow2.f32 %v8685_v5  ;;  %5086 = vmatpush1.bf16.msra.mxu1 %v4943_v24  ;;  %5126 = vmatprep.subr.bf16.mxu0 %v4946_v33  ;;  %v8687_v50 = vmul.f32 -1.442695, %v15123_v27  ;;  %16514 = vst [vmem:[#allocation33_spill] sm:$0xff] %v15136_v43 }
 0x4be   : > { %v11071_v48 = vpop.eup %11070  ;;  %11090 = vrcp.f32 %v3787_v61  ;;  %v3796_v39 = vadd.f32 1.0, %v11069_v36  ;;  %5127 = vmatpush1.bf16.msra.mxu0 %v4945_v6  ;;  %v16513_v6 = vld [vmem:[#allocation37_spill] sm:$0xff]  ;;  %v16515_v61 = vld [vmem:[#allocation76_spill] sm:$0xff] }
 0x4bf   : > { %v11073_v7 = vpop.eup %11072  ;;  %11092 = vrcp.f32 %v3789_v44  ;;  %v3798_v52 = vadd.f32 1.0, %v11071_v48  ;;  %v15134_v62 = vadd.f32 %v16513_v6, %v13819_v54  ;;  %v15140_v36 = vadd.f32 %v16515_v61, %v13898_v11  ;;  %v16516_v44 = vld [vmem:[#allocation84_spill] sm:$0xff]  ;;  %v16522_v6 = vld [vmem:[#allocation41_spill] sm:$0xff] }
 0x4c0   : > { %v11075_v47 = vpop.eup %11074  ;;  %11094 = vrcp.f32 %v3796_v39  ;;  %v3797_v32 = vadd.f32 1.0, %v11073_v7  ;;  %v15144_v48 = vadd.f32 %v16516_v44, %v13910_v57  ;;  %v15146_v39 = vpop.f32.mrb[181].mxu1 }
 0x4c1   : > { %v11077_v15 = vpop.eup %11076  ;;  %11096 = vrcp.f32 %v3798_v52  ;;  %v3799_v49 = vadd.f32 1.0, %v11075_v47  ;;  %16517 = vst [vmem:[#allocation66_spill] sm:$0xff] %v15146_v39  ;;  %v16518_v52 = vld [vmem:[#allocation87_spill] sm:$0xff]  ;;  %v8696_v44 = vmul.f32 -1.442695, %v15134_v62  ;;  %v16526_v39 = vld [vmem:[#allocation29_spill] sm:$0xff] }
 0x4c2   : > { %v11079_v19 = vpop.eup %11078  ;;  %11098 = vrcp.f32 %v3797_v32  ;;  %v3806_v5 = vadd.f32 1.0, %v11077_v15  ;;  %v15150_v47 = vadd.f32 %v16518_v52, %v13812_v9  ;;  %v16519_v32 = vld [vmem:[#allocation57_spill] sm:$0xff] }
 0x4c3   : > { %v11081_v60 = vpop.eup %11080  ;;  %11100 = vrcp.f32 %v3799_v49  ;;  %v3808_v24 = vadd.f32 1.0, %v11079_v19  ;;  %v15154_v15 = vadd.f32 %v16519_v32, %v13819_v54  ;;  %v15156_v49 = vpop.f32.mrb[182].mxu1  ;;  %v8694_v54 = vmul.f32 -1.442695, %v15130_v35  ;;  %v16524_v32 = vld [vmem:[#allocation43_spill] sm:$0xff] }
 0x4c4   : > { %v11083_v33 = vpop.eup %11082  ;;  %11102 = vrcp.f32 %v3806_v5  ;;  %v3807_v63 = vadd.f32 1.0, %v11081_v60  ;;  %16520 = vst [vmem:[#allocation108_spill] sm:$0xff] %v15156_v49  ;;  %v16521_v60 = vld [vmem:[#allocation85_spill] sm:$0xff] }
 0x4c5   : > { %v11085_v10 = vpop.eup %11084  ;;  %11104 = vrcp.f32 %v3808_v24  ;;  %v3809_v7 = vadd.f32 1.0, %v11083_v33  ;;  %v15160_v12 = vadd.f32 %v16521_v60, %v13898_v11  ;;  %v15163_v24 = vrot.slane %v1144_v28, %v16522_v6  ;;  %v15165_v33 = vpop.f32.mrb[183].mxu1 }
 0x4c6   : > { %v11087_v19 = vpop.eup %11086  ;;  %11106 = vrcp.f32 %v3807_v63  ;;  %v3816_v5 = vadd.f32 1.0, %v11085_v10  ;;  %16523 = vst [vmem:[#allocation77_spill] sm:$0xff] %v15165_v33  ;;  %v8695_v10 = vmul.f32 -1.442695, %v15140_v36  ;;  %v15171_v11 = vrot.slane %v1144_v28, %v16524_v32  ;;  %v15192_v30 = vpop.f32.mrb[184].mxu1 }
 0x4c7   : > { %v11089_v9 = vpop.eup %11088  ;;  %11108 = vrcp.f32 %v3809_v7  ;;  %v3818_v61 = vadd.f32 1.0, %v11087_v19  ;;  %v8697_v6 = vmul.f32 -1.442695, %v15144_v48  ;;  %v8704_v33 = vmul.f32 -1.442695, %v15150_v47  ;;  %16528 = vst [vmem:[#allocation71_spill] sm:$0xff] %v15192_v30 }
 0x4c8   : > { %v11091_v52 = vpop.eup %11090  ;;  %11110 = vrcp.f32 %v3816_v5  ;;  %v3817_v63 = vadd.f32 1.0, %v11089_v9  ;;  %v8706_v7 = vmul.f32 -1.442695, %v15154_v15  ;;  %v8705_v49 = vmul.f32 -1.442695, %v15160_v12  ;;  %v16525_v5 = vld [vmem:[#allocation79_spill] sm:$0xff] }
 0x4c9   : > { %v11093_v60 = vpop.eup %11092  ;;  %11112 = vrcp.f32 %v3818_v61  ;;  %v15179_v9 = vadd.f32 %v16525_v5, %v13910_v57  ;;  %v15183_v28 = vadd.f32 %v16526_v39, %v15163_v24  ;;  %v4746_v61 = vmul.f32 %v15109_v4, %v14965_v40  ;;  %v16529_v5 = vld [vmem:[#allocation64_spill] sm:$0xff]  ;;  %v15201_v40 = vpop.f32.mrb[185].mxu1 }
 0x4ca   : > { %v11095_v19 = vpop.eup %11094  ;;  %11114 = vrcp.f32 %v3817_v63  ;;  %v15190_v63 = vadd.f32 %v16527_v20, %v15163_v24  ;;  %v4748_v57 = vmul.f32 %v15113_v38, %v14971_v31  ;;  %v15199_v22 = vadd.f32 %v16529_v5, %v15171_v11  ;;  %16530 = vst [vmem:[#allocation56_spill] sm:$0xff] %v15201_v40 }
 0x4cb   : > { %v11097_v32 = vpop.eup %11096  ;;  %v4756_v43 = vmul.f32 %v11095_v19, %v15020_v45  ;;  %11116 = vpow2.f32 %v8687_v50  ;;  %v4747_v4 = vmul.f32 %v11091_v52, %v15012_v0  ;;  %v15205_v19 = vpop.f32.mrb[186].mxu1  ;;  %v4749_v31 = vmul.f32 %v11093_v60, %v15016_v8 }
 0x4cc   : > { %v11099_v16 = vpop.eup %11098  ;;  %v4758_v39 = vmul.f32 %v11097_v32, %v15024_v26  ;;  %11118 = vpow2.f32 %v8694_v54  ;;  %16531 = vst [vmem:[#allocation109_spill] sm:$0xff] %v15205_v19  ;;  %v15209_v54 = vpop.f32.mrb[187].mxu1  ;;  %v8707_v0 = vmul.f32 -1.442695, %v15179_v9 }
 0x4cd   : > { %v11101_v45 = vpop.eup %11100  ;;  %v4953_v20 = vpack.c.bf16 %v4756_v43, %v4746_v61  ;;  %v4757_v50 = vmul.f32 %v11099_v16, %v15028_v25  ;;  %11120 = vpow2.f32 %v8696_v44  ;;  %16532 = vst [vmem:[#allocation112_spill] sm:$0xff] %v15209_v54  ;;  %v15211_v32 = vpop.f32.mrb[160].mxu0  ;;  %v16533_v25 = vld [vmem:[#allocation102_spill] sm:$0xff] }
 0x4ce   : > { %v11103_v30 = vpop.eup %11102  ;;  %v4955_v26 = vpack.c.bf16 %v4758_v39, %v4748_v57  ;;  %v4759_v38 = vmul.f32 %v11101_v45, %v15040_v18  ;;  %11122 = vpow2.f32 %v8695_v10  ;;  %v15216_v16 = vadd.f32 %v16533_v25, %v15171_v11  ;;  %v15218_v44 = vpop.f32.mrb[161].mxu0 }
 0x4cf   : > { %v11105_v5 = vpop.eup %11104  ;;  %11124 = vpow2.f32 %v8697_v6  ;;  %v4954_v43 = vpack.c.bf16 %v4757_v50, %v4747_v4  ;;  %v8398_v18 = vmul.f32 -1.442695, %v15183_v28  ;;  %v5017_v10 = vpop.f32.mrb[162].mxu0  ;;  %v8399_v6 = vmul.f32 -1.442695, %v15199_v22 }
 0x4d0   : > { %v11107_v8 = vpop.eup %11106  ;;  %11126 = vpow2.f32 %v8704_v33  ;;  %v4956_v52 = vpack.c.bf16 %v4759_v38, %v4749_v31  ;;  %v5018_v57 = vpop.f32.mrb[163].mxu0  ;;  %v8408_v45 = vmul.f32 -1.442695, %v15190_v63  ;;  %v4766_v4 = vmul.f32 %v11103_v30, %v15047_v21 }
 0x4d1   : > { %v15221_v60 = vpop.eup %11108  ;;  %11128 = vpow2.f32 %v8706_v7  ;;  %5087 = vmatprep.subr.bf16.mxu1 %v4954_v43  ;;  %v8409_v7 = vmul.f32 -1.442695, %v15216_v16  ;;  %v15230_v31 = vpop.f32.mrb[188].mxu1  ;;  %v15233_v25 = vmul.f32 %v11105_v5, %v15053_v46  ;;  %v4767_v21 = vmul.f32 %v11107_v8, %v15057_v3 }
 0x4d2   : > { %v11111_v39 = vpop.eup %11110  ;;  %11130 = vpow2.f32 %v8705_v49  ;;  %5088 = vmatpush1.bf16.msra.mxu1 %v4953_v20  ;;  %5128 = vmatprep.subr.bf16.mxu0 %v4956_v52  ;;  %16534 = vst [vmem:[#allocation114_spill] sm:$0xff] %v15230_v31  ;;  %v15238_v20 = vpop.f32.mrb[189].mxu1 }
 0x4d3   : > { %v11113_v33 = vpop.eup %11112  ;;  %v4776_v50 = vmul.f32 %v11111_v39, %v15071_v2  ;;  %11132 = vpow2.f32 %v8707_v0  ;;  %5129 = vmatpush1.bf16.msra.mxu0 %v4955_v26  ;;  %16535 = vst [vmem:[#allocation115_spill] sm:$0xff] %v15238_v20  ;;  %v15242_v26 = vpop.f32.mrb[190].mxu1 }
 0x4d4   : > { %v11115_v38 = vpop.eup %11114  ;;  %v15236_v49 = vmul.f32 %v11113_v33, %v15079_v51  ;;  %11134 = vpow2.f32 %v8398_v18  ;;  %16536 = vst [vmem:[#allocation116_spill] sm:$0xff] %v15242_v26  ;;  %v15246_v51 = vpop.f32.mrb[191].mxu1  ;;  %v16538_v33 = vld [vmem:[#allocation75_spill] sm:$0xff] }
 0x4d5   : > { %v11117_v43 = vpop.eup %11116  ;;  %v4963_v2 = vpack.c.bf16 %v4776_v50, %v4766_v4  ;;  %v4777_v30 = vmul.f32 %v11115_v38, %v15084_v17  ;;  %11136 = vpow2.f32 %v8399_v6  ;;  %16537 = vst [vmem:[#allocation117_spill] sm:$0xff] %v15246_v51  ;;  %v15250_v4 = vadd.f32 %v16538_v33, %v15163_v24 }
 0x4d6   : > { %v11119_v0 = vpop.eup %11118  ;;  %v3819_v5 = vadd.f32 1.0, %v11117_v43  ;;  %11138 = vpow2.f32 %v8408_v45  ;;  %v16540_v43 = vld [vmem:[#allocation38_spill] sm:$0xff]  ;;  %v16550_v54 = vpack.c.bf16 %v15236_v49, %v15233_v25 }
 0x4d7   : > { %v11121_v18 = vpop.eup %11120  ;;  %v3826_v52 = vadd.f32 1.0, %v11119_v0  ;;  %11140 = vpow2.f32 %v8409_v7  ;;  %v4964_v10 = vpack.c.bf16 %v4777_v30, %v4767_v21  ;;  %v16539_v7 = vld [vmem:[#allocation39_spill] sm:$0xff]  ;;  %v15258_v21 = vadd.f32 %v16540_v43, %v15163_v24 }
 0x4d8   : > { %v11123_v57 = vpop.eup %11122  ;;  %11142 = vrcp.f32 %v3819_v5  ;;  %v3828_v3 = vadd.f32 1.0, %v11121_v18  ;;  %v15254_v38 = vadd.f32 %v16539_v7, %v15171_v11 }
 0x4d9   : > { %v11125_v8 = vpop.eup %11124  ;;  %11144 = vrcp.f32 %v3826_v52  ;;  %v3827_v17 = vadd.f32 1.0, %v11123_v57  ;;  %5089 = vmatprep.subr.bf16.mxu1 %v4964_v10  ;;  %v8418_v10 = vmul.f32 -1.442695, %v15250_v4 }
 0x4da   : > { %v11127_v6 = vpop.eup %11126  ;;  %11146 = vrcp.f32 %v3828_v3  ;;  %v3829_v39 = vadd.f32 1.0, %v11125_v8  ;;  %5090 = vmatpush1.bf16.msra.mxu1 %v4963_v2  ;;  %v8419_v8 = vmul.f32 -1.442695, %v15254_v38 }
 0x4db   : > { %v11129_v45 = vpop.eup %11128  ;;  %11148 = vrcp.f32 %v3827_v17  ;;  %v3836_v50 = vadd.f32 1.0, %v11127_v6  ;;  %v8428_v17 = vmul.f32 -1.442695, %v15258_v21 }
 0x4dc   : > { %v11131_v30 = vpop.eup %11130  ;;  %11150 = vrcp.f32 %v3829_v39  ;;  %v3838_v0 = vadd.f32 1.0, %v11129_v45  ;;  %v16541_v39 = vld [vmem:[#allocation35_spill] sm:$0xff] }
 0x4dd   : > { %v11133_v5 = vpop.eup %11132  ;;  %11152 = vrcp.f32 %v3836_v50  ;;  %v3837_v18 = vadd.f32 1.0, %v11131_v30  ;;  %v15265_v45 = vadd.f32 %v16541_v39, %v15171_v11  ;;  %v16542_v50 = vld [vmem:[#allocation68_spill] sm:$0xff]  ;;  %v16545_v39 = vld [vmem:[#allocation95_spill] sm:$0xff] }
 0x4de   : > { %v11135_v52 = vpop.eup %11134  ;;  %11154 = vrcp.f32 %v3838_v0  ;;  %v3839_v2 = vadd.f32 1.0, %v11133_v5  ;;  %v15269_v7 = vadd.f32 %v16542_v50, %v15163_v24  ;;  %v16543_v0 = vld [vmem:[#allocation49_spill] sm:$0xff]  ;;  %v15281_v61 = vadd.f32 %v16545_v39, %v15171_v11  ;;  %v16546_v50 = vld [vmem:[#allocation91_spill] sm:$0xff]  ;;  %v16548_v39 = vld [vmem:[#allocation72_spill] sm:$0xff] }
 0x4df   : > { %v11137_v57 = vpop.eup %11136  ;;  %11156 = vrcp.f32 %v3837_v18  ;;  %v3530_v3 = vadd.f32 1.0, %v11135_v52  ;;  %v15273_v5 = vadd.f32 %v16543_v0, %v15171_v11  ;;  %v16544_v18 = vld [vmem:[#allocation94_spill] sm:$0xff]  ;;  %v15285_v46 = vadd.f32 %v16546_v50, %v15163_v24 }
 0x4e0   : > { %v11139_v6 = vpop.eup %11138  ;;  %11158 = vrcp.f32 %v3839_v2  ;;  %v3531_v33 = vadd.f32 1.0, %v11137_v57  ;;  %v15277_v52 = vadd.f32 %v16544_v18, %v15163_v24  ;;  %v16547_v18 = vld [vmem:[#allocation31_spill] sm:$0xff]  ;;  %v15297_v26 = vadd.f32 %v16548_v39, %v15163_v24 }
 0x4e1   : > { %v11141_v43 = vpop.eup %11140  ;;  %11160 = vrcp.f32 %v3530_v3  ;;  %v3540_v30 = vadd.f32 1.0, %v11139_v6  ;;  %v4769_v6 = vmul.f32 %v15221_v60, %v15064_v37  ;;  %v15292_v51 = vadd.f32 %v16547_v18, %v15171_v11 }
 0x4e2   : > { %v11143_v2 = vpop.eup %11142  ;;  %11162 = vrcp.f32 %v3531_v33  ;;  %v3541_v57 = vadd.f32 1.0, %v11141_v43  ;;  %v8429_v43 = vmul.f32 -1.442695, %v15265_v45  ;;  %v8438_v20 = vmul.f32 -1.442695, %v15269_v7 }
 0x4e3   : > { %v11145_v3 = vpop.eup %11144  ;;  %v4779_v0 = vmul.f32 %v11143_v2, %v15123_v27  ;;  %11164 = vrcp.f32 %v3540_v30  ;;  %v8439_v27 = vmul.f32 -1.442695, %v15273_v5  ;;  %v8448_v30 = vmul.f32 -1.442695, %v15277_v52 }
 0x4e4   : > { %v11147_v33 = vpop.eup %11146  ;;  %11166 = vrcp.f32 %v3541_v57  ;;  %v8449_v2 = vmul.f32 -1.442695, %v15281_v61  ;;  %v8458_v18 = vmul.f32 -1.442695, %v15285_v46  ;;  %v8459_v39 = vmul.f32 -1.442695, %v15292_v51 }
 0x4e5   : > { %v11149_v50 = vpop.eup %11148  ;;  %11168 = vpow2.f32 %v8418_v10  ;;  %v4966_v37 = vpack.c.bf16 %v4779_v0, %v4769_v6  ;;  %v16549_v10 = vld [vmem:[#allocation90_spill] sm:$0xff]  ;;  %v4788_v19 = vmul.f32 %v11147_v33, %v15134_v62 }
 0x4e6   : > { %v11151_v60 = vpop.eup %11150  ;;  %11170 = vpow2.f32 %v8419_v8  ;;  %v15307_v31 = vadd.f32 %v16549_v10, %v15171_v11  ;;  %v4786_v8 = vmul.f32 %v11145_v3, %v15130_v35  ;;  %v16551_v10 = vld [vmem:[#allocation58_spill] sm:$0xff] }
 0x4e7   : > { %v11153_v57 = vpop.eup %11152  ;;  %11172 = vpow2.f32 %v8428_v17  ;;  %5130 = vmatprep.subr.bf16.mxu0 %v4966_v37  ;;  %v8468_v17 = vmul.f32 -1.442695, %v15297_v26  ;;  %v15319_v56 = vadd.f32 %v16551_v10, %v15163_v24  ;;  %v4789_v25 = vmul.f32 %v11151_v60, %v15144_v48 }
 0x4e8   : > { %v11155_v6 = vpop.eup %11154  ;;  %v4796_v0 = vmul.f32 %v11153_v57, %v15150_v47  ;;  %11174 = vpow2.f32 %v8429_v43  ;;  %5131 = vmatpush1.bf16.msra.mxu0 %v16550_v54  ;;  %v4787_v47 = vmul.f32 %v11149_v50, %v15140_v36 }
 0x4e9   : > { %v11157_v37 = vpop.eup %11156  ;;  %v4798_v40 = vmul.f32 %v11155_v6, %v15154_v15  ;;  %11176 = vpow2.f32 %v8438_v20  ;;  %v8469_v20 = vmul.f32 -1.442695, %v15307_v31  ;;  %v8478_v36 = vmul.f32 -1.442695, %v15319_v56 }
 0x4ea   : > { %v11159_v35 = vpop.eup %11158  ;;  %v4973_v3 = vpack.c.bf16 %v4796_v0, %v4786_v8  ;;  %v4797_v43 = vmul.f32 %v11157_v37, %v15160_v12  ;;  %11178 = vpow2.f32 %v8439_v27  ;;  %v16552_v0 = vmov 1.0|1.0  }
 0x4eb   : > { %v11161_v54 = vpop.eup %11160  ;;  %v4975_v49 = vpack.c.bf16 %v4798_v40, %v4788_v19  ;;  %v4799_v62 = vmul.f32 %v11159_v35, %v15179_v9  ;;  %11180 = vpow2.f32 %v8448_v30 }
 0x4ec   : > { %v11163_v15 = vpop.eup %11162  ;;  %11182 = vpow2.f32 %v8449_v2  ;;  %v4974_v33 = vpack.c.bf16 %v4797_v43, %v4787_v47  ;;  %v4490_v12 = vmul.f32 %v11161_v54, %v15183_v28 }
 0x4ed   : > { %v11165_v57 = vpop.eup %11164  ;;  %11184 = vpow2.f32 %v8458_v18  ;;  %v4976_v6 = vpack.c.bf16 %v4799_v62, %v4789_v25  ;;  %v4491_v9 = vmul.f32 %v11163_v15, %v15199_v22  ;;  %v9488_v22 = vld [vmem:[#allocation11] ss:$16 sps:$4 sm:$0xff]  }
 0x4ee   : > { %v11167_v50 = vpop.eup %11166  ;;  %v4500_v27 = vmul.f32 %v11165_v57, %v15190_v63  ;;  %11186 = vpow2.f32 %v8459_v39  ;;  %5091 = vmatprep.subr.bf16.mxu1 %v4974_v33  ;;  %v9490_v63 = vld [vmem:[#allocation11 + $0x4] ss:$16 sps:$4 sm:$0xff]  }
 0x4ef   : > { %v11169_v48 = vpop.eup %11168  ;;  %v4501_v40 = vmul.f32 %v11167_v50, %v15216_v16  ;;  %11188 = vpow2.f32 %v8468_v17  ;;  %5132 = vmatprep.subr.bf16.mxu0 %v4976_v6  ;;  %5092 = vmatpush1.bf16.msra.mxu1 %v4973_v3  ;;  %v9496_v3 = vld [vmem:[#allocation11 + $0x24] ss:$16 sps:$4 sm:$0xff]  }
 0x4f0   : > { %v11171_v19 = vpop.eup %11170  ;;  %v4827_v60 = vpack.c.bf16 %v4500_v27, %v4490_v12  ;;  %v3550_v30 = vadd.f32 1.0, %v11169_v48  ;;  %11190 = vpow2.f32 %v8469_v20  ;;  %5133 = vmatpush1.bf16.msra.mxu0 %v4975_v49  ;;  %v16553_v25 = vld [vmem:[#allocation60_spill] sm:$0xff]  ;;  %v16555_v6 = vld [vmem:[#allocation74_spill] sm:$0xff]  ;;  %v15348_v27 = vadd.f32 %v14871_v55, %v15163_v24  ;;  %v16556_v48 = vld [vmem:[#allocation97_spill] sm:$0xff] }
 0x4f1   : > { %v11173_v2 = vpop.eup %11172  ;;  %v3551_v18 = vadd.f32 1.0, %v11171_v19  ;;  %11192 = vpow2.f32 %v8478_v36  ;;  %v4828_v28 = vpack.c.bf16 %v4501_v40, %v4491_v9  ;;  %7279 = vmatprep.subr.bf16.mxu0 %v9490_v63  ;;  %v15336_v49 = vadd.f32 %v16553_v25, %v15171_v11  ;;  %v16554_v62 = vld [vmem:[#allocation100_spill] sm:$0xff] }
 0x4f2   : > { %v11175_v39 = vpop.eup %11174  ;;  %11194 = vrcp.f32 %v3550_v30  ;;  %v3560_v8 = vadd.f32 1.0, %v11173_v2  ;;  %5094 = vmatmul.mubr.bf16.vlgmr.msra.gmra.mrb[192].mxu1 %v16552_v0  ;;  %v15340_v15 = vadd.f32 %v16554_v62, %v15163_v24  ;;  %v9494_v20 = vld [vmem:[#allocation11 + $0x20] ss:$16 sps:$4 sm:$0xff]   ;;  %v15344_v36 = vadd.f32 %v16555_v6, %v15171_v11  ;;  %v16558_v2 = vld [vmem:[#allocation111_spill] sm:$0xff] }
 0x4f3   : > { %v11177_v16 = vpop.eup %11176  ;;  %11196 = vrcp.f32 %v3551_v18  ;;  %v3561_v17 = vadd.f32 1.0, %v11175_v39  ;;  %5135 = vmatmul.mubr.bf16.vlgmr.msra.gmra.mrb[168].mxu0 %v16552_v0  ;;  %5143 = vmatprep.subr.bf16.mxu1 %v4828_v28  ;;  %v15352_v9 = vadd.f32 %v16556_v48, %v15171_v11  ;;  %v15360_v18 = vadd.f32 %v16558_v2, %v15171_v11  ;;  %v9502_v28 = vld [vmem:[#allocation11 + $0x44] ss:$16 sps:$4 sm:$0xff]   ;;  %v16559_v39 = vld [vmem:[#allocation103_spill] sm:$0xff] }
 0x4f4   : > { %v11179_v37 = vpop.eup %11178  ;;  %11198 = vrcp.f32 %v3560_v8  ;;  %v3570_v10 = vadd.f32 1.0, %v11177_v16  ;;  %5144 = vmatpush1.bf16.msra.mxu1 %v4827_v60  ;;  %5175 = vmatprep.mubr.bf16.mxu1 %v16552_v0  ;;  %v16557_v60 = vld [vmem:[#allocation110_spill] sm:$0xff]  ;;  %v15364_v8 = vadd.f32 %v16559_v39, %v15163_v24  ;;  %v8498_v25 = vmul.f32 -1.442695, %v15348_v27 }
 0x4f5   : > { %v11181_v35 = vpop.eup %11180  ;;  %11200 = vrcp.f32 %v3561_v17  ;;  %v3571_v47 = vadd.f32 1.0, %v11179_v37  ;;  %7280 = vmatpush1.bf16.msra.mxu0 %v9488_v22  ;;  %v15356_v30 = vadd.f32 %v16557_v60, %v15163_v24  ;;  %v11765_v22 = vmov 1966171168   ;;  %v9500_v17 = vld [vmem:[#allocation11 + $0x40] ss:$16 sps:$4 sm:$0xff]  }
 0x4f6   : > { %v11183_v43 = vpop.eup %11182  ;;  %11202 = vrcp.f32 %v3570_v10  ;;  %v3580_v54 = vadd.f32 1.0, %v11181_v35  ;;  %7281 = vmatprep.subr.bf16.mxu0 %v9496_v3  ;;  %v5199_v16 = vunpack.c.l.s4 %v11765_v22  ;;  %v8479_v35 = vmul.f32 -1.442695, %v15336_v49  ;;  %v9506_v60 = vld [vmem:[#allocation11 + $0x60] ss:$16 sps:$4 sm:$0xff]  }
 0x4f7   : > { %v11185_v33 = vpop.eup %11184  ;;  %11204 = vrcp.f32 %v3571_v47  ;;  %v3581_v57 = vadd.f32 1.0, %v11183_v43  ;;  %v8488_v47 = vmul.f32 -1.442695, %v15340_v15  ;;  %v8509_v48 = vmul.f32 -1.442695, %v15360_v18 }
 0x4f8   : > { %v11187_v50 = vpop.eup %11186  ;;  %11206 = vrcp.f32 %v3580_v54  ;;  %v3590_v12 = vadd.f32 1.0, %v11185_v33  ;;  %v8489_v54 = vmul.f32 -1.442695, %v15344_v36  ;;  %v8508_v33 = vmul.f32 -1.442695, %v15356_v30 }
 0x4f9   : > { %v11189_v40 = vpop.eup %11188  ;;  %11208 = vrcp.f32 %v3581_v57  ;;  %v3591_v19 = vadd.f32 1.0, %v11187_v50  ;;  %7282 = vmatpush1.bf16.msra.mxu0 %v9494_v20  ;;  %v8499_v20 = vmul.f32 -1.442695, %v15352_v9  ;;  %v16560_v57 = vld [vmem:[#allocation101_spill] sm:$0xff]  ;;  %v9508_v50 = vld [vmem:[#allocation11 + $0x64] ss:$16 sps:$4 sm:$0xff]  }
 0x4fa   : > { %v11191_v63 = vpop.eup %11190  ;;  %11210 = vrcp.f32 %v3590_v12  ;;  %v3600_v55 = vadd.f32 1.0, %v11189_v40  ;;  %7283 = vmatprep.subr.bf16.mxu0 %v9502_v28  ;;  %v15374_v6 = vadd.f32 %v16560_v57, %v15171_v11  ;;  %v8518_v40 = vmul.f32 -1.442695, %v15364_v8  ;;  %v9514_v57 = vld [vmem:[#allocation11 + $0x84] ss:$16 sps:$4 sm:$0xff]  }
 0x4fb   : > { %v11193_v37 = vpop.eup %11192  ;;  %11212 = vrcp.f32 %v3591_v19  ;;  %v3601_v10 = vadd.f32 1.0, %v11191_v63  ;;  %v5200_v19 = vunpack.c.0.s8 %v5199_v16  ;;  %v16562_v16 = vld [vmem:[#allocation50_spill] sm:$0xff] }
 0x4fc   : > { %v11195_v3 = vpop.eup %11194  ;;  %11214 = vrcp.f32 %v3600_v55  ;;  %v3610_v43 = vadd.f32 1.0, %v11193_v37  ;;  %v16561_v55 = vld [vmem:[#allocation141_spill] sm:$0xff] }
 0x4fd   : > { %v11197_v62 = vpop.eup %11196  ;;  %11216 = vrcp.f32 %v3601_v10  ;;  %7284 = vmatpush1.bf16.msra.mxu0 %v9500_v17  ;;  %v4510_v28 = vmul.f32 %v11195_v3, %v15250_v4  ;;  %v15382_v39 = vadd.f32 %v16561_v55, %v15163_v24  ;;  %v15388_v17 = vadd.f32 %v16562_v16, %v15171_v11 }
 0x4fe   : > { %v11199_v12 = vpop.eup %11198  ;;  %11218 = vrcp.f32 %v3610_v43  ;;  %7285 = vmatprep.subr.bf16.mxu0 %v9508_v50  ;;  %v4511_v37 = vmul.f32 %v11197_v62, %v15254_v38  ;;  %v16565_v62 = vld [vmem:[#allocation40_spill] sm:$0xff] }
 0x4ff   : > { %v11201_v2 = vpop.eup %11200  ;;  %v4520_v63 = vmul.f32 %v11199_v12, %v15258_v21  ;;  %11220 = vpow2.f32 %v8479_v35  ;;  %v8519_v21 = vmul.f32 -1.442695, %v15374_v6  ;;  %v16563_v35 = vld [vmem:[#allocation54_spill] sm:$0xff]  ;;  %v15400_v12 = vsub.s32 %v5200_v19, %v16565_v62 }
 0x500   : > { %v11203_v22 = vpop.eup %11202  ;;  %v4521_v10 = vmul.f32 %v11201_v2, %v15265_v45  ;;  %11222 = vpow2.f32 %v8488_v47  ;;  %v15393_v3 = vadd.f32 %v16563_v35, %v15163_v24  ;;  %v16564_v45 = vld [vmem:[#allocation96_spill] sm:$0xff]  ;;  %v8528_v55 = vmul.f32 -1.442695, %v15382_v39 }
 0x501   : > { %v11205_v43 = vpop.eup %11204  ;;  %v4837_v4 = vpack.c.bf16 %v4520_v63, %v4510_v28  ;;  %11224 = vpow2.f32 %v8489_v54  ;;  %v15397_v47 = vadd.f32 %v16564_v45, %v15171_v11  ;;  %7286 = vmatpush1.bf16.msra.mxu0 %v9506_v60  ;;  %v9512_v2 = vld [vmem:[#allocation11 + $0x80] ss:$16 sps:$4 sm:$0xff]   ;;  %v4530_v28 = vmul.f32 %v11203_v22, %v15269_v7  ;;  %v9520_v22 = vld [vmem:[#allocation11 + $0xa4] ss:$16 sps:$4 sm:$0xff]  }
 0x502   : > { %v11207_v50 = vpop.eup %11206  ;;  %11226 = vpow2.f32 %v8498_v25  ;;  %v4838_v38 = vpack.c.bf16 %v4521_v10, %v4511_v37  ;;  %7287 = vmatprep.subr.bf16.mxu0 %v9514_v57  ;;  %v4531_v37 = vmul.f32 %v11205_v43, %v15273_v5  ;;  %v8529_v19 = vmul.f32 -1.442695, %v15388_v17 }
 0x503   : > { %v11209_v54 = vpop.eup %11208  ;;  %v4540_v63 = vmul.f32 %v11207_v50, %v15277_v52  ;;  %11228 = vpow2.f32 %v8499_v20  ;;  %v5054_v16 = vpop.f32.mrb[164].mxu0  ;;  %v8538_v7 = vmul.f32 -1.442695, %v15393_v3  ;;  %v8539_v5 = vmul.f32 -1.442695, %v15397_v47 }
 0x504   : > { %v11211_v25 = vpop.eup %11210  ;;  %v4541_v10 = vmul.f32 %v11209_v54, %v15281_v61  ;;  %11230 = vpow2.f32 %v8508_v33  ;;  %5145 = vmatprep.subr.bf16.mxu1 %v4838_v38  ;;  %v5056_v60 = vpop.f32.mrb[165].mxu0  ;;  %v16566_v61 = vcombine.low %v15211_v32, %v15218_v44 }
 0x505   : > { %v11213_v35 = vpop.eup %11212  ;;  %v4847_v45 = vpack.c.bf16 %v4540_v63, %v4530_v28  ;;  %11232 = vpow2.f32 %v8509_v48  ;;  %5146 = vmatpush1.bf16.msra.mxu1 %v4837_v4  ;;  %v5195_v52 = vcombine.low %v5054_v16, %v5056_v60  ;;  %v5058_v20 = vpop.f32.mrb[166].mxu0  ;;  %7288 = vmatpush1.bf16.msra.mxu0 %v9512_v2  ;;  %v9518_v48 = vld [vmem:[#allocation11 + $0xa0] ss:$16 sps:$4 sm:$0xff]   ;;  %v4550_v38 = vmul.f32 %v11211_v25, %v15285_v46  ;;  %v9526_v46 = vld [vmem:[#allocation11 + $0xc4] ss:$16 sps:$4 sm:$0xff]  }
 0x506   : > { %v11215_v57 = vpop.eup %11214  ;;  %11234 = vpow2.f32 %v8518_v40  ;;  %v4848_v50 = vpack.c.bf16 %v4541_v10, %v4531_v37  ;;  %v15414_v33 = vrot.slane %v16566_v61, %v15400_v12  ;;  %v5059_v43 = vpop.f32.mrb[167].mxu0  ;;  %7289 = vmatprep.subr.bf16.mxu0 %v9520_v22  ;;  %v4551_v63 = vmul.f32 %v11213_v35, %v15292_v51  ;;  %v9524_v37 = vld [vmem:[#allocation11 + $0xc0] ss:$16 sps:$4 sm:$0xff]   ;;  %v9532_v35 = vld [vmem:[#allocation11 + $0xe4] ss:$16 sps:$4 sm:$0xff]  }
 0x507   : > { %v11217_v4 = vpop.eup %11216  ;;  %v4560_v54 = vmul.f32 %v11215_v57, %v15297_v26  ;;  %11236 = vpow2.f32 %v8519_v21  ;;  %v15419_v40 = vrot.slane %v5195_v52, %v15400_v12 }
 0x508   : > { %v15421_v28 = vpop.eup %11218  ;;  %v4561_v32 = vmul.f32 %v11217_v4, %v15307_v31  ;;  %11238 = vpow2.f32 %v8528_v55  ;;  %5147 = vmatprep.subr.bf16.mxu1 %v4848_v50  ;;  %v16568_v4 = vld [vmem:[#allocation113_spill] sm:$0xff] }
 0x509   : > { %v11221_v44 = vpop.eup %11220  ;;  %v4857_v2 = vpack.c.bf16 %v4560_v54, %v4550_v38  ;;  %11240 = vpow2.f32 %v8529_v19  ;;  %5148 = vmatpush1.bf16.msra.mxu1 %v4847_v45  ;;  %v5226_v26 = vcombine.low %v15414_v33, %v15419_v40  ;;  %7290 = vmatpush1.bf16.msra.mxu0 %v9518_v48  ;;  %v15433_v38 = vadd.f32 %v16568_v4, %v15171_v11  ;;  %v9538_v54 = vld [vmem:[#allocation11 + $0x104] ss:$16 sps:$4 sm:$0xff]   ;;  %v9595_v40 = vld [vmem:[#allocation11 + $0x22c] ss:$16 sps:$4 sm:$0xff]  }
 0x50a   : > { %v11223_v21 = vpop.eup %11222  ;;  %v3611_v16 = vadd.f32 1.0, %v11221_v44  ;;  %11242 = vpow2.f32 %v8538_v7  ;;  %v4858_v25 = vpack.c.bf16 %v4561_v32, %v4551_v63  ;;  %7291 = vmatprep.subr.bf16.mxu0 %v9526_v46  ;;  %v9530_v7 = vld [vmem:[#allocation11 + $0xe0] ss:$16 sps:$4 sm:$0xff]   ;;  %v15437_v44 = vadd.f32 %v14973_v42, %v15163_v24  ;;  %v9592_v33 = vld [vmem:[#allocation11 + $0x224] ss:$16 sps:$4 sm:$0xff]  }
 0x50b   : > { %v11225_v10 = vpop.eup %11224  ;;  %v3620_v51 = vadd.f32 1.0, %v11223_v21  ;;  %11244 = vpow2.f32 %v8539_v5  ;;  %v16567_v5 = vld [vmem:[#allocation32_spill] sm:$0xff] }
 0x50c   : > { %v11227_v31 = vpop.eup %11226  ;;  %11246 = vrcp.f32 %v3611_v16  ;;  %v3621_v55 = vadd.f32 1.0, %v11225_v10  ;;  %5149 = vmatprep.subr.bf16.mxu1 %v4858_v25  ;;  %v15429_v61 = vadd.f32 %v16567_v5, %v15163_v24  ;;  %v15441_v16 = vadd.f32 %v14977_v14, %v15171_v11 }
 0x50d   : > { %v11229_v19 = vpop.eup %11228  ;;  %11248 = vrcp.f32 %v3620_v51  ;;  %v3630_v60 = vadd.f32 1.0, %v11227_v31  ;;  %5150 = vmatpush1.bf16.msra.mxu1 %v4857_v2  ;;  %7292 = vmatpush1.bf16.msra.mxu0 %v9524_v37  ;;  %v9536_v2 = vld [vmem:[#allocation11 + $0x100] ss:$16 sps:$4 sm:$0xff]   ;;  %v15445_v25 = vadd.f32 %v14981_v58, %v15163_v24  ;;  %v15450_v51 = vadd.f32 %v14986_v29, %v15171_v11 }
 0x50e   : > { %v11231_v45 = vpop.eup %11230  ;;  %11250 = vrcp.f32 %v3621_v55  ;;  %v3631_v52 = vadd.f32 1.0, %v11229_v19  ;;  %7293 = vmatprep.subr.bf16.mxu0 %v9532_v35  ;;  %v8548_v42 = vmul.f32 -1.442695, %v15429_v61  ;;  %v8549_v14 = vmul.f32 -1.442695, %v15433_v38 }
 0x50f   : > { %v11233_v20 = vpop.eup %11232  ;;  %11252 = vrcp.f32 %v3630_v60  ;;  %v3640_v22 = vadd.f32 1.0, %v11231_v45  ;;  %v15455_v19 = vadd.f32 %v15000_v23, %v15163_v24  ;;  %v8558_v35 = vmul.f32 -1.442695, %v15437_v44 }
 0x510   : > { %v11235_v57 = vpop.eup %11234  ;;  %11254 = vrcp.f32 %v3631_v52  ;;  %v3641_v50 = vadd.f32 1.0, %v11233_v20  ;;  %v15460_v45 = vadd.f32 %v15004_v13, %v15171_v11  ;;  %v8559_v52 = vmul.f32 -1.442695, %v15441_v16 }
 0x511   : > { %v11237_v43 = vpop.eup %11236  ;;  %11256 = vrcp.f32 %v3640_v22  ;;  %v3650_v48 = vadd.f32 1.0, %v11235_v57  ;;  %7294 = vmatpush1.bf16.msra.mxu0 %v9530_v7  ;;  %v8568_v7 = vmul.f32 -1.442695, %v15445_v25  ;;  %v15466_v23 = vadd.f32 %v15006_v1, %v15163_v24 }
 0x512   : > { %v11239_v63 = vpop.eup %11238  ;;  %11258 = vrcp.f32 %v3641_v50  ;;  %v3651_v32 = vadd.f32 1.0, %v11237_v43  ;;  %7295 = vmatprep.subr.bf16.mxu0 %v9538_v54  ;;  %v4570_v22 = vmul.f32 %v15421_v28, %v15319_v56  ;;  %v8569_v13 = vmul.f32 -1.442695, %v15450_v51 }
 0x513   : > { %v11241_v46 = vpop.eup %11240  ;;  %11260 = vrcp.f32 %v3650_v48  ;;  %v3660_v21 = vadd.f32 1.0, %v11239_v63  ;;  %v8578_v48 = vmul.f32 -1.442695, %v15455_v19  ;;  %v8579_v54 = vmul.f32 -1.442695, %v15460_v45 }
 0x514   : > { %v11243_v37 = vpop.eup %11242  ;;  %11262 = vrcp.f32 %v3651_v32  ;;  %v3661_v10 = vadd.f32 1.0, %v11241_v46  ;;  %v15478_v56 = vadd.f32 %v15008_v59, %v15171_v11  ;;  %v8588_v63 = vmul.f32 -1.442695, %v15466_v23 }
 0x515   : > { %v11245_v31 = vpop.eup %11244  ;;  %11264 = vrcp.f32 %v3660_v21  ;;  %v3670_v55 = vadd.f32 1.0, %v11243_v37  ;;  %7296 = vmatpush1.bf16.msra.mxu0 %v9536_v2  ;;  %v16570_v21 = vld [vmem:[#allocation98_spill] sm:$0xff] }
 0x516   : > { %v11247_v58 = vpop.eup %11246  ;;  %11266 = vrcp.f32 %v3661_v10  ;;  %v3671_v60 = vadd.f32 1.0, %v11245_v31  ;;  %v15489_v37 = vadd.f32 %v16570_v21, %v15171_v11  ;;  %v16571_v31 = vld [vmem:[#allocation99_spill] sm:$0xff] }
 0x517   : > { %v11249_v29 = vpop.eup %11248  ;;  %11268 = vrcp.f32 %v3670_v55  ;;  %v4571_v5 = vmul.f32 %v11247_v58, %v15336_v49  ;;  %v16569_v49 = vld [vmem:[#allocation59_spill] sm:$0xff]  ;;  %v15495_v55 = vadd.f32 %v16571_v31, %v15163_v24  ;;  %v15519_v31 = vadd.f32 %v15090_v53, %v15171_v11 }
 0x518   : > { %v11251_v20 = vpop.eup %11250  ;;  %v4580_v57 = vmul.f32 %v11249_v29, %v15340_v15  ;;  %11270 = vrcp.f32 %v3671_v60 }
 0x519   : > { %v11253_v50 = vpop.eup %11252  ;;  %v4581_v43 = vmul.f32 %v11251_v20, %v15344_v36  ;;  %11272 = vpow2.f32 %v8548_v42  ;;  %v15483_v36 = vadd.f32 %v16569_v49, %v15163_v24 }
 0x51a   : > { %v11255_v4 = vpop.eup %11254  ;;  %v4867_v1 = vpack.c.bf16 %v4580_v57, %v4570_v22  ;;  %11274 = vpow2.f32 %v8549_v14  ;;  %v4590_v2 = vmul.f32 %v11253_v50, %v15348_v27  ;;  %v8608_v57 = vmul.f32 -1.442695, %v15495_v55 }
 0x51b   : > { %v11257_v15 = vpop.eup %11256  ;;  %11276 = vpow2.f32 %v8558_v35  ;;  %v4868_v28 = vpack.c.bf16 %v4581_v43, %v4571_v5  ;;  %v4591_v10 = vmul.f32 %v11255_v4, %v15352_v9  ;;  %v8598_v35 = vmul.f32 -1.442695, %v15483_v36 }
 0x51c   : > { %v11259_v32 = vpop.eup %11258  ;;  %v4600_v46 = vmul.f32 %v11257_v15, %v15356_v30  ;;  %11278 = vpow2.f32 %v8559_v52  ;;  %v8589_v30 = vmul.f32 -1.442695, %v15478_v56  ;;  %v8599_v52 = vmul.f32 -1.442695, %v15489_v37 }
 0x51d   : > { %v11261_v59 = vpop.eup %11260  ;;  %v4601_v42 = vmul.f32 %v11259_v32, %v15360_v18  ;;  %11280 = vpow2.f32 %v8568_v7  ;;  %5151 = vmatprep.subr.bf16.mxu1 %v4868_v28  ;;  %v16572_v32 = vld [vmem:[#allocation126_spill] sm:$0xff] }
 0x51e   : > { %v11263_v14 = vpop.eup %11262  ;;  %v4877_v27 = vpack.c.bf16 %v4600_v46, %v4590_v2  ;;  %11282 = vpow2.f32 %v8569_v13  ;;  %5152 = vmatpush1.bf16.msra.mxu1 %v4867_v1  ;;  %v4610_v18 = vmul.f32 %v11261_v59, %v15364_v8  ;;  %v15511_v2 = vadd.f32 %v16572_v32, %v15171_v11 }
 0x51f   : > { %v11265_v58 = vpop.eup %11264  ;;  %11284 = vpow2.f32 %v8578_v48  ;;  %v4878_v60 = vpack.c.bf16 %v4601_v42, %v4591_v10  ;;  %v4611_v20 = vmul.f32 %v11263_v14, %v15374_v6  ;;  %v15515_v59 = vadd.f32 %v15086_v34, %v15163_v24 }
 0x520   : > { %v11267_v9 = vpop.eup %11266  ;;  %v4620_v29 = vmul.f32 %v11265_v58, %v15382_v39  ;;  %11286 = vpow2.f32 %v8579_v54  ;;  %v8609_v34 = vmul.f32 -1.442695, %v15511_v2 }
 0x521   : > { %v15502_v7 = vpop.eup %11268  ;;  %v4621_v22 = vmul.f32 %v11267_v9, %v15388_v17  ;;  %11288 = vpow2.f32 %v8588_v63  ;;  %5153 = vmatprep.subr.bf16.mxu1 %v4878_v60 }
 0x522   : > { %v15507_v13 = vpop.eup %11270  ;;  %v4887_v50 = vpack.c.bf16 %v4620_v29, %v4610_v18  ;;  %11290 = vpow2.f32 %v8589_v30  ;;  %5154 = vmatpush1.bf16.msra.mxu1 %v4877_v27  ;;  %v15523_v30 = vadd.f32 %v15097_v41, %v15163_v24  ;;  %v8618_v29 = vmul.f32 -1.442695, %v15515_v59 }
 0x523   : > { %v11273_v8 = vpop.eup %11272  ;;  %11292 = vpow2.f32 %v8598_v35  ;;  %v4888_v39 = vpack.c.bf16 %v4621_v22, %v4611_v20  ;;  %v16573_v35 = vld [vmem:[#allocation123_spill] sm:$0xff] }
 0x524   : > { %v11275_v5 = vpop.eup %11274  ;;  %v3680_v43 = vadd.f32 1.0, %v11273_v8  ;;  %11294 = vpow2.f32 %v8599_v52  ;;  %v15528_v9 = vadd.f32 %v16573_v35, %v15171_v11  ;;  %v16574_v52 = vld [vmem:[#allocation30_spill] sm:$0xff] }
 0x525   : > { %v11277_v48 = vpop.eup %11276  ;;  %v3681_v4 = vadd.f32 1.0, %v11275_v5  ;;  %11296 = vpow2.f32 %v8608_v57  ;;  %5155 = vmatprep.subr.bf16.mxu1 %v4888_v39  ;;  %v15533_v20 = vadd.f32 %v16574_v52, %v15163_v24  ;;  %v8619_v57 = vmul.f32 -1.442695, %v15519_v31 }
 0x526   : > { %v11279_v6 = vpop.eup %11278  ;;  %11298 = vrcp.f32 %v3680_v43  ;;  %v3690_v17 = vadd.f32 1.0, %v11277_v48  ;;  %5156 = vmatpush1.bf16.msra.mxu1 %v4887_v50  ;;  %v16575_v50 = vld [vmem:[#allocation104_spill] sm:$0xff]  ;;  %v8628_v43 = vmul.f32 -1.442695, %v15523_v30  ;;  %v16576_v48 = vld [vmem:[#allocation105_spill] sm:$0xff] }
 0x527   : > { %v11281_v1 = vpop.eup %11280  ;;  %11300 = vrcp.f32 %v3681_v4  ;;  %v3691_v54 = vadd.f32 1.0, %v11279_v6  ;;  %v15538_v8 = vadd.f32 %v16575_v50, %v15171_v11  ;;  %v15543_v4 = vadd.f32 %v16576_v48, %v15163_v24 }
 0x528   : > { %v11283_v15 = vpop.eup %11282  ;;  %11302 = vrcp.f32 %v3690_v17  ;;  %v3700_v28 = vadd.f32 1.0, %v11281_v1  ;;  %v4630_v17 = vmul.f32 %v15502_v7, %v15393_v3  ;;  %v16577_v3 = vld [vmem:[#allocation106_spill] sm:$0xff] }
 0x529   : > { %v11285_v63 = vpop.eup %11284  ;;  %11304 = vrcp.f32 %v3691_v54  ;;  %v3701_v49 = vadd.f32 1.0, %v11283_v15  ;;  %v8629_v54 = vmul.f32 -1.442695, %v15528_v9 }
 0x52a   : > { %v11287_v46 = vpop.eup %11286  ;;  %11306 = vrcp.f32 %v3700_v28  ;;  %v3710_v21 = vadd.f32 1.0, %v11285_v63  ;;  %v4631_v28 = vmul.f32 %v15507_v13, %v15397_v47  ;;  %v16578_v47 = vld [vmem:[#allocation33_spill] sm:$0xff] }
 0x52b   : > { %v11289_v10 = vpop.eup %11288  ;;  %11308 = vrcp.f32 %v3701_v49  ;;  %v3711_v42 = vadd.f32 1.0, %v11287_v46  ;;  %v8638_v49 = vmul.f32 -1.442695, %v15533_v20 }
 0x52c   : > { %v11291_v14 = vpop.eup %11290  ;;  %11310 = vrcp.f32 %v3710_v21  ;;  %v3720_v27 = vadd.f32 1.0, %v11289_v10  ;;  %v8639_v21 = vmul.f32 -1.442695, %v15538_v8 }
 0x52d   : > { %v11293_v58 = vpop.eup %11292  ;;  %11312 = vrcp.f32 %v3711_v42  ;;  %v3721_v60 = vadd.f32 1.0, %v11291_v14  ;;  %v8648_v42 = vmul.f32 -1.442695, %v15543_v4 }
 0x52e   : > { %v11295_v18 = vpop.eup %11294  ;;  %11314 = vrcp.f32 %v3720_v27  ;;  %v3730_v53 = vadd.f32 1.0, %v11293_v58  ;;  %v16579_v58 = vld [vmem:[#allocation66_spill] sm:$0xff] }
 0x52f   : > { %v11297_v41 = vpop.eup %11296  ;;  %11316 = vrcp.f32 %v3721_v60  ;;  %v3731_v22 = vadd.f32 1.0, %v11295_v18  ;;  %v15567_v60 = vadd.f32 %v16579_v58, %v15171_v11 }
 0x530   : > { %v11299_v39 = vpop.eup %11298  ;;  %11318 = vrcp.f32 %v3730_v53  ;;  %v3740_v5 = vadd.f32 1.0, %v11297_v41  ;;  %v16580_v53 = vld [vmem:[#allocation108_spill] sm:$0xff]  ;;  %v16581_v41 = vld [vmem:[#allocation77_spill] sm:$0xff] }
 0x531   : > { %v11301_v6 = vpop.eup %11300  ;;  %v4640_v1 = vmul.f32 %v11299_v39, %v15429_v61  ;;  %11320 = vrcp.f32 %v3731_v22  ;;  %v15556_v61 = vadd.f32 %v16577_v3, %v15171_v11  ;;  %v15578_v22 = vadd.f32 %v16581_v41, %v15171_v11  ;;  %v9542_v41 = vld [vmem:[#allocation11 + $0x120] ss:$16 sps:$4 sm:$0xff]  }
 0x532   : > { %v11303_v15 = vpop.eup %11302  ;;  %v4641_v63 = vmul.f32 %v11301_v6, %v15433_v38  ;;  %11322 = vrcp.f32 %v3740_v5  ;;  %v15561_v38 = vadd.f32 %v16578_v47, %v15163_v24 }
 0x533   : > { %v11305_v32 = vpop.eup %11304  ;;  %v4897_v46 = vpack.c.bf16 %v4640_v1, %v4630_v17  ;;  %11324 = vpow2.f32 %v8609_v34  ;;  %v4650_v14 = vmul.f32 %v11303_v15, %v15437_v44 }
 0x534   : > { %v11307_v7 = vpop.eup %11306  ;;  %11326 = vpow2.f32 %v8618_v29  ;;  %v4898_v10 = vpack.c.bf16 %v4641_v63, %v4631_v28  ;;  %v4651_v35 = vmul.f32 %v11305_v32, %v15441_v16  ;;  %v15573_v29 = vadd.f32 %v16580_v53, %v15163_v24 }
 0x535   : > { %v11309_v13 = vpop.eup %11308  ;;  %v4660_v27 = vmul.f32 %v11307_v7, %v15445_v25  ;;  %11328 = vpow2.f32 %v8619_v57  ;;  %v8649_v25 = vmul.f32 -1.442695, %v15556_v61 }
 0x536   : > { %v11311_v34 = vpop.eup %11310  ;;  %v4661_v18 = vmul.f32 %v11309_v13, %v15450_v51  ;;  %11330 = vpow2.f32 %v8628_v43  ;;  %5157 = vmatprep.subr.bf16.mxu1 %v4898_v10  ;;  %v8658_v51 = vmul.f32 -1.442695, %v15561_v38  ;;  %v8659_v43 = vmul.f32 -1.442695, %v15567_v60 }
 0x537   : > { %v11313_v52 = vpop.eup %11312  ;;  %v4907_v44 = vpack.c.bf16 %v4660_v27, %v4650_v14  ;;  %11332 = vpow2.f32 %v8629_v54  ;;  %5158 = vmatpush1.bf16.msra.mxu1 %v4897_v46  ;;  %v4670_v39 = vmul.f32 %v11311_v34, %v15455_v19  ;;  %v8668_v1 = vmul.f32 -1.442695, %v15573_v29  ;;  %v16582_v34 = vld [vmem:[#allocation71_spill] sm:$0xff] }
 0x538   : > { %v11315_v57 = vpop.eup %11314  ;;  %11334 = vpow2.f32 %v8638_v49  ;;  %v4908_v16 = vpack.c.bf16 %v4661_v18, %v4651_v35  ;;  %v4671_v6 = vmul.f32 %v11313_v52, %v15460_v45  ;;  %v8669_v19 = vmul.f32 -1.442695, %v15578_v22  ;;  %v9544_v18 = vld [vmem:[#allocation11 + $0x124] ss:$16 sps:$4 sm:$0xff]  }
 0x539   : > { %v11317_v50 = vpop.eup %11316  ;;  %v4680_v5 = vmul.f32 %v11315_v57, %v15466_v23  ;;  %11336 = vpow2.f32 %v8639_v21  ;;  %v15600_v35 = vadd.f32 %v16582_v34, %v15163_v24  ;;  %7297 = vmatprep.subr.bf16.mxu0 %v9544_v18  ;;  %v16589_v34 = vld [vmem:[#allocation117_spill] sm:$0xff] }
 0x53a   : > { %v11319_v48 = vpop.eup %11318  ;;  %v4681_v17 = vmul.f32 %v11317_v50, %v15478_v56  ;;  %11338 = vpow2.f32 %v8648_v42  ;;  %5159 = vmatprep.subr.bf16.mxu1 %v4908_v16  ;;  %7298 = vmatpush1.bf16.msra.mxu0 %v9542_v41  ;;  %v15635_v18 = vadd.f32 %v16589_v34, %v15171_v11 }
 0x53b   : > { %v15587_v54 = vpop.eup %11320  ;;  %v4917_v15 = vpack.c.bf16 %v4680_v5, %v4670_v39  ;;  %11340 = vpow2.f32 %v8649_v25  ;;  %5160 = vmatpush1.bf16.msra.mxu1 %v4907_v44  ;;  %v15591_v49 = vmul.f32 %v11319_v48, %v15483_v36  ;;  %v16583_v44 = vld [vmem:[#allocation56_spill] sm:$0xff] }
 0x53c   : > { %v11323_v23 = vpop.eup %11322  ;;  %11342 = vpow2.f32 %v8658_v51  ;;  %v4918_v28 = vpack.c.bf16 %v4681_v17, %v4671_v6  ;;  %v15604_v25 = vadd.f32 %v16583_v44, %v15171_v11  ;;  %v16584_v51 = vld [vmem:[#allocation109_spill] sm:$0xff]  ;;  %v8678_v6 = vmul.f32 -1.442695, %v15600_v35  ;;  %v16585_v17 = vld [vmem:[#allocation112_spill] sm:$0xff] }
 0x53d   : > { %v11325_v63 = vpop.eup %11324  ;;  %v15594_v45 = vmul.f32 %v11323_v23, %v15495_v55  ;;  %11344 = vpow2.f32 %v8659_v43  ;;  %v15608_v50 = vadd.f32 %v16584_v51, %v15163_v24 }
 0x53e   : > { %v11327_v56 = vpop.eup %11326  ;;  %v3741_v32 = vadd.f32 1.0, %v11325_v63  ;;  %11346 = vpow2.f32 %v8668_v1  ;;  %5161 = vmatprep.subr.bf16.mxu1 %v4918_v28  ;;  %v15613_v1 = vadd.f32 %v16585_v17, %v15171_v11  ;;  %v8679_v28 = vmul.f32 -1.442695, %v15604_v25  ;;  %v16586_v63 = vld [vmem:[#allocation114_spill] sm:$0xff] }
 0x53f   : > { %v11329_v46 = vpop.eup %11328  ;;  %v4927_v21 = vpack.c.bf16 %v15594_v45, %v15591_v49  ;;  %v3750_v3 = vadd.f32 1.0, %v11327_v56  ;;  %11348 = vpow2.f32 %v8669_v19  ;;  %5162 = vmatpush1.bf16.msra.mxu1 %v4917_v15  ;;  %v9550_v15 = vld [vmem:[#allocation11 + $0x144] ss:$16 sps:$4 sm:$0xff]   ;;  %v15618_v56 = vadd.f32 %v16586_v63, %v15163_v24 }
 0x540   : > { %v11331_v7 = vpop.eup %11330  ;;  %11350 = vrcp.f32 %v3741_v32  ;;  %v3751_v10 = vadd.f32 1.0, %v11329_v46  ;;  %v9548_v32 = vld [vmem:[#allocation11 + $0x140] ss:$16 sps:$4 sm:$0xff]   ;;  %7299 = vmatprep.subr.bf16.mxu0 %v9550_v15  ;;  %v9568_v63 = vld [vmem:[#allocation11 + $0x1a4] ss:$16 sps:$4 sm:$0xff]  }
 0x541   : > { %v11333_v36 = vpop.eup %11332  ;;  %11352 = vrcp.f32 %v3750_v3  ;;  %v3760_v42 = vadd.f32 1.0, %v11331_v7  ;;  %v8688_v7 = vmul.f32 -1.442695, %v15608_v50  ;;  %7300 = vmatpush1.bf16.msra.mxu0 %v9548_v32 }
 0x542   : > { %v11335_v55 = vpop.eup %11334  ;;  %11354 = vrcp.f32 %v3751_v10  ;;  %v3761_v47 = vadd.f32 1.0, %v11333_v36  ;;  %v16587_v10 = vld [vmem:[#allocation115_spill] sm:$0xff] }
 0x543   : > { %v11337_v13 = vpop.eup %11336  ;;  %11356 = vrcp.f32 %v3760_v42  ;;  %v3770_v14 = vadd.f32 1.0, %v11335_v55  ;;  %v15623_v36 = vadd.f32 %v16587_v10, %v15171_v11  ;;  %v4691_v55 = vmul.f32 %v15587_v54, %v15489_v37  ;;  %v9554_v54 = vld [vmem:[#allocation11 + $0x160] ss:$16 sps:$4 sm:$0xff]  }
 0x544   : > { %v11339_v27 = vpop.eup %11338  ;;  %11358 = vrcp.f32 %v3761_v47  ;;  %v3771_v58 = vadd.f32 1.0, %v11337_v13  ;;  %v16588_v13 = vld [vmem:[#allocation116_spill] sm:$0xff] }
 0x545   : > { %v11341_v53 = vpop.eup %11340  ;;  %11360 = vrcp.f32 %v3770_v14  ;;  %v3780_v52 = vadd.f32 1.0, %v11339_v27  ;;  %v15630_v14 = vadd.f32 %v16588_v13, %v15163_v24 }
 0x546   : > { %v11343_v57 = vpop.eup %11342  ;;  %11362 = vrcp.f32 %v3771_v58  ;;  %v3781_v16 = vadd.f32 1.0, %v11341_v53  ;;  %v8689_v58 = vmul.f32 -1.442695, %v15613_v1  ;;  %v9556_v53 = vld [vmem:[#allocation11 + $0x164] ss:$16 sps:$4 sm:$0xff]  }
 0x547   : > { %v11345_v39 = vpop.eup %11344  ;;  %11364 = vrcp.f32 %v3780_v52  ;;  %v3790_v5 = vadd.f32 1.0, %v11343_v57  ;;  %v8699_v57 = vmul.f32 -1.442695, %v15623_v36  ;;  %7301 = vmatprep.subr.bf16.mxu0 %v9556_v53 }
 0x548   : > { %v11347_v43 = vpop.eup %11346  ;;  %11366 = vrcp.f32 %v3781_v16  ;;  %v3791_v48 = vadd.f32 1.0, %v11345_v39  ;;  %v8708_v39 = vmul.f32 -1.442695, %v15630_v14  ;;  %7302 = vmatpush1.bf16.msra.mxu0 %v9554_v54  ;;  %v9586_v54 = vld [vmem:[#allocation11 + $0x204] ss:$16 sps:$4 sm:$0xff]  }
 0x549   : > { %v11349_v19 = vpop.eup %11348  ;;  %11368 = vrcp.f32 %v3790_v5  ;;  %v3800_v23 = vadd.f32 1.0, %v11347_v43 }
 0x54a   : > { %v11351_v46 = vpop.eup %11350  ;;  %11370 = vrcp.f32 %v3791_v48  ;;  %v3801_v3 = vadd.f32 1.0, %v11349_v19 }
 0x54b   : > { %v11353_v42 = vpop.eup %11352  ;;  %v4701_v47 = vmul.f32 %v11351_v46, %v15511_v2  ;;  %11372 = vrcp.f32 %v3800_v23  ;;  %v8698_v2 = vmul.f32 -1.442695, %v15618_v56  ;;  %v9574_v46 = vld [vmem:[#allocation11 + $0x1c4] ss:$16 sps:$4 sm:$0xff]  }
 0x54c   : > { %v11355_v27 = vpop.eup %11354  ;;  %11374 = vrcp.f32 %v3801_v3  ;;  %v4710_v24 = vmul.f32 %v11353_v42, %v15515_v59  ;;  %v8709_v59 = vmul.f32 -1.442695, %v15635_v18  ;;  %v9572_v42 = vld [vmem:[#allocation11 + $0x1c0] ss:$16 sps:$4 sm:$0xff]  }
 0x54d   : > { %v11357_v52 = vpop.eup %11356  ;;  %11376 = vpow2.f32 %v8678_v6  ;;  %v4928_v37 = vpack.c.bf16 %v4701_v47, %v4691_v55  ;;  %v4711_v11 = vmul.f32 %v11355_v27, %v15519_v31  ;;  %v9560_v6 = vld [vmem:[#allocation11 + $0x180] ss:$16 sps:$4 sm:$0xff]   ;;  %v9580_v27 = vld [vmem:[#allocation11 + $0x1e4] ss:$16 sps:$4 sm:$0xff]  }
 0x54e   : > { %v11359_v44 = vpop.eup %11358  ;;  %v4720_v41 = vmul.f32 %v11357_v52, %v15523_v30  ;;  %11378 = vpow2.f32 %v8679_v28  ;;  %v9562_v30 = vld [vmem:[#allocation11 + $0x184] ss:$16 sps:$4 sm:$0xff]   ;;  %v9566_v28 = vld [vmem:[#allocation11 + $0x1a0] ss:$16 sps:$4 sm:$0xff]  }
 0x54f   : > { %v11361_v16 = vpop.eup %11360  ;;  %v4721_v51 = vmul.f32 %v11359_v44, %v15528_v9  ;;  %11380 = vpow2.f32 %v8688_v7  ;;  %5163 = vmatprep.subr.bf16.mxu1 %v4928_v37  ;;  %7303 = vmatprep.subr.bf16.mxu0 %v9562_v30 }
 0x550   : > { %v11363_v5 = vpop.eup %11362  ;;  %v4937_v43 = vpack.c.bf16 %v4720_v41, %v4710_v24  ;;  %11382 = vpow2.f32 %v8689_v58  ;;  %5164 = vmatpush1.bf16.msra.mxu1 %v4927_v21  ;;  %v4730_v17 = vmul.f32 %v11361_v16, %v15533_v20  ;;  %7304 = vmatpush1.bf16.msra.mxu0 %v9560_v6 }
 0x551   : > { %v11365_v48 = vpop.eup %11364  ;;  %11384 = vpow2.f32 %v8698_v2  ;;  %v4938_v31 = vpack.c.bf16 %v4721_v51, %v4711_v11  ;;  %v4731_v23 = vmul.f32 %v11363_v5, %v15538_v8  ;;  %7305 = vmatprep.subr.bf16.mxu0 %v9568_v63  ;;  %v9509_v63 = vld [vmem:[#allocation11 + $0x68] ss:$16 sps:$4 sm:$0xff]  }
 0x552   : > { %v11367_v9 = vpop.eup %11366  ;;  %v4740_v15 = vmul.f32 %v11365_v48, %v15543_v4  ;;  %11386 = vpow2.f32 %v8699_v57 }
 0x553   : > { %v11369_v19 = vpop.eup %11368  ;;  %v4741_v49 = vmul.f32 %v11367_v9, %v15556_v61  ;;  %11388 = vpow2.f32 %v8708_v39  ;;  %5165 = vmatprep.subr.bf16.mxu1 %v4938_v31 }
 0x554   : > { %v11371_v45 = vpop.eup %11370  ;;  %v4947_v21 = vpack.c.bf16 %v4740_v15, %v4730_v17  ;;  %11390 = vpow2.f32 %v8709_v59  ;;  %5166 = vmatpush1.bf16.msra.mxu1 %v4937_v43  ;;  %v4750_v3 = vmul.f32 %v11369_v19, %v15561_v38  ;;  %7306 = vmatpush1.bf16.msra.mxu0 %v9566_v28  ;;  %v9499_v28 = vld [vmem:[#allocation11 + $0x2c] ss:$16 sps:$4 sm:$0xff]  }
 0x555   : > { %v11373_v32 = vpop.eup %11372  ;;  %v4948_v20 = vpack.c.bf16 %v4741_v49, %v4731_v23  ;;  %v4751_v61 = vmul.f32 %v11371_v45, %v15567_v60  ;;  %7307 = vmatprep.subr.bf16.mxu0 %v9574_v46  ;;  %v9523_v46 = vld [vmem:[#allocation11 + $0xac] ss:$16 sps:$4 sm:$0xff]  }
 0x556   : > { %v11375_v4 = vpop.eup %11374  ;;  %v4760_v7 = vmul.f32 %v11373_v32, %v15573_v29  ;;  %v9517_v32 = vld [vmem:[#allocation11 + $0x8c] ss:$16 sps:$4 sm:$0xff]  }
 0x557   : > { %v11377_v8 = vpop.eup %11376  ;;  %v4761_v10 = vmul.f32 %v11375_v4, %v15578_v22  ;;  %5167 = vmatprep.subr.bf16.mxu1 %v4948_v20  ;;  %v9578_v22 = vld [vmem:[#allocation11 + $0x1e0] ss:$16 sps:$4 sm:$0xff]   ;;  %v9515_v20 = vld [vmem:[#allocation11 + $0x88] ss:$16 sps:$4 sm:$0xff]  }
 0x558   : > { %v11379_v55 = vpop.eup %11378  ;;  %v4957_v47 = vpack.c.bf16 %v4760_v7, %v4750_v3  ;;  %v3810_v13 = vadd.f32 1.0, %v11377_v8  ;;  %5168 = vmatpush1.bf16.msra.mxu1 %v4947_v21  ;;  %7308 = vmatpush1.bf16.msra.mxu0 %v9572_v42  ;;  %v9521_v4 = vld [vmem:[#allocation11 + $0xa8] ss:$16 sps:$4 sm:$0xff]   ;;  %v9535_v7 = vld [vmem:[#allocation11 + $0xec] ss:$16 sps:$4 sm:$0xff]  }
 0x559   : > { %v11381_v58 = vpop.eup %11380  ;;  %v3811_v34 = vadd.f32 1.0, %v11379_v55  ;;  %v4958_v38 = vpack.c.bf16 %v4761_v10, %v4751_v61  ;;  %7309 = vmatprep.subr.bf16.mxu0 %v9580_v27  ;;  %v9527_v3 = vld [vmem:[#allocation11 + $0xc8] ss:$16 sps:$4 sm:$0xff]   ;;  %v9541_v61 = vld [vmem:[#allocation11 + $0x10c] ss:$16 sps:$4 sm:$0xff]  }
 0x55a   : > { %v11383_v53 = vpop.eup %11382  ;;  %11392 = vrcp.f32 %v3810_v13  ;;  %v3820_v29 = vadd.f32 1.0, %v11381_v58  ;;  %v9533_v8 = vld [vmem:[#allocation11 + $0xe8] ss:$16 sps:$4 sm:$0xff]   ;;  %v9547_v42 = vld [vmem:[#allocation11 + $0x12c] ss:$16 sps:$4 sm:$0xff]  }
 0x55b   : > { %v11385_v52 = vpop.eup %11384  ;;  %11394 = vrcp.f32 %v3811_v34  ;;  %v3821_v60 = vadd.f32 1.0, %v11383_v53  ;;  %5169 = vmatprep.subr.bf16.mxu1 %v4958_v38  ;;  %v9539_v10 = vld [vmem:[#allocation11 + $0x108] ss:$16 sps:$4 sm:$0xff]   ;;  %v9559_v27 = vld [vmem:[#allocation11 + $0x16c] ss:$16 sps:$4 sm:$0xff]  }
 0x55c   : > { %v11387_v37 = vpop.eup %11386  ;;  %11396 = vrcp.f32 %v3820_v29  ;;  %v3830_v2 = vadd.f32 1.0, %v11385_v52  ;;  %5170 = vmatpush1.bf16.msra.mxu1 %v4957_v47  ;;  %7310 = vmatpush1.bf16.msra.mxu0 %v9578_v22  ;;  %v9545_v55 = vld [vmem:[#allocation11 + $0x128] ss:$16 sps:$4 sm:$0xff]   ;;  %v9553_v47 = vld [vmem:[#allocation11 + $0x14c] ss:$16 sps:$4 sm:$0xff]  }
 0x55d   : > { %v11389_v44 = vpop.eup %11388  ;;  %11398 = vrcp.f32 %v3821_v60  ;;  %v3831_v24 = vadd.f32 1.0, %v11387_v37  ;;  %7320 = vmatprep.subr.bf16.mxu0 %v9586_v54  ;;  %v9551_v13 = vld [vmem:[#allocation11 + $0x148] ss:$16 sps:$4 sm:$0xff]   ;;  %v9565_v34 = vld [vmem:[#allocation11 + $0x18c] ss:$16 sps:$4 sm:$0xff]  }
 0x55e   : > { %v11391_v41 = vpop.eup %11390  ;;  %11400 = vrcp.f32 %v3830_v2  ;;  %v3840_v57 = vadd.f32 1.0, %v11389_v44  ;;  %v9557_v58 = vld [vmem:[#allocation11 + $0x168] ss:$16 sps:$4 sm:$0xff]   ;;  %v9571_v53 = vld [vmem:[#allocation11 + $0x1ac] ss:$16 sps:$4 sm:$0xff]  }
 0x55f   : > { %11402 = vrcp.f32 %v3831_v24  ;;  %v3841_v16 = vadd.f32 1.0, %v11391_v41  ;;  %v9563_v38 = vld [vmem:[#allocation11 + $0x188] ss:$16 sps:$4 sm:$0xff]   ;;  %v9577_v52 = vld [vmem:[#allocation11 + $0x1cc] ss:$16 sps:$4 sm:$0xff]  }
 0x560   : > { %11404 = vrcp.f32 %v3840_v57  ;;  %v9569_v29 = vld [vmem:[#allocation11 + $0x1a8] ss:$16 sps:$4 sm:$0xff]   ;;  %v9583_v22 = vld [vmem:[#allocation11 + $0x1ec] ss:$16 sps:$4 sm:$0xff]  }
 0x561   : > { %11406 = vrcp.f32 %v3841_v16  ;;  %v9575_v60 = vld [vmem:[#allocation11 + $0x1c8] ss:$16 sps:$4 sm:$0xff]   ;;  %v9589_v2 = vld [vmem:[#allocation11 + $0x20c] ss:$16 sps:$4 sm:$0xff]  }
 0x562   : > { %v9581_v37 = vld [vmem:[#allocation11 + $0x1e8] ss:$16 sps:$4 sm:$0xff]  }
 0x564   : > { %v11393_v11 = vpop.eup %11392 }
 0x565   : > { %v11395_v51 = vpop.eup %11394  ;;  %v4770_v43 = vmul.f32 %v11393_v11, %v15600_v35 }
 0x566   : > { %v11397_v39 = vpop.eup %11396  ;;  %v4771_v48 = vmul.f32 %v11395_v51, %v15604_v25  ;;  %v9493_v25 = vld [vmem:[#allocation11 + $0xc] ss:$16 sps:$4 sm:$0xff]  }
 0x567   : > { %v11399_v5 = vpop.eup %11398  ;;  %v4780_v59 = vmul.f32 %v11397_v39, %v15608_v50 }
 0x568   : > { %v11401_v30 = vpop.eup %11400  ;;  %v4781_v31 = vmul.f32 %v11399_v5, %v15613_v1  ;;  %v9491_v1 = vld [vmem:[#allocation11 + $0x8] ss:$16 sps:$4 sm:$0xff]  }
 0x569   : > { %v11403_v6 = vpop.eup %11402  ;;  %v4967_v9 = vpack.c.bf16 %v4780_v59, %v4770_v43  ;;  %v4790_v23 = vmul.f32 %v11401_v30, %v15618_v56  ;;  %v9497_v56 = vld [vmem:[#allocation11 + $0x28] ss:$16 sps:$4 sm:$0xff]  }
 0x56a   : > { %v11405_v17 = vpop.eup %11404  ;;  %v4968_v15 = vpack.c.bf16 %v4781_v31, %v4771_v48  ;;  %v4791_v45 = vmul.f32 %v11403_v6, %v15623_v36  ;;  %v9503_v36 = vld [vmem:[#allocation11 + $0x48] ss:$16 sps:$4 sm:$0xff]   ;;  %v5234_v48 = vrot.slane %v5226_v26, %v15400_v12 }
 0x56b   : > { %v11407_v19 = vpop.eup %11406  ;;  %v4800_v49 = vmul.f32 %v11405_v17, %v15630_v14  ;;  %v9505_v14 = vld [vmem:[#allocation11 + $0x4c] ss:$16 sps:$4 sm:$0xff]  }
 0x56c   : > { %v4801_v35 = vmul.f32 %v11407_v19, %v15635_v18  ;;  %5171 = vmatprep.subr.bf16.mxu1 %v4968_v15  ;;  %v9511_v18 = vld [vmem:[#allocation11 + $0x6c] ss:$16 sps:$4 sm:$0xff]  }
 0x56d   : > { %v4977_v50 = vpack.c.bf16 %v4800_v49, %v4790_v23  ;;  %5172 = vmatpush1.bf16.msra.mxu1 %v4967_v9  ;;  %v16590_v17 = vld [vmem:[#allocation43_spill] sm:$0xff]  ;;  %v16591_v19 = vld [vmem:[#allocation41_spill] sm:$0xff]  ;;  %v16592_v49 = vld [vmem:[#allocation44_spill] sm:$0xff] }
 0x56e   : > { %v4978_v21 = vpack.c.bf16 %v4801_v35, %v4791_v45 }
 0x570   : > { %5173 = vmatprep.subr.bf16.mxu1 %v4978_v21  ;;  %v9587_v21 = vld [vmem:[#allocation11 + $0x208] ss:$16 sps:$4 sm:$0xff]  }
 0x571   : > { %5174 = vmatpush1.bf16.msra.mxu1 %v4977_v50  ;;  %v9584_v50 = vld [vmem:[#allocation11 + $0x200] ss:$16 sps:$4 sm:$0xff]  }
 0x572   : > { %7484 = vmatprep.subr.bf16.mxu1 %v9493_v25 }
 0x574   : > { %5176 = vmatmul.mubr.bf16.vlgmr.msra.gmra.mrb[196].mxu1 %v16552_v0  ;;  %v9529_v0 = vld [vmem:[#allocation11 + $0xcc] ss:$16 sps:$4 sm:$0xff]  }
 0x575   : > { %7485 = vmatpush1.bf16.msra.mxu1 %v9491_v1  ;;  %v9590_v1 = vld [vmem:[#allocation11 + $0x220] ss:$16 sps:$4 sm:$0xff]  }
 0x576   : > { %7486 = vmatprep.subr.bf16.mxu1 %v9499_v28  ;;  %v9593_v28 = vld [vmem:[#allocation11 + $0x228] ss:$16 sps:$4 sm:$0xff]  }
 0x579   : > { %7487 = vmatpush1.bf16.msra.mxu1 %v9497_v56  ;;  %v9598_v56 = vld [vmem:[#allocation11 + $0x244] ss:$16 sps:$4 sm:$0xff]  }
 0x57a   : > { %7488 = vmatprep.subr.bf16.mxu1 %v9505_v14  ;;  %v9601_v14 = vld [vmem:[#allocation11 + $0x24c] ss:$16 sps:$4 sm:$0xff]  }
 0x57d   : > { %7489 = vmatpush1.bf16.msra.mxu1 %v9503_v36  ;;  %v9596_v36 = vld [vmem:[#allocation11 + $0x240] ss:$16 sps:$4 sm:$0xff]  }
 0x57e   : > { %7490 = vmatprep.subr.bf16.mxu1 %v9511_v18  ;;  %v9599_v18 = vld [vmem:[#allocation11 + $0x248] ss:$16 sps:$4 sm:$0xff]  }
 0x581   : > { %7491 = vmatpush1.bf16.msra.mxu1 %v9509_v63  ;;  %v9604_v63 = vld [vmem:[#allocation11 + $0x264] ss:$16 sps:$4 sm:$0xff]  }
 0x582   : > { %7492 = vmatprep.subr.bf16.mxu1 %v9517_v32  ;;  %v9607_v32 = vld [vmem:[#allocation11 + $0x26c] ss:$16 sps:$4 sm:$0xff]  }
 0x585   : > { %7493 = vmatpush1.bf16.msra.mxu1 %v9515_v20  ;;  %v9602_v20 = vld [vmem:[#allocation11 + $0x260] ss:$16 sps:$4 sm:$0xff]  }
 0x586   : > { %7494 = vmatprep.subr.bf16.mxu1 %v9523_v46  ;;  %v9605_v46 = vld [vmem:[#allocation11 + $0x268] ss:$16 sps:$4 sm:$0xff]  }
 0x589   : > { %7495 = vmatpush1.bf16.msra.mxu1 %v9521_v4  ;;  %v9610_v4 = vld [vmem:[#allocation11 + $0x284] ss:$16 sps:$4 sm:$0xff]  }
 0x58a   : > { %7496 = vmatprep.subr.bf16.mxu1 %v9529_v0  ;;  %v9613_v0 = vld [vmem:[#allocation11 + $0x28c] ss:$16 sps:$4 sm:$0xff]  }
 0x58d   : > { %7497 = vmatpush1.bf16.msra.mxu1 %v9527_v3  ;;  %v9608_v3 = vld [vmem:[#allocation11 + $0x280] ss:$16 sps:$4 sm:$0xff]  }
 0x58e   : > { %7498 = vmatprep.subr.bf16.mxu1 %v9535_v7  ;;  %v9611_v7 = vld [vmem:[#allocation11 + $0x288] ss:$16 sps:$4 sm:$0xff]  }
 0x591   : > { %7499 = vmatpush1.bf16.msra.mxu1 %v9533_v8  ;;  %v9616_v8 = vld [vmem:[#allocation11 + $0x2a4] ss:$16 sps:$4 sm:$0xff]  }
 0x592   : > { %7500 = vmatprep.subr.bf16.mxu1 %v9541_v61  ;;  %v9619_v61 = vld [vmem:[#allocation11 + $0x2ac] ss:$16 sps:$4 sm:$0xff]  }
 0x595   : > { %7501 = vmatpush1.bf16.msra.mxu1 %v9539_v10  ;;  %v9614_v10 = vld [vmem:[#allocation11 + $0x2a0] ss:$16 sps:$4 sm:$0xff]  }
 0x596   : > { %7502 = vmatprep.subr.bf16.mxu1 %v9547_v42  ;;  %v9617_v42 = vld [vmem:[#allocation11 + $0x2a8] ss:$16 sps:$4 sm:$0xff]  }
 0x599   : > { %7503 = vmatpush1.bf16.msra.mxu1 %v9545_v55  ;;  %v9622_v55 = vld [vmem:[#allocation11 + $0x2c4] ss:$16 sps:$4 sm:$0xff]  }
 0x59a   : > { %7504 = vmatprep.subr.bf16.mxu1 %v9553_v47  ;;  %v9625_v47 = vld [vmem:[#allocation11 + $0x2cc] ss:$16 sps:$4 sm:$0xff]  }
 0x59d   : > { %7505 = vmatpush1.bf16.msra.mxu1 %v9551_v13  ;;  %v9620_v13 = vld [vmem:[#allocation11 + $0x2c0] ss:$16 sps:$4 sm:$0xff]  }
 0x59e   : > { %7506 = vmatprep.subr.bf16.mxu1 %v9559_v27  ;;  %v9623_v27 = vld [vmem:[#allocation11 + $0x2c8] ss:$16 sps:$4 sm:$0xff]  }
 0x5a1   : > { %7507 = vmatpush1.bf16.msra.mxu1 %v9557_v58  ;;  %v9628_v58 = vld [vmem:[#allocation11 + $0x2e4] ss:$16 sps:$4 sm:$0xff]  }
 0x5a2   : > { %7508 = vmatprep.subr.bf16.mxu1 %v9565_v34  ;;  %v9631_v34 = vld [vmem:[#allocation11 + $0x2ec] ss:$16 sps:$4 sm:$0xff]  }
 0x5a5   : > { %7509 = vmatpush1.bf16.msra.mxu1 %v9563_v38  ;;  %v16593_v38 = vlaneseq }
 0x5a6   : > { %7510 = vmatprep.subr.bf16.mxu1 %v9571_v53  ;;  %v9776_v53 = vld [vmem:[#allocation11 + $0x600] ss:$16 sps:$4 sm:$0xff]  }
 0x5a7   : > { %vm15681_vm1 = vcmp.lt.s32.totalorder %v16593_v38, 256  ;;  %v9701_v38 = vld [vmem:[#allocation11 + $0x468] ss:$16 sps:$4 sm:$0xff]  }
 0x5a9   : > { %7511 = vmatpush1.bf16.msra.mxu1 %v9569_v29  ;;  %v11766_v29 = vmov 0.0  }
 0x5aa   : > { %7512 = vmatprep.subr.bf16.mxu1 %v9577_v52  ;;  %477 = vst.msk [vmem:[#allocation2 + $0x8] sm:$0x3] %vm15681_vm1, %v11766_v29  ;;  %v9626_v52 = vld [vmem:[#allocation11 + $0x2e0] ss:$16 sps:$4 sm:$0xff]   ;;  %v9706_v29 = vld [vmem:[#allocation11 + $0x484] ss:$16 sps:$4 sm:$0xff]  }
 0x5ad   : > { %7513 = vmatpush1.bf16.msra.mxu1 %v9575_v60  ;;  %v9629_v60 = vld [vmem:[#allocation11 + $0x2e8] ss:$16 sps:$4 sm:$0xff]  }
 0x5ae   : > { %7514 = vmatprep.subr.bf16.mxu1 %v9583_v22  ;;  %v9634_v22 = vld [vmem:[#allocation11 + $0x304] ss:$16 sps:$4 sm:$0xff]  }
 0x5b1   : > { %7515 = vmatpush1.bf16.msra.mxu1 %v9581_v37  ;;  %v9637_v37 = vld [vmem:[#allocation11 + $0x30c] ss:$16 sps:$4 sm:$0xff]  }
 0x5b2   : > { %7525 = vmatprep.subr.bf16.mxu1 %v9589_v2  ;;  %v9632_v2 = vld [vmem:[#allocation11 + $0x300] ss:$16 sps:$4 sm:$0xff]  }
 0x5c5   : > { %v5095_v54 = vpop.f32.mrb[192].mxu1 }
 0x5c6   : > { %v5136_v44 = vpop.f32.mrb[168].mxu0  ;;  %v5097_v24 = vpop.f32.mrb[193].mxu1 }
 0x5c7   : > { %v5196_v41 = vcombine.low %v5095_v54, %v5097_v24  ;;  %v5138_v57 = vpop.f32.mrb[169].mxu0  ;;  %v5099_v16 = vpop.f32.mrb[194].mxu1  ;;  %v9635_v54 = vld [vmem:[#allocation11 + $0x308] ss:$16 sps:$4 sm:$0xff]   ;;  %v9643_v24 = vld [vmem:[#allocation11 + $0x32c] ss:$16 sps:$4 sm:$0xff]  }
 0x5c8   : > { %v5197_v11 = vcombine.low %v5136_v44, %v5138_v57  ;;  %v5140_v51 = vpop.f32.mrb[170].mxu0  ;;  %v5100_v39 = vpop.f32.mrb[195].mxu1  ;;  %v9640_v44 = vld [vmem:[#allocation11 + $0x324] ss:$16 sps:$4 sm:$0xff]   ;;  %v9641_v57 = vld [vmem:[#allocation11 + $0x328] ss:$16 sps:$4 sm:$0xff]  }
 0x5c9   : > { %v5218_v5 = vrot.slane %v5196_v41, %v15400_v12  ;;  %v5141_v43 = vpop.f32.mrb[171].mxu0  ;;  %v9638_v41 = vld [vmem:[#allocation11 + $0x320] ss:$16 sps:$4 sm:$0xff]   ;;  %v9646_v16 = vld [vmem:[#allocation11 + $0x344] ss:$16 sps:$4 sm:$0xff]  }
 0x5ca   : > { %v5225_v59 = vrot.slane %v5197_v11, %v15400_v12  ;;  %v9649_v11 = vld [vmem:[#allocation11 + $0x34c] ss:$16 sps:$4 sm:$0xff]   ;;  %v9644_v51 = vld [vmem:[#allocation11 + $0x340] ss:$16 sps:$4 sm:$0xff]   ;;  %v9647_v39 = vld [vmem:[#allocation11 + $0x348] ss:$16 sps:$4 sm:$0xff]  }
 0x5cb   : > { %v9655_v43 = vld [vmem:[#allocation11 + $0x36c] ss:$16 sps:$4 sm:$0xff]  }
 0x5cc   : > { %v5227_v30 = vcombine.low %v5218_v5, %v5225_v59  ;;  %v9652_v5 = vld [vmem:[#allocation11 + $0x364] ss:$16 sps:$4 sm:$0xff]   ;;  %v9650_v59 = vld [vmem:[#allocation11 + $0x360] ss:$16 sps:$4 sm:$0xff]  }
 0x5ce   : > { %v5241_v31 = vrot.slane %v5227_v30, %v15400_v12  ;;  %v9653_v30 = vld [vmem:[#allocation11 + $0x368] ss:$16 sps:$4 sm:$0xff]  }
 0x5d0   : > { %v5242_v6 = vcombine.low %v5234_v48, %v5241_v31  ;;  %v9658_v48 = vld [vmem:[#allocation11 + $0x384] ss:$16 sps:$4 sm:$0xff]   ;;  %v9661_v31 = vld [vmem:[#allocation11 + $0x38c] ss:$16 sps:$4 sm:$0xff]  }
 0x5d2   : > { %v15672_v9 = vmul.f32 0.00390625, %v5242_v6  ;;  %v9656_v6 = vld [vmem:[#allocation11 + $0x380] ss:$16 sps:$4 sm:$0xff]  }
 0x5d4   : > { %v5284_v15 = vrot.slane %v15672_v9, %v16590_v17  ;;  %v5280_v23 = vrot.slane %v15672_v9, %v16591_v19  ;;  %v5292_v45 = vrot.slane %v15672_v9, %v16592_v49 }
 0x5d6   : > { %v5328_v35 = vpack.c.bf16 %v5284_v15, %v5284_v15  ;;  %v5327_v25 = vpack.c.bf16 %v5280_v23, %v5280_v23  ;;  %v5330_v26 = vpack.c.bf16 %v5292_v45, %v5292_v45  ;;  %v9659_v15 = vld [vmem:[#allocation11 + $0x388] ss:$16 sps:$4 sm:$0xff]   ;;  %v9664_v23 = vld [vmem:[#allocation11 + $0x3a4] ss:$16 sps:$4 sm:$0xff]   ;;  %v9667_v45 = vld [vmem:[#allocation11 + $0x3ac] ss:$16 sps:$4 sm:$0xff]  }
 0x5d8   : > { %7311 = vmatprep.mubr.bf16.mxu0 %v5328_v35  ;;  %7516 = vmatprep.mubr.bf16.mxu1 %v5328_v35  ;;  %v9662_v35 = vld [vmem:[#allocation11 + $0x3a0] ss:$16 sps:$4 sm:$0xff]  }
 0x5d9   : > { %7312 = vmatmul.mubr.bf16.vlgmr.msra.gmra.mrb[172].mxu0 %v5327_v25  ;;  %7517 = vmatmul.mubr.bf16.vlgmr.msra.gmra.mrb[200].mxu1 %v5327_v25  ;;  %v9673_v25 = vld [vmem:[#allocation11 + $0x3cc] ss:$16 sps:$4 sm:$0xff]  }
 0x5da   : > { %7321 = vmatpush1.bf16.msra.mxu0 %v9584_v50  ;;  %7526 = vmatpush1.bf16.msra.mxu1 %v9587_v21  ;;  %v9665_v50 = vld [vmem:[#allocation11 + $0x3a8] ss:$16 sps:$4 sm:$0xff]   ;;  %v9670_v21 = vld [vmem:[#allocation11 + $0x3c4] ss:$16 sps:$4 sm:$0xff]  }
 0x5db   : > { %7352 = vmatprep.mubr.bf16.mxu0 %v5330_v26  ;;  %7557 = vmatprep.mubr.bf16.mxu1 %v5330_v26  ;;  %v9676_v26 = vld [vmem:[#allocation11 + $0x3e4] ss:$16 sps:$4 sm:$0xff]  }
 0x5dc   : > { %7322 = vmatprep.subr.bf16.mxu0 %v9592_v33  ;;  %7527 = vmatprep.subr.bf16.mxu1 %v9595_v40  ;;  %v9668_v33 = vld [vmem:[#allocation11 + $0x3c0] ss:$16 sps:$4 sm:$0xff]   ;;  %v9671_v40 = vld [vmem:[#allocation11 + $0x3c8] ss:$16 sps:$4 sm:$0xff]  }
 0x5de   : > { %7323 = vmatpush1.bf16.msra.mxu0 %v9590_v1  ;;  %7528 = vmatpush1.bf16.msra.mxu1 %v9593_v28  ;;  %v9679_v1 = vld [vmem:[#allocation11 + $0x3ec] ss:$16 sps:$4 sm:$0xff]   ;;  %v9674_v28 = vld [vmem:[#allocation11 + $0x3e0] ss:$16 sps:$4 sm:$0xff]  }
 0x5df   : > { %7324 = vmatprep.subr.bf16.mxu0 %v9598_v56  ;;  %7529 = vmatprep.subr.bf16.mxu1 %v9601_v14  ;;  %v9677_v56 = vld [vmem:[#allocation11 + $0x3e8] ss:$16 sps:$4 sm:$0xff]   ;;  %v16596_v14 = vld [vmem:[#allocation42_spill] sm:$0xff] }
 0x5e2   : > { %7325 = vmatpush1.bf16.msra.mxu0 %v9596_v36  ;;  %7530 = vmatpush1.bf16.msra.mxu1 %v9599_v18  ;;  %v5288_v36 = vrot.slane %v15672_v9, %v16596_v14  ;;  %v9682_v18 = vld [vmem:[#allocation11 + $0x404] ss:$16 sps:$4 sm:$0xff]  }
 0x5e3   : > { %7326 = vmatprep.subr.bf16.mxu0 %v9604_v63  ;;  %7531 = vmatprep.subr.bf16.mxu1 %v9607_v32  ;;  %v9685_v63 = vld [vmem:[#allocation11 + $0x40c] ss:$16 sps:$4 sm:$0xff]   ;;  %v16597_v32 = vsub.s32 5, %v16565_v62 }
 0x5e6   : > { %7327 = vmatpush1.bf16.msra.mxu0 %v9602_v20  ;;  %7532 = vmatpush1.bf16.msra.mxu1 %v9605_v46  ;;  %v5300_v20 = vrot.slane %v15672_v9, %v16597_v32  ;;  %v9680_v46 = vld [vmem:[#allocation11 + $0x400] ss:$16 sps:$4 sm:$0xff]   ;;  %v9760_v32 = vld [vmem:[#allocation11 + $0x5a4] ss:$16 sps:$4 sm:$0xff]  }
 0x5e7   : > { %7328 = vmatprep.subr.bf16.mxu0 %v9610_v4  ;;  %7533 = vmatprep.subr.bf16.mxu1 %v9613_v0  ;;  %v5329_v4 = vpack.c.bf16 %v5288_v36, %v5288_v36  ;;  %v9683_v0 = vld [vmem:[#allocation11 + $0x408] ss:$16 sps:$4 sm:$0xff]   ;;  %v9752_v36 = vld [vmem:[#allocation11 + $0x580] ss:$16 sps:$4 sm:$0xff]  }
 0x5ea   : > { %7329 = vmatpush1.bf16.msra.mxu0 %v9608_v3  ;;  %7534 = vmatpush1.bf16.msra.mxu1 %v9611_v7  ;;  %v5332_v3 = vpack.c.bf16 %v5300_v20, %v5300_v20  ;;  %v9688_v7 = vld [vmem:[#allocation11 + $0x424] ss:$16 sps:$4 sm:$0xff]  }
 0x5eb   : > { %7330 = vmatprep.subr.bf16.mxu0 %v9616_v8  ;;  %7535 = vmatprep.subr.bf16.mxu1 %v9619_v61  ;;  %v9691_v8 = vld [vmem:[#allocation11 + $0x42c] ss:$16 sps:$4 sm:$0xff]   ;;  %v9686_v61 = vld [vmem:[#allocation11 + $0x420] ss:$16 sps:$4 sm:$0xff]  }
 0x5ee   : > { %7331 = vmatpush1.bf16.msra.mxu0 %v9614_v10  ;;  %7536 = vmatpush1.bf16.msra.mxu1 %v9617_v42  ;;  %v9689_v10 = vld [vmem:[#allocation11 + $0x428] ss:$16 sps:$4 sm:$0xff]   ;;  %v9694_v42 = vld [vmem:[#allocation11 + $0x444] ss:$16 sps:$4 sm:$0xff]  }
 0x5ef   : > { %7332 = vmatprep.subr.bf16.mxu0 %v9622_v55  ;;  %7537 = vmatprep.subr.bf16.mxu1 %v9625_v47  ;;  %v9697_v55 = vld [vmem:[#allocation11 + $0x44c] ss:$16 sps:$4 sm:$0xff]   ;;  %v9692_v47 = vld [vmem:[#allocation11 + $0x440] ss:$16 sps:$4 sm:$0xff]  }
 0x5f2   : > { %7333 = vmatpush1.bf16.msra.mxu0 %v9620_v13  ;;  %7538 = vmatpush1.bf16.msra.mxu1 %v9623_v27  ;;  %v9695_v13 = vld [vmem:[#allocation11 + $0x448] ss:$16 sps:$4 sm:$0xff]   ;;  %v9700_v27 = vld [vmem:[#allocation11 + $0x464] ss:$16 sps:$4 sm:$0xff]  }
 0x5f3   : > { %7334 = vmatprep.subr.bf16.mxu0 %v9628_v58  ;;  %7539 = vmatprep.subr.bf16.mxu1 %v9631_v34  ;;  %v9703_v58 = vld [vmem:[#allocation11 + $0x46c] ss:$16 sps:$4 sm:$0xff]   ;;  %v9698_v34 = vld [vmem:[#allocation11 + $0x460] ss:$16 sps:$4 sm:$0xff]  }
 0x5f6   : > { %7335 = vmatpush1.bf16.msra.mxu0 %v9626_v52  ;;  %7540 = vmatpush1.bf16.msra.mxu1 %v9629_v60  ;;  %v9709_v52 = vld [vmem:[#allocation11 + $0x48c] ss:$16 sps:$4 sm:$0xff]   ;;  %v9704_v60 = vld [vmem:[#allocation11 + $0x480] ss:$16 sps:$4 sm:$0xff]  }
 0x5f7   : > { %7336 = vmatprep.subr.bf16.mxu0 %v9634_v22  ;;  %7541 = vmatprep.subr.bf16.mxu1 %v9637_v37  ;;  %v9707_v22 = vld [vmem:[#allocation11 + $0x488] ss:$16 sps:$4 sm:$0xff]   ;;  %v9712_v37 = vld [vmem:[#allocation11 + $0x4a4] ss:$16 sps:$4 sm:$0xff]  }
 0x5fa   : > { %7337 = vmatpush1.bf16.msra.mxu0 %v9632_v2  ;;  %7542 = vmatpush1.bf16.msra.mxu1 %v9635_v54  ;;  %v9715_v2 = vld [vmem:[#allocation11 + $0x4ac] ss:$16 sps:$4 sm:$0xff]   ;;  %v9710_v54 = vld [vmem:[#allocation11 + $0x4a0] ss:$16 sps:$4 sm:$0xff]  }
 0x5fb   : > { %7338 = vmatprep.subr.bf16.mxu0 %v9640_v44  ;;  %7543 = vmatprep.subr.bf16.mxu1 %v9643_v24  ;;  %v9713_v44 = vld [vmem:[#allocation11 + $0x4a8] ss:$16 sps:$4 sm:$0xff]   ;;  %v9718_v24 = vld [vmem:[#allocation11 + $0x4c4] ss:$16 sps:$4 sm:$0xff]  }
 0x5fe   : > { %7339 = vmatpush1.bf16.msra.mxu0 %v9638_v41  ;;  %7544 = vmatpush1.bf16.msra.mxu1 %v9641_v57  ;;  %v9721_v41 = vld [vmem:[#allocation11 + $0x4cc] ss:$16 sps:$4 sm:$0xff]   ;;  %v9716_v57 = vld [vmem:[#allocation11 + $0x4c0] ss:$16 sps:$4 sm:$0xff]  }
 0x5ff   : > { %7340 = vmatprep.subr.bf16.mxu0 %v9646_v16  ;;  %7545 = vmatprep.subr.bf16.mxu1 %v9649_v11  ;;  %v9719_v16 = vld [vmem:[#allocation11 + $0x4c8] ss:$16 sps:$4 sm:$0xff]   ;;  %v9724_v11 = vld [vmem:[#allocation11 + $0x4e4] ss:$16 sps:$4 sm:$0xff]  }
 0x602   : > { %7341 = vmatpush1.bf16.msra.mxu0 %v9644_v51  ;;  %7546 = vmatpush1.bf16.msra.mxu1 %v9647_v39  ;;  %v9727_v51 = vld [vmem:[#allocation11 + $0x4ec] ss:$16 sps:$4 sm:$0xff]   ;;  %v9722_v39 = vld [vmem:[#allocation11 + $0x4e0] ss:$16 sps:$4 sm:$0xff]  }
 0x603   : > { %7342 = vmatprep.subr.bf16.mxu0 %v9652_v5  ;;  %7547 = vmatprep.subr.bf16.mxu1 %v9655_v43  ;;  %v9725_v5 = vld [vmem:[#allocation11 + $0x4e8] ss:$16 sps:$4 sm:$0xff]   ;;  %v9730_v43 = vld [vmem:[#allocation11 + $0x504] ss:$16 sps:$4 sm:$0xff]  }
 0x606   : > { %7343 = vmatpush1.bf16.msra.mxu0 %v9650_v59  ;;  %7548 = vmatpush1.bf16.msra.mxu1 %v9653_v30  ;;  %v9733_v59 = vld [vmem:[#allocation11 + $0x50c] ss:$16 sps:$4 sm:$0xff]   ;;  %v9728_v30 = vld [vmem:[#allocation11 + $0x500] ss:$16 sps:$4 sm:$0xff]  }
 0x607   : > { %7344 = vmatprep.subr.bf16.mxu0 %v9658_v48  ;;  %7549 = vmatprep.subr.bf16.mxu1 %v9661_v31  ;;  %v9731_v48 = vld [vmem:[#allocation11 + $0x508] ss:$16 sps:$4 sm:$0xff]   ;;  %v9736_v31 = vld [vmem:[#allocation11 + $0x524] ss:$16 sps:$4 sm:$0xff]  }
 0x60a   : > { %7345 = vmatpush1.bf16.msra.mxu0 %v9656_v6  ;;  %7550 = vmatpush1.bf16.msra.mxu1 %v9659_v15  ;;  %v9739_v6 = vld [vmem:[#allocation11 + $0x52c] ss:$16 sps:$4 sm:$0xff]   ;;  %v9734_v15 = vld [vmem:[#allocation11 + $0x520] ss:$16 sps:$4 sm:$0xff]  }
 0x60b   : > { %7346 = vmatprep.subr.bf16.mxu0 %v9664_v23  ;;  %7551 = vmatprep.subr.bf16.mxu1 %v9667_v45  ;;  %v9737_v23 = vld [vmem:[#allocation11 + $0x528] ss:$16 sps:$4 sm:$0xff]   ;;  %v9742_v45 = vld [vmem:[#allocation11 + $0x544] ss:$16 sps:$4 sm:$0xff]  }
 0x60e   : > { %7347 = vmatpush1.bf16.msra.mxu0 %v9662_v35  ;;  %7552 = vmatpush1.bf16.msra.mxu1 %v9665_v50  ;;  %v9745_v35 = vld [vmem:[#allocation11 + $0x54c] ss:$16 sps:$4 sm:$0xff]   ;;  %v9740_v50 = vld [vmem:[#allocation11 + $0x540] ss:$16 sps:$4 sm:$0xff]  }
 0x60f   : > { %7348 = vmatprep.subr.bf16.mxu0 %v9670_v21  ;;  %7553 = vmatprep.subr.bf16.mxu1 %v9673_v25  ;;  %v9743_v21 = vld [vmem:[#allocation11 + $0x548] ss:$16 sps:$4 sm:$0xff]   ;;  %v9748_v25 = vld [vmem:[#allocation11 + $0x564] ss:$16 sps:$4 sm:$0xff]  }
 0x612   : > { %7349 = vmatpush1.bf16.msra.mxu0 %v9668_v33  ;;  %7554 = vmatpush1.bf16.msra.mxu1 %v9671_v40  ;;  %v9751_v33 = vld [vmem:[#allocation11 + $0x56c] ss:$16 sps:$4 sm:$0xff]   ;;  %v9746_v40 = vld [vmem:[#allocation11 + $0x560] ss:$16 sps:$4 sm:$0xff]  }
 0x613   : > { %7350 = vmatprep.subr.bf16.mxu0 %v9676_v26  ;;  %7555 = vmatprep.subr.bf16.mxu1 %v9679_v1  ;;  %v9749_v26 = vld [vmem:[#allocation11 + $0x568] ss:$16 sps:$4 sm:$0xff]   ;;  %v9754_v1 = vld [vmem:[#allocation11 + $0x584] ss:$16 sps:$4 sm:$0xff]  }
 0x616   : > { %7351 = vmatpush1.bf16.msra.mxu0 %v9674_v28  ;;  %7556 = vmatpush1.bf16.msra.mxu1 %v9677_v56  ;;  %v9757_v28 = vld [vmem:[#allocation11 + $0x58c] ss:$16 sps:$4 sm:$0xff]  }
 0x617   : > { %7361 = vmatprep.subr.bf16.mxu0 %v9682_v18  ;;  %7566 = vmatprep.subr.bf16.mxu1 %v9685_v63  ;;  %v9755_v63 = vld [vmem:[#allocation11 + $0x588] ss:$16 sps:$4 sm:$0xff]  }
 0x619   : > { %7353 = vmatmul.mubr.bf16.vlgmr.msra.gmra.mrb[172].mxu0 %v5329_v4  ;;  %7558 = vmatmul.mubr.bf16.vlgmr.msra.gmra.mrb[200].mxu1 %v5329_v4  ;;  %v9763_v4 = vld [vmem:[#allocation11 + $0x5ac] ss:$16 sps:$4 sm:$0xff]  }
 0x61a   : > { %7362 = vmatpush1.bf16.msra.mxu0 %v9680_v46  ;;  %7393 = vmatprep.mubr.bf16.mxu0 %v5332_v3 }
 0x61b   : > { %7567 = vmatpush1.bf16.msra.mxu1 %v9683_v0  ;;  %7598 = vmatprep.mubr.bf16.mxu1 %v5332_v3 }
 0x61c   : > { %7363 = vmatprep.subr.bf16.mxu0 %v9688_v7  ;;  %7568 = vmatprep.subr.bf16.mxu1 %v9691_v8  ;;  %v9758_v7 = vld [vmem:[#allocation11 + $0x5a0] ss:$16 sps:$4 sm:$0xff]  }
 0x61d   : > { %v4818_v8 = vld [vmem:[#allocation2 + $0x8] sm:$0x3] }
 0x61e   : > { %7364 = vmatpush1.bf16.msra.mxu0 %v9686_v61  ;;  %v9761_v61 = vld [vmem:[#allocation11 + $0x5a8] ss:$16 sps:$4 sm:$0xff]  }
 0x61f   : > { %7569 = vmatpush1.bf16.msra.mxu1 %v9689_v10  ;;  %7365 = vmatprep.subr.bf16.mxu0 %v9694_v42  ;;  %v9766_v10 = vld [vmem:[#allocation11 + $0x5c4] ss:$16 sps:$4 sm:$0xff]  }
 0x620   : > { %7570 = vmatprep.subr.bf16.mxu1 %v9697_v55  ;;  %v9769_v55 = vld [vmem:[#allocation11 + $0x5cc] ss:$16 sps:$4 sm:$0xff]  }
 0x622   : > { %7366 = vmatpush1.bf16.msra.mxu0 %v9692_v47 }
 0x623   : > { %7571 = vmatpush1.bf16.msra.mxu1 %v9695_v13  ;;  %7367 = vmatprep.subr.bf16.mxu0 %v9700_v27  ;;  %v9764_v13 = vld [vmem:[#allocation11 + $0x5c0] ss:$16 sps:$4 sm:$0xff]   ;;  %v9767_v27 = vld [vmem:[#allocation11 + $0x5c8] ss:$16 sps:$4 sm:$0xff]  }
 0x624   : > { %7572 = vmatprep.subr.bf16.mxu1 %v9703_v58  ;;  %v9772_v58 = vld [vmem:[#allocation11 + $0x5e4] ss:$16 sps:$4 sm:$0xff]  }
 0x626   : > { %7368 = vmatpush1.bf16.msra.mxu0 %v9698_v34  ;;  %v9775_v34 = vld [vmem:[#allocation11 + $0x5ec] ss:$16 sps:$4 sm:$0xff]  }
 0x627   : > { %7573 = vmatpush1.bf16.msra.mxu1 %v9701_v38  ;;  %7369 = vmatprep.subr.bf16.mxu0 %v9706_v29  ;;  %v9770_v38 = vld [vmem:[#allocation11 + $0x5e0] ss:$16 sps:$4 sm:$0xff]   ;;  %v9773_v29 = vld [vmem:[#allocation11 + $0x5e8] ss:$16 sps:$4 sm:$0xff]  }
 0x628   : > { %7574 = vmatprep.subr.bf16.mxu1 %v9709_v52 }
 0x62a   : > { %7370 = vmatpush1.bf16.msra.mxu0 %v9704_v60  ;;  %v9778_v60 = vld [vmem:[#allocation11 + $0x604] ss:$16 sps:$4 sm:$0xff]  }
 0x62b   : > { %7575 = vmatpush1.bf16.msra.mxu1 %v9707_v22  ;;  %7371 = vmatprep.subr.bf16.mxu0 %v9712_v37  ;;  %v9781_v22 = vld [vmem:[#allocation11 + $0x60c] ss:$16 sps:$4 sm:$0xff]   ;;  %v16599_v37 = vsub.s32 7, %v16565_v62 }
 0x62c   : > { %7576 = vmatprep.subr.bf16.mxu1 %v9715_v2 }
 0x62d   : > { %v5308_v2 = vrot.slane %v15672_v9, %v16599_v37  ;;  %v9862_v37 = vld [vmem:[#allocation11 + $0x7c4] ss:$16 sps:$4 sm:$0xff]  }
 0x62e   : > { %7372 = vmatpush1.bf16.msra.mxu0 %v9710_v54 }
 0x62f   : > { %7577 = vmatpush1.bf16.msra.mxu1 %v9713_v44  ;;  %7373 = vmatprep.subr.bf16.mxu0 %v9718_v24  ;;  %v9779_v44 = vld [vmem:[#allocation11 + $0x608] ss:$16 sps:$4 sm:$0xff]   ;;  %v9784_v24 = vld [vmem:[#allocation11 + $0x624] ss:$16 sps:$4 sm:$0xff]  }
 0x630   : > { %7578 = vmatprep.subr.bf16.mxu1 %v9721_v41  ;;  %v5334_v41 = vpack.c.bf16 %v5308_v2, %v5308_v2  ;;  %v9865_v2 = vld [vmem:[#allocation11 + $0x7cc] ss:$16 sps:$4 sm:$0xff]  }
 0x632   : > { %7374 = vmatpush1.bf16.msra.mxu0 %v9716_v57  ;;  %v9787_v57 = vld [vmem:[#allocation11 + $0x62c] ss:$16 sps:$4 sm:$0xff]  }
 0x633   : > { %7579 = vmatpush1.bf16.msra.mxu1 %v9719_v16  ;;  %7375 = vmatprep.subr.bf16.mxu0 %v9724_v11  ;;  %v9782_v16 = vld [vmem:[#allocation11 + $0x620] ss:$16 sps:$4 sm:$0xff]   ;;  %v9785_v11 = vld [vmem:[#allocation11 + $0x628] ss:$16 sps:$4 sm:$0xff]  }
 0x634   : > { %7580 = vmatprep.subr.bf16.mxu1 %v9727_v51  ;;  %v9790_v51 = vld [vmem:[#allocation11 + $0x644] ss:$16 sps:$4 sm:$0xff]  }
 0x636   : > { %7376 = vmatpush1.bf16.msra.mxu0 %v9722_v39  ;;  %v9793_v39 = vld [vmem:[#allocation11 + $0x64c] ss:$16 sps:$4 sm:$0xff]  }
 0x637   : > { %7581 = vmatpush1.bf16.msra.mxu1 %v9725_v5  ;;  %7377 = vmatprep.subr.bf16.mxu0 %v9730_v43  ;;  %v9788_v5 = vld [vmem:[#allocation11 + $0x640] ss:$16 sps:$4 sm:$0xff]   ;;  %v9791_v43 = vld [vmem:[#allocation11 + $0x648] ss:$16 sps:$4 sm:$0xff]  }
 0x638   : > { %7582 = vmatprep.subr.bf16.mxu1 %v9733_v59  ;;  %v9796_v59 = vld [vmem:[#allocation11 + $0x664] ss:$16 sps:$4 sm:$0xff]  }
 0x63a   : > { %7378 = vmatpush1.bf16.msra.mxu0 %v9728_v30  ;;  %v9799_v30 = vld [vmem:[#allocation11 + $0x66c] ss:$16 sps:$4 sm:$0xff]  }
 0x63b   : > { %7583 = vmatpush1.bf16.msra.mxu1 %v9731_v48  ;;  %7379 = vmatprep.subr.bf16.mxu0 %v9736_v31  ;;  %v9794_v48 = vld [vmem:[#allocation11 + $0x660] ss:$16 sps:$4 sm:$0xff]   ;;  %v9797_v31 = vld [vmem:[#allocation11 + $0x668] ss:$16 sps:$4 sm:$0xff]  }
 0x63c   : > { %7584 = vmatprep.subr.bf16.mxu1 %v9739_v6  ;;  %v9802_v6 = vld [vmem:[#allocation11 + $0x684] ss:$16 sps:$4 sm:$0xff]  }
 0x63e   : > { %7380 = vmatpush1.bf16.msra.mxu0 %v9734_v15  ;;  %v9805_v15 = vld [vmem:[#allocation11 + $0x68c] ss:$16 sps:$4 sm:$0xff]  }
 0x63f   : > { %7585 = vmatpush1.bf16.msra.mxu1 %v9737_v23  ;;  %7381 = vmatprep.subr.bf16.mxu0 %v9742_v45  ;;  %v9800_v23 = vld [vmem:[#allocation11 + $0x680] ss:$16 sps:$4 sm:$0xff]   ;;  %v9803_v45 = vld [vmem:[#allocation11 + $0x688] ss:$16 sps:$4 sm:$0xff]  }
 0x640   : > { %7586 = vmatprep.subr.bf16.mxu1 %v9745_v35  ;;  %v9808_v35 = vld [vmem:[#allocation11 + $0x6a4] ss:$16 sps:$4 sm:$0xff]  }
 0x642   : > { %7382 = vmatpush1.bf16.msra.mxu0 %v9740_v50  ;;  %v9811_v50 = vld [vmem:[#allocation11 + $0x6ac] ss:$16 sps:$4 sm:$0xff]  }
 0x643   : > { %7587 = vmatpush1.bf16.msra.mxu1 %v9743_v21  ;;  %7383 = vmatprep.subr.bf16.mxu0 %v9748_v25  ;;  %v9806_v21 = vld [vmem:[#allocation11 + $0x6a0] ss:$16 sps:$4 sm:$0xff]   ;;  %v9809_v25 = vld [vmem:[#allocation11 + $0x6a8] ss:$16 sps:$4 sm:$0xff]  }
 0x644   : > { %7588 = vmatprep.subr.bf16.mxu1 %v9751_v33  ;;  %v9814_v33 = vld [vmem:[#allocation11 + $0x6c4] ss:$16 sps:$4 sm:$0xff]  }
 0x646   : > { %7384 = vmatpush1.bf16.msra.mxu0 %v9746_v40  ;;  %v9817_v40 = vld [vmem:[#allocation11 + $0x6cc] ss:$16 sps:$4 sm:$0xff]  }
 0x647   : > { %v5177_v56 = vpop.f32.mrb[196].mxu1  ;;  %7589 = vmatpush1.bf16.msra.mxu1 %v9749_v26  ;;  %7385 = vmatprep.subr.bf16.mxu0 %v9754_v1  ;;  %v9812_v26 = vld [vmem:[#allocation11 + $0x6c0] ss:$16 sps:$4 sm:$0xff]   ;;  %v9815_v1 = vld [vmem:[#allocation11 + $0x6c8] ss:$16 sps:$4 sm:$0xff]  }
 0x648   : > { %v5179_v18 = vpop.f32.mrb[197].mxu1  ;;  %7590 = vmatprep.subr.bf16.mxu1 %v9757_v28  ;;  %v9820_v28 = vld [vmem:[#allocation11 + $0x6e4] ss:$16 sps:$4 sm:$0xff]  }
 0x649   : > { %v5243_v20 = vcombine.low %v5177_v56, %v5179_v18  ;;  %v5181_v46 = vpop.f32.mrb[198].mxu1  ;;  %v9823_v56 = vld [vmem:[#allocation11 + $0x6ec] ss:$16 sps:$4 sm:$0xff]   ;;  %v9821_v18 = vld [vmem:[#allocation11 + $0x6e8] ss:$16 sps:$4 sm:$0xff]  }
 0x64a   : > { %v5182_v0 = vpop.f32.mrb[199].mxu1  ;;  %7386 = vmatpush1.bf16.msra.mxu0 %v9752_v36  ;;  %v9818_v36 = vld [vmem:[#allocation11 + $0x6e0] ss:$16 sps:$4 sm:$0xff]   ;;  %v9827_v46 = vld [vmem:[#allocation11 + $0x708] ss:$16 sps:$4 sm:$0xff]  }
 0x64b   : > { %v5250_v3 = vrot.slane %v5243_v20, %v15400_v12  ;;  %7591 = vmatpush1.bf16.msra.mxu1 %v9755_v63  ;;  %7387 = vmatprep.subr.bf16.mxu0 %v9760_v32  ;;  %v9826_v63 = vld [vmem:[#allocation11 + $0x704] ss:$16 sps:$4 sm:$0xff]   ;;  %v9829_v32 = vld [vmem:[#allocation11 + $0x70c] ss:$16 sps:$4 sm:$0xff]   ;;  %v9824_v20 = vld [vmem:[#allocation11 + $0x700] ss:$16 sps:$4 sm:$0xff]  }
 0x64c   : > { %7592 = vmatprep.subr.bf16.mxu1 %v9763_v4  ;;  %v9832_v4 = vld [vmem:[#allocation11 + $0x724] ss:$16 sps:$4 sm:$0xff]   ;;  %v9835_v0 = vld [vmem:[#allocation11 + $0x72c] ss:$16 sps:$4 sm:$0xff]  }
 0x64d   : > { %v5257_v42 = vrot.slane %v5250_v3, %v15400_v12  ;;  %v16598_v12 = vsub.s32 4, %v16565_v62  ;;  %v9830_v3 = vld [vmem:[#allocation11 + $0x720] ss:$16 sps:$4 sm:$0xff]  }
 0x64e   : > { %7388 = vmatpush1.bf16.msra.mxu0 %v9758_v7  ;;  %v9833_v7 = vld [vmem:[#allocation11 + $0x728] ss:$16 sps:$4 sm:$0xff]  }
 0x64f   : > { %v5261_v47 = vadd.f32 %v5257_v42, %v4818_v8  ;;  %7593 = vmatpush1.bf16.msra.mxu1 %v9761_v61  ;;  %7389 = vmatprep.subr.bf16.mxu0 %v9766_v10  ;;  %v5296_v52 = vrot.slane %v15672_v9, %v16598_v12  ;;  %v9838_v8 = vld [vmem:[#allocation11 + $0x744] ss:$16 sps:$4 sm:$0xff]   ;;  %v9841_v61 = vld [vmem:[#allocation11 + $0x74c] ss:$16 sps:$4 sm:$0xff]   ;;  %v9836_v10 = vld [vmem:[#allocation11 + $0x740] ss:$16 sps:$4 sm:$0xff]  }
 0x650   : > { %7594 = vmatprep.subr.bf16.mxu1 %v9769_v55  ;;  %v9839_v42 = vld [vmem:[#allocation11 + $0x748] ss:$16 sps:$4 sm:$0xff]   ;;  %v9844_v55 = vld [vmem:[#allocation11 + $0x764] ss:$16 sps:$4 sm:$0xff]  }
 0x651   : > { %5267 = vst.msk [vmem:[#allocation2 + $0x8] sm:$0x3] %vm15681_vm1, %v5261_v47  ;;  %v5331_v54 = vpack.c.bf16 %v5296_v52, %v5296_v52  ;;  %v9847_v47 = vld [vmem:[#allocation11 + $0x76c] ss:$16 sps:$4 sm:$0xff]   ;;  %v9856_v12 = vld [vmem:[#allocation11 + $0x7a4] ss:$16 sps:$4 sm:$0xff]  }
 0x652   : > { %7390 = vmatpush1.bf16.msra.mxu0 %v9764_v13  ;;  %v9842_v13 = vld [vmem:[#allocation11 + $0x760] ss:$16 sps:$4 sm:$0xff]   ;;  %v9859_v52 = vld [vmem:[#allocation11 + $0x7ac] ss:$16 sps:$4 sm:$0xff]  }
 0x653   : > { %7595 = vmatpush1.bf16.msra.mxu1 %v9767_v27  ;;  %7391 = vmatprep.subr.bf16.mxu0 %v9772_v58  ;;  %v9845_v27 = vld [vmem:[#allocation11 + $0x768] ss:$16 sps:$4 sm:$0xff]   ;;  %v9850_v58 = vld [vmem:[#allocation11 + $0x784] ss:$16 sps:$4 sm:$0xff]  }
 0x654   : > { %7596 = vmatprep.subr.bf16.mxu1 %v9775_v34  ;;  %v9853_v34 = vld [vmem:[#allocation11 + $0x78c] ss:$16 sps:$4 sm:$0xff]  }
 0x656   : > { %7392 = vmatpush1.bf16.msra.mxu0 %v9770_v38  ;;  %v9848_v38 = vld [vmem:[#allocation11 + $0x780] ss:$16 sps:$4 sm:$0xff]  }
 0x657   : > { %7597 = vmatpush1.bf16.msra.mxu1 %v9773_v29  ;;  %7402 = vmatprep.subr.bf16.mxu0 %v9778_v60  ;;  %v9851_v29 = vld [vmem:[#allocation11 + $0x788] ss:$16 sps:$4 sm:$0xff]   ;;  %v9854_v60 = vld [vmem:[#allocation11 + $0x7a0] ss:$16 sps:$4 sm:$0xff]  }
 0x658   : > { %7607 = vmatprep.subr.bf16.mxu1 %v9781_v22  ;;  %v9857_v22 = vld [vmem:[#allocation11 + $0x7a8] ss:$16 sps:$4 sm:$0xff]  }
 0x659   : > { %7394 = vmatmul.mubr.bf16.vlgmr.msra.gmra.mrb[172].mxu0 %v5331_v54 }
 0x65a   : > { %7599 = vmatmul.mubr.bf16.vlgmr.msra.gmra.mrb[200].mxu1 %v5331_v54  ;;  %7403 = vmatpush1.bf16.msra.mxu0 %v9776_v53  ;;  %v9860_v53 = vld [vmem:[#allocation11 + $0x7c0] ss:$16 sps:$4 sm:$0xff]  }
 0x65b   : > { %7434 = vmatprep.mubr.bf16.mxu0 %v5334_v41  ;;  %7608 = vmatpush1.bf16.msra.mxu1 %v9779_v44  ;;  %v5272_v54 = vld [vmem:[#allocation2 + $0x8] sm:$0x3]  ;;  %v9863_v44 = vld [vmem:[#allocation11 + $0x7c8] ss:$16 sps:$4 sm:$0xff]  }
 0x65c   : > { %7639 = vmatprep.mubr.bf16.mxu1 %v5334_v41  ;;  %7404 = vmatprep.subr.bf16.mxu0 %v9784_v24  ;;  %v9868_v24 = vld [vmem:[#allocation11 + $0x7e4] ss:$16 sps:$4 sm:$0xff]   ;;  %v9871_v41 = vld [vmem:[#allocation11 + $0x7ec] ss:$16 sps:$4 sm:$0xff]  }
 0x65d   : > { %7609 = vmatprep.subr.bf16.mxu1 %v9787_v57  ;;  %v15702_v57 = vmul.f32 0.00390625, %v5272_v54  ;;  %v9946_v54 = vld [vmem:[#allocation11 + $0x984] ss:$16 sps:$4 sm:$0xff]  }
 0x65e   : > { %7405 = vmatpush1.bf16.msra.mxu0 %v9782_v16  ;;  %v9866_v16 = vld [vmem:[#allocation11 + $0x7e0] ss:$16 sps:$4 sm:$0xff]  }
 0x65f   : > { %7610 = vmatpush1.bf16.msra.mxu1 %v9785_v11  ;;  %7406 = vmatprep.subr.bf16.mxu0 %v9790_v51  ;;  %v9869_v11 = vld [vmem:[#allocation11 + $0x7e8] ss:$16 sps:$4 sm:$0xff]   ;;  %v16600_v51 = vsub.s32 6, %v16565_v62  ;;  %v9878_v62 = vld [vmem:[#allocation11 + $0x820] ss:$16 sps:$4 sm:$0xff]  }
 0x660   : > { %7611 = vmatprep.subr.bf16.mxu1 %v9793_v39 }
 0x661   : > { %v5304_v39 = vrot.slane %v15672_v9, %v16600_v51  ;;  %v9881_v9 = vld [vmem:[#allocation11 + $0x828] ss:$16 sps:$4 sm:$0xff]   ;;  %v9950_v51 = vld [vmem:[#allocation11 + $0x9a0] ss:$16 sps:$4 sm:$0xff]  }
 0x662   : > { %7407 = vmatpush1.bf16.msra.mxu0 %v9788_v5  ;;  %v9874_v5 = vld [vmem:[#allocation11 + $0x804] ss:$16 sps:$4 sm:$0xff]  }
 0x663   : > { %7612 = vmatpush1.bf16.msra.mxu1 %v9791_v43  ;;  %7408 = vmatprep.subr.bf16.mxu0 %v9796_v59  ;;  %v9877_v43 = vld [vmem:[#allocation11 + $0x80c] ss:$16 sps:$4 sm:$0xff]   ;;  %v5316_v59 = vrot.slane %v15702_v57, %v16590_v17 }
 0x664   : > { %7613 = vmatprep.subr.bf16.mxu1 %v9799_v30  ;;  %v9872_v30 = vld [vmem:[#allocation11 + $0x800] ss:$16 sps:$4 sm:$0xff]  }
 0x666   : > { %7409 = vmatpush1.bf16.msra.mxu0 %v9794_v48  ;;  %v5333_v48 = vpack.c.bf16 %v5304_v39, %v5304_v39  ;;  %v9953_v39 = vld [vmem:[#allocation11 + $0x9a8] ss:$16 sps:$4 sm:$0xff]  }
 0x667   : > { %7614 = vmatpush1.bf16.msra.mxu1 %v9797_v31  ;;  %7410 = vmatprep.subr.bf16.mxu0 %v9802_v6  ;;  %v9875_v31 = vld [vmem:[#allocation11 + $0x808] ss:$16 sps:$4 sm:$0xff]   ;;  %v9880_v6 = vld [vmem:[#allocation11 + $0x824] ss:$16 sps:$4 sm:$0xff]  }
 0x668   : > { %7615 = vmatprep.subr.bf16.mxu1 %v9805_v15  ;;  %v5336_v15 = vpack.c.bf16 %v5316_v59, %v5316_v59  ;;  %v9956_v59 = vld [vmem:[#allocation11 + $0x9c0] ss:$16 sps:$4 sm:$0xff]  }
 0x66a   : > { %7411 = vmatpush1.bf16.msra.mxu0 %v9800_v23  ;;  %v9883_v23 = vld [vmem:[#allocation11 + $0x82c] ss:$16 sps:$4 sm:$0xff]  }
 0x66b   : > { %7616 = vmatpush1.bf16.msra.mxu1 %v9803_v45  ;;  %7412 = vmatprep.subr.bf16.mxu0 %v9808_v35  ;;  %v9886_v45 = vld [vmem:[#allocation11 + $0x844] ss:$16 sps:$4 sm:$0xff]   ;;  %v9889_v35 = vld [vmem:[#allocation11 + $0x84c] ss:$16 sps:$4 sm:$0xff]  }
 0x66c   : > { %7617 = vmatprep.subr.bf16.mxu1 %v9811_v50  ;;  %v9884_v50 = vld [vmem:[#allocation11 + $0x840] ss:$16 sps:$4 sm:$0xff]  }
 0x66e   : > { %7413 = vmatpush1.bf16.msra.mxu0 %v9806_v21  ;;  %v9887_v21 = vld [vmem:[#allocation11 + $0x848] ss:$16 sps:$4 sm:$0xff]  }
 0x66f   : > { %7618 = vmatpush1.bf16.msra.mxu1 %v9809_v25  ;;  %7414 = vmatprep.subr.bf16.mxu0 %v9814_v33  ;;  %v9892_v25 = vld [vmem:[#allocation11 + $0x864] ss:$16 sps:$4 sm:$0xff]   ;;  %v9895_v33 = vld [vmem:[#allocation11 + $0x86c] ss:$16 sps:$4 sm:$0xff]  }
 0x670   : > { %7619 = vmatprep.subr.bf16.mxu1 %v9817_v40  ;;  %v9890_v40 = vld [vmem:[#allocation11 + $0x860] ss:$16 sps:$4 sm:$0xff]  }
 0x672   : > { %7415 = vmatpush1.bf16.msra.mxu0 %v9812_v26  ;;  %v9893_v26 = vld [vmem:[#allocation11 + $0x868] ss:$16 sps:$4 sm:$0xff]  }
 0x673   : > { %7620 = vmatpush1.bf16.msra.mxu1 %v9815_v1  ;;  %7416 = vmatprep.subr.bf16.mxu0 %v9820_v28  ;;  %v9898_v1 = vld [vmem:[#allocation11 + $0x884] ss:$16 sps:$4 sm:$0xff]   ;;  %v9901_v28 = vld [vmem:[#allocation11 + $0x88c] ss:$16 sps:$4 sm:$0xff]  }
 0x674   : > { %7621 = vmatprep.subr.bf16.mxu1 %v9823_v56  ;;  %v9896_v56 = vld [vmem:[#allocation11 + $0x880] ss:$16 sps:$4 sm:$0xff]  }
 0x676   : > { %7417 = vmatpush1.bf16.msra.mxu0 %v9818_v36  ;;  %v9899_v36 = vld [vmem:[#allocation11 + $0x888] ss:$16 sps:$4 sm:$0xff]  }
 0x677   : > { %7622 = vmatpush1.bf16.msra.mxu1 %v9821_v18  ;;  %7418 = vmatprep.subr.bf16.mxu0 %v9826_v63  ;;  %v9904_v18 = vld [vmem:[#allocation11 + $0x8a4] ss:$16 sps:$4 sm:$0xff]   ;;  %v9907_v63 = vld [vmem:[#allocation11 + $0x8ac] ss:$16 sps:$4 sm:$0xff]  }
 0x678   : > { %7623 = vmatprep.subr.bf16.mxu1 %v9829_v32  ;;  %v9902_v32 = vld [vmem:[#allocation11 + $0x8a0] ss:$16 sps:$4 sm:$0xff]  }
 0x67a   : > { %7419 = vmatpush1.bf16.msra.mxu0 %v9824_v20  ;;  %v9905_v20 = vld [vmem:[#allocation11 + $0x8a8] ss:$16 sps:$4 sm:$0xff]  }
 0x67b   : > { %7624 = vmatpush1.bf16.msra.mxu1 %v9827_v46  ;;  %7420 = vmatprep.subr.bf16.mxu0 %v9832_v4  ;;  %v9910_v46 = vld [vmem:[#allocation11 + $0x8c4] ss:$16 sps:$4 sm:$0xff]   ;;  %v9913_v4 = vld [vmem:[#allocation11 + $0x8cc] ss:$16 sps:$4 sm:$0xff]  }
 0x67c   : > { %7625 = vmatprep.subr.bf16.mxu1 %v9835_v0  ;;  %v9908_v0 = vld [vmem:[#allocation11 + $0x8c0] ss:$16 sps:$4 sm:$0xff]  }
 0x67e   : > { %7421 = vmatpush1.bf16.msra.mxu0 %v9830_v3  ;;  %v9911_v3 = vld [vmem:[#allocation11 + $0x8c8] ss:$16 sps:$4 sm:$0xff]  }
 0x67f   : > { %7626 = vmatpush1.bf16.msra.mxu1 %v9833_v7  ;;  %7422 = vmatprep.subr.bf16.mxu0 %v9838_v8  ;;  %v9916_v7 = vld [vmem:[#allocation11 + $0x8e4] ss:$16 sps:$4 sm:$0xff]   ;;  %v9919_v8 = vld [vmem:[#allocation11 + $0x8ec] ss:$16 sps:$4 sm:$0xff]  }
 0x680   : > { %7627 = vmatprep.subr.bf16.mxu1 %v9841_v61  ;;  %v9914_v61 = vld [vmem:[#allocation11 + $0x8e0] ss:$16 sps:$4 sm:$0xff]  }
 0x682   : > { %7423 = vmatpush1.bf16.msra.mxu0 %v9836_v10  ;;  %v9917_v10 = vld [vmem:[#allocation11 + $0x8e8] ss:$16 sps:$4 sm:$0xff]  }
 0x683   : > { %7628 = vmatpush1.bf16.msra.mxu1 %v9839_v42  ;;  %7424 = vmatprep.subr.bf16.mxu0 %v9844_v55  ;;  %v9922_v42 = vld [vmem:[#allocation11 + $0x904] ss:$16 sps:$4 sm:$0xff]   ;;  %v9925_v55 = vld [vmem:[#allocation11 + $0x90c] ss:$16 sps:$4 sm:$0xff]  }
 0x684   : > { %7629 = vmatprep.subr.bf16.mxu1 %v9847_v47  ;;  %v9920_v47 = vld [vmem:[#allocation11 + $0x900] ss:$16 sps:$4 sm:$0xff]  }
 0x686   : > { %7425 = vmatpush1.bf16.msra.mxu0 %v9842_v13  ;;  %v9923_v13 = vld [vmem:[#allocation11 + $0x908] ss:$16 sps:$4 sm:$0xff]  }
 0x687   : > { %7630 = vmatpush1.bf16.msra.mxu1 %v9845_v27  ;;  %7426 = vmatprep.subr.bf16.mxu0 %v9850_v58  ;;  %v9928_v27 = vld [vmem:[#allocation11 + $0x924] ss:$16 sps:$4 sm:$0xff]   ;;  %v9931_v58 = vld [vmem:[#allocation11 + $0x92c] ss:$16 sps:$4 sm:$0xff]  }
 0x688   : > { %7631 = vmatprep.subr.bf16.mxu1 %v9853_v34  ;;  %v9926_v34 = vld [vmem:[#allocation11 + $0x920] ss:$16 sps:$4 sm:$0xff]  }
 0x68a   : > { %7427 = vmatpush1.bf16.msra.mxu0 %v9848_v38  ;;  %v9929_v38 = vld [vmem:[#allocation11 + $0x928] ss:$16 sps:$4 sm:$0xff]  }
 0x68b   : > { %7632 = vmatpush1.bf16.msra.mxu1 %v9851_v29  ;;  %7428 = vmatprep.subr.bf16.mxu0 %v9856_v12  ;;  %v9934_v29 = vld [vmem:[#allocation11 + $0x944] ss:$16 sps:$4 sm:$0xff]   ;;  %v9937_v12 = vld [vmem:[#allocation11 + $0x94c] ss:$16 sps:$4 sm:$0xff]  }
 0x68c   : > { %7633 = vmatprep.subr.bf16.mxu1 %v9859_v52  ;;  %v9932_v52 = vld [vmem:[#allocation11 + $0x940] ss:$16 sps:$4 sm:$0xff]  }
 0x68e   : > { %7429 = vmatpush1.bf16.msra.mxu0 %v9854_v60  ;;  %v9935_v60 = vld [vmem:[#allocation11 + $0x948] ss:$16 sps:$4 sm:$0xff]  }
 0x68f   : > { %7634 = vmatpush1.bf16.msra.mxu1 %v9857_v22  ;;  %7430 = vmatprep.subr.bf16.mxu0 %v9862_v37  ;;  %v9940_v22 = vld [vmem:[#allocation11 + $0x964] ss:$16 sps:$4 sm:$0xff]   ;;  %v9943_v37 = vld [vmem:[#allocation11 + $0x96c] ss:$16 sps:$4 sm:$0xff]  }
 0x690   : > { %7635 = vmatprep.subr.bf16.mxu1 %v9865_v2  ;;  %v9938_v2 = vld [vmem:[#allocation11 + $0x960] ss:$16 sps:$4 sm:$0xff]  }
 0x692   : > { %7431 = vmatpush1.bf16.msra.mxu0 %v9860_v53  ;;  %v9941_v53 = vld [vmem:[#allocation11 + $0x968] ss:$16 sps:$4 sm:$0xff]  }
 0x693   : > { %7636 = vmatpush1.bf16.msra.mxu1 %v9863_v44  ;;  %7432 = vmatprep.subr.bf16.mxu0 %v9868_v24  ;;  %v9949_v44 = vld [vmem:[#allocation11 + $0x98c] ss:$16 sps:$4 sm:$0xff]   ;;  %v9944_v24 = vld [vmem:[#allocation11 + $0x980] ss:$16 sps:$4 sm:$0xff]  }
 0x694   : > { %7637 = vmatprep.subr.bf16.mxu1 %v9871_v41  ;;  %v9947_v41 = vld [vmem:[#allocation11 + $0x988] ss:$16 sps:$4 sm:$0xff]  }
 0x696   : > { %7433 = vmatpush1.bf16.msra.mxu0 %v9866_v16  ;;  %v9952_v16 = vld [vmem:[#allocation11 + $0x9a4] ss:$16 sps:$4 sm:$0xff]  }
 0x697   : > { %7638 = vmatpush1.bf16.msra.mxu1 %v9869_v11  ;;  %7443 = vmatprep.subr.bf16.mxu0 %v9874_v5  ;;  %v9955_v11 = vld [vmem:[#allocation11 + $0x9ac] ss:$16 sps:$4 sm:$0xff]   ;;  %v9958_v5 = vld [vmem:[#allocation11 + $0x9c4] ss:$16 sps:$4 sm:$0xff]  }
 0x698   : > { %7648 = vmatprep.subr.bf16.mxu1 %v9877_v43  ;;  %v9961_v43 = vld [vmem:[#allocation11 + $0x9cc] ss:$16 sps:$4 sm:$0xff]  }
 0x699   : > { %7435 = vmatmul.mubr.bf16.vlgmr.msra.gmra.mrb[172].mxu0 %v5333_v48 }
 0x69a   : > { %7640 = vmatmul.mubr.bf16.vlgmr.msra.gmra.mrb[200].mxu1 %v5333_v48  ;;  %7444 = vmatpush1.bf16.msra.mxu0 %v9872_v30  ;;  %v9959_v30 = vld [vmem:[#allocation11 + $0x9c8] ss:$16 sps:$4 sm:$0xff]   ;;  %v9964_v48 = vld [vmem:[#allocation11 + $0x9e4] ss:$16 sps:$4 sm:$0xff]  }
 0x69b   : > { %7475 = vmatprep.mubr.bf16.mxu0 %v5336_v15  ;;  %7649 = vmatpush1.bf16.msra.mxu1 %v9875_v31  ;;  %v9967_v31 = vld [vmem:[#allocation11 + $0x9ec] ss:$16 sps:$4 sm:$0xff]  }
 0x69c   : > { %7680 = vmatprep.mubr.bf16.mxu1 %v5336_v15  ;;  %7445 = vmatprep.subr.bf16.mxu0 %v9880_v6  ;;  %v9962_v6 = vld [vmem:[#allocation11 + $0x9e0] ss:$16 sps:$4 sm:$0xff]   ;;  %v9965_v15 = vld [vmem:[#allocation11 + $0x9e8] ss:$16 sps:$4 sm:$0xff]  }
 0x69d   : > { %7650 = vmatprep.subr.bf16.mxu1 %v9883_v23  ;;  %v5312_v23 = vrot.slane %v15702_v57, %v16591_v19  ;;  %v9976_v57 = vld [vmem:[#allocation14 + $0x50] sm:$0xff]  }
 0x69e   : > { %7446 = vmatpush1.bf16.msra.mxu0 %v9878_v62 }
 0x69f   : > { %7651 = vmatpush1.bf16.msra.mxu1 %v9881_v9  ;;  %7447 = vmatprep.subr.bf16.mxu0 %v9886_v45  ;;  %v5335_v62 = vpack.c.bf16 %v5312_v23, %v5312_v23  ;;  %v9968_v9 = vld [vmem:[#allocation14 + $0x40] sm:$0xff]  }
 0x6a0   : > { %7652 = vmatprep.subr.bf16.mxu1 %v9889_v35  ;;  %v9969_v45 = vld [vmem:[#allocation14 + $0xc0] sm:$0xff]  }
 0x6a1   : > { %v9970_v35 = vld [vmem:[#allocation14] sm:$0xff]  }
 0x6a2   : > { %7448 = vmatpush1.bf16.msra.mxu0 %v9884_v50  ;;  %v9971_v50 = vld [vmem:[#allocation14 + $0x80] sm:$0xff]  }
 0x6a3   : > { %7653 = vmatpush1.bf16.msra.mxu1 %v9887_v21  ;;  %7449 = vmatprep.subr.bf16.mxu0 %v9892_v25  ;;  %v9972_v21 = vld [vmem:[#allocation14 + $0x48] sm:$0xff]  }
 0x6a4   : > { %7654 = vmatprep.subr.bf16.mxu1 %v9895_v33  ;;  %v9973_v25 = vld [vmem:[#allocation14 + $0xc8] sm:$0xff]  }
 0x6a5   : > { %v9974_v33 = vld [vmem:[#allocation14 + $0x8] sm:$0xff]  }
 0x6a6   : > { %7450 = vmatpush1.bf16.msra.mxu0 %v9890_v40  ;;  %v9975_v40 = vld [vmem:[#allocation14 + $0x88] sm:$0xff]  }
 0x6a7   : > { %7655 = vmatpush1.bf16.msra.mxu1 %v9893_v26  ;;  %7451 = vmatprep.subr.bf16.mxu0 %v9898_v1  ;;  %v9977_v26 = vld [vmem:[#allocation14 + $0xd0] sm:$0xff]  }
 0x6a8   : > { %7656 = vmatprep.subr.bf16.mxu1 %v9901_v28  ;;  %v9978_v1 = vld [vmem:[#allocation14 + $0x10] sm:$0xff]  }
 0x6a9   : > { %v9979_v28 = vld [vmem:[#allocation14 + $0x90] sm:$0xff]  }
 0x6aa   : > { %7452 = vmatpush1.bf16.msra.mxu0 %v9896_v56  ;;  %v9980_v56 = vld [vmem:[#allocation14 + $0x58] sm:$0xff]  }
 0x6ab   : > { %7657 = vmatpush1.bf16.msra.mxu1 %v9899_v36  ;;  %7453 = vmatprep.subr.bf16.mxu0 %v9904_v18  ;;  %v9981_v36 = vld [vmem:[#allocation14 + $0xd8] sm:$0xff]  }
 0x6ac   : > { %7658 = vmatprep.subr.bf16.mxu1 %v9907_v63  ;;  %v9982_v18 = vld [vmem:[#allocation14 + $0x18] sm:$0xff]  }
 0x6ad   : > { %v9983_v63 = vld [vmem:[#allocation14 + $0x98] sm:$0xff]  }
 0x6ae   : > { %7454 = vmatpush1.bf16.msra.mxu0 %v9902_v32  ;;  %v9984_v32 = vld [vmem:[#allocation14 + $0x60] sm:$0xff]  }
 0x6af   : > { %7659 = vmatpush1.bf16.msra.mxu1 %v9905_v20  ;;  %7455 = vmatprep.subr.bf16.mxu0 %v9910_v46  ;;  %v9985_v20 = vld [vmem:[#allocation14 + $0xe0] sm:$0xff]  }
 0x6b0   : > { %7660 = vmatprep.subr.bf16.mxu1 %v9913_v4  ;;  %v9986_v46 = vld [vmem:[#allocation14 + $0x20] sm:$0xff]  }
 0x6b1   : > { %v9987_v4 = vld [vmem:[#allocation14 + $0xa0] sm:$0xff]  }
 0x6b2   : > { %7456 = vmatpush1.bf16.msra.mxu0 %v9908_v0  ;;  %v9988_v0 = vld [vmem:[#allocation14 + $0x68] sm:$0xff]  }
 0x6b3   : > { %7661 = vmatpush1.bf16.msra.mxu1 %v9911_v3  ;;  %7457 = vmatprep.subr.bf16.mxu0 %v9916_v7  ;;  %v9989_v3 = vld [vmem:[#allocation14 + $0xe8] sm:$0xff]  }
 0x6b4   : > { %7662 = vmatprep.subr.bf16.mxu1 %v9919_v8  ;;  %v9990_v7 = vld [vmem:[#allocation14 + $0x28] sm:$0xff]  }
 0x6b5   : > { %v9991_v8 = vld [vmem:[#allocation14 + $0xa8] sm:$0xff]  }
 0x6b6   : > { %7458 = vmatpush1.bf16.msra.mxu0 %v9914_v61  ;;  %v9992_v61 = vld [vmem:[#allocation14 + $0x70] sm:$0xff]  }
 0x6b7   : > { %7663 = vmatpush1.bf16.msra.mxu1 %v9917_v10  ;;  %7459 = vmatprep.subr.bf16.mxu0 %v9922_v42  ;;  %v9993_v10 = vld [vmem:[#allocation14 + $0xf0] sm:$0xff]  }
 0x6b8   : > { %7664 = vmatprep.subr.bf16.mxu1 %v9925_v55  ;;  %v9994_v42 = vld [vmem:[#allocation14 + $0x30] sm:$0xff]  }
 0x6b9   : > { %v9995_v55 = vld [vmem:[#allocation14 + $0xb0] sm:$0xff]  }
 0x6ba   : > { %7460 = vmatpush1.bf16.msra.mxu0 %v9920_v47  ;;  %v9996_v47 = vld [vmem:[#allocation14 + $0x78] sm:$0xff]  }
 0x6bb   : > { %7665 = vmatpush1.bf16.msra.mxu1 %v9923_v13  ;;  %7461 = vmatprep.subr.bf16.mxu0 %v9928_v27  ;;  %v9997_v13 = vld [vmem:[#allocation14 + $0xf8] sm:$0xff]  }
 0x6bc   : > { %7666 = vmatprep.subr.bf16.mxu1 %v9931_v58  ;;  %v9998_v27 = vld [vmem:[#allocation14 + $0x38] sm:$0xff]  }
 0x6bd   : > { %v9999_v58 = vld [vmem:[#allocation14 + $0xb8] sm:$0xff]  }
 0x6be   : > { %7462 = vmatpush1.bf16.msra.mxu0 %v9926_v34  ;;  %v5657_v34 = vld [vmem:[#allocation12] sm:$0xf] }
 0x6bf   : > { %7667 = vmatpush1.bf16.msra.mxu1 %v9929_v38  ;;  %7463 = vmatprep.subr.bf16.mxu0 %v9934_v29  ;;  %v7262_v38 = vrot.slane %v5657_v34, %v16591_v19  ;;  %v7270_v29 = vrot.slane %v5657_v34, %v16596_v14 }
 0x6c0   : > { %7668 = vmatprep.subr.bf16.mxu1 %v9937_v12  ;;  %v7266_v12 = vrot.slane %v5657_v34, %v16590_v17 }
 0x6c2   : > { %7464 = vmatpush1.bf16.msra.mxu0 %v9932_v52  ;;  %v7274_v52 = vrot.slane %v5657_v34, %v16592_v49 }
 0x6c3   : > { %7669 = vmatpush1.bf16.msra.mxu1 %v9935_v60  ;;  %7465 = vmatprep.subr.bf16.mxu0 %v9940_v22 }
 0x6c4   : > { %7670 = vmatprep.subr.bf16.mxu1 %v9943_v37 }
 0x6c6   : > { %7466 = vmatpush1.bf16.msra.mxu0 %v9938_v2 }
 0x6c7   : > { %7671 = vmatpush1.bf16.msra.mxu1 %v9941_v53  ;;  %7467 = vmatprep.subr.bf16.mxu0 %v9946_v54 }
 0x6c8   : > { %7672 = vmatprep.subr.bf16.mxu1 %v9949_v44 }
 0x6ca   : > { %7468 = vmatpush1.bf16.msra.mxu0 %v9944_v24 }
 0x6cb   : > { %7673 = vmatpush1.bf16.msra.mxu1 %v9947_v41  ;;  %7469 = vmatprep.subr.bf16.mxu0 %v9952_v16 }
 0x6cc   : > { %7674 = vmatprep.subr.bf16.mxu1 %v9955_v11 }
 0x6ce   : > { %7470 = vmatpush1.bf16.msra.mxu0 %v9950_v51 }
 0x6cf   : > { %7675 = vmatpush1.bf16.msra.mxu1 %v9953_v39  ;;  %7471 = vmatprep.subr.bf16.mxu0 %v9958_v5 }
 0x6d0   : > { %7676 = vmatprep.subr.bf16.mxu1 %v9961_v43 }
 0x6d2   : > { %7472 = vmatpush1.bf16.msra.mxu0 %v9956_v59 }
 0x6d3   : > { %7677 = vmatpush1.bf16.msra.mxu1 %v9959_v30  ;;  %7473 = vmatprep.subr.bf16.mxu0 %v9964_v48 }
 0x6d4   : > { %7678 = vmatprep.subr.bf16.mxu1 %v9967_v31 }
 0x6d6   : > { %7474 = vmatpush1.bf16.msra.mxu0 %v9962_v6 }
 0x6d7   : > { %7679 = vmatpush1.bf16.msra.mxu1 %v9965_v15  ;;  %9088 = vmatprep.subr.bf16.mxu0 %v9968_v9 }
 0x6d8   : > { %9110 = vmatprep.subr.bf16.mxu1 %v9969_v45 }
 0x6d9   : > { %7476 = vmatmul.mubr.bf16.vlgmr.msra.gmra.mrb[172].mxu0 %v5335_v62 }
 0x6da   : > { %7681 = vmatmul.mubr.bf16.vlgmr.msra.gmra.mrb[200].mxu1 %v5335_v62  ;;  %9089 = vmatpush3.bf16.msra.mxu0 %v9970_v35 }
 0x6db   : > { %9111 = vmatpush3.bf16.msra.mxu1 %v9971_v50  ;;  %9090 = vmatprep.subr.bf16.mxu0 %v9972_v21 }
 0x6dc   : > { %9112 = vmatprep.subr.bf16.mxu1 %v9973_v25 }
 0x6de   : > { %9091 = vmatpush3.bf16.msra.mxu0 %v9974_v33 }
 0x6df   : > { %9113 = vmatpush3.bf16.msra.mxu1 %v9975_v40  ;;  %9092 = vmatprep.subr.bf16.mxu0 %v9976_v57 }
 0x6e0   : > { %9114 = vmatprep.subr.bf16.mxu1 %v9977_v26 }
 0x6e2   : > { %9093 = vmatpush3.bf16.msra.mxu0 %v9978_v1 }
 0x6e3   : > { %9115 = vmatpush3.bf16.msra.mxu1 %v9979_v28  ;;  %9094 = vmatprep.subr.bf16.mxu0 %v9980_v56  ;;  %v7785_v28 = vld [vmem:[#allocation15] sm:$0x1] }
 0x6e4   : > { %9116 = vmatprep.subr.bf16.mxu1 %v9981_v36 }
 0x6e6   : > { %9095 = vmatpush3.bf16.msra.mxu0 %v9982_v18 }
 0x6e7   : > { %9117 = vmatpush3.bf16.msra.mxu1 %v9983_v63  ;;  %9096 = vmatprep.subr.bf16.mxu0 %v9984_v32 }
 0x6e8   : > { %9118 = vmatprep.subr.bf16.mxu1 %v9985_v20 }
 0x6ea   : > { %9097 = vmatpush3.bf16.msra.mxu0 %v9986_v46 }
 0x6eb   : > { %9119 = vmatpush3.bf16.msra.mxu1 %v9987_v4  ;;  %9098 = vmatprep.subr.bf16.mxu0 %v9988_v0 }
 0x6ec   : > { %9120 = vmatprep.subr.bf16.mxu1 %v9989_v3 }
 0x6ee   : > { %9099 = vmatpush3.bf16.msra.mxu0 %v9990_v7 }
 0x6ef   : > { %9121 = vmatpush3.bf16.msra.mxu1 %v9991_v8  ;;  %9100 = vmatprep.subr.bf16.mxu0 %v9992_v61 }
 0x6f0   : > { %9122 = vmatprep.subr.bf16.mxu1 %v9993_v10 }
 0x6f2   : > { %9101 = vmatpush3.bf16.msra.mxu0 %v9994_v42 }
 0x6f3   : > { %9123 = vmatpush3.bf16.msra.mxu1 %v9995_v55  ;;  %9102 = vmatprep.subr.bf16.mxu0 %v9996_v47 }
 0x6f4   : > { %9124 = vmatprep.subr.bf16.mxu1 %v9997_v13 }
 0x6f6   : > { %9103 = vmatpush3.bf16.msra.mxu0 %v9998_v27 }
 0x6f7   : > { %9125 = vmatpush3.bf16.msra.mxu1 %v9999_v58 }
 0x7ac   : > { %v7477_v60 = vpop.f32.mrb[172].mxu0 }
 0x7ad   : > { %v9168_v22 = vadd.f32 %v7477_v60, %v7262_v38  ;;  %v7682_v37 = vpop.f32.mrb[200].mxu1  ;;  %v7479_v2 = vpop.f32.mrb[173].mxu0 }
 0x7ae   : > { %v9170_v53 = vadd.f32 %v7682_v37, %v7270_v29  ;;  %v9169_v54 = vadd.f32 %v7479_v2, %v7266_v12  ;;  %v7684_v44 = vpop.f32.mrb[201].mxu1  ;;  %v7481_v24 = vpop.f32.mrb[174].mxu0 }
 0x7af   : > { %v9030_v41 = vmul.f32 -1.442695, %v9168_v22  ;;  %v9171_v16 = vadd.f32 %v7684_v44, %v7274_v52  ;;  %v7686_v11 = vpop.f32.mrb[202].mxu1  ;;  %v7482_v51 = vpop.f32.mrb[175].mxu0 }
 0x7b0   : > { %v9032_v39 = vmul.f32 -1.442695, %v9170_v53  ;;  %v9031_v19 = vmul.f32 -1.442695, %v9169_v54  ;;  %v7687_v5 = vpop.f32.mrb[203].mxu1 }
 0x7b1   : > { %11408 = vpow2.f32 %v9030_v41  ;;  %v9033_v14 = vmul.f32 -1.442695, %v9171_v16 }
 0x7b2   : > { %11410 = vpow2.f32 %v9032_v39 }
 0x7b3   : > { %11412 = vpow2.f32 %v9031_v19 }
 0x7b4   : > { %11414 = vpow2.f32 %v9033_v14 }
 0x7bb   : > { %v11409_v17 = vpop.eup %11408 }
 0x7bc   : > { %v11411_v49 = vpop.eup %11410  ;;  %v7701_v43 = vadd.f32 1.0, %v11409_v17 }
 0x7bd   : > { %v11413_v59 = vpop.eup %11412  ;;  %v7703_v30 = vadd.f32 1.0, %v11411_v49 }
 0x7be   : > { %v11415_v48 = vpop.eup %11414  ;;  %11416 = vrcp.f32 %v7701_v43  ;;  %v7702_v31 = vadd.f32 1.0, %v11413_v59 }
 0x7bf   : > { %11418 = vrcp.f32 %v7703_v30  ;;  %v7704_v6 = vadd.f32 1.0, %v11415_v48 }
 0x7c0   : > { %11420 = vrcp.f32 %v7702_v31 }
 0x7c1   : > { %11422 = vrcp.f32 %v7704_v6 }
 0x7c8   : > { %v11417_v15 = vpop.eup %11416 }
 0x7c9   : > { %v11419_v23 = vpop.eup %11418  ;;  %v7713_v9 = vmul.f32 %v11417_v15, %v9168_v22 }
 0x7ca   : > { %v11421_v62 = vpop.eup %11420  ;;  %v7715_v35 = vmul.f32 %v11419_v23, %v9170_v53 }
 0x7cb   : > { %v11423_v45 = vpop.eup %11422  ;;  %v7714_v50 = vmul.f32 %v11421_v62, %v9169_v54  ;;  %v7717_v33 = vpack.c.bf16 %v7713_v9, %v7713_v9 }
 0x7cc   : > { %v7716_v21 = vmul.f32 %v11423_v45, %v9171_v16  ;;  %v7719_v57 = vpack.c.bf16 %v7715_v35, %v7715_v35 }
 0x7cd   : > { %v7718_v25 = vpack.c.bf16 %v7714_v50, %v7714_v50 }
 0x7ce   : > { %v7720_v40 = vpack.c.bf16 %v7716_v21, %v7716_v21 }
 0x7cf   : > { %8010 = vmatprep.mubr.bf16.mxu0 %v7718_v25 }
 0x7d0   : > { %8050 = vmatprep.mubr.bf16.mxu1 %v7720_v40  ;;  %8011 = vmatmul.mubr.bf16.vlgmr.msra.gmra.mrb[176].mxu0 %v7717_v33 }
 0x7d1   : > { %8051 = vmatmul.mubr.bf16.vlgmr.msra.gmra.mrb[204].mxu1 %v7719_v57 }
 0x8a3   : > { %v9104_v26 = vpop.f32.mrb[176].mxu0 }
 0x8a4   : > { %v9126_v1 = vpop.f32.mrb[204].mxu1  ;;  %v9105_v56 = vpop.f32.mrb[177].mxu0 }
 0x8a5   : > { %v9106_v36 = vadd.f32 %v9105_v56, %v9104_v26  ;;  %v9127_v18 = vpop.f32.mrb[205].mxu1  ;;  %v9107_v63 = vpop.f32.mrb[178].mxu0 }
 0x8a6   : > { %v9128_v32 = vadd.f32 %v9127_v18, %v9126_v1  ;;  %v9129_v20 = vpop.f32.mrb[206].mxu1  ;;  %v9108_v46 = vpop.f32.mrb[179].mxu0 }
 0x8a7   : > { %v8013_v4 = vadd.f32 %v9106_v36, %v7785_v28  ;;  %v9130_v0 = vpop.f32.mrb[207].mxu1 }
 0x8a9   : > { %v8053_v3 = vadd.f32 %v9128_v32, %v8013_v4 }
 0x8ab   : > { %8058 = vst [vmem:[%s456_s1] sm:$0x1] %v8053_v3 }
 0x8ac   : > { %11662 = shalt.err (!%p11659_p6)
}
 0x8ad   : > { %s11663_s20 = scalar_lea.hbm %s15720_s2, 16  ;;  %s11667_s15 = scalar_lea.hbm %s15776_s9, 32 }
 0x8ae   : > { %p11664_p7 = scmp.ne.s32.totalorder %s15720_s2, %s11663_s20  ;;  %p11668_p0 = scmp.lt.u32.totalorder %s15720_s2, %s15776_s9 }
 0x8af   : > { %p11669_p2 = scmp.lt.u32.totalorder %s11667_s15, %s11663_s20  ;;  %p11671_p1 = scmp.lt.u32.totalorder %s11663_s20, %s15720_s2 }
 0x8b0   : > { %p11665_p9 = pnand %p11664_p7, %p16601_p4 }
 0x8b1   : > { %p11670_p13 = por %p11669_p2, %p11668_p0 }
 0x8b2   : > { %p11666_p12 = pneg %p11665_p9 }
 0x8b3   : > { %p11672_p8 = por %p11671_p1, %p11670_p13 }
 0x8b5   : > { %p11673_p10 = pnand %p11672_p8, %p11666_p12 }
 0x8b7   : > { %11676 = shalt.err (!%p11673_p10)
}
 0x8b8   : > { %9236 = dma.vmem_to_hbm [thread:$0]  (%p16601_p4), %s15722_s3, 16, %s15720_s2, %s8060_s17  }
 0x8b9 PF: > { %s16602_s27 = sld [smem:[#allocation27_spill]]  ;;  %p9283_p11 = scmp.ge.s32.totalorder %s11747_s14, 2 }
 0x8ba   : > { %s8084_s18 = sand.u32 1, %s11727_s30  }
 0x8bb   : > { %s8085_s21 = scalar_lea.sflag [#allocation5], %s8084_s18 }
 0x8bf   : > { %p16603_p3 = scmp.ne.s32.totalorder %s16602_s27, 0 }
 0x8c1   : > { %p9264_p5 = pnand %p9283_p11, %p16603_p3 }
 0x8c3   : > { %11722 = dma.done.wait (!%p9264_p5), %s8085_s21, 16  }
 0x8c4   : > { %11724 = vsyncadd (!%p9264_p5), %s8085_s21, 4294967280  ;;  %s27_s14 = sadd.s32 1, %s11747_s14   ;;  %s16604_s24 = sld [smem:[#allocation24_spill]] }
 0x8c5   : > { %p24_p6 = scmp.ge.s32.totalorder %s27_s14, 4   ;;  %s16605_s11 = sld [smem:[#allocation28_spill]] }
 0x8c6   : > { %s16606_s12 = sld [smem:[#allocation25_spill]]  ;;  %s16607_s13 = sld [smem:[#allocation26_spill]] }
 0x8c7   : > { %s16608_s30 = smov %s11731_s10  ;;  %26 = sbr.rel (!%p24_p6) target bundleno = 14 (0xe), region = 132 }
 0x8ca   : > { %s16609_s10 = smov %s16604_s24 }
 0x8ce   :  { %8089 = vsyncpa [#allocation4], 1 }
 0x8cf   :  { %8091 = vsyncpa [#allocation4 + $0x1], 1 }
 0x8d0   :  { %8092 = vsyncpa [#allocation7], 1 }
 0x8d1   :  { %8093 = vsyncpa [#allocation10], 1 }
 0x8d2   :  { %8094 = vsyncpa [#allocation13], 1 }
 0x8d3   :  { %8095 = vsyncpa [#allocation16], 1 }
 0x8d4   :  { %8096 = vsyncpa [#allocation5], 1 }
 0x8d5   :  { %8098 = vsyncpa [#allocation5 + $0x1], 1 }

</bundles_post_ra>
